<compile_context>
chip_gen: v6e
topology: v6e:2x2x1
jax: 0.10.0
libtpu: 0.0.40
codegen_flags: <defaults>
</compile_context>

<pallas_src>
import jax
import jax.numpy as jnp
from jax.experimental import pallas as pl
from jax.experimental.pallas import tpu as pltpu

EMBED_DIM = 512
HIDDEN_DIM = 512
FINAL_DIM = 1024
NUM_GLIMPSES = 2


# --------------------------------- kernel ---------------------------------
def _make_kernel(graphs_per_block, n_ent):
    G = graphs_per_block

    def kernel(obj_ref, head_ref, tail_ref, pred_ref, graph_ref,
               wv_ref, bv_ref, wq_ref, bq_ref, wa_ref, ba_ref,
               w1_ref, b1_ref, w2_ref, b2_ref, out_ref):
        obj = obj_ref[...]                                   # (G*Ne, 512) f32
        graph = graph_ref[...]                               # (G*Ne, G*Nr) f32 block-diag

        # atten column-normalizer: denom[e] = sum_r graph[e,r] + 1e-9 (loop-invariant,
        # reciprocal on the EUP slot)
        denom = jnp.sum(graph, axis=1, keepdims=True) + 1e-9
        inv_denom = pl.reciprocal(denom, approx=True)        # (G*Ne, 1)

        # FCNet lin_v for BOTH glimpses at once (glimpse-invariant -> hoisted).
        # wv_ref[k] reads the (512, 1024) head/tail/pred row-block directly from the
        # pipelined weight buffer (no slab load + value slices).
        v_lin = (jnp.dot(head_ref[...], wv_ref[0], preferred_element_type=jnp.float32)
                 + jnp.dot(tail_ref[...], wv_ref[1], preferred_element_type=jnp.float32)
                 + jnp.dot(pred_ref[...], wv_ref[2], preferred_element_type=jnp.float32)
                 + bv_ref[...])
        v_mid = jnp.maximum(v_lin, 0.0)                      # (G*Nr, 1024) f32

        # s_both[e, :] = sum_r graph[e, r] * v_mid[r, :]
        # (block-diagonal graph keeps the stacked graphs independent)
        s_both = jnp.dot(graph.astype(jnp.bfloat16), v_mid.astype(jnp.bfloat16),
                         preferred_element_type=jnp.float32)  # (G*Ne, 1024)

        q = obj                                               # (G*Ne, 512) f32
        for g in range(NUM_GLIMPSES):
            # FCNet lin_q (depends on updated q, so stays in the loop)
            q_lin = jnp.dot(q.astype(jnp.bfloat16), wq_ref[g],
                            preferred_element_type=jnp.float32) + bq_ref[g]
            q_mid = jnp.maximum(q_lin, 0.0)                   # (G*Ne, 512)

            # bilinear attention: h[b,d] = sum_{e in graph b} q_mid[e,d]*s[e,d]/denom[e]
            s_g = s_both[:, g * HIDDEN_DIM:(g + 1) * HIDDEN_DIM]
            contrib = q_mid * inv_denom * s_g                 # (G*Ne, 512)
            h = jnp.sum(contrib.reshape(G, n_ent, HIDDEN_DIM), axis=1)   # (G, 512)

            # FCNet lin_atten (no activation); q = q + atten_h (broadcast per graph)
            atten_h = jnp.dot(h.astype(jnp.bfloat16), wa_ref[g],
                              preferred_element_type=jnp.float32) + ba_ref[g]  # (G, 512)
            q = (q.reshape(G, n_ent, HIDDEN_DIM) + atten_h[:, None, :]
                 ).reshape(G * n_ent, HIDDEN_DIM)

        # q.sum over entities per graph, then final_fc: Linear -> ReLU -> Linear -> ReLU
        q_sum = jnp.sum(q.reshape(G, n_ent, HIDDEN_DIM), axis=1)          # (G, 512)
        y1 = jnp.maximum(
            jnp.dot(q_sum.astype(jnp.bfloat16), w1_ref[...],
                    preferred_element_type=jnp.float32) + b1_ref[...], 0.0)   # (G, 512)
        y2 = jnp.maximum(
            jnp.dot(y1.astype(jnp.bfloat16), w2_ref[...],
                    preferred_element_type=jnp.float32) + b2_ref[...], 0.0)   # (G, 1024)
        out_ref[...] = y2

    return kernel


# --------------------------------- wrapper ---------------------------------
def _default_graphs_per_block(batch):
    # v7x has 2 TensorCores per chip -> keep one graph per grid step and let the
    # "parallel" axis shard them; single-TC chips (v5e/v6e) fold all graphs into one
    # block so every weight crosses the MXU exactly once per call.
    kind = jax.devices()[0].device_kind.lower()
    if 'v7' in kind or '7x' in kind:
        return 1
    return batch


def sg_encode_pallas(obj, head, tail, pred, graph, params, graphs_per_block=None):
    """obj: (B,N_ent,512) f32; head/tail/pred: (B,N_rel,512) bf16; graph: (B,N_ent,N_rel) f32."""
    B, n_ent, _ = obj.shape
    _, n_rel, _ = head.shape
    G = graphs_per_block if graphs_per_block is not None else _default_graphs_per_block(B)
    assert B % G == 0
    nb = B // G

    # --- pack G graphs per block: rows stacked, graph block-diagonal ---
    def pack(x):
        return x.reshape(nb, G * x.shape[1], x.shape[2])

    obj_p, head_p, tail_p, pred_p = pack(obj), pack(head), pack(tail), pack(pred)
    graph_g = graph.reshape(nb, G, n_ent, n_rel)
    eye = jnp.eye(G, dtype=graph.dtype)
    graph_bd = (graph_g[:, :, :, None, :] * eye[None, :, None, :, None]
                ).reshape(nb, G * n_ent, G * n_rel)

    # --- weights: bf16 into the MXU; wv glimpses concatenated along the output axis
    #     and split into head/tail/pred row-blocks -> (3, 512, 2*512) ---
    wv_cat = jnp.concatenate([params['wv'][g] for g in range(NUM_GLIMPSES)], axis=1)
    wv3 = wv_cat.reshape(3, EMBED_DIM, NUM_GLIMPSES * HIDDEN_DIM).astype(jnp.bfloat16)
    bv_cat = jnp.concatenate([params['bv'][g] for g in range(NUM_GLIMPSES)], axis=1)
    wq = params['wq'].astype(jnp.bfloat16)
    wa = params['wa'].astype(jnp.bfloat16)
    w1 = params['w1'].astype(jnp.bfloat16)
    w2 = params['w2'].astype(jnp.bfloat16)

    def per_block(shape):        # per-grid-step inputs
        return pl.BlockSpec((None,) + shape, lambda b: (b, 0, 0))

    def shared(shape):           # weights: constant index_map -> streamed from HBM once
        n = len(shape)
        return pl.BlockSpec(shape, lambda b: (0,) * n)

    in_specs = [
        per_block((G * n_ent, EMBED_DIM)),                    # obj
        per_block((G * n_rel, EMBED_DIM)),                    # head
        per_block((G * n_rel, EMBED_DIM)),                    # tail
        per_block((G * n_rel, EMBED_DIM)),                    # pred
        per_block((G * n_ent, G * n_rel)),                    # graph (block-diagonal)
        shared((3, EMBED_DIM, NUM_GLIMPSES * HIDDEN_DIM)),    # wv  (both glimpses)
        shared((1, NUM_GLIMPSES * HIDDEN_DIM)),               # bv  (both glimpses)
        shared((NUM_GLIMPSES, EMBED_DIM, HIDDEN_DIM)),        # wq
        shared((NUM_GLIMPSES, 1, HIDDEN_DIM)),                # bq
        shared((NUM_GLIMPSES, HIDDEN_DIM, HIDDEN_DIM)),       # wa
        shared((NUM_GLIMPSES, 1, HIDDEN_DIM)),                # ba
        shared((HIDDEN_DIM, HIDDEN_DIM)),                     # w1
        shared((1, HIDDEN_DIM)),                              # b1
        shared((HIDDEN_DIM, FINAL_DIM)),                      # w2
        shared((1, FINAL_DIM)),                               # b2
    ]

    out = pl.pallas_call(
        _make_kernel(G, n_ent),
        out_shape=jax.ShapeDtypeStruct((nb, G, FINAL_DIM), jnp.float32),
        grid=(nb,),
        in_specs=in_specs,
        out_specs=pl.BlockSpec((None, G, FINAL_DIM), lambda b: (b, 0, 0)),
        compiler_params=pltpu.CompilerParams(
            dimension_semantics=("parallel",),
            vmem_limit_bytes=32 * 1024 * 1024),
    )(obj_p, head_p, tail_p, pred_p, graph_bd,
      wv3, bv_cat, wq, params['bq'], wa, params['ba'],
      w1, params['b1'], w2, params['b2'])
    return out.reshape(B, FINAL_DIM)


# --------------------- embedding gathers + forward (plain JAX) ---------------------
def _gather(entities, relations, embeds):
    obj = jnp.take(embeds['obj'], entities, axis=0)
    head = jnp.take(embeds['rel_head'], relations[:, 0], axis=0)
    tail = jnp.take(embeds['rel_tail'], relations[:, 1], axis=0)
    pred = jnp.take(embeds['rel_pred'], relations[:, 2], axis=0)
    return obj, head, tail, pred


def sgencode_forward(graph_dict, img_embeds, txt_embeds, params, graphs_per_block=None):
    """Embedding gathers in plain JAX; both graphs fused into a single Pallas call."""
    img, txt = graph_dict['img'], graph_dict['txt']
    i_obj, i_h, i_t, i_p = _gather(img['entities'], img['relations'], img_embeds)
    t_obj, t_h, t_t, t_p = _gather(txt['entities'], txt['relations'], txt_embeds)
    assert i_obj.shape == t_obj.shape and i_h.shape == t_h.shape, \
        "fused call assumes matching N_ent/N_rel for img and txt graphs"

    obj = jnp.stack([i_obj, t_obj]).astype(jnp.float32)       # (2, N_ent, 512) f32
    head = jnp.stack([i_h, t_h]).astype(jnp.bfloat16)         # (2, N_rel, 512) bf16
    tail = jnp.stack([i_t, t_t]).astype(jnp.bfloat16)
    pred = jnp.stack([i_p, t_p]).astype(jnp.bfloat16)
    graph = jnp.stack([graph_dict['image_graph'],
                       graph_dict['text_graph']]).astype(jnp.float32)  # (2, N_ent, N_rel)
    return sg_encode_pallas(obj, head, tail, pred, graph, params,
                            graphs_per_block)                          # (2, 1024)


# ----------------------------- reference (plain JAX, f32) -----------------------------
def encode_ref(entities, relations, graph, embeds, params):
    obj = jnp.take(embeds['obj'], entities, axis=0)
    rel = jnp.concatenate([jnp.take(embeds['rel_head'], relations[:, 0], axis=0),
                           jnp.take(embeds['rel_tail'], relations[:, 1], axis=0),
                           jnp.take(embeds['rel_pred'], relations[:, 2], axis=0)], axis=-1)
    atten = graph.T
    atten = atten / (atten.sum(0, keepdims=True) + 1e-9)              # (N_rel, N_ent)
    q = obj
    for g in range(NUM_GLIMPSES):
        v_mid = jnp.maximum(rel @ params['wv'][g] + params['bv'][g], 0.0)
        q_mid = jnp.maximum(q @ params['wq'][g] + params['bq'][g], 0.0)
        v2 = v_mid.T @ atten                                          # (512, N_ent)
        h = jnp.sum(v2 * q_mid.T, axis=1, keepdims=True).T            # (1, 512)
        q = q + (h @ params['wa'][g] + params['ba'][g])
    q_sum = jnp.sum(q, axis=0, keepdims=True)
    y1 = jnp.maximum(q_sum @ params['w1'] + params['b1'], 0.0)
    y2 = jnp.maximum(y1 @ params['w2'] + params['b2'], 0.0)
    return y2


# ----------------------------- deterministic init -----------------------------
def init_all(key):
    ks = iter(jax.random.split(key, 32))

    def dense(k, fan_in, fan_out):
        return jax.random.normal(k, (fan_in, fan_out), jnp.float32) / jnp.sqrt(fan_in)

    def emb(k, n, d=EMBED_DIM):
        return jax.random.normal(k, (n, d), jnp.float32) * 0.5

    params = {
        'wv': jnp.stack([dense(next(ks), 3 * EMBED_DIM, HIDDEN_DIM) for _ in range(NUM_GLIMPSES)]),
        'bv': jnp.stack([0.01 * jax.random.normal(next(ks), (1, HIDDEN_DIM), jnp.float32)
                         for _ in range(NUM_GLIMPSES)]),
        'wq': jnp.stack([dense(next(ks), EMBED_DIM, HIDDEN_DIM) for _ in range(NUM_GLIMPSES)]),
        'bq': jnp.stack([0.01 * jax.random.normal(next(ks), (1, HIDDEN_DIM), jnp.float32)
                         for _ in range(NUM_GLIMPSES)]),
        'wa': jnp.stack([dense(next(ks), HIDDEN_DIM, HIDDEN_DIM) for _ in range(NUM_GLIMPSES)]),
        'ba': jnp.stack([0.01 * jax.random.normal(next(ks), (1, HIDDEN_DIM), jnp.float32)
                         for _ in range(NUM_GLIMPSES)]),
        'w1': dense(next(ks), HIDDEN_DIM, HIDDEN_DIM),
        'b1': 0.01 * jax.random.normal(next(ks), (1, HIDDEN_DIM), jnp.float32),
        'w2': dense(next(ks), HIDDEN_DIM, FINAL_DIM),
        'b2': 0.01 * jax.random.normal(next(ks), (1, FINAL_DIM), jnp.float32),
    }
    img_embeds = {'obj': emb(next(ks), 151), 'rel_head': emb(next(ks), 151),
                  'rel_tail': emb(next(ks), 151), 'rel_pred': emb(next(ks), 51)}
    txt_embeds = {'obj': emb(next(ks), 4460), 'rel_head': emb(next(ks), 4460),
                  'rel_tail': emb(next(ks), 4460), 'rel_pred': emb(next(ks), 646)}
    return params, img_embeds, txt_embeds


if __name__ == "__main__":
    key = jax.random.PRNGKey(0)
    k_par, k_in = jax.random.split(key)
    params, img_embeds, txt_embeds = init_all(k_par)

    N_ENT, N_REL = 8, 8
    ki = iter(jax.random.split(k_in, 12))
    graph_dict = {
        'img': {
            'entities': jax.random.randint(next(ki), (N_ENT,), 0, 151, jnp.int32),
            'relations': jnp.concatenate(
                [jax.random.randint(next(ki), (N_REL, 2), 0, 151, jnp.int32),
                 jax.random.randint(next(ki), (N_REL, 1), 0, 51, jnp.int32)], axis=1),
        },
        'image_graph': jax.random.uniform(next(ki), (N_ENT, N_REL), jnp.float32),
        'txt': {
            'entities': jax.random.randint(next(ki), (N_ENT,), 0, 4460, jnp.int32),
            'relations': jnp.concatenate(
                [jax.random.randint(next(ki), (N_REL, 2), 0, 4460, jnp.int32),
                 jax.random.randint(next(ki), (N_REL, 1), 0, 646, jnp.int32)], axis=1),
        },
        'text_graph': jax.random.uniform(next(ki), (N_ENT, N_REL), jnp.float32),
    }

    out = sgencode_forward(graph_dict, img_embeds, txt_embeds, params)
    out = jax.block_until_ready(out)
    assert out.shape == (2, FINAL_DIM) and out.dtype == jnp.float32

    # Cross-check against a plain-JAX f32 reference of the same forward semantics
    # (bf16 MXU inputs + approx reciprocal stay well within the 5e-2 tolerance).
    ref_img = encode_ref(graph_dict['img']['entities'], graph_dict['img']['relations'],
                         graph_dict['image_graph'], img_embeds, params)
    ref_txt = encode_ref(graph_dict['txt']['entities'], graph_dict['txt']['relations'],
                         graph_dict['text_graph'], txt_embeds, params)
    ref = jnp.stack([ref_img[0], ref_txt[0]])
    assert jnp.allclose(out, ref, rtol=5e-2, atol=5e-2), "mismatch vs reference"

    print("KERNEL_OK")
</pallas_src>

<mosaic_0001>
module attributes {stable_mosaic.version = 11 : i64} {
  func.func @kernel(%arg0: i32, %arg1: memref<1x16x512xf32, #tpu.memory_space<vmem>>, %arg2: memref<1x16x512xbf16, #tpu.memory_space<vmem>>, %arg3: memref<1x16x512xbf16, #tpu.memory_space<vmem>>, %arg4: memref<1x16x512xbf16, #tpu.memory_space<vmem>>, %arg5: memref<1x16x16xf32, #tpu.memory_space<vmem>>, %arg6: memref<3x512x1024xbf16, #tpu.memory_space<vmem>>, %arg7: memref<1x1024xf32, #tpu.memory_space<vmem>>, %arg8: memref<2x512x512xbf16, #tpu.memory_space<vmem>>, %arg9: memref<2x1x512xf32, #tpu.memory_space<vmem>>, %arg10: memref<2x512x512xbf16, #tpu.memory_space<vmem>>, %arg11: memref<2x1x512xf32, #tpu.memory_space<vmem>>, %arg12: memref<512x512xbf16, #tpu.memory_space<vmem>>, %arg13: memref<1x512xf32, #tpu.memory_space<vmem>>, %arg14: memref<512x1024xbf16, #tpu.memory_space<vmem>>, %arg15: memref<1x1024xf32, #tpu.memory_space<vmem>>, %arg16: memref<1x2x1024xf32, #tpu.memory_space<vmem>>) attributes {dimension_semantics = [#tpu.dimension_semantics<parallel>], iteration_bounds = array<i64: 1>, scalar_prefetch = 0 : i64, scratch_operands = 0 : i64, tpu.core_type = #tpu.core_type<tc>, window_params = [{transform_indices = @transform_0, window_bounds = array<i64: 1, 16, 512>}, {transform_indices = @transform_1, window_bounds = array<i64: 1, 16, 512>}, {transform_indices = @transform_2, window_bounds = array<i64: 1, 16, 512>}, {transform_indices = @transform_3, window_bounds = array<i64: 1, 16, 512>}, {transform_indices = @transform_4, window_bounds = array<i64: 1, 16, 16>}, {pipeline_mode = #tpu.pipeline_mode<synchronous>, transform_indices = @transform_5, window_bounds = array<i64: 3, 512, 1024>}, {pipeline_mode = #tpu.pipeline_mode<synchronous>, transform_indices = @transform_6, window_bounds = array<i64: 1, 1024>}, {pipeline_mode = #tpu.pipeline_mode<synchronous>, transform_indices = @transform_7, window_bounds = array<i64: 2, 512, 512>}, {pipeline_mode = #tpu.pipeline_mode<synchronous>, transform_indices = @transform_8, window_bounds = array<i64: 2, 1, 512>}, {pipeline_mode = #tpu.pipeline_mode<synchronous>, transform_indices = @transform_9, window_bounds = array<i64: 2, 512, 512>}, {pipeline_mode = #tpu.pipeline_mode<synchronous>, transform_indices = @transform_10, window_bounds = array<i64: 2, 1, 512>}, {pipeline_mode = #tpu.pipeline_mode<synchronous>, transform_indices = @transform_11, window_bounds = array<i64: 512, 512>}, {pipeline_mode = #tpu.pipeline_mode<synchronous>, transform_indices = @transform_12, window_bounds = array<i64: 1, 512>}, {pipeline_mode = #tpu.pipeline_mode<synchronous>, transform_indices = @transform_13, window_bounds = array<i64: 512, 1024>}, {pipeline_mode = #tpu.pipeline_mode<synchronous>, transform_indices = @transform_14, window_bounds = array<i64: 1, 1024>}, {transform_indices = @transform_15, window_bounds = array<i64: 1, 2, 1024>}]} {
    %c0 = arith.constant 0 : index
    %c0_0 = arith.constant 0 : index
    %c0_1 = arith.constant 0 : index
    %0 = vector.load %arg1[%c0, %c0_0, %c0_1] : memref<1x16x512xf32, #tpu.memory_space<vmem>>, vector<1x16x512xf32>
    %1 = vector.shape_cast %0 : vector<1x16x512xf32> to vector<16x512xf32>
    %c0_2 = arith.constant 0 : index
    %c0_3 = arith.constant 0 : index
    %c0_4 = arith.constant 0 : index
    %2 = vector.load %arg5[%c0_2, %c0_3, %c0_4] : memref<1x16x16xf32, #tpu.memory_space<vmem>>, vector<1x16x16xf32>
    %3 = vector.shape_cast %2 : vector<1x16x16xf32> to vector<16x16xf32>
    %cst = arith.constant dense<0.000000e+00> : vector<16xf32>
    %4 = vector.multi_reduction <add>, %3, %cst [1] : vector<16x16xf32> to vector<16xf32>
    %5 = vector.shape_cast %4 : vector<16xf32> to vector<16x1xf32>
    %cst_5 = arith.constant 9.99999971E-10 : f32
    %6 = vector.broadcast %cst_5 : f32 to vector<16x1xf32>
    %7 = arith.addf %5, %6 : vector<16x1xf32>
    %8 = tpu.reciprocal %7 {approx = true} : vector<16x1xf32> -> vector<16x1xf32>
    %c0_6 = arith.constant 0 : index
    %c0_7 = arith.constant 0 : index
    %c0_8 = arith.constant 0 : index
    %9 = vector.load %arg2[%c0_6, %c0_7, %c0_8] : memref<1x16x512xbf16, #tpu.memory_space<vmem>>, vector<1x16x512xbf16>
    %10 = vector.shape_cast %9 : vector<1x16x512xbf16> to vector<16x512xbf16>
    %c0_9 = arith.constant 0 : index
    %c0_10 = arith.constant 0 : index
    %c0_11 = arith.constant 0 : index
    %11 = vector.load %arg6[%c0_9, %c0_10, %c0_11] : memref<3x512x1024xbf16, #tpu.memory_space<vmem>>, vector<1x512x1024xbf16>
    %12 = vector.shape_cast %11 : vector<1x512x1024xbf16> to vector<512x1024xbf16>
    %cst_12 = arith.constant dense<0.000000e+00> : vector<16x1024xf32>
    %13 = tpu.matmul %10, %12, %cst_12 {dimension_numbers = #tpu.dot_dimension_numbers<[1], [0], [0], [1], [0, 0, 1, 1], [], []>} : vector<16x512xbf16>, vector<512x1024xbf16>, vector<16x1024xf32> -> vector<16x1024xf32>
    %c0_13 = arith.constant 0 : index
    %c0_14 = arith.constant 0 : index
    %c0_15 = arith.constant 0 : index
    %14 = vector.load %arg3[%c0_13, %c0_14, %c0_15] : memref<1x16x512xbf16, #tpu.memory_space<vmem>>, vector<1x16x512xbf16>
    %15 = vector.shape_cast %14 : vector<1x16x512xbf16> to vector<16x512xbf16>
    %c1 = arith.constant 1 : index
    %c0_16 = arith.constant 0 : index
    %c0_17 = arith.constant 0 : index
    %16 = vector.load %arg6[%c1, %c0_16, %c0_17] : memref<3x512x1024xbf16, #tpu.memory_space<vmem>>, vector<1x512x1024xbf16>
    %17 = vector.shape_cast %16 : vector<1x512x1024xbf16> to vector<512x1024xbf16>
    %cst_18 = arith.constant dense<0.000000e+00> : vector<16x1024xf32>
    %18 = tpu.matmul %15, %17, %cst_18 {dimension_numbers = #tpu.dot_dimension_numbers<[1], [0], [0], [1], [0, 0, 1, 1], [], []>} : vector<16x512xbf16>, vector<512x1024xbf16>, vector<16x1024xf32> -> vector<16x1024xf32>
    %19 = arith.addf %13, %18 : vector<16x1024xf32>
    %c0_19 = arith.constant 0 : index
    %c0_20 = arith.constant 0 : index
    %c0_21 = arith.constant 0 : index
    %20 = vector.load %arg4[%c0_19, %c0_20, %c0_21] : memref<1x16x512xbf16, #tpu.memory_space<vmem>>, vector<1x16x512xbf16>
    %21 = vector.shape_cast %20 : vector<1x16x512xbf16> to vector<16x512xbf16>
    %c2 = arith.constant 2 : index
    %c0_22 = arith.constant 0 : index
    %c0_23 = arith.constant 0 : index
    %22 = vector.load %arg6[%c2, %c0_22, %c0_23] : memref<3x512x1024xbf16, #tpu.memory_space<vmem>>, vector<1x512x1024xbf16>
    %23 = vector.shape_cast %22 : vector<1x512x1024xbf16> to vector<512x1024xbf16>
    %cst_24 = arith.constant dense<0.000000e+00> : vector<16x1024xf32>
    %24 = tpu.matmul %21, %23, %cst_24 {dimension_numbers = #tpu.dot_dimension_numbers<[1], [0], [0], [1], [0, 0, 1, 1], [], []>} : vector<16x512xbf16>, vector<512x1024xbf16>, vector<16x1024xf32> -> vector<16x1024xf32>
    %25 = arith.addf %19, %24 : vector<16x1024xf32>
    %c0_25 = arith.constant 0 : index
    %c0_26 = arith.constant 0 : index
    %26 = vector.load %arg7[%c0_25, %c0_26] : memref<1x1024xf32, #tpu.memory_space<vmem>>, vector<1x1024xf32>
    %27 = vector.broadcast %26 : vector<1x1024xf32> to vector<16x1024xf32>
    %28 = arith.addf %25, %27 : vector<16x1024xf32>
    %cst_27 = arith.constant 0.000000e+00 : f32
    %29 = vector.broadcast %cst_27 : f32 to vector<16x1024xf32>
    %30 = arith.maximumf %28, %29 : vector<16x1024xf32>
    %31 = arith.truncf %3 : vector<16x16xf32> to vector<16x16xbf16>
    %32 = arith.truncf %30 : vector<16x1024xf32> to vector<16x1024xbf16>
    %cst_28 = arith.constant dense<0.000000e+00> : vector<16x1024xf32>
    %33 = tpu.matmul %31, %32, %cst_28 {dimension_numbers = #tpu.dot_dimension_numbers<[1], [0], [0], [1], [0, 0, 1, 1], [], []>} : vector<16x16xbf16>, vector<16x1024xbf16>, vector<16x1024xf32> -> vector<16x1024xf32>
    %34 = arith.truncf %1 : vector<16x512xf32> to vector<16x512xbf16>
    %c0_29 = arith.constant 0 : index
    %c0_30 = arith.constant 0 : index
    %c0_31 = arith.constant 0 : index
    %35 = vector.load %arg8[%c0_29, %c0_30, %c0_31] : memref<2x512x512xbf16, #tpu.memory_space<vmem>>, vector<1x512x512xbf16>
    %36 = vector.shape_cast %35 : vector<1x512x512xbf16> to vector<512x512xbf16>
    %cst_32 = arith.constant dense<0.000000e+00> : vector<16x512xf32>
    %37 = tpu.matmul %34, %36, %cst_32 {dimension_numbers = #tpu.dot_dimension_numbers<[1], [0], [0], [1], [0, 0, 1, 1], [], []>} : vector<16x512xbf16>, vector<512x512xbf16>, vector<16x512xf32> -> vector<16x512xf32>
    %c0_33 = arith.constant 0 : index
    %c0_34 = arith.constant 0 : index
    %c0_35 = arith.constant 0 : index
    %38 = vector.load %arg9[%c0_33, %c0_34, %c0_35] : memref<2x1x512xf32, #tpu.memory_space<vmem>>, vector<1x1x512xf32>
    %39 = vector.shape_cast %38 : vector<1x1x512xf32> to vector<1x512xf32>
    %40 = vector.broadcast %39 : vector<1x512xf32> to vector<16x512xf32>
    %41 = arith.addf %37, %40 : vector<16x512xf32>
    %cst_36 = arith.constant 0.000000e+00 : f32
    %42 = vector.broadcast %cst_36 : f32 to vector<16x512xf32>
    %43 = arith.maximumf %41, %42 : vector<16x512xf32>
    %44 = vector.extract_strided_slice %33 {offsets = [0, 0], sizes = [16, 512], strides = [1, 1]} : vector<16x1024xf32> to vector<16x512xf32>
    %45 = vector.broadcast %8 : vector<16x1xf32> to vector<16x512xf32>
    %46 = arith.mulf %43, %45 : vector<16x512xf32>
    %47 = arith.mulf %46, %44 : vector<16x512xf32>
    %48 = vector.shape_cast %47 : vector<16x512xf32> to vector<2x8x512xf32>
    %cst_37 = arith.constant dense<0.000000e+00> : vector<2x512xf32>
    %49 = vector.multi_reduction <add>, %48, %cst_37 [1] : vector<2x8x512xf32> to vector<2x512xf32>
    %50 = arith.truncf %49 : vector<2x512xf32> to vector<2x512xbf16>
    %c0_38 = arith.constant 0 : index
    %c0_39 = arith.constant 0 : index
    %c0_40 = arith.constant 0 : index
    %51 = vector.load %arg10[%c0_38, %c0_39, %c0_40] : memref<2x512x512xbf16, #tpu.memory_space<vmem>>, vector<1x512x512xbf16>
    %52 = vector.shape_cast %51 : vector<1x512x512xbf16> to vector<512x512xbf16>
    %cst_41 = arith.constant dense<0.000000e+00> : vector<2x512xf32>
    %53 = tpu.matmul %50, %52, %cst_41 {dimension_numbers = #tpu.dot_dimension_numbers<[1], [0], [0], [1], [0, 0, 1, 1], [], []>} : vector<2x512xbf16>, vector<512x512xbf16>, vector<2x512xf32> -> vector<2x512xf32>
    %c0_42 = arith.constant 0 : index
    %c0_43 = arith.constant 0 : index
    %c0_44 = arith.constant 0 : index
    %54 = vector.load %arg11[%c0_42, %c0_43, %c0_44] : memref<2x1x512xf32, #tpu.memory_space<vmem>>, vector<1x1x512xf32>
    %55 = vector.shape_cast %54 : vector<1x1x512xf32> to vector<1x512xf32>
    %56 = vector.broadcast %55 : vector<1x512xf32> to vector<2x512xf32>
    %57 = arith.addf %53, %56 : vector<2x512xf32>
    %58 = vector.shape_cast %1 : vector<16x512xf32> to vector<2x8x512xf32>
    %59 = vector.shape_cast %57 : vector<2x512xf32> to vector<2x1x512xf32>
    %60 = vector.broadcast %59 : vector<2x1x512xf32> to vector<2x8x512xf32>
    %61 = arith.addf %58, %60 : vector<2x8x512xf32>
    %62 = vector.shape_cast %61 : vector<2x8x512xf32> to vector<16x512xf32>
    %63 = arith.truncf %62 : vector<16x512xf32> to vector<16x512xbf16>
    %c1_45 = arith.constant 1 : index
    %c0_46 = arith.constant 0 : index
    %c0_47 = arith.constant 0 : index
    %64 = vector.load %arg8[%c1_45, %c0_46, %c0_47] : memref<2x512x512xbf16, #tpu.memory_space<vmem>>, vector<1x512x512xbf16>
    %65 = vector.shape_cast %64 : vector<1x512x512xbf16> to vector<512x512xbf16>
    %cst_48 = arith.constant dense<0.000000e+00> : vector<16x512xf32>
    %66 = tpu.matmul %63, %65, %cst_48 {dimension_numbers = #tpu.dot_dimension_numbers<[1], [0], [0], [1], [0, 0, 1, 1], [], []>} : vector<16x512xbf16>, vector<512x512xbf16>, vector<16x512xf32> -> vector<16x512xf32>
    %c1_49 = arith.constant 1 : index
    %c0_50 = arith.constant 0 : index
    %c0_51 = arith.constant 0 : index
    %67 = vector.load %arg9[%c1_49, %c0_50, %c0_51] : memref<2x1x512xf32, #tpu.memory_space<vmem>>, vector<1x1x512xf32>
    %68 = vector.shape_cast %67 : vector<1x1x512xf32> to vector<1x512xf32>
    %69 = vector.broadcast %68 : vector<1x512xf32> to vector<16x512xf32>
    %70 = arith.addf %66, %69 : vector<16x512xf32>
    %cst_52 = arith.constant 0.000000e+00 : f32
    %71 = vector.broadcast %cst_52 : f32 to vector<16x512xf32>
    %72 = arith.maximumf %70, %71 : vector<16x512xf32>
    %73 = vector.extract_strided_slice %33 {offsets = [0, 512], sizes = [16, 512], strides = [1, 1]} : vector<16x1024xf32> to vector<16x512xf32>
    %74 = vector.broadcast %8 : vector<16x1xf32> to vector<16x512xf32>
    %75 = arith.mulf %72, %74 : vector<16x512xf32>
    %76 = arith.mulf %75, %73 : vector<16x512xf32>
    %77 = vector.shape_cast %76 : vector<16x512xf32> to vector<2x8x512xf32>
    %cst_53 = arith.constant dense<0.000000e+00> : vector<2x512xf32>
    %78 = vector.multi_reduction <add>, %77, %cst_53 [1] : vector<2x8x512xf32> to vector<2x512xf32>
    %79 = arith.truncf %78 : vector<2x512xf32> to vector<2x512xbf16>
    %c1_54 = arith.constant 1 : index
    %c0_55 = arith.constant 0 : index
    %c0_56 = arith.constant 0 : index
    %80 = vector.load %arg10[%c1_54, %c0_55, %c0_56] : memref<2x512x512xbf16, #tpu.memory_space<vmem>>, vector<1x512x512xbf16>
    %81 = vector.shape_cast %80 : vector<1x512x512xbf16> to vector<512x512xbf16>
    %cst_57 = arith.constant dense<0.000000e+00> : vector<2x512xf32>
    %82 = tpu.matmul %79, %81, %cst_57 {dimension_numbers = #tpu.dot_dimension_numbers<[1], [0], [0], [1], [0, 0, 1, 1], [], []>} : vector<2x512xbf16>, vector<512x512xbf16>, vector<2x512xf32> -> vector<2x512xf32>
    %c1_58 = arith.constant 1 : index
    %c0_59 = arith.constant 0 : index
    %c0_60 = arith.constant 0 : index
    %83 = vector.load %arg11[%c1_58, %c0_59, %c0_60] : memref<2x1x512xf32, #tpu.memory_space<vmem>>, vector<1x1x512xf32>
    %84 = vector.shape_cast %83 : vector<1x1x512xf32> to vector<1x512xf32>
    %85 = vector.broadcast %84 : vector<1x512xf32> to vector<2x512xf32>
    %86 = arith.addf %82, %85 : vector<2x512xf32>
    %87 = vector.shape_cast %62 : vector<16x512xf32> to vector<2x8x512xf32>
    %88 = vector.shape_cast %86 : vector<2x512xf32> to vector<2x1x512xf32>
    %89 = vector.broadcast %88 : vector<2x1x512xf32> to vector<2x8x512xf32>
    %90 = arith.addf %87, %89 : vector<2x8x512xf32>
    %91 = vector.shape_cast %90 : vector<2x8x512xf32> to vector<16x512xf32>
    %92 = vector.shape_cast %91 : vector<16x512xf32> to vector<2x8x512xf32>
    %cst_61 = arith.constant dense<0.000000e+00> : vector<2x512xf32>
    %93 = vector.multi_reduction <add>, %92, %cst_61 [1] : vector<2x8x512xf32> to vector<2x512xf32>
    %94 = arith.truncf %93 : vector<2x512xf32> to vector<2x512xbf16>
    %c0_62 = arith.constant 0 : index
    %c0_63 = arith.constant 0 : index
    %95 = vector.load %arg12[%c0_62, %c0_63] : memref<512x512xbf16, #tpu.memory_space<vmem>>, vector<512x512xbf16>
    %cst_64 = arith.constant dense<0.000000e+00> : vector<2x512xf32>
    %96 = tpu.matmul %94, %95, %cst_64 {dimension_numbers = #tpu.dot_dimension_numbers<[1], [0], [0], [1], [0, 0, 1, 1], [], []>} : vector<2x512xbf16>, vector<512x512xbf16>, vector<2x512xf32> -> vector<2x512xf32>
    %c0_65 = arith.constant 0 : index
    %c0_66 = arith.constant 0 : index
    %97 = vector.load %arg13[%c0_65, %c0_66] : memref<1x512xf32, #tpu.memory_space<vmem>>, vector<1x512xf32>
    %98 = vector.broadcast %97 : vector<1x512xf32> to vector<2x512xf32>
    %99 = arith.addf %96, %98 : vector<2x512xf32>
    %cst_67 = arith.constant 0.000000e+00 : f32
    %100 = vector.broadcast %cst_67 : f32 to vector<2x512xf32>
    %101 = arith.maximumf %99, %100 : vector<2x512xf32>
    %102 = arith.truncf %101 : vector<2x512xf32> to vector<2x512xbf16>
    %c0_68 = arith.constant 0 : index
    %c0_69 = arith.constant 0 : index
    %103 = vector.load %arg14[%c0_68, %c0_69] : memref<512x1024xbf16, #tpu.memory_space<vmem>>, vector<512x1024xbf16>
    %cst_70 = arith.constant dense<0.000000e+00> : vector<2x1024xf32>
    %104 = tpu.matmul %102, %103, %cst_70 {dimension_numbers = #tpu.dot_dimension_numbers<[1], [0], [0], [1], [0, 0, 1, 1], [], []>} : vector<2x512xbf16>, vector<512x1024xbf16>, vector<2x1024xf32> -> vector<2x1024xf32>
    %c0_71 = arith.constant 0 : index
    %c0_72 = arith.constant 0 : index
    %105 = vector.load %arg15[%c0_71, %c0_72] : memref<1x1024xf32, #tpu.memory_space<vmem>>, vector<1x1024xf32>
    %106 = vector.broadcast %105 : vector<1x1024xf32> to vector<2x1024xf32>
    %107 = arith.addf %104, %106 : vector<2x1024xf32>
    %cst_73 = arith.constant 0.000000e+00 : f32
    %108 = vector.broadcast %cst_73 : f32 to vector<2x1024xf32>
    %109 = arith.maximumf %107, %108 : vector<2x1024xf32>
    %c0_74 = arith.constant 0 : index
    %c0_75 = arith.constant 0 : index
    %c0_76 = arith.constant 0 : index
    %110 = vector.load %arg16[%c0_74, %c0_75, %c0_76] : memref<1x2x1024xf32, #tpu.memory_space<vmem>>, vector<1x2x1024xf32>
    %111 = vector.shape_cast %110 : vector<1x2x1024xf32> to vector<2x1024xf32>
    %112 = vector.shape_cast %109 : vector<2x1024xf32> to vector<1x2x1024xf32>
    tpu.vector_store %arg16[%c0_74, %c0_75, %c0_76], %112 {strides = array<i32>} : memref<1x2x1024xf32, #tpu.memory_space<vmem>>, vector<1x2x1024xf32>,
    return
  }
  func.func @transform_0(%arg0: i32) -> (i32, i32, i32) {
    %c0_i32 = arith.constant 0 : i32
    %c0_i32_0 = arith.constant 0 : i32
    %c0_i32_1 = arith.constant 0 : i32
    return %arg0, %c0_i32, %c0_i32_0 : i32, i32, i32
  }
  func.func @transform_1(%arg0: i32) -> (i32, i32, i32) {
    %c0_i32 = arith.constant 0 : i32
    %c0_i32_0 = arith.constant 0 : i32
    %c0_i32_1 = arith.constant 0 : i32
    return %arg0, %c0_i32, %c0_i32_0 : i32, i32, i32
  }
  func.func @transform_2(%arg0: i32) -> (i32, i32, i32) {
    %c0_i32 = arith.constant 0 : i32
    %c0_i32_0 = arith.constant 0 : i32
    %c0_i32_1 = arith.constant 0 : i32
    return %arg0, %c0_i32, %c0_i32_0 : i32, i32, i32
  }
  func.func @transform_3(%arg0: i32) -> (i32, i32, i32) {
    %c0_i32 = arith.constant 0 : i32
    %c0_i32_0 = arith.constant 0 : i32
    %c0_i32_1 = arith.constant 0 : i32
    return %arg0, %c0_i32, %c0_i32_0 : i32, i32, i32
  }
  func.func @transform_4(%arg0: i32) -> (i32, i32, i32) {
    %c0_i32 = arith.constant 0 : i32
    %c0_i32_0 = arith.constant 0 : i32
    %c0_i32_1 = arith.constant 0 : i32
    return %arg0, %c0_i32, %c0_i32_0 : i32, i32, i32
  }
  func.func @transform_5(%arg0: i32) -> (i32, i32, i32) {
    %c0_i32 = arith.constant 0 : i32
    %c0_i32_0 = arith.constant 0 : i32
    %c0_i32_1 = arith.constant 0 : i32
    %c0_i32_2 = arith.constant 0 : i32
    return %c0_i32, %c0_i32_0, %c0_i32_1 : i32, i32, i32
  }
  func.func @transform_6(%arg0: i32) -> (i32, i32) {
    %c0_i32 = arith.constant 0 : i32
    %c0_i32_0 = arith.constant 0 : i32
    %c0_i32_1 = arith.constant 0 : i32
    return %c0_i32, %c0_i32_0 : i32, i32
  }
  func.func @transform_7(%arg0: i32) -> (i32, i32, i32) {
    %c0_i32 = arith.constant 0 : i32
    %c0_i32_0 = arith.constant 0 : i32
    %c0_i32_1 = arith.constant 0 : i32
    %c0_i32_2 = arith.constant 0 : i32
    return %c0_i32, %c0_i32_0, %c0_i32_1 : i32, i32, i32
  }
  func.func @transform_8(%arg0: i32) -> (i32, i32, i32) {
    %c0_i32 = arith.constant 0 : i32
    %c0_i32_0 = arith.constant 0 : i32
    %c0_i32_1 = arith.constant 0 : i32
    %c0_i32_2 = arith.constant 0 : i32
    return %c0_i32, %c0_i32_0, %c0_i32_1 : i32, i32, i32
  }
  func.func @transform_9(%arg0: i32) -> (i32, i32, i32) {
    %c0_i32 = arith.constant 0 : i32
    %c0_i32_0 = arith.constant 0 : i32
    %c0_i32_1 = arith.constant 0 : i32
    %c0_i32_2 = arith.constant 0 : i32
    return %c0_i32, %c0_i32_0, %c0_i32_1 : i32, i32, i32
  }
  func.func @transform_10(%arg0: i32) -> (i32, i32, i32) {
    %c0_i32 = arith.constant 0 : i32
    %c0_i32_0 = arith.constant 0 : i32
    %c0_i32_1 = arith.constant 0 : i32
    %c0_i32_2 = arith.constant 0 : i32
    return %c0_i32, %c0_i32_0, %c0_i32_1 : i32, i32, i32
  }
  func.func @transform_11(%arg0: i32) -> (i32, i32) {
    %c0_i32 = arith.constant 0 : i32
    %c0_i32_0 = arith.constant 0 : i32
    %c0_i32_1 = arith.constant 0 : i32
    return %c0_i32, %c0_i32_0 : i32, i32
  }
  func.func @transform_12(%arg0: i32) -> (i32, i32) {
    %c0_i32 = arith.constant 0 : i32
    %c0_i32_0 = arith.constant 0 : i32
    %c0_i32_1 = arith.constant 0 : i32
    return %c0_i32, %c0_i32_0 : i32, i32
  }
  func.func @transform_13(%arg0: i32) -> (i32, i32) {
    %c0_i32 = arith.constant 0 : i32
    %c0_i32_0 = arith.constant 0 : i32
    %c0_i32_1 = arith.constant 0 : i32
    return %c0_i32, %c0_i32_0 : i32, i32
  }
  func.func @transform_14(%arg0: i32) -> (i32, i32) {
    %c0_i32 = arith.constant 0 : i32
    %c0_i32_0 = arith.constant 0 : i32
    %c0_i32_1 = arith.constant 0 : i32
    return %c0_i32, %c0_i32_0 : i32, i32
  }
  func.func @transform_15(%arg0: i32) -> (i32, i32, i32) {
    %c0_i32 = arith.constant 0 : i32
    %c0_i32_0 = arith.constant 0 : i32
    %c0_i32_1 = arith.constant 0 : i32
    return %arg0, %c0_i32, %c0_i32_0 : i32, i32, i32
  }
}

</mosaic_0001>

<bundles_post_ra>
// kernel: tpu_custom_call.1
= control target key start
LH: loop header
LB: loop body
LE: loop exit
PB: predicated region body
PF: predicated region fallthrough
CT: control target
= control target key end

     0   :  { %20 = vsyncpa [#allocation3], 0  ;;  %s17290_s0 = inlined_call_operand.hbm [shape: f32[1,16,512], index: 0, kind: input, shape index: {}]   ;;  %s17291_s1 = inlined_call_operand.hbm [shape: bf16[1,16,512], index: 1, kind: input, shape index: {}]   ;;  %s17292_s2 = inlined_call_operand.hbm [shape: bf16[1,16,512], index: 2, kind: input, shape index: {}]   ;;  %s17293_s3 = inlined_call_operand.hbm [shape: bf16[1,16,512], index: 3, kind: input, shape index: {}]   ;;  %s17294_s4 = inlined_call_operand.hbm [shape: f32[1,16,16], index: 4, kind: input, shape index: {}]   ;;  %s17295_s5 = inlined_call_operand.hbm [shape: bf16[3,512,1024], index: 5, kind: input, shape index: {}]   ;;  %s17296_s6 = inlined_call_operand.hbm [shape: f32[1,1024], index: 6, kind: input, shape index: {}]   ;;  %s17297_s7 = inlined_call_operand.hbm [shape: bf16[2,512,512], index: 7, kind: input, shape index: {}]   ;;  %s17298_s8 = inlined_call_operand.hbm [shape: f32[2,1,512], index: 8, kind: input, shape index: {}]   ;;  %s17299_s9 = inlined_call_operand.hbm [shape: bf16[2,512,512], index: 9, kind: input, shape index: {}]   ;;  %s17300_s10 = inlined_call_operand.hbm [shape: f32[2,1,512], index: 10, kind: input, shape index: {}]   ;;  %s17301_s11 = inlined_call_operand.hbm [shape: bf16[512,512], index: 11, kind: input, shape index: {}]   ;;  %s17302_s12 = inlined_call_operand.hbm [shape: f32[1,512], index: 12, kind: input, shape index: {}]   ;;  %s17303_s13 = inlined_call_operand.hbm [shape: bf16[512,1024], index: 13, kind: input, shape index: {}]   ;;  %s17304_s14 = inlined_call_operand.hbm [shape: f32[1,1024], index: 14, kind: input, shape index: {}]   ;;  %s17305_s15 = inlined_call_operand.hbm [shape: f32[1,2,1024], index: 15, kind: output, shape index: {}]  }
   0x1   :  { %21 = vsyncpa [#allocation6], 0 }
   0x2   :  { %22 = vsyncpa [#allocation9], 0 }
   0x3   :  { %23 = vsyncpa [#allocation12], 0 }
   0x4   :  { %24 = vsyncpa [#allocation15], 0 }
   0x5   :  { %25 = vsyncpa [#allocation18], 0 }
   0x6   :  { %26 = vsyncpa [#allocation21], 0 }
   0x7   :  { %27 = vsyncpa [#allocation24], 0 }
   0x8   :  { %28 = vsyncpa [#allocation4], 0  ;;  %s16562_s18 = smov [#allocation5]  }
   0x9   :  { %s46_s19 = sshll.u32 %s16562_s18, 4  ;;  %s47_s19 = int_to_ptr.vmem [resolvable:$true] %s46_s19 }
   0xa   :  { %s16232_s20 = scalar_lea.vmem %s47_s19, 512  ;;  %p16237_p1 = scmp.lt.s32.totalorder %s47_s19, %s47_s19 }
   0xb   :  { %p16233_p0 = scmp.ne.s32.totalorder %s47_s19, %s16232_s20  ;;  %p16238_p2 = scmp.lt.s32.totalorder %s16232_s20, %s16232_s20 }
   0xd   :  { %p16239_p3 = por %p16238_p2, %p16237_p1 }
   0xf   :  { %p16240_p4 = pnand %p16239_p3, %p16233_p0 }
  0x11   :  { %16243 = shalt.err (!%p16240_p4)
}
  0x12   :  { %s16563_s21 = smov 256   ;;  %s16564_s22 = smov 16  }
  0x13   :  { %52 = dma.hbm_to_vmem [thread:$0]  %s17291_s1, 512, %s47_s19, [#allocation6], %s16563_s21, %s16563_s21, %s16564_s22  }
  0x14   :  { %s16565_s25 = smov [#allocation8]  }
  0x15   :  { %s70_s26 = sshll.u32 %s16565_s25, 4  ;;  %s71_s26 = int_to_ptr.vmem [resolvable:$true] %s70_s26 }
  0x16   :  { %s16252_s27 = scalar_lea.vmem %s71_s26, 512  ;;  %p16257_p6 = scmp.lt.s32.totalorder %s71_s26, %s71_s26 }
  0x17   :  { %p16253_p5 = scmp.ne.s32.totalorder %s71_s26, %s16252_s27  ;;  %p16258_p7 = scmp.lt.s32.totalorder %s16252_s27, %s16252_s27 }
  0x19   :  { %p16259_p8 = por %p16258_p7, %p16257_p6 }
  0x1b   :  { %p16260_p9 = pnand %p16259_p8, %p16253_p5 }
  0x1d   :  { %16263 = shalt.err (!%p16260_p9)
}
  0x1e   :  { %76 = dma.hbm_to_vmem [thread:$0]  %s17293_s3, 512, %s71_s26, [#allocation9], %s16563_s21, %s16563_s21, %s16564_s22  }
  0x1f   :  { %s16566_s30 = smov [#allocation11]   ;;  %s16567_s1 = smov [#allocation14]  }
  0x20   :  { %s94_s16 = sshll.u32 %s16566_s30, 4  ;;  %s116_s17 = sshll.u32 %s16567_s1, 4  ;;  %s95_s16 = int_to_ptr.vmem [resolvable:$true] %s94_s16  ;;  %s117_s17 = int_to_ptr.vmem [resolvable:$true] %s116_s17 }
  0x21   :  { %s16272_s18 = scalar_lea.vmem %s95_s16, 98304  ;;  %p16277_p11 = scmp.lt.s32.totalorder %s95_s16, %s95_s16 }
  0x22   :  { %p16273_p10 = scmp.ne.s32.totalorder %s95_s16, %s16272_s18  ;;  %p16278_p12 = scmp.lt.s32.totalorder %s16272_s18, %s16272_s18 }
  0x24   :  { %p16279_p13 = por %p16278_p12, %p16277_p11 }
  0x26   :  { %p16280_p0 = pnand %p16279_p13, %p16273_p10 }
  0x28   :  { %16283 = shalt.err (!%p16280_p0)
}
  0x29   :  { %s16568_s19 = smov 512   ;;  %s16569_s20 = smov 32  }
  0x2a   :  { %100 = dma.hbm_to_vmem [thread:$0]  %s17295_s5, 98304, %s95_s16, [#allocation12], %s16568_s19, %s16568_s19, %s16569_s20  }
  0x2b   :  { %s16292_s24 = scalar_lea.vmem %s117_s17, 32768  ;;  %p16297_p2 = scmp.lt.s32.totalorder %s117_s17, %s117_s17 }
  0x2c   :  { %p16293_p1 = scmp.ne.s32.totalorder %s117_s17, %s16292_s24  ;;  %p16298_p3 = scmp.lt.s32.totalorder %s16292_s24, %s16292_s24 }
  0x2e   :  { %p16299_p4 = por %p16298_p3, %p16297_p2 }
  0x30   :  { %p16300_p5 = pnand %p16299_p4, %p16293_p1 }
  0x32   :  { %16303 = shalt.err (!%p16300_p5)
}
  0x33   :  { %122 = dma.hbm_to_vmem [thread:$0]  %s17297_s7, 32768, %s117_s17, [#allocation15], %s16563_s21, %s16563_s21, %s16564_s22  }
  0x34   :  { %s16570_s27 = smov [#allocation17]   ;;  %s16571_s29 = smov [#allocation20]  }
  0x35   :  { %s140_s28 = sshll.u32 %s16570_s27, 4  ;;  %s164_s30 = sshll.u32 %s16571_s29, 4  ;;  %s141_s28 = int_to_ptr.vmem [resolvable:$true] %s140_s28  ;;  %s165_s30 = int_to_ptr.vmem [resolvable:$true] %s164_s30 }
  0x36   :  { %s16312_s5 = scalar_lea.vmem %s141_s28, 32768  ;;  %p16317_p7 = scmp.lt.s32.totalorder %s141_s28, %s141_s28 }
  0x37   :  { %p16313_p6 = scmp.ne.s32.totalorder %s141_s28, %s16312_s5  ;;  %p16318_p8 = scmp.lt.s32.totalorder %s16312_s5, %s16312_s5 }
  0x39   :  { %p16319_p9 = por %p16318_p8, %p16317_p7 }
  0x3b   :  { %p16320_p10 = pnand %p16319_p9, %p16313_p6 }
  0x3d   :  { %16323 = shalt.err (!%p16320_p10)
}
  0x3e   :  { %146 = dma.hbm_to_vmem [thread:$0]  %s17299_s9, 32768, %s141_s28, [#allocation18], %s16563_s21, %s16563_s21, %s16564_s22  }
  0x3f   :  { %s16332_s7 = scalar_lea.vmem %s165_s30, 16384  ;;  %p16337_p12 = scmp.lt.s32.totalorder %s165_s30, %s165_s30 }
  0x40   :  { %p16333_p11 = scmp.ne.s32.totalorder %s165_s30, %s16332_s7  ;;  %p16338_p13 = scmp.lt.s32.totalorder %s16332_s7, %s16332_s7 }
  0x42   :  { %p16339_p0 = por %p16338_p13, %p16337_p12 }
  0x44   :  { %p16340_p1 = pnand %p16339_p0, %p16333_p11 }
  0x46   :  { %16343 = shalt.err (!%p16340_p1)
}
  0x47   :  { %170 = dma.hbm_to_vmem [thread:$0]  %s17301_s11, 16384, %s165_s30, [#allocation21], %s16563_s21, %s16563_s21, %s16564_s22  }
  0x48   :  { %s16572_s23 = smov [#allocation23]   ;;  %s16573_s24 = smov [#allocation2]  }
  0x49   :  { %s186_s3 = sshll.u32 %s16572_s23, 4  ;;  %s34_s25 = sshll.u32 %s16573_s24, 4  ;;  %s187_s3 = int_to_ptr.vmem [resolvable:$true] %s186_s3  ;;  %s35_s25 = int_to_ptr.vmem [resolvable:$true] %s34_s25 }
  0x4a   :  { %s16352_s9 = scalar_lea.vmem %s187_s3, 32768  ;;  %p16357_p3 = scmp.lt.s32.totalorder %s187_s3, %s187_s3 }
  0x4b   :  { %p16353_p2 = scmp.ne.s32.totalorder %s187_s3, %s16352_s9  ;;  %p16358_p4 = scmp.lt.s32.totalorder %s16352_s9, %s16352_s9 }
  0x4d   :  { %p16359_p5 = por %p16358_p4, %p16357_p3 }
  0x4f   :  { %p16360_p6 = pnand %p16359_p5, %p16353_p2 }
  0x51   :  { %16363 = shalt.err (!%p16360_p6)
}
  0x52   :  { %192 = dma.hbm_to_vmem [thread:$0]  %s17303_s13, 32768, %s187_s3, [#allocation24], %s16568_s19, %s16568_s19, %s16569_s20  }
  0x53   :  { %s16372_s11 = scalar_lea.vmem %s35_s25, 1024  ;;  %p16377_p8 = scmp.lt.s32.totalorder %s35_s25, %s35_s25 }
  0x54   :  { %p16373_p7 = scmp.ne.s32.totalorder %s35_s25, %s16372_s11  ;;  %p16378_p9 = scmp.lt.s32.totalorder %s16372_s11, %s16372_s11 }
  0x56   :  { %p16379_p10 = por %p16378_p9, %p16377_p8 }
  0x58   :  { %p16380_p11 = pnand %p16379_p10, %p16373_p7 }
  0x5a   :  { %16383 = shalt.err (!%p16380_p11)
}
  0x5b   :  { %40 = dma.hbm_to_vmem [thread:$0]  %s17290_s0, 1024, %s35_s25, [#allocation3], %s16568_s19, %s16568_s19, %s16569_s20  }
  0x5c   :  { %s16574_s30 = smov [#allocation7]   ;;  %s16575_s16 = smov [#allocation10]  }
  0x5d   :  { %s58_s5 = sshll.u32 %s16574_s30, 4  ;;  %s82_s1 = sshll.u32 %s16575_s16, 4  ;;  %s59_s5 = int_to_ptr.vmem [resolvable:$true] %s58_s5  ;;  %s83_s1 = int_to_ptr.vmem [resolvable:$true] %s82_s1 }
  0x5e   :  { %s16392_s13 = scalar_lea.vmem %s59_s5, 512  ;;  %p16397_p13 = scmp.lt.s32.totalorder %s59_s5, %s59_s5 }
  0x5f   :  { %p16393_p12 = scmp.ne.s32.totalorder %s59_s5, %s16392_s13  ;;  %p16398_p0 = scmp.lt.s32.totalorder %s16392_s13, %s16392_s13 }
  0x61   :  { %p16399_p1 = por %p16398_p0, %p16397_p13 }
  0x63   :  { %p16400_p2 = pnand %p16399_p1, %p16393_p12 }
  0x65   :  { %16403 = shalt.err (!%p16400_p2)
}
  0x66   :  { %64 = dma.hbm_to_vmem [thread:$0]  %s17292_s2, 512, %s59_s5, [#allocation6], %s16563_s21, %s16563_s21, %s16564_s22  }
  0x67   :  { %s16412_s0 = scalar_lea.vmem %s83_s1, 256  ;;  %p16417_p4 = scmp.lt.s32.totalorder %s83_s1, %s83_s1 }
  0x68   :  { %p16413_p3 = scmp.ne.s32.totalorder %s83_s1, %s16412_s0  ;;  %p16418_p5 = scmp.lt.s32.totalorder %s16412_s0, %s16412_s0 }
  0x6a   :  { %p16419_p6 = por %p16418_p5, %p16417_p4 }
  0x6c   :  { %p16420_p7 = pnand %p16419_p6, %p16413_p3 }
  0x6e   :  { %16423 = shalt.err (!%p16420_p7)
}
  0x6f   :  { %s16576_s19 = smov 128   ;;  %s16577_s20 = smov 8  }
  0x70   :  { %88 = dma.hbm_to_vmem [thread:$0]  %s17294_s4, 256, %s83_s1, [#allocation9], %s16576_s19, %s16576_s19, %s16577_s20  }
  0x71   :  { %s16578_s3 = smov [#allocation13]   ;;  %s16579_s25 = smov [#allocation16]  }
  0x72   :  { %s107_s24 = sshll.u32 %s16578_s3, 4  ;;  %s128_s9 = sshll.u32 %s16579_s25, 4  ;;  %s108_s24 = int_to_ptr.vmem [resolvable:$true] %s107_s24  ;;  %s129_s9 = int_to_ptr.vmem [resolvable:$true] %s128_s9 }
  0x73   :  { %s16432_s2 = scalar_lea.vmem %s108_s24, 128  ;;  %p16437_p9 = scmp.lt.s32.totalorder %s108_s24, %s108_s24 }
  0x74   :  { %p16433_p8 = scmp.ne.s32.totalorder %s108_s24, %s16432_s2  ;;  %p16438_p10 = scmp.lt.s32.totalorder %s16432_s2, %s16432_s2 }
  0x76   :  { %p16439_p11 = por %p16438_p10, %p16437_p9 }
  0x78   :  { %p16440_p12 = pnand %p16439_p11, %p16433_p8 }
  0x7a   :  { %16443 = shalt.err (!%p16440_p12)
}
  0x7b   :  { %110 = dma.hbm_to_vmem [thread:$0]  %s17296_s6, 128, %s108_s24, [#allocation12]  }
  0x7c   :  { %s16452_s26 = scalar_lea.vmem %s129_s9, 128  ;;  %p16457_p0 = scmp.lt.s32.totalorder %s129_s9, %s129_s9 }
  0x7d   :  { %p16453_p13 = scmp.ne.s32.totalorder %s129_s9, %s16452_s26  ;;  %p16458_p1 = scmp.lt.s32.totalorder %s16452_s26, %s16452_s26 }
  0x7f   :  { %p16459_p2 = por %p16458_p1, %p16457_p0 }
  0x81   :  { %p16460_p3 = pnand %p16459_p2, %p16453_p13 }
  0x83   :  { %16463 = shalt.err (!%p16460_p3)
}
  0x84   :  { %s16580_s4 = smov 64   ;;  %s16581_s27 = smov 4  }
  0x85   :  { %134 = dma.hbm_to_vmem [thread:$0]  %s17298_s8, 128, %s129_s9, [#allocation15], %s16580_s4, %s16580_s4, %s16581_s27  }
  0x86   :  { %s16582_s29 = smov [#allocation19]   ;;  %s16583_s5 = smov [#allocation22]  }
  0x87   :  { %s152_s30 = sshll.u32 %s16582_s29, 4  ;;  %s177_s16 = sshll.u32 %s16583_s5, 4  ;;  %s153_s30 = int_to_ptr.vmem [resolvable:$true] %s152_s30  ;;  %s178_s16 = int_to_ptr.vmem [resolvable:$true] %s177_s16 }
  0x88   :  { %s16472_s6 = scalar_lea.vmem %s153_s30, 128  ;;  %p16477_p5 = scmp.lt.s32.totalorder %s153_s30, %s153_s30 }
  0x89   :  { %p16473_p4 = scmp.ne.s32.totalorder %s153_s30, %s16472_s6  ;;  %p16478_p6 = scmp.lt.s32.totalorder %s16472_s6, %s16472_s6 }
  0x8b   :  { %p16479_p7 = por %p16478_p6, %p16477_p5 }
  0x8d   :  { %p16480_p8 = pnand %p16479_p7, %p16473_p4 }
  0x8f   :  { %16483 = shalt.err (!%p16480_p8)
}
  0x90   :  { %158 = dma.hbm_to_vmem [thread:$0]  %s17300_s10, 128, %s153_s30, [#allocation18], %s16580_s4, %s16580_s4, %s16581_s27  }
  0x91   :  { %s16492_s7 = scalar_lea.vmem %s178_s16, 64  ;;  %p16497_p10 = scmp.lt.s32.totalorder %s178_s16, %s178_s16 }
  0x92   :  { %p16493_p9 = scmp.ne.s32.totalorder %s178_s16, %s16492_s7  ;;  %p16498_p11 = scmp.lt.s32.totalorder %s16492_s7, %s16492_s7 }
  0x94   :  { %p16499_p12 = por %p16498_p11, %p16497_p10 }
  0x96   :  { %p16500_p13 = pnand %p16499_p12, %p16493_p9 }
  0x98   :  { %16503 = shalt.err (!%p16500_p13)
}
  0x99   :  { %180 = dma.hbm_to_vmem [thread:$0]  %s17302_s12, 64, %s178_s16, [#allocation21]  }
  0x9a   :  { %s16584_s0 = smov [#allocation25]  }
  0x9b   :  { %s199_s19 = sshll.u32 %s16584_s0, 4  ;;  %s200_s19 = int_to_ptr.vmem [resolvable:$true] %s199_s19 }
  0x9c   :  { %s16512_s20 = scalar_lea.vmem %s200_s19, 128  ;;  %p16517_p1 = scmp.lt.s32.totalorder %s200_s19, %s200_s19 }
  0x9d   :  { %p16513_p0 = scmp.ne.s32.totalorder %s200_s19, %s16512_s20  ;;  %p16518_p2 = scmp.lt.s32.totalorder %s16512_s20, %s16512_s20 }
  0x9f   :  { %p16519_p3 = por %p16518_p2, %p16517_p1 }
  0xa1   :  { %p16520_p4 = pnand %p16519_p3, %p16513_p0 }
  0xa3   :  { %16523 = shalt.err (!%p16520_p4)
}
  0xa4   :  { %202 = dma.hbm_to_vmem [thread:$0]  %s17304_s14, 128, %s200_s19, [#allocation24]  }
  0xa5   :  { %16544 = dma.done.wait [#allocation3], 1024  }
  0xa6   :  { %16545 = vsyncadd [#allocation3], 4294966272 }
  0xa7   :  { %16546 = dma.done.wait [#allocation6], 1024  }
  0xa8   :  { %16547 = vsyncadd [#allocation6], 4294966272 }
  0xa9   :  { %16548 = dma.done.wait [#allocation9], 768  }
  0xaa   :  { %16549 = vsyncadd [#allocation9], 4294966528 }
  0xab   :  { %16550 = dma.done.wait [#allocation12], 98432  }
  0xac   :  { %16551 = vsyncadd [#allocation12], 4294868864 }
  0xad   :  { %16552 = dma.done.wait [#allocation15], 32896  }
  0xae   :  { %16553 = vsyncadd [#allocation15], 4294934400 }
  0xaf   :  { %16554 = dma.done.wait [#allocation18], 32896  }
  0xb0   :  { %16555 = vsyncadd [#allocation18], 4294934400 }
  0xb1   :  { %16556 = dma.done.wait [#allocation21], 16448  }
  0xb2   :  { %16557 = vsyncadd [#allocation21], 4294950848 }
  0xb3   :  { %16558 = dma.done.wait [#allocation24], 32896  }
  0xb4   :  { %16559 = vsyncadd [#allocation24], 4294934400  ;;  %v591_v0 = vld [vmem:[#allocation11 + $0x9c0] sm:$0xff]  ;;  %v16743_v59 = vld [vmem:[#allocation7 + $0xc] ss:$16 sps:$4 sm:$0xff]   ;;  %vm259_vm0 = vcmask 130048  }
  0xb5   :  { %v595_v1 = vld [vmem:[#allocation11 + $0x9e0] sm:$0xff]  ;;  %2166 = vmatprep.mubr.bf16.mxu1 %v16743_v59  ;;  %vm7470_vm1 = vcmask 1041409   ;;  %s16588_s12 = smov [#allocation26]  }
  0xb6   :  { %v719_v2 = vld [vmem:[#allocation11 + $0xdc0] sm:$0xff]  ;;  %v13576_v3 = vcombine.high %v591_v0, %v595_v1  ;;  %v13575_v5 = vcombine.low %v591_v0, %v595_v1  ;;  %s13499_s14 = sshll.u32 %s16588_s12, 4  ;;  %s13500_s14 = int_to_ptr.vmem [resolvable:$true] %s13499_s14 }
  0xb7   :  { %v723_v4 = vld [vmem:[#allocation11 + $0xde0] sm:$0xff]  ;;  %s16524_s23 = scalar_lea.vmem %s13500_s14, 256  ;;  %p16529_p6 = scmp.lt.s32.totalorder %s13500_s14, %s13500_s14 }
  0xb8   :  { %v583_v6 = vld [vmem:[#allocation11 + $0x980] sm:$0xff]  ;;  %v13704_v8 = vcombine.high %v719_v2, %v723_v4  ;;  %v13703_v9 = vcombine.low %v719_v2, %v723_v4  ;;  %2091 = vmatprep.subr.bf16.mxu0 %v13576_v3  ;;  %p16525_p5 = scmp.ne.s32.totalorder %s13500_s14, %s16524_s23  ;;  %p16530_p7 = scmp.lt.s32.totalorder %s16524_s23, %s16524_s23 }
  0xb9   :  { %v587_v7 = vld [vmem:[#allocation11 + $0x9a0] sm:$0xff]  ;;  %2092 = vmatpush1.bf16.msra.mxu0 %v13575_v5 }
  0xba   :  { %v13568_v10 = vcombine.high %v583_v6, %v587_v7  ;;  %v711_v11 = vld [vmem:[#allocation11 + $0xd80] sm:$0xff]  ;;  %2134 = vmatprep.subr.bf16.mxu1 %v13704_v8  ;;  %v13567_v18 = vcombine.low %v583_v6, %v587_v7  ;;  %p16531_p8 = por %p16530_p7, %p16529_p6 }
  0xbb   :  { %v715_v12 = vld [vmem:[#allocation11 + $0xda0] sm:$0xff]  ;;  %2135 = vmatpush1.bf16.msra.mxu1 %v13703_v9 }
  0xbc   :  { %v575_v13 = vld [vmem:[#allocation11 + $0x940] sm:$0xff]  ;;  %v13696_v14 = vcombine.high %v711_v11, %v715_v12  ;;  %2093 = vmatprep.subr.bf16.mxu0 %v13568_v10  ;;  %v13695_v19 = vcombine.low %v711_v11, %v715_v12  ;;  %p16532_p9 = pnand %p16531_p8, %p16525_p5 }
  0xbd   :  { %v579_v15 = vld [vmem:[#allocation11 + $0x960] sm:$0xff]  ;;  %2094 = vmatpush1.bf16.msra.mxu0 %v13567_v18 }
  0xbe   :  { %v703_v16 = vld [vmem:[#allocation11 + $0xd40] sm:$0xff]  ;;  %v13560_v20 = vcombine.high %v575_v13, %v579_v15  ;;  %2136 = vmatprep.subr.bf16.mxu1 %v13696_v14  ;;  %v13559_v26 = vcombine.low %v575_v13, %v579_v15 }
  0xbf   :  { %v707_v17 = vld [vmem:[#allocation11 + $0xd60] sm:$0xff]  ;;  %2137 = vmatpush1.bf16.msra.mxu1 %v13695_v19 }
  0xc0   :  { %v13688_v21 = vcombine.high %v703_v16, %v707_v17  ;;  %v567_v22 = vld [vmem:[#allocation11 + $0x900] sm:$0xff]  ;;  %2095 = vmatprep.subr.bf16.mxu0 %v13560_v20  ;;  %v13687_v27 = vcombine.low %v703_v16, %v707_v17 }
  0xc1   :  { %v571_v23 = vld [vmem:[#allocation11 + $0x920] sm:$0xff]  ;;  %2096 = vmatpush1.bf16.msra.mxu0 %v13559_v26 }
  0xc2   :  { %v695_v24 = vld [vmem:[#allocation11 + $0xd00] sm:$0xff]  ;;  %v13552_v28 = vcombine.high %v567_v22, %v571_v23  ;;  %2138 = vmatprep.subr.bf16.mxu1 %v13688_v21  ;;  %v13551_v34 = vcombine.low %v567_v22, %v571_v23 }
  0xc3   :  { %v699_v25 = vld [vmem:[#allocation11 + $0xd20] sm:$0xff]  ;;  %2139 = vmatpush1.bf16.msra.mxu1 %v13687_v27 }
  0xc4   :  { %v13680_v29 = vcombine.high %v695_v24, %v699_v25  ;;  %v559_v30 = vld [vmem:[#allocation11 + $0x8c0] sm:$0xff]  ;;  %2097 = vmatprep.subr.bf16.mxu0 %v13552_v28  ;;  %v13679_v35 = vcombine.low %v695_v24, %v699_v25 }
  0xc5   :  { %v563_v31 = vld [vmem:[#allocation11 + $0x8e0] sm:$0xff]  ;;  %2098 = vmatpush1.bf16.msra.mxu0 %v13551_v34 }
  0xc6   :  { %v687_v32 = vld [vmem:[#allocation11 + $0xcc0] sm:$0xff]  ;;  %v13544_v36 = vcombine.high %v559_v30, %v563_v31  ;;  %2140 = vmatprep.subr.bf16.mxu1 %v13680_v29  ;;  %v13543_v42 = vcombine.low %v559_v30, %v563_v31 }
  0xc7   :  { %v691_v33 = vld [vmem:[#allocation11 + $0xce0] sm:$0xff]  ;;  %2141 = vmatpush1.bf16.msra.mxu1 %v13679_v35 }
  0xc8   :  { %v13672_v37 = vcombine.high %v687_v32, %v691_v33  ;;  %v551_v38 = vld [vmem:[#allocation11 + $0x880] sm:$0xff]  ;;  %2099 = vmatprep.subr.bf16.mxu0 %v13544_v36  ;;  %v13671_v43 = vcombine.low %v687_v32, %v691_v33 }
  0xc9   :  { %v555_v39 = vld [vmem:[#allocation11 + $0x8a0] sm:$0xff]  ;;  %2100 = vmatpush1.bf16.msra.mxu0 %v13543_v42 }
  0xca   :  { %v679_v40 = vld [vmem:[#allocation11 + $0xc80] sm:$0xff]  ;;  %v13536_v44 = vcombine.high %v551_v38, %v555_v39  ;;  %2142 = vmatprep.subr.bf16.mxu1 %v13672_v37  ;;  %v13535_v50 = vcombine.low %v551_v38, %v555_v39 }
  0xcb   :  { %v683_v41 = vld [vmem:[#allocation11 + $0xca0] sm:$0xff]  ;;  %2143 = vmatpush1.bf16.msra.mxu1 %v13671_v43 }
  0xcc   :  { %v13664_v45 = vcombine.high %v679_v40, %v683_v41  ;;  %v543_v46 = vld [vmem:[#allocation11 + $0x840] sm:$0xff]  ;;  %2101 = vmatprep.subr.bf16.mxu0 %v13536_v44  ;;  %v13663_v52 = vcombine.low %v679_v40, %v683_v41 }
  0xcd   :  { %v547_v47 = vld [vmem:[#allocation11 + $0x860] sm:$0xff]  ;;  %2102 = vmatpush1.bf16.msra.mxu0 %v13535_v50 }
  0xce   :  { %v671_v48 = vld [vmem:[#allocation11 + $0xc40] sm:$0xff]  ;;  %v13528_v53 = vcombine.high %v543_v46, %v547_v47  ;;  %2144 = vmatprep.subr.bf16.mxu1 %v13664_v45  ;;  %v13527_v60 = vcombine.low %v543_v46, %v547_v47 }
  0xcf   :  { %v675_v49 = vld [vmem:[#allocation11 + $0xc60] sm:$0xff]  ;;  %2145 = vmatpush1.bf16.msra.mxu1 %v13663_v52 }
  0xd0   :  { %v535_v51 = vld [vmem:[#allocation11 + $0x800] sm:$0xff]  ;;  %v13656_v55 = vcombine.high %v671_v48, %v675_v49  ;;  %2103 = vmatprep.subr.bf16.mxu0 %v13528_v53  ;;  %v13655_v61 = vcombine.low %v671_v48, %v675_v49 }
  0xd1   :  { %v539_v54 = vld [vmem:[#allocation11 + $0x820] sm:$0xff]  ;;  %2104 = vmatpush1.bf16.msra.mxu0 %v13527_v60 }
  0xd2   :  { %v16741_v56 = vld [vmem:[#allocation7 + $0x4] ss:$16 sps:$4 sm:$0xff]   ;;  %v13520_v62 = vcombine.high %v535_v51, %v539_v54  ;;  %2146 = vmatprep.subr.bf16.mxu1 %v13656_v55  ;;  %v13519_v4 = vcombine.low %v535_v51, %v539_v54 }
  0xd3   :  { %v663_v57 = vld [vmem:[#allocation11 + $0xc00] sm:$0xff]  ;;  %2123 = vmatprep.mubr.bf16.mxu0 %v16741_v56  ;;  %2147 = vmatpush1.bf16.msra.mxu1 %v13655_v61 }
  0xd4   :  { %v667_v58 = vld [vmem:[#allocation11 + $0xc20] sm:$0xff]  ;;  %2105 = vmatprep.subr.bf16.mxu0 %v13520_v62 }
  0xd5   :  { %v13648_v63 = vcombine.high %v663_v57, %v667_v58  ;;  %v655_v0 = vld [vmem:[#allocation11 + $0xbc0] sm:$0xff]  ;;  %v13647_v5 = vcombine.low %v663_v57, %v667_v58  ;;  %2106 = vmatpush1.bf16.msra.mxu0 %v13519_v4  ;;  %v720_v4 = vld [vmem:[#allocation11 + $0xdc8] sm:$0xff] }
  0xd6   :  { %v659_v1 = vld [vmem:[#allocation11 + $0xbe0] sm:$0xff] }
  0xd7   :  { %v783_v2 = vld [vmem:[#allocation11 + $0xfc0] sm:$0xff]  ;;  %v13640_v6 = vcombine.high %v655_v0, %v659_v1  ;;  %2148 = vmatprep.subr.bf16.mxu1 %v13648_v63  ;;  %v13639_v12 = vcombine.low %v655_v0, %v659_v1 }
  0xd8   :  { %v787_v3 = vld [vmem:[#allocation11 + $0xfe0] sm:$0xff]  ;;  %2149 = vmatpush1.bf16.msra.mxu1 %v13647_v5  ;;  %v724_v5 = vld [vmem:[#allocation11 + $0xde8] sm:$0xff] }
  0xd9   :  { %v13768_v7 = vcombine.high %v783_v2, %v787_v3  ;;  %v647_v8 = vld [vmem:[#allocation11 + $0xb80] sm:$0xff]  ;;  %2107 = vmatprep.subr.bf16.mxu0 %v13640_v6  ;;  %v13767_v13 = vcombine.low %v783_v2, %v787_v3  ;;  %v592_v2 = vld [vmem:[#allocation11 + $0x9c8] sm:$0xff] }
  0xda   :  { %v651_v9 = vld [vmem:[#allocation11 + $0xba0] sm:$0xff]  ;;  %2108 = vmatpush2.bf16.msra.mxu0 %v13639_v12  ;;  %v596_v3 = vld [vmem:[#allocation11 + $0x9e8] sm:$0xff] }
  0xdb   :  { %v775_v10 = vld [vmem:[#allocation11 + $0xf80] sm:$0xff]  ;;  %v13632_v14 = vcombine.high %v647_v8, %v651_v9  ;;  %2150 = vmatprep.subr.bf16.mxu1 %v13768_v7  ;;  %v13631_v20 = vcombine.low %v647_v8, %v651_v9  ;;  %v13578_v8 = vcombine.high %v592_v2, %v596_v3  ;;  %v13706_v9 = vcombine.high %v720_v4, %v724_v5 }
  0xdc   :  { %v779_v11 = vld [vmem:[#allocation11 + $0xfa0] sm:$0xff]  ;;  %2151 = vmatpush2.bf16.msra.mxu1 %v13767_v13  ;;  %v712_v13 = vld [vmem:[#allocation11 + $0xd88] sm:$0xff] }
  0xdd   :  { %v13760_v15 = vcombine.high %v775_v10, %v779_v11  ;;  %v639_v16 = vld [vmem:[#allocation11 + $0xb40] sm:$0xff]  ;;  %2109 = vmatprep.subr.bf16.mxu0 %v13632_v14  ;;  %v13759_v21 = vcombine.low %v775_v10, %v779_v11  ;;  %v584_v10 = vld [vmem:[#allocation11 + $0x988] sm:$0xff] }
  0xde   :  { %v643_v17 = vld [vmem:[#allocation11 + $0xb60] sm:$0xff]  ;;  %2110 = vmatpush2.bf16.msra.mxu0 %v13631_v20  ;;  %v588_v11 = vld [vmem:[#allocation11 + $0x9a8] sm:$0xff] }
  0xdf   :  { %v767_v18 = vld [vmem:[#allocation11 + $0xf40] sm:$0xff]  ;;  %v13624_v22 = vcombine.high %v639_v16, %v643_v17  ;;  %2152 = vmatprep.subr.bf16.mxu1 %v13760_v15  ;;  %v13623_v28 = vcombine.low %v639_v16, %v643_v17  ;;  %v716_v14 = vld [vmem:[#allocation11 + $0xda8] sm:$0xff]  ;;  %v13577_v16 = vcombine.low %v592_v2, %v596_v3  ;;  %v13705_v17 = vcombine.low %v720_v4, %v724_v5 }
  0xe0   :  { %v771_v19 = vld [vmem:[#allocation11 + $0xf60] sm:$0xff]  ;;  %2153 = vmatpush2.bf16.msra.mxu1 %v13759_v21  ;;  %v16749_v15 = vld [vmem:[#allocation7 + $0x8] ss:$16 sps:$4 sm:$0xff]  }
  0xe1   :  { %v13752_v23 = vcombine.high %v767_v18, %v771_v19  ;;  %v631_v24 = vld [vmem:[#allocation11 + $0xb00] sm:$0xff]  ;;  %2111 = vmatprep.subr.bf16.mxu0 %v13624_v22  ;;  %v13751_v29 = vcombine.low %v767_v18, %v771_v19  ;;  %v13570_v18 = vcombine.high %v584_v10, %v588_v11  ;;  %v13698_v19 = vcombine.high %v712_v13, %v716_v14  ;;  %v576_v20 = vld [vmem:[#allocation11 + $0x948] sm:$0xff] }
  0xe2   :  { %v635_v25 = vld [vmem:[#allocation11 + $0xb20] sm:$0xff]  ;;  %2112 = vmatpush2.bf16.msra.mxu0 %v13623_v28  ;;  %v580_v21 = vld [vmem:[#allocation11 + $0x968] sm:$0xff] }
  0xe3   :  { %v759_v26 = vld [vmem:[#allocation11 + $0xf00] sm:$0xff]  ;;  %v13616_v30 = vcombine.high %v631_v24, %v635_v25  ;;  %2154 = vmatprep.subr.bf16.mxu1 %v13752_v23  ;;  %v13615_v36 = vcombine.low %v631_v24, %v635_v25  ;;  %v704_v22 = vld [vmem:[#allocation11 + $0xd48] sm:$0xff]  ;;  %v13569_v24 = vcombine.low %v584_v10, %v588_v11  ;;  %v13697_v25 = vcombine.low %v712_v13, %v716_v14 }
  0xe4   :  { %v763_v27 = vld [vmem:[#allocation11 + $0xf20] sm:$0xff]  ;;  %2155 = vmatpush2.bf16.msra.mxu1 %v13751_v29  ;;  %v708_v23 = vld [vmem:[#allocation11 + $0xd68] sm:$0xff] }
  0xe5   :  { %v13744_v31 = vcombine.high %v759_v26, %v763_v27  ;;  %v623_v32 = vld [vmem:[#allocation11 + $0xac0] sm:$0xff]  ;;  %2113 = vmatprep.subr.bf16.mxu0 %v13616_v30  ;;  %v13743_v37 = vcombine.low %v759_v26, %v763_v27  ;;  %v13562_v26 = vcombine.high %v576_v20, %v580_v21  ;;  %v568_v27 = vld [vmem:[#allocation11 + $0x908] sm:$0xff]  ;;  %v13690_v30 = vcombine.high %v704_v22, %v708_v23 }
  0xe6   :  { %v627_v33 = vld [vmem:[#allocation11 + $0xae0] sm:$0xff]  ;;  %2114 = vmatpush2.bf16.msra.mxu0 %v13615_v36  ;;  %v572_v28 = vld [vmem:[#allocation11 + $0x928] sm:$0xff] }
  0xe7   :  { %v751_v34 = vld [vmem:[#allocation11 + $0xec0] sm:$0xff]  ;;  %v13608_v38 = vcombine.high %v623_v32, %v627_v33  ;;  %2156 = vmatprep.subr.bf16.mxu1 %v13744_v31  ;;  %v13607_v44 = vcombine.low %v623_v32, %v627_v33  ;;  %v696_v29 = vld [vmem:[#allocation11 + $0xd08] sm:$0xff]  ;;  %v13561_v32 = vcombine.low %v576_v20, %v580_v21  ;;  %v13689_v33 = vcombine.low %v704_v22, %v708_v23 }
  0xe8   :  { %v755_v35 = vld [vmem:[#allocation11 + $0xee0] sm:$0xff]  ;;  %2157 = vmatpush2.bf16.msra.mxu1 %v13743_v37  ;;  %v700_v31 = vld [vmem:[#allocation11 + $0xd28] sm:$0xff] }
  0xe9   :  { %v13736_v39 = vcombine.high %v751_v34, %v755_v35  ;;  %v615_v40 = vld [vmem:[#allocation11 + $0xa80] sm:$0xff]  ;;  %2115 = vmatprep.subr.bf16.mxu0 %v13608_v38  ;;  %v13735_v45 = vcombine.low %v751_v34, %v755_v35  ;;  %v13554_v34 = vcombine.high %v568_v27, %v572_v28  ;;  %v560_v35 = vld [vmem:[#allocation11 + $0x8c8] sm:$0xff]  ;;  %v13682_v38 = vcombine.high %v696_v29, %v700_v31 }
  0xea   :  { %v619_v41 = vld [vmem:[#allocation11 + $0xaa0] sm:$0xff]  ;;  %2116 = vmatpush2.bf16.msra.mxu0 %v13607_v44  ;;  %v564_v36 = vld [vmem:[#allocation11 + $0x8e8] sm:$0xff] }
  0xeb   :  { %v743_v42 = vld [vmem:[#allocation11 + $0xe80] sm:$0xff]  ;;  %v13600_v46 = vcombine.high %v615_v40, %v619_v41  ;;  %2158 = vmatprep.subr.bf16.mxu1 %v13736_v39  ;;  %v13599_v52 = vcombine.low %v615_v40, %v619_v41  ;;  %v688_v37 = vld [vmem:[#allocation11 + $0xcc8] sm:$0xff]  ;;  %v13553_v40 = vcombine.low %v568_v27, %v572_v28  ;;  %v13681_v41 = vcombine.low %v696_v29, %v700_v31 }
  0xec   :  { %v747_v43 = vld [vmem:[#allocation11 + $0xea0] sm:$0xff]  ;;  %2159 = vmatpush2.bf16.msra.mxu1 %v13735_v45  ;;  %v692_v39 = vld [vmem:[#allocation11 + $0xce8] sm:$0xff] }
  0xed   :  { %v13728_v47 = vcombine.high %v743_v42, %v747_v43  ;;  %v607_v48 = vld [vmem:[#allocation11 + $0xa40] sm:$0xff]  ;;  %2117 = vmatprep.subr.bf16.mxu0 %v13600_v46  ;;  %v13727_v53 = vcombine.low %v743_v42, %v747_v43  ;;  %v13546_v42 = vcombine.high %v560_v35, %v564_v36  ;;  %v552_v43 = vld [vmem:[#allocation11 + $0x888] sm:$0xff]  ;;  %v13674_v46 = vcombine.high %v688_v37, %v692_v39 }
  0xee   :  { %v611_v49 = vld [vmem:[#allocation11 + $0xa60] sm:$0xff]  ;;  %2118 = vmatpush2.bf16.msra.mxu0 %v13599_v52  ;;  %v556_v44 = vld [vmem:[#allocation11 + $0x8a8] sm:$0xff] }
  0xef   :  { %v735_v50 = vld [vmem:[#allocation11 + $0xe40] sm:$0xff]  ;;  %v13592_v54 = vcombine.high %v607_v48, %v611_v49  ;;  %2160 = vmatprep.subr.bf16.mxu1 %v13728_v47  ;;  %v13591_v62 = vcombine.low %v607_v48, %v611_v49  ;;  %v680_v45 = vld [vmem:[#allocation11 + $0xc88] sm:$0xff]  ;;  %v13545_v48 = vcombine.low %v560_v35, %v564_v36  ;;  %v13673_v49 = vcombine.low %v688_v37, %v692_v39 }
  0xf0   :  { %v739_v51 = vld [vmem:[#allocation11 + $0xe60] sm:$0xff]  ;;  %2161 = vmatpush2.bf16.msra.mxu1 %v13727_v53  ;;  %v684_v47 = vld [vmem:[#allocation11 + $0xca8] sm:$0xff] }
  0xf1   :  { %v13720_v55 = vcombine.high %v735_v50, %v739_v51  ;;  %v599_v57 = vld [vmem:[#allocation11 + $0xa00] sm:$0xff]  ;;  %2119 = vmatprep.subr.bf16.mxu0 %v13592_v54  ;;  %v13719_v63 = vcombine.low %v735_v50, %v739_v51  ;;  %v13538_v50 = vcombine.high %v552_v43, %v556_v44  ;;  %v544_v51 = vld [vmem:[#allocation11 + $0x848] sm:$0xff]  ;;  %v13666_v54 = vcombine.high %v680_v45, %v684_v47 }
  0xf2   :  { %v603_v58 = vld [vmem:[#allocation11 + $0xa20] sm:$0xff]  ;;  %2120 = vmatpush2.bf16.msra.mxu0 %v13591_v62  ;;  %v548_v52 = vld [vmem:[#allocation11 + $0x868] sm:$0xff] }
  0xf3   :  { %v727_v60 = vld [vmem:[#allocation11 + $0xe00] sm:$0xff]  ;;  %v13584_v0 = vcombine.high %v599_v57, %v603_v58  ;;  %2162 = vmatprep.subr.bf16.mxu1 %v13720_v55  ;;  %v13583_v6 = vcombine.low %v599_v57, %v603_v58  ;;  %v672_v53 = vld [vmem:[#allocation11 + $0xc48] sm:$0xff]  ;;  %v13537_v57 = vcombine.low %v552_v43, %v556_v44  ;;  %v13665_v58 = vcombine.low %v680_v45, %v684_v47 }
  0xf4   :  { %v731_v61 = vld [vmem:[#allocation11 + $0xe20] sm:$0xff]  ;;  %2163 = vmatpush2.bf16.msra.mxu1 %v13719_v63  ;;  %v676_v55 = vld [vmem:[#allocation11 + $0xc68] sm:$0xff]  ;;  %v13529_v2 = vcombine.low %v544_v51, %v548_v52 }
  0xf5   :  { %v13712_v1 = vcombine.high %v727_v60, %v731_v61  ;;  %2121 = vmatprep.subr.bf16.mxu0 %v13584_v0  ;;  %v13711_v7 = vcombine.low %v727_v60, %v731_v61  ;;  %v16747_v12 = vld [vmem:[#allocation7] ss:$16 sps:$4 sm:$0xff]   ;;  %v13530_v60 = vcombine.high %v544_v51, %v548_v52  ;;  %v536_v61 = vld [vmem:[#allocation11 + $0x808] sm:$0xff]  ;;  %v13658_v0 = vcombine.high %v672_v53, %v676_v55 }
  0xf6   :  { %2122 = vmatpush2.bf16.msra.mxu0 %v13583_v6  ;;  %v540_v62 = vld [vmem:[#allocation11 + $0x828] sm:$0xff]  ;;  %v13657_v3 = vcombine.low %v672_v53, %v676_v55 }
  0xf7   :  { %2164 = vmatprep.subr.bf16.mxu1 %v13712_v1  ;;  %2177 = vmatprep.subr.bf16.mxu0 %v13578_v8  ;;  %v664_v63 = vld [vmem:[#allocation11 + $0xc08] sm:$0xff]  ;;  %v13522_v4 = vcombine.high %v536_v61, %v540_v62  ;;  %v13521_v10 = vcombine.low %v536_v61, %v540_v62 }
  0xf8   :  { %2165 = vmatpush2.bf16.msra.mxu1 %v13711_v7  ;;  %v668_v1 = vld [vmem:[#allocation11 + $0xc28] sm:$0xff] }
  0xf9   :  { %2220 = vmatprep.subr.bf16.mxu1 %v13706_v9  ;;  %2124 = vmatmul.mubr.bf16.vlgmr.msra.gmra.mxu0 %v16747_v12  ;;  %v656_v5 = vld [vmem:[#allocation11 + $0xbc8] sm:$0xff]  ;;  %v13650_v8 = vcombine.high %v664_v63, %v668_v1  ;;  %v13649_v11 = vcombine.low %v664_v63, %v668_v1 }
  0xfa   :  { %2178 = vmatpush1.bf16.msra.mxu0 %v13577_v16  ;;  %2209 = vmatprep.mubr.bf16.mxu0 %v16741_v56  ;;  %v660_v6 = vld [vmem:[#allocation11 + $0xbe8] sm:$0xff] }
  0xfb   :  { %2167 = vmatmul.mubr.bf16.vlgmr.msra.gmra.mxu1 %v16749_v15  ;;  %2179 = vmatprep.subr.bf16.mxu0 %v13570_v18  ;;  %v784_v7 = vld [vmem:[#allocation11 + $0xfc8] sm:$0xff]  ;;  %v13642_v13 = vcombine.high %v656_v5, %v660_v6  ;;  %v13641_v20 = vcombine.low %v656_v5, %v660_v6 }
  0xfc   :  { %2221 = vmatpush1.bf16.msra.mxu1 %v13705_v17  ;;  %2252 = vmatprep.mubr.bf16.mxu1 %v16743_v59  ;;  %v788_v9 = vld [vmem:[#allocation11 + $0xfe8] sm:$0xff] }
  0xfd   :  { %2222 = vmatprep.subr.bf16.mxu1 %v13698_v19  ;;  %v648_v14 = vld [vmem:[#allocation11 + $0xb88] sm:$0xff]  ;;  %v13770_v18 = vcombine.high %v784_v7, %v788_v9  ;;  %v13769_v21 = vcombine.low %v784_v7, %v788_v9  ;;  %v593_v9 = vld [vmem:[#allocation11 + $0x9d0] sm:$0xff] }
  0xfe   :  { %2180 = vmatpush1.bf16.msra.mxu0 %v13569_v24  ;;  %v652_v16 = vld [vmem:[#allocation11 + $0xba8] sm:$0xff] }
  0xff   :  { %2181 = vmatprep.subr.bf16.mxu0 %v13562_v26  ;;  %v776_v17 = vld [vmem:[#allocation11 + $0xf88] sm:$0xff]  ;;  %v13634_v22 = vcombine.high %v648_v14, %v652_v16  ;;  %v13633_v28 = vcombine.low %v648_v14, %v652_v16  ;;  %v725_v14 = vld [vmem:[#allocation11 + $0xdf0] sm:$0xff] }
 0x100   :  { %2223 = vmatpush1.bf16.msra.mxu1 %v13697_v25  ;;  %v780_v19 = vld [vmem:[#allocation11 + $0xfa8] sm:$0xff] }
 0x101   :  { %2224 = vmatprep.subr.bf16.mxu1 %v13690_v30  ;;  %v640_v23 = vld [vmem:[#allocation11 + $0xb48] sm:$0xff]  ;;  %v13762_v26 = vcombine.high %v776_v17, %v780_v19  ;;  %v13761_v29 = vcombine.low %v776_v17, %v780_v19  ;;  %v585_v19 = vld [vmem:[#allocation11 + $0x990] sm:$0xff] }
 0x102   :  { %2182 = vmatpush1.bf16.msra.mxu0 %v13561_v32  ;;  %v644_v24 = vld [vmem:[#allocation11 + $0xb68] sm:$0xff] }
 0x103   :  { %2183 = vmatprep.subr.bf16.mxu0 %v13554_v34  ;;  %v768_v25 = vld [vmem:[#allocation11 + $0xf48] sm:$0xff]  ;;  %v13626_v30 = vcombine.high %v640_v23, %v644_v24  ;;  %v13625_v36 = vcombine.low %v640_v23, %v644_v24  ;;  %v717_v23 = vld [vmem:[#allocation11 + $0xdb0] sm:$0xff] }
 0x104   :  { %2225 = vmatpush1.bf16.msra.mxu1 %v13689_v33  ;;  %v772_v27 = vld [vmem:[#allocation11 + $0xf68] sm:$0xff] }
 0x105   :  { %2226 = vmatprep.subr.bf16.mxu1 %v13682_v38  ;;  %v632_v31 = vld [vmem:[#allocation11 + $0xb08] sm:$0xff]  ;;  %v13754_v34 = vcombine.high %v768_v25, %v772_v27  ;;  %v13753_v37 = vcombine.low %v768_v25, %v772_v27  ;;  %v577_v27 = vld [vmem:[#allocation11 + $0x950] sm:$0xff] }
 0x106   :  { %2184 = vmatpush1.bf16.msra.mxu0 %v13553_v40  ;;  %v636_v32 = vld [vmem:[#allocation11 + $0xb28] sm:$0xff] }
 0x107   :  { %2185 = vmatprep.subr.bf16.mxu0 %v13546_v42  ;;  %v760_v33 = vld [vmem:[#allocation11 + $0xf08] sm:$0xff]  ;;  %v13618_v38 = vcombine.high %v632_v31, %v636_v32  ;;  %v13617_v44 = vcombine.low %v632_v31, %v636_v32  ;;  %v709_v31 = vld [vmem:[#allocation11 + $0xd70] sm:$0xff] }
 0x108   :  { %2227 = vmatpush1.bf16.msra.mxu1 %v13681_v41  ;;  %v764_v35 = vld [vmem:[#allocation11 + $0xf28] sm:$0xff] }
 0x109   :  { %2228 = vmatprep.subr.bf16.mxu1 %v13674_v46  ;;  %v624_v39 = vld [vmem:[#allocation11 + $0xac8] sm:$0xff]  ;;  %v13746_v42 = vcombine.high %v760_v33, %v764_v35  ;;  %v13745_v45 = vcombine.low %v760_v33, %v764_v35  ;;  %v569_v35 = vld [vmem:[#allocation11 + $0x910] sm:$0xff] }
 0x10a   :  { %2186 = vmatpush1.bf16.msra.mxu0 %v13545_v48  ;;  %v628_v40 = vld [vmem:[#allocation11 + $0xae8] sm:$0xff] }
 0x10b   :  { %2187 = vmatprep.subr.bf16.mxu0 %v13538_v50  ;;  %v752_v41 = vld [vmem:[#allocation11 + $0xec8] sm:$0xff]  ;;  %v13610_v46 = vcombine.high %v624_v39, %v628_v40  ;;  %v13609_v52 = vcombine.low %v624_v39, %v628_v40  ;;  %v701_v39 = vld [vmem:[#allocation11 + $0xd30] sm:$0xff] }
 0x10c   :  { %2229 = vmatpush1.bf16.msra.mxu1 %v13673_v49  ;;  %v756_v43 = vld [vmem:[#allocation11 + $0xee8] sm:$0xff] }
 0x10d   :  { %2230 = vmatprep.subr.bf16.mxu1 %v13666_v54  ;;  %v616_v47 = vld [vmem:[#allocation11 + $0xa88] sm:$0xff]  ;;  %v13738_v50 = vcombine.high %v752_v41, %v756_v43  ;;  %v13737_v53 = vcombine.low %v752_v41, %v756_v43  ;;  %v561_v41 = vld [vmem:[#allocation11 + $0x8d0] sm:$0xff] }
 0x10e   :  { %2188 = vmatpush1.bf16.msra.mxu0 %v13537_v57  ;;  %v620_v48 = vld [vmem:[#allocation11 + $0xaa8] sm:$0xff]  ;;  %v689_v43 = vld [vmem:[#allocation11 + $0xcd0] sm:$0xff] }
 0x10f   :  { %2189 = vmatprep.subr.bf16.mxu0 %v13530_v60  ;;  %v744_v49 = vld [vmem:[#allocation11 + $0xe88] sm:$0xff]  ;;  %v13602_v54 = vcombine.high %v616_v47, %v620_v48  ;;  %v13601_v62 = vcombine.low %v616_v47, %v620_v48  ;;  %v553_v48 = vld [vmem:[#allocation11 + $0x890] sm:$0xff] }
 0x110   :  { %2231 = vmatpush1.bf16.msra.mxu1 %v13665_v58  ;;  %v748_v51 = vld [vmem:[#allocation11 + $0xea8] sm:$0xff] }
 0x111   :  { %2232 = vmatprep.subr.bf16.mxu1 %v13658_v0  ;;  %v608_v55 = vld [vmem:[#allocation11 + $0xa48] sm:$0xff]  ;;  %v13730_v60 = vcombine.high %v744_v49, %v748_v51  ;;  %v13729_v63 = vcombine.low %v744_v49, %v748_v51  ;;  %v681_v49 = vld [vmem:[#allocation11 + $0xc90] sm:$0xff] }
 0x112   :  { %2190 = vmatpush1.bf16.msra.mxu0 %v13529_v2  ;;  %v612_v57 = vld [vmem:[#allocation11 + $0xa68] sm:$0xff]  ;;  %v685_v51 = vld [vmem:[#allocation11 + $0xcb0] sm:$0xff] }
 0x113   :  { %2191 = vmatprep.subr.bf16.mxu0 %v13522_v4  ;;  %v736_v58 = vld [vmem:[#allocation11 + $0xe48] sm:$0xff]  ;;  %v13594_v0 = vcombine.high %v608_v55, %v612_v57  ;;  %v13593_v6 = vcombine.low %v608_v55, %v612_v57  ;;  %v545_v55 = vld [vmem:[#allocation11 + $0x850] sm:$0xff] }
 0x114   :  { %2233 = vmatpush1.bf16.msra.mxu1 %v13657_v3  ;;  %v740_v61 = vld [vmem:[#allocation11 + $0xe68] sm:$0xff]  ;;  %v549_v57 = vld [vmem:[#allocation11 + $0x870] sm:$0xff] }
 0x115   :  { %2234 = vmatprep.subr.bf16.mxu1 %v13650_v8  ;;  %v600_v1 = vld [vmem:[#allocation11 + $0xa08] sm:$0xff]  ;;  %v13722_v4 = vcombine.high %v736_v58, %v740_v61  ;;  %v13721_v7 = vcombine.low %v736_v58, %v740_v61  ;;  %v673_v58 = vld [vmem:[#allocation11 + $0xc50] sm:$0xff] }
 0x116   :  { %2192 = vmatpush1.bf16.msra.mxu0 %v13521_v10  ;;  %v604_v2 = vld [vmem:[#allocation11 + $0xa28] sm:$0xff]  ;;  %v597_v10 = vld [vmem:[#allocation11 + $0x9f0] sm:$0xff] }
 0x117   :  { %2193 = vmatprep.subr.bf16.mxu0 %v13642_v13  ;;  %v728_v3 = vld [vmem:[#allocation11 + $0xe08] sm:$0xff]  ;;  %v13586_v8 = vcombine.high %v600_v1, %v604_v2  ;;  %v13585_v16 = vcombine.low %v600_v1, %v604_v2  ;;  %v13579_v24 = vcombine.low %v593_v9, %v597_v10  ;;  %v677_v61 = vld [vmem:[#allocation11 + $0xc70] sm:$0xff] }
 0x118   :  { %2235 = vmatpush1.bf16.msra.mxu1 %v13649_v11  ;;  %v732_v5 = vld [vmem:[#allocation11 + $0xe28] sm:$0xff]  ;;  %v721_v11 = vld [vmem:[#allocation11 + $0xdd0] sm:$0xff] }
 0x119   :  { %2236 = vmatprep.subr.bf16.mxu1 %v13770_v18  ;;  %v13714_v13 = vcombine.high %v728_v3, %v732_v5  ;;  %v13713_v17 = vcombine.low %v728_v3, %v732_v5  ;;  %v13580_v18 = vcombine.high %v593_v9, %v597_v10  ;;  %v13707_v25 = vcombine.low %v721_v11, %v725_v14  ;;  %v537_v1 = vld [vmem:[#allocation11 + $0x810] sm:$0xff] }
 0x11a   :  { %2194 = vmatpush2.bf16.msra.mxu0 %v13641_v20  ;;  %v589_v20 = vld [vmem:[#allocation11 + $0x9b0] sm:$0xff] }
 0x11b   :  { %2195 = vmatprep.subr.bf16.mxu0 %v13634_v22  ;;  %v13708_v22 = vcombine.high %v721_v11, %v725_v14  ;;  %v13571_v32 = vcombine.low %v585_v19, %v589_v20  ;;  %v541_v2 = vld [vmem:[#allocation11 + $0x830] sm:$0xff] }
 0x11c   :  { %2237 = vmatpush2.bf16.msra.mxu1 %v13769_v21  ;;  %v713_v21 = vld [vmem:[#allocation11 + $0xd90] sm:$0xff] }
 0x11d   :  { %2238 = vmatprep.subr.bf16.mxu1 %v13762_v26  ;;  %v13572_v26 = vcombine.high %v585_v19, %v589_v20  ;;  %v13699_v33 = vcombine.low %v713_v21, %v717_v23  ;;  %v665_v3 = vld [vmem:[#allocation11 + $0xc10] sm:$0xff] }
 0x11e   :  { %2196 = vmatpush2.bf16.msra.mxu0 %v13633_v28  ;;  %v581_v28 = vld [vmem:[#allocation11 + $0x970] sm:$0xff] }
 0x11f   :  { %2197 = vmatprep.subr.bf16.mxu0 %v13626_v30  ;;  %v13700_v30 = vcombine.high %v713_v21, %v717_v23  ;;  %v669_v5 = vld [vmem:[#allocation11 + $0xc30] sm:$0xff] }
 0x120   :  { %2239 = vmatpush2.bf16.msra.mxu1 %v13761_v29  ;;  %v705_v29 = vld [vmem:[#allocation11 + $0xd50] sm:$0xff] }
 0x121   :  { %2240 = vmatprep.subr.bf16.mxu1 %v13754_v34  ;;  %v13564_v34 = vcombine.high %v577_v27, %v581_v28  ;;  %v657_v9 = vld [vmem:[#allocation11 + $0xbd0] sm:$0xff] }
 0x122   :  { %2198 = vmatpush2.bf16.msra.mxu0 %v13625_v36  ;;  %v573_v36 = vld [vmem:[#allocation11 + $0x930] sm:$0xff] }
 0x123   :  { %2199 = vmatprep.subr.bf16.mxu0 %v13618_v38  ;;  %v13692_v38 = vcombine.high %v705_v29, %v709_v31  ;;  %v13556_v40 = vcombine.high %v569_v35, %v573_v36  ;;  %v661_v10 = vld [vmem:[#allocation11 + $0xbf0] sm:$0xff] }
 0x124   :  { %2241 = vmatpush2.bf16.msra.mxu1 %v13753_v37  ;;  %v697_v37 = vld [vmem:[#allocation11 + $0xd10] sm:$0xff] }
 0x125   :  { %2242 = vmatprep.subr.bf16.mxu1 %v13746_v42  ;;  %v565_v42 = vld [vmem:[#allocation11 + $0x8f0] sm:$0xff]  ;;  %v13683_v47 = vcombine.low %v697_v37, %v701_v39 }
 0x126   :  { %2200 = vmatpush2.bf16.msra.mxu0 %v13617_v44  ;;  %v13684_v44 = vcombine.high %v697_v37, %v701_v39  ;;  %v785_v11 = vld [vmem:[#allocation11 + $0xfd0] sm:$0xff] }
 0x127   :  { %2201 = vmatprep.subr.bf16.mxu0 %v13610_v46  ;;  %v13555_v46 = vcombine.low %v569_v35, %v573_v36  ;;  %v789_v14 = vld [vmem:[#allocation11 + $0xff0] sm:$0xff] }
 0x128   :  { %2243 = vmatpush2.bf16.msra.mxu1 %v13745_v45  ;;  %v693_v45 = vld [vmem:[#allocation11 + $0xcf0] sm:$0xff] }
 0x129   :  { %2244 = vmatprep.subr.bf16.mxu1 %v13738_v50  ;;  %v13676_v50 = vcombine.high %v689_v43, %v693_v45  ;;  %v649_v19 = vld [vmem:[#allocation11 + $0xb90] sm:$0xff] }
 0x12a   :  { %2202 = vmatpush2.bf16.msra.mxu0 %v13609_v52  ;;  %v13547_v52 = vcombine.low %v561_v41, %v565_v42  ;;  %v653_v20 = vld [vmem:[#allocation11 + $0xbb0] sm:$0xff] }
 0x12b   :  { %2203 = vmatprep.subr.bf16.mxu0 %v13602_v54  ;;  %v777_v21 = vld [vmem:[#allocation11 + $0xf90] sm:$0xff] }
 0x12c   :  { %2245 = vmatpush2.bf16.msra.mxu1 %v13737_v53  ;;  %v13675_v53 = vcombine.low %v689_v43, %v693_v45  ;;  %v781_v23 = vld [vmem:[#allocation11 + $0xfb0] sm:$0xff] }
 0x12d   :  { %2246 = vmatprep.subr.bf16.mxu1 %v13730_v60  ;;  %v13668_v60 = vcombine.high %v681_v49, %v685_v51  ;;  %v633_v35 = vld [vmem:[#allocation11 + $0xb10] sm:$0xff] }
 0x12e   :  { %2204 = vmatpush2.bf16.msra.mxu0 %v13601_v62  ;;  %v637_v36 = vld [vmem:[#allocation11 + $0xb30] sm:$0xff] }
 0x12f   :  { %2205 = vmatprep.subr.bf16.mxu0 %v13594_v0  ;;  %v13532_v0 = vcombine.high %v545_v55, %v549_v57  ;;  %v761_v37 = vld [vmem:[#allocation11 + $0xf10] sm:$0xff] }
 0x130   :  { %2247 = vmatpush2.bf16.msra.mxu1 %v13729_v63  ;;  %v13667_v63 = vcombine.low %v681_v49, %v685_v51  ;;  %v765_v39 = vld [vmem:[#allocation11 + $0xf30] sm:$0xff] }
 0x131   :  { %2248 = vmatprep.subr.bf16.mxu1 %v13722_v4  ;;  %v13660_v4 = vcombine.high %v673_v58, %v677_v61  ;;  %v753_v43 = vld [vmem:[#allocation11 + $0xed0] sm:$0xff] }
 0x132   :  { %2206 = vmatpush2.bf16.msra.mxu0 %v13593_v6  ;;  %v13531_v6 = vcombine.low %v545_v55, %v549_v57  ;;  %v757_v45 = vld [vmem:[#allocation11 + $0xef0] sm:$0xff] }
 0x133   :  { %2207 = vmatprep.subr.bf16.mxu0 %v13586_v8  ;;  %v13524_v8 = vcombine.high %v537_v1, %v541_v2  ;;  %v745_v49 = vld [vmem:[#allocation11 + $0xe90] sm:$0xff] }
 0x134   :  { %2249 = vmatpush2.bf16.msra.mxu1 %v13721_v7  ;;  %v13659_v7 = vcombine.low %v673_v58, %v677_v61  ;;  %v749_v51 = vld [vmem:[#allocation11 + $0xeb0] sm:$0xff] }
 0x135   :  { %2250 = vmatprep.subr.bf16.mxu1 %v13714_v13  ;;  %v13652_v13 = vcombine.high %v665_v3, %v669_v5  ;;  %v609_v55 = vld [vmem:[#allocation11 + $0xa50] sm:$0xff] }
 0x136   :  { %2208 = vmatpush2.bf16.msra.mxu0 %v13585_v16  ;;  %v13523_v16 = vcombine.low %v537_v1, %v541_v2  ;;  %v613_v57 = vld [vmem:[#allocation11 + $0xa70] sm:$0xff] }
 0x137   :  { %2263 = vmatprep.subr.bf16.mxu0 %v13580_v18  ;;  %v13644_v18 = vcombine.high %v657_v9, %v661_v10  ;;  %v737_v58 = vld [vmem:[#allocation11 + $0xe50] sm:$0xff] }
 0x138   :  { %2251 = vmatpush2.bf16.msra.mxu1 %v13713_v17  ;;  %v13651_v17 = vcombine.low %v665_v3, %v669_v5  ;;  %v741_v61 = vld [vmem:[#allocation11 + $0xe70] sm:$0xff] }
 0x139   :  { %2306 = vmatprep.subr.bf16.mxu1 %v13708_v22  ;;  %2210 = vmatmul.mubr.bf16.vlgmr.msra.gmra.mxu0 %v16747_v12  ;;  %v13563_v12 = vcombine.low %v577_v27, %v581_v28  ;;  %v13772_v22 = vcombine.high %v785_v11, %v789_v14  ;;  %v641_v27 = vld [vmem:[#allocation11 + $0xb50] sm:$0xff] }
 0x13a   :  { %2264 = vmatpush1.bf16.msra.mxu0 %v13579_v24  ;;  %2295 = vmatprep.mubr.bf16.mxu0 %v16741_v56  ;;  %v13548_v56 = vcombine.high %v561_v41, %v565_v42  ;;  %v13643_v24 = vcombine.low %v657_v9, %v661_v10  ;;  %v645_v28 = vld [vmem:[#allocation11 + $0xb70] sm:$0xff]  ;;  %v594_v9 = vld [vmem:[#allocation11 + $0x9d8] sm:$0xff] }
 0x13b   :  { %2253 = vmatmul.mubr.bf16.vlgmr.msra.gmra.mxu1 %v16749_v15  ;;  %2265 = vmatprep.subr.bf16.mxu0 %v13572_v26  ;;  %v13691_v15 = vcombine.low %v705_v29, %v709_v31  ;;  %v13636_v26 = vcombine.high %v649_v19, %v653_v20  ;;  %v769_v29 = vld [vmem:[#allocation11 + $0xf50] sm:$0xff]  ;;  %v598_v10 = vld [vmem:[#allocation11 + $0x9f8] sm:$0xff] }
 0x13c   :  { %2307 = vmatpush1.bf16.msra.mxu1 %v13707_v25  ;;  %2338 = vmatprep.mubr.bf16.mxu1 %v16743_v59  ;;  %v557_v59 = vld [vmem:[#allocation11 + $0x8b0] sm:$0xff]  ;;  %v13771_v25 = vcombine.low %v785_v11, %v789_v14  ;;  %v722_v11 = vld [vmem:[#allocation11 + $0xdd8] sm:$0xff] }
 0x13d   :  { %2308 = vmatprep.subr.bf16.mxu1 %v13700_v30  ;;  %v13540_v54 = vcombine.high %v553_v48, %v557_v59  ;;  %v13539_v62 = vcombine.low %v553_v48, %v557_v59  ;;  %v13764_v30 = vcombine.high %v777_v21, %v781_v23  ;;  %v773_v31 = vld [vmem:[#allocation11 + $0xf70] sm:$0xff]  ;;  %v726_v14 = vld [vmem:[#allocation11 + $0xdf8] sm:$0xff] }
 0x13e   :  { %2266 = vmatpush1.bf16.msra.mxu0 %v13571_v32  ;;  %v13635_v32 = vcombine.low %v649_v19, %v653_v20  ;;  %v625_v41 = vld [vmem:[#allocation11 + $0xad0] sm:$0xff]  ;;  %v586_v19 = vld [vmem:[#allocation11 + $0x998] sm:$0xff] }
 0x13f   :  { %2267 = vmatprep.subr.bf16.mxu0 %v13564_v34  ;;  %v13628_v34 = vcombine.high %v641_v27, %v645_v28  ;;  %v629_v42 = vld [vmem:[#allocation11 + $0xaf0] sm:$0xff]  ;;  %v590_v20 = vld [vmem:[#allocation11 + $0x9b8] sm:$0xff] }
 0x140   :  { %2309 = vmatpush1.bf16.msra.mxu1 %v13699_v33  ;;  %v13763_v33 = vcombine.low %v777_v21, %v781_v23  ;;  %v617_v48 = vld [vmem:[#allocation11 + $0xa90] sm:$0xff]  ;;  %v714_v21 = vld [vmem:[#allocation11 + $0xd98] sm:$0xff] }
 0x141   :  { %2310 = vmatprep.subr.bf16.mxu1 %v13692_v38  ;;  %v13756_v38 = vcombine.high %v769_v29, %v773_v31  ;;  %v621_v59 = vld [vmem:[#allocation11 + $0xab0] sm:$0xff]  ;;  %v718_v23 = vld [vmem:[#allocation11 + $0xdb8] sm:$0xff] }
 0x142   :  { %2268 = vmatpush1.bf16.msra.mxu0 %v13563_v12  ;;  %v13627_v12 = vcombine.low %v641_v27, %v645_v28  ;;  %v601_v1 = vld [vmem:[#allocation11 + $0xa10] sm:$0xff]  ;;  %v13702_v27 = vcombine.high %v714_v21, %v718_v23  ;;  %v578_v28 = vld [vmem:[#allocation11 + $0x958] sm:$0xff] }
 0x143   :  { %2269 = vmatprep.subr.bf16.mxu0 %v13556_v40  ;;  %v13620_v40 = vcombine.high %v633_v35, %v637_v36  ;;  %v605_v2 = vld [vmem:[#allocation11 + $0xa30] sm:$0xff] }
 0x144   :  { %2311 = vmatpush1.bf16.msra.mxu1 %v13691_v15  ;;  %v13755_v15 = vcombine.low %v769_v29, %v773_v31  ;;  %v729_v3 = vld [vmem:[#allocation11 + $0xe10] sm:$0xff]  ;;  %v582_v29 = vld [vmem:[#allocation11 + $0x978] sm:$0xff] }
 0x145   :  { %2312 = vmatprep.subr.bf16.mxu1 %v13684_v44  ;;  %v13748_v44 = vcombine.high %v761_v37, %v765_v39  ;;  %v733_v5 = vld [vmem:[#allocation11 + $0xe30] sm:$0xff]  ;;  %v706_v31 = vld [vmem:[#allocation11 + $0xd58] sm:$0xff] }
 0x146   :  { %2270 = vmatpush1.bf16.msra.mxu0 %v13555_v46  ;;  %v13619_v46 = vcombine.low %v633_v35, %v637_v36  ;;  %v13701_v35 = vcombine.low %v714_v21, %v718_v23  ;;  %v13566_v36 = vcombine.high %v578_v28, %v582_v29  ;;  %v650_v23 = vld [vmem:[#allocation11 + $0xb98] sm:$0xff] }
 0x147   :  { %2271 = vmatprep.subr.bf16.mxu0 %v13548_v56  ;;  %v13612_v56 = vcombine.high %v625_v41, %v629_v42 }
 0x148   :  { %2313 = vmatpush1.bf16.msra.mxu1 %v13683_v47  ;;  %v13747_v47 = vcombine.low %v761_v37, %v765_v39  ;;  %v570_v37 = vld [vmem:[#allocation11 + $0x918] sm:$0xff] }
 0x149   :  { %2314 = vmatprep.subr.bf16.mxu1 %v13676_v50  ;;  %v13740_v50 = vcombine.high %v753_v43, %v757_v45  ;;  %v698_v39 = vld [vmem:[#allocation11 + $0xd18] sm:$0xff] }
 0x14a   :  { %2272 = vmatpush1.bf16.msra.mxu0 %v13547_v52  ;;  %v13611_v52 = vcombine.low %v625_v41, %v629_v42  ;;  %v16207_v41 = vld [vmem:[#allocation7 + $0xc] ss:$16 sps:$4 sm:$0xff]   ;;  %v13565_v42 = vcombine.low %v578_v28, %v582_v29 }
 0x14b   :  { %2273 = vmatprep.subr.bf16.mxu0 %v13540_v54  ;;  %v13604_v54 = vcombine.high %v617_v48, %v621_v59 }
 0x14c   :  { %2315 = vmatpush1.bf16.msra.mxu1 %v13675_v53  ;;  %v13739_v53 = vcombine.low %v753_v43, %v757_v45  ;;  %v562_v45 = vld [vmem:[#allocation11 + $0x8d8] sm:$0xff] }
 0x14d   :  { %2316 = vmatprep.subr.bf16.mxu1 %v13668_v60  ;;  %v13732_v60 = vcombine.high %v745_v49, %v749_v51 }
 0x14e   :  { %2274 = vmatpush1.bf16.msra.mxu0 %v13539_v62  ;;  %v13603_v62 = vcombine.low %v617_v48, %v621_v59  ;;  %v694_v48 = vld [vmem:[#allocation11 + $0xcf8] sm:$0xff] }
 0x14f   :  { %2275 = vmatprep.subr.bf16.mxu0 %v13532_v0  ;;  %v13596_v0 = vcombine.high %v609_v55, %v613_v57 }
 0x150   :  { %2317 = vmatpush1.bf16.msra.mxu1 %v13667_v63  ;;  %v13731_v63 = vcombine.low %v745_v49, %v749_v51  ;;  %v554_v51 = vld [vmem:[#allocation11 + $0x898] sm:$0xff] }
 0x151   :  { %2318 = vmatprep.subr.bf16.mxu1 %v13660_v4  ;;  %v13724_v4 = vcombine.high %v737_v58, %v741_v61 }
 0x152   :  { %2276 = vmatpush1.bf16.msra.mxu0 %v13531_v6  ;;  %v13595_v6 = vcombine.low %v609_v55, %v613_v57  ;;  %v686_v55 = vld [vmem:[#allocation11 + $0xcb8] sm:$0xff] }
 0x153   :  { %2277 = vmatprep.subr.bf16.mxu0 %v13524_v8  ;;  %v13588_v8 = vcombine.high %v601_v1, %v605_v2 }
 0x154   :  { %2319 = vmatpush1.bf16.msra.mxu1 %v13659_v7  ;;  %v13723_v7 = vcombine.low %v737_v58, %v741_v61  ;;  %v546_v61 = vld [vmem:[#allocation11 + $0x858] sm:$0xff] }
 0x155   :  { %2320 = vmatprep.subr.bf16.mxu1 %v13652_v13  ;;  %v13716_v13 = vcombine.high %v729_v3, %v733_v5 }
 0x156   :  { %2278 = vmatpush1.bf16.msra.mxu0 %v13523_v16  ;;  %v13587_v16 = vcombine.low %v601_v1, %v605_v2  ;;  %v678_v1 = vld [vmem:[#allocation11 + $0xc78] sm:$0xff] }
 0x157   :  { %2279 = vmatprep.subr.bf16.mxu0 %v13644_v18  ;;  %v13582_v18 = vcombine.high %v594_v9, %v598_v10 }
 0x158   :  { %2321 = vmatpush1.bf16.msra.mxu1 %v13651_v17  ;;  %v13715_v17 = vcombine.low %v729_v3, %v733_v5  ;;  %v538_v5 = vld [vmem:[#allocation11 + $0x818] sm:$0xff] }
 0x159   :  { %2322 = vmatprep.subr.bf16.mxu1 %v13772_v22  ;;  %v13710_v22 = vcombine.high %v722_v11, %v726_v14 }
 0x15a   :  { %2280 = vmatpush2.bf16.msra.mxu0 %v13643_v24  ;;  %v13581_v24 = vcombine.low %v594_v9, %v598_v10  ;;  %v670_v9 = vld [vmem:[#allocation11 + $0xc38] sm:$0xff] }
 0x15b   :  { %2281 = vmatprep.subr.bf16.mxu0 %v13636_v26  ;;  %v13574_v26 = vcombine.high %v586_v19, %v590_v20 }
 0x15c   :  { %2323 = vmatpush2.bf16.msra.mxu1 %v13771_v25  ;;  %v13709_v25 = vcombine.low %v722_v11, %v726_v14  ;;  %v658_v14 = vld [vmem:[#allocation11 + $0xbd8] sm:$0xff] }
 0x15d   :  { %2324 = vmatprep.subr.bf16.mxu1 %v13764_v30  ;;  %v16759_v30 = vld [vmem:[#allocation7] ss:$16 sps:$4 sm:$0xff]  }
 0x15e   :  { %2282 = vmatpush2.bf16.msra.mxu0 %v13635_v32  ;;  %v710_v32 = vld [vmem:[#allocation11 + $0xd78] sm:$0xff] }
 0x15f   :  { %2283 = vmatprep.subr.bf16.mxu0 %v13628_v34  ;;  %v13573_v34 = vcombine.low %v586_v19, %v590_v20  ;;  %v13693_v43 = vcombine.low %v706_v31, %v710_v32  ;;  %v790_v19 = vld [vmem:[#allocation11 + $0xff8] sm:$0xff] }
 0x160   :  { %2325 = vmatpush2.bf16.msra.mxu1 %v13763_v33  ;;  %v16762_v33 = vld [vmem:[#allocation7 + $0x8] ss:$16 sps:$4 sm:$0xff]  }
 0x161   :  { %2326 = vmatprep.subr.bf16.mxu1 %v13756_v38  ;;  %v574_v38 = vld [vmem:[#allocation11 + $0x938] sm:$0xff] }
 0x162   :  { %2284 = vmatpush2.bf16.msra.mxu0 %v13627_v12  ;;  %v13694_v12 = vcombine.high %v706_v31, %v710_v32  ;;  %v13557_v59 = vcombine.low %v570_v37, %v574_v38  ;;  %v642_v32 = vld [vmem:[#allocation11 + $0xb58] sm:$0xff] }
 0x163   :  { %2285 = vmatprep.subr.bf16.mxu0 %v13620_v40  ;;  %v16206_v40 = vld [vmem:[#allocation7 + $0x4] ss:$16 sps:$4 sm:$0xff]  }
 0x164   :  { %2327 = vmatpush2.bf16.msra.mxu1 %v13755_v15  ;;  %v702_v15 = vld [vmem:[#allocation11 + $0xd38] sm:$0xff] }
 0x165   :  { %2328 = vmatprep.subr.bf16.mxu1 %v13748_v44  ;;  %v13558_v44 = vcombine.high %v570_v37, %v574_v38  ;;  %v13685_v49 = vcombine.low %v698_v39, %v702_v15  ;;  %v774_v37 = vld [vmem:[#allocation11 + $0xf78] sm:$0xff] }
 0x166   :  { %2286 = vmatpush2.bf16.msra.mxu0 %v13619_v46  ;;  %v566_v46 = vld [vmem:[#allocation11 + $0x8f8] sm:$0xff] }
 0x167   :  { %2287 = vmatprep.subr.bf16.mxu0 %v13612_v56  ;;  %v13686_v56 = vcombine.high %v698_v39, %v702_v15  ;;  %v13549_v57 = vcombine.low %v562_v45, %v566_v46  ;;  %v634_v15 = vld [vmem:[#allocation11 + $0xb18] sm:$0xff] }
 0x168   :  { %2329 = vmatpush2.bf16.msra.mxu1 %v13747_v47  ;;  %v690_v47 = vld [vmem:[#allocation11 + $0xcd8] sm:$0xff] }
 0x169   :  { %2330 = vmatprep.subr.bf16.mxu1 %v13740_v50  ;;  %v13550_v50 = vcombine.high %v562_v45, %v566_v46  ;;  %v13677_v58 = vcombine.low %v690_v47, %v694_v48 }
 0x16a   :  { %2288 = vmatpush2.bf16.msra.mxu0 %v13611_v52  ;;  %v558_v52 = vld [vmem:[#allocation11 + $0x8b8] sm:$0xff] }
 0x16b   :  { %2289 = vmatprep.subr.bf16.mxu0 %v13604_v54  ;;  %v13678_v54 = vcombine.high %v690_v47, %v694_v48  ;;  %v13541_v2 = vcombine.low %v554_v51, %v558_v52  ;;  %v626_v47 = vld [vmem:[#allocation11 + $0xad8] sm:$0xff] }
 0x16c   :  { %2331 = vmatpush2.bf16.msra.mxu1 %v13739_v53  ;;  %v682_v53 = vld [vmem:[#allocation11 + $0xc98] sm:$0xff] }
 0x16d   :  { %2332 = vmatprep.subr.bf16.mxu1 %v13732_v60  ;;  %v13542_v60 = vcombine.high %v554_v51, %v558_v52  ;;  %v13669_v3 = vcombine.low %v682_v53, %v686_v55  ;;  %v754_v48 = vld [vmem:[#allocation11 + $0xed8] sm:$0xff] }
 0x16e   :  { %2290 = vmatpush2.bf16.msra.mxu0 %v13603_v62  ;;  %v550_v62 = vld [vmem:[#allocation11 + $0x878] sm:$0xff] }
 0x16f   :  { %2291 = vmatprep.subr.bf16.mxu0 %v13596_v0  ;;  %v13670_v0 = vcombine.high %v682_v53, %v686_v55  ;;  %v13533_v10 = vcombine.low %v546_v61, %v550_v62  ;;  %v618_v53 = vld [vmem:[#allocation11 + $0xa98] sm:$0xff] }
 0x170   :  { %2333 = vmatpush2.bf16.msra.mxu1 %v13731_v63  ;;  %v674_v63 = vld [vmem:[#allocation11 + $0xc58] sm:$0xff] }
 0x171   :  { %2334 = vmatprep.subr.bf16.mxu1 %v13724_v4  ;;  %v13534_v4 = vcombine.high %v546_v61, %v550_v62  ;;  %v13661_v11 = vcombine.low %v674_v63, %v678_v1  ;;  %v746_v55 = vld [vmem:[#allocation11 + $0xe98] sm:$0xff] }
 0x172   :  { %2292 = vmatpush2.bf16.msra.mxu0 %v13595_v6  ;;  %v542_v6 = vld [vmem:[#allocation11 + $0x838] sm:$0xff] }
 0x173   :  { %2293 = vmatprep.subr.bf16.mxu0 %v13588_v8  ;;  %v13662_v8 = vcombine.high %v674_v63, %v678_v1  ;;  %v13525_v20 = vcombine.low %v538_v5, %v542_v6  ;;  %v610_v63 = vld [vmem:[#allocation11 + $0xa58] sm:$0xff] }
 0x174   :  { %2335 = vmatpush2.bf16.msra.mxu1 %v13723_v7  ;;  %v666_v7 = vld [vmem:[#allocation11 + $0xc18] sm:$0xff] }
 0x175   :  { %2336 = vmatprep.subr.bf16.mxu1 %v13716_v13  ;;  %v13526_v13 = vcombine.high %v538_v5, %v542_v6  ;;  %v13653_v21 = vcombine.low %v666_v7, %v670_v9  ;;  %v738_v1 = vld [vmem:[#allocation11 + $0xe58] sm:$0xff] }
 0x176   :  { %2294 = vmatpush2.bf16.msra.mxu0 %v13587_v16  ;;  %v662_v16 = vld [vmem:[#allocation11 + $0xbf8] sm:$0xff] }
 0x177   :  { %2349 = vmatprep.subr.bf16.mxu0 %v13582_v18  ;;  %v13654_v18 = vcombine.high %v666_v7, %v670_v9  ;;  %v13645_v28 = vcombine.low %v658_v14, %v662_v16  ;;  %v602_v7 = vld [vmem:[#allocation11 + $0xa18] sm:$0xff] }
 0x178   :  { %2337 = vmatpush2.bf16.msra.mxu1 %v13715_v17  ;;  %v786_v17 = vld [vmem:[#allocation11 + $0xfd8] sm:$0xff] }
 0x179   :  { %2392 = vmatprep.subr.bf16.mxu1 %v13710_v22  ;;  %2296 = vmatmul.mubr.bf16.vlgmr.msra.gmra.mxu0 %v16759_v30  ;;  %v13646_v22 = vcombine.high %v658_v14, %v662_v16  ;;  %v13773_v29 = vcombine.low %v786_v17, %v790_v19  ;;  %v730_v9 = vld [vmem:[#allocation11 + $0xe18] sm:$0xff] }
 0x17a   :  { %2350 = vmatpush1.bf16.msra.mxu0 %v13581_v24  ;;  %2381 = vmatprep.mubr.bf16.mxu0 %v16206_v40  ;;  %v654_v24 = vld [vmem:[#allocation11 + $0xbb8] sm:$0xff] }
 0x17b   :  { %2339 = vmatmul.mubr.bf16.vlgmr.msra.gmra.mxu1 %v16762_v33  ;;  %2351 = vmatprep.subr.bf16.mxu0 %v13574_v26  ;;  %v13774_v26 = vcombine.high %v786_v17, %v790_v19  ;;  %v13638_v31 = vcombine.high %v650_v23, %v654_v24  ;;  %v13637_v38 = vcombine.low %v650_v23, %v654_v24  ;;  %v638_v40 = vld [vmem:[#allocation11 + $0xb38] sm:$0xff]  ;;  %v330_v17 = vld [vmem:[#allocation11 + $0x1c0] sm:$0xff] }
 0x17c   :  { %2393 = vmatpush1.bf16.msra.mxu1 %v13709_v25  ;;  %2424 = vmatprep.mubr.bf16.mxu1 %v16207_v41  ;;  %v778_v25 = vld [vmem:[#allocation11 + $0xf98] sm:$0xff]  ;;  %v13622_v46 = vcombine.high %v634_v15, %v638_v40  ;;  %v458_v19 = vld [vmem:[#allocation11 + $0x5c0] sm:$0xff] }
 0x17d   :  { %2394 = vmatprep.subr.bf16.mxu1 %v13702_v27  ;;  %v782_v27 = vld [vmem:[#allocation11 + $0xfb8] sm:$0xff] }
 0x17e   :  { %2352 = vmatpush1.bf16.msra.mxu0 %v13573_v34  ;;  %v646_v34 = vld [vmem:[#allocation11 + $0xb78] sm:$0xff]  ;;  %v13765_v39 = vcombine.low %v778_v25, %v782_v27 }
 0x17f   :  { %2353 = vmatprep.subr.bf16.mxu0 %v13566_v36  ;;  %v13766_v36 = vcombine.high %v778_v25, %v782_v27  ;;  %v762_v41 = vld [vmem:[#allocation11 + $0xf18] sm:$0xff]  ;;  %v322_v25 = vld [vmem:[#allocation11 + $0x180] sm:$0xff] }
 0x180   :  { %2395 = vmatpush1.bf16.msra.mxu1 %v13701_v35  ;;  %v770_v35 = vld [vmem:[#allocation11 + $0xf58] sm:$0xff]  ;;  %v450_v27 = vld [vmem:[#allocation11 + $0x580] sm:$0xff] }
 0x181   :  { %2396 = vmatprep.subr.bf16.mxu1 %v13694_v12  ;;  %v13630_v12 = vcombine.high %v642_v32, %v646_v34  ;;  %v13757_v45 = vcombine.low %v770_v35, %v774_v37 }
 0x182   :  { %2354 = vmatpush1.bf16.msra.mxu0 %v13565_v42  ;;  %v13758_v42 = vcombine.high %v770_v35, %v774_v37  ;;  %v442_v37 = vld [vmem:[#allocation11 + $0x540] sm:$0xff] }
 0x183   :  { %2355 = vmatprep.subr.bf16.mxu0 %v13558_v44  ;;  %v13629_v44 = vcombine.low %v642_v32, %v646_v34  ;;  %v314_v32 = vld [vmem:[#allocation11 + $0x140] sm:$0xff] }
 0x184   :  { %2397 = vmatpush1.bf16.msra.mxu1 %v13693_v43  ;;  %v766_v43 = vld [vmem:[#allocation11 + $0xf38] sm:$0xff]  ;;  %v318_v34 = vld [vmem:[#allocation11 + $0x160] sm:$0xff] }
 0x185   :  { %2398 = vmatprep.subr.bf16.mxu1 %v13686_v56  ;;  %v630_v56 = vld [vmem:[#allocation11 + $0xaf8] sm:$0xff]  ;;  %v13749_v51 = vcombine.low %v762_v41, %v766_v43 }
 0x186   :  { %2356 = vmatpush1.bf16.msra.mxu0 %v13557_v59  ;;  %v13750_v59 = vcombine.high %v762_v41, %v766_v43  ;;  %v13614_v52 = vcombine.high %v626_v47, %v630_v56 }
 0x187   :  { %2357 = vmatprep.subr.bf16.mxu0 %v13550_v50  ;;  %v13621_v50 = vcombine.low %v634_v15, %v638_v40  ;;  %v16767_v15 = vld [vmem:[#allocation5 + $0xc] ss:$16 sps:$4 sm:$0xff]  }
 0x188   :  { %2399 = vmatpush1.bf16.msra.mxu1 %v13685_v49  ;;  %v758_v49 = vld [vmem:[#allocation11 + $0xef8] sm:$0xff] }
 0x189   :  { %2400 = vmatprep.subr.bf16.mxu1 %v13678_v54  ;;  %v622_v54 = vld [vmem:[#allocation11 + $0xab8] sm:$0xff]  ;;  %v13741_v61 = vcombine.low %v754_v48, %v758_v49 }
 0x18a   :  { %2358 = vmatpush1.bf16.msra.mxu0 %v13549_v57  ;;  %v13742_v57 = vcombine.high %v754_v48, %v758_v49  ;;  %v13606_v62 = vcombine.high %v618_v53, %v622_v54  ;;  %v434_v48 = vld [vmem:[#allocation11 + $0x500] sm:$0xff] }
 0x18b   :  { %2359 = vmatprep.subr.bf16.mxu0 %v13542_v60  ;;  %v13613_v60 = vcombine.low %v626_v47, %v630_v56  ;;  %v306_v47 = vld [vmem:[#allocation11 + $0x100] sm:$0xff] }
 0x18c   :  { %2401 = vmatpush1.bf16.msra.mxu1 %v13677_v58  ;;  %v750_v58 = vld [vmem:[#allocation11 + $0xeb8] sm:$0xff]  ;;  %v310_v56 = vld [vmem:[#allocation11 + $0x120] sm:$0xff] }
 0x18d   :  { %2402 = vmatprep.subr.bf16.mxu1 %v13670_v0  ;;  %v614_v0 = vld [vmem:[#allocation11 + $0xa78] sm:$0xff]  ;;  %v13733_v5 = vcombine.low %v746_v55, %v750_v58 }
 0x18e   :  { %2360 = vmatpush1.bf16.msra.mxu0 %v13541_v2  ;;  %v13734_v2 = vcombine.high %v746_v55, %v750_v58  ;;  %v13598_v6 = vcombine.high %v610_v63, %v614_v0  ;;  %v426_v55 = vld [vmem:[#allocation11 + $0x4c0] sm:$0xff] }
 0x18f   :  { %2361 = vmatprep.subr.bf16.mxu0 %v13534_v4  ;;  %v13605_v4 = vcombine.low %v618_v53, %v622_v54  ;;  %v298_v53 = vld [vmem:[#allocation11 + $0xc0] sm:$0xff] }
 0x190   :  { %2403 = vmatpush1.bf16.msra.mxu1 %v13669_v3  ;;  %v742_v3 = vld [vmem:[#allocation11 + $0xe78] sm:$0xff]  ;;  %v302_v54 = vld [vmem:[#allocation11 + $0xe0] sm:$0xff] }
 0x191   :  { %2404 = vmatprep.subr.bf16.mxu1 %v13662_v8  ;;  %v606_v8 = vld [vmem:[#allocation11 + $0xa38] sm:$0xff]  ;;  %v13725_v14 = vcombine.low %v738_v1, %v742_v3  ;;  %v430_v58 = vld [vmem:[#allocation11 + $0x4e0] sm:$0xff] }
 0x192   :  { %2362 = vmatpush1.bf16.msra.mxu0 %v13533_v10  ;;  %v13726_v10 = vcombine.high %v738_v1, %v742_v3  ;;  %v13590_v16 = vcombine.high %v602_v7, %v606_v8  ;;  %v418_v1 = vld [vmem:[#allocation11 + $0x480] sm:$0xff] }
 0x193   :  { %2363 = vmatprep.subr.bf16.mxu0 %v13526_v13  ;;  %v13597_v13 = vcombine.low %v610_v63, %v614_v0  ;;  %v290_v63 = vld [vmem:[#allocation11 + $0x80] sm:$0xff] }
 0x194   :  { %2405 = vmatpush1.bf16.msra.mxu1 %v13661_v11  ;;  %v734_v11 = vld [vmem:[#allocation11 + $0xe38] sm:$0xff]  ;;  %v294_v0 = vld [vmem:[#allocation11 + $0xa0] sm:$0xff] }
 0x195   :  { %2406 = vmatprep.subr.bf16.mxu1 %v13654_v18  ;;  %v334_v18 = vld [vmem:[#allocation11 + $0x1e0] sm:$0xff]  ;;  %v13717_v23 = vcombine.low %v730_v9, %v734_v11 }
 0x196   :  { %2364 = vmatpush1.bf16.msra.mxu0 %v13525_v20  ;;  %v13718_v20 = vcombine.high %v730_v9, %v734_v11  ;;  %v13836_v24 = vcombine.high %v330_v17, %v334_v18  ;;  %v422_v3 = vld [vmem:[#allocation11 + $0x4a0] sm:$0xff] }
 0x197   :  { %2365 = vmatprep.subr.bf16.mxu0 %v13646_v22  ;;  %v13589_v22 = vcombine.low %v602_v7, %v606_v8  ;;  %v282_v7 = vld [vmem:[#allocation11 + $0x40] sm:$0xff] }
 0x198   :  { %2407 = vmatpush1.bf16.msra.mxu1 %v13653_v21  ;;  %v462_v21 = vld [vmem:[#allocation11 + $0x5e0] sm:$0xff] }
 0x199   :  { %2408 = vmatprep.subr.bf16.mxu1 %v13774_v26  ;;  %v326_v26 = vld [vmem:[#allocation11 + $0x1a0] sm:$0xff]  ;;  %v13963_v35 = vcombine.low %v458_v19, %v462_v21 }
 0x19a   :  { %2366 = vmatpush2.bf16.msra.mxu0 %v13645_v28  ;;  %v13964_v28 = vcombine.high %v458_v19, %v462_v21  ;;  %v286_v8 = vld [vmem:[#allocation11 + $0x60] sm:$0xff] }
 0x19b   :  { %2367 = vmatprep.subr.bf16.mxu0 %v13638_v31  ;;  %v13835_v31 = vcombine.low %v330_v17, %v334_v18  ;;  %v410_v9 = vld [vmem:[#allocation11 + $0x440] sm:$0xff] }
 0x19c   :  { %2409 = vmatpush2.bf16.msra.mxu1 %v13773_v29  ;;  %v454_v29 = vld [vmem:[#allocation11 + $0x5a0] sm:$0xff] }
 0x19d   :  { %2410 = vmatprep.subr.bf16.mxu1 %v13766_v36  ;;  %v13828_v36 = vcombine.high %v322_v25, %v326_v26  ;;  %v414_v11 = vld [vmem:[#allocation11 + $0x460] sm:$0xff] }
 0x19e   :  { %2368 = vmatpush2.bf16.msra.mxu0 %v13637_v38  ;;  %v446_v38 = vld [vmem:[#allocation11 + $0x560] sm:$0xff] }
 0x19f   :  { %2369 = vmatprep.subr.bf16.mxu0 %v13630_v12  ;;  %v13956_v12 = vcombine.high %v450_v27, %v454_v29  ;;  %v13948_v49 = vcombine.high %v442_v37, %v446_v38  ;;  %v274_v17 = vld [vmem:[#allocation11] sm:$0xff] }
 0x1a0   :  { %2411 = vmatpush2.bf16.msra.mxu1 %v13765_v39  ;;  %v16765_v39 = vld [vmem:[#allocation5 + $0x4] ss:$16 sps:$4 sm:$0xff]  }
 0x1a1   :  { %2412 = vmatprep.subr.bf16.mxu1 %v13758_v42  ;;  %v13827_v42 = vcombine.low %v322_v25, %v326_v26  ;;  %v278_v18 = vld [vmem:[#allocation11 + $0x20] sm:$0xff] }
 0x1a2   :  { %2370 = vmatpush2.bf16.msra.mxu0 %v13629_v44  ;;  %v402_v19 = vld [vmem:[#allocation11 + $0x400] sm:$0xff] }
 0x1a3   :  { %2371 = vmatprep.subr.bf16.mxu0 %v13622_v46  ;;  %v13820_v46 = vcombine.high %v314_v32, %v318_v34  ;;  %v406_v21 = vld [vmem:[#allocation11 + $0x420] sm:$0xff] }
 0x1a4   :  { %2413 = vmatpush2.bf16.msra.mxu1 %v13757_v45  ;;  %v13955_v45 = vcombine.low %v450_v27, %v454_v29  ;;  %v394_v25 = vld [vmem:[#allocation11 + $0x3c0] sm:$0xff] }
 0x1a5   :  { %2414 = vmatprep.subr.bf16.mxu1 %v13750_v59  ;;  %v398_v26 = vld [vmem:[#allocation11 + $0x3e0] sm:$0xff] }
 0x1a6   :  { %2372 = vmatpush2.bf16.msra.mxu0 %v13621_v50  ;;  %v438_v50 = vld [vmem:[#allocation11 + $0x520] sm:$0xff] }
 0x1a7   :  { %2373 = vmatprep.subr.bf16.mxu0 %v13614_v52  ;;  %v13812_v52 = vcombine.high %v306_v47, %v310_v56  ;;  %v522_v27 = vld [vmem:[#allocation11 + $0x7c0] sm:$0xff] }
 0x1a8   :  { %2415 = vmatpush2.bf16.msra.mxu1 %v13749_v51  ;;  %v13947_v51 = vcombine.low %v442_v37, %v446_v38  ;;  %v526_v29 = vld [vmem:[#allocation11 + $0x7e0] sm:$0xff] }
 0x1a9   :  { %2416 = vmatprep.subr.bf16.mxu1 %v13742_v57  ;;  %v13940_v57 = vcombine.high %v434_v48, %v438_v50  ;;  %v514_v37 = vld [vmem:[#allocation11 + $0x780] sm:$0xff]  ;;  %v14028_v38 = vcombine.high %v522_v27, %v526_v29 }
 0x1aa   :  { %2374 = vmatpush2.bf16.msra.mxu0 %v13613_v60  ;;  %v13811_v60 = vcombine.low %v306_v47, %v310_v56  ;;  %v510_v56 = vld [vmem:[#allocation11 + $0x760] sm:$0xff] }
 0x1ab   :  { %2375 = vmatprep.subr.bf16.mxu0 %v13606_v62  ;;  %v13804_v62 = vcombine.high %v298_v53, %v302_v54 }
 0x1ac   :  { %2417 = vmatpush2.bf16.msra.mxu1 %v13741_v61  ;;  %v13939_v61 = vcombine.low %v434_v48, %v438_v50  ;;  %v370_v50 = vld [vmem:[#allocation11 + $0x300] sm:$0xff] }
 0x1ad   :  { %2418 = vmatprep.subr.bf16.mxu1 %v13734_v2  ;;  %v13932_v2 = vcombine.high %v426_v55, %v430_v58 }
 0x1ae   :  { %2376 = vmatpush2.bf16.msra.mxu0 %v13605_v4  ;;  %v13803_v4 = vcombine.low %v298_v53, %v302_v54  ;;  %v502_v53 = vld [vmem:[#allocation11 + $0x720] sm:$0xff] }
 0x1af   :  { %2377 = vmatprep.subr.bf16.mxu0 %v13598_v6  ;;  %v13796_v6 = vcombine.high %v290_v63, %v294_v0 }
 0x1b0   :  { %2419 = vmatpush2.bf16.msra.mxu1 %v13733_v5  ;;  %v13931_v5 = vcombine.low %v426_v55, %v430_v58  ;;  %v362_v58 = vld [vmem:[#allocation11 + $0x2c0] sm:$0xff] }
 0x1b1   :  { %2420 = vmatprep.subr.bf16.mxu1 %v13726_v10  ;;  %v13924_v10 = vcombine.high %v418_v1, %v422_v3 }
 0x1b2   :  { %2378 = vmatpush2.bf16.msra.mxu0 %v13597_v13  ;;  %v13795_v13 = vcombine.low %v290_v63, %v294_v0  ;;  %v494_v63 = vld [vmem:[#allocation11 + $0x6e0] sm:$0xff] }
 0x1b3   :  { %2379 = vmatprep.subr.bf16.mxu0 %v13590_v16  ;;  %v13788_v16 = vcombine.high %v282_v7, %v286_v8 }
 0x1b4   :  { %2421 = vmatpush2.bf16.msra.mxu1 %v13725_v14  ;;  %v13923_v14 = vcombine.low %v418_v1, %v422_v3  ;;  %v354_v3 = vld [vmem:[#allocation11 + $0x280] sm:$0xff] }
 0x1b5   :  { %2422 = vmatprep.subr.bf16.mxu1 %v13718_v20  ;;  %v13916_v20 = vcombine.high %v410_v9, %v414_v11 }
 0x1b6   :  { %2380 = vmatpush2.bf16.msra.mxu0 %v13589_v22  ;;  %v13787_v22 = vcombine.low %v282_v7, %v286_v8  ;;  %v486_v7 = vld [vmem:[#allocation11 + $0x6a0] sm:$0xff] }
 0x1b7   :  { %3735 = vmatprep.subr.bf16.mxu0 %v13836_v24  ;;  %v13780_v24 = vcombine.high %v274_v17, %v278_v18 }
 0x1b8   :  { %2423 = vmatpush2.bf16.msra.mxu1 %v13717_v23  ;;  %v13915_v23 = vcombine.low %v410_v9, %v414_v11  ;;  %v346_v11 = vld [vmem:[#allocation11 + $0x240] sm:$0xff] }
 0x1b9   :  { %3778 = vmatprep.subr.bf16.mxu1 %v13964_v28  ;;  %v2125_v40 = vpop.f32.mrf.mxu0  ;;  %2382 = vmatmul.mubr.bf16.vlgmr.msra.gmra.mxu0 %v16759_v30  ;;  %v13908_v28 = vcombine.high %v402_v19, %v406_v21 }
 0x1ba   :  { %3736 = vmatpush1.bf16.msra.mxu0 %v13835_v31  ;;  %3767 = vmatprep.mubr.bf16.mxu0 %v16765_v39  ;;  %v13779_v31 = vcombine.low %v274_v17, %v278_v18  ;;  %v478_v17 = vld [vmem:[#allocation11 + $0x660] sm:$0xff] }
 0x1bb   :  { %v2168_v41 = vpop.f32.mrf.mxu1  ;;  %2425 = vmatmul.mubr.bf16.vlgmr.msra.gmra.mxu1 %v16762_v33  ;;  %v2127_v44 = vpop.f32.mrf.mxu0  ;;  %3737 = vmatprep.subr.bf16.mxu0 %v13828_v36  ;;  %v13819_v33 = vcombine.low %v314_v32, %v318_v34  ;;  %v13907_v32 = vcombine.low %v402_v19, %v406_v21  ;;  %v13900_v34 = vcombine.high %v394_v25, %v398_v26  ;;  %v390_v36 = vld [vmem:[#allocation11 + $0x3a0] sm:$0xff] }
 0x1bc   :  { %v16771_v43 = vadd.f32 %v2168_v41, %v2125_v40  ;;  %3779 = vmatpush1.bf16.msra.mxu1 %v13963_v35  ;;  %3810 = vmatprep.mubr.bf16.mxu1 %v16767_v15  ;;  %v386_v35 = vld [vmem:[#allocation11 + $0x380] sm:$0xff]  ;;  %v13899_v40 = vcombine.low %v394_v25, %v398_v26  ;;  %v14027_v41 = vcombine.low %v522_v27, %v526_v29  ;;  %v331_v29 = vld [vmem:[#allocation11 + $0x1c8] sm:$0xff] }
 0x1bd   :  { %v2170_v59 = vpop.f32.mrf.mxu1  ;;  %3780 = vmatprep.subr.bf16.mxu1 %v13956_v12  ;;  %v518_v12 = vld [vmem:[#allocation11 + $0x7a0] sm:$0xff]  ;;  %v13891_v48 = vcombine.low %v386_v35, %v390_v36 }
 0x1be   :  { %v16774_v30 = vadd.f32 %v2170_v59, %v2127_v44  ;;  %3738 = vmatpush1.bf16.msra.mxu0 %v13827_v42  ;;  %v13892_v42 = vcombine.high %v386_v35, %v390_v36  ;;  %v378_v44 = vld [vmem:[#allocation11 + $0x340] sm:$0xff]  ;;  %v14020_v47 = vcombine.high %v514_v37, %v518_v12  ;;  %v14019_v59 = vcombine.low %v514_v37, %v518_v12  ;;  %v463_v35 = vld [vmem:[#allocation11 + $0x5e8] sm:$0xff]  ;;  %v16777_v37 = vpop.f32.mrf.mxu0 }
 0x1bf   :  { %3739 = vmatprep.subr.bf16.mxu0 %v13820_v46  ;;  %v506_v46 = vld [vmem:[#allocation11 + $0x740] sm:$0xff] }
 0x1c0   :  { %3781 = vmatpush1.bf16.msra.mxu1 %v13955_v45  ;;  %v382_v45 = vld [vmem:[#allocation11 + $0x360] sm:$0xff]  ;;  %v14011_v55 = vcombine.low %v506_v46, %v510_v56 }
 0x1c1   :  { %3782 = vmatprep.subr.bf16.mxu1 %v13948_v49  ;;  %v13884_v49 = vcombine.high %v378_v44, %v382_v45  ;;  %v13883_v54 = vcombine.low %v378_v44, %v382_v45  ;;  %v338_v21 = vld [vmem:[#allocation11 + $0x200] sm:$0xff]  ;;  %v451_v44 = vld [vmem:[#allocation11 + $0x588] sm:$0xff]  ;;  %v16781_v45 = vpop.f32.mrf.mxu1 }
 0x1c2   :  { %3740 = vmatpush1.bf16.msra.mxu0 %v13819_v33  ;;  %v374_v33 = vld [vmem:[#allocation11 + $0x320] sm:$0xff] }
 0x1c3   :  { %3741 = vmatprep.subr.bf16.mxu0 %v13812_v52  ;;  %v14012_v52 = vcombine.high %v506_v46, %v510_v56  ;;  %v13875_v0 = vcombine.low %v370_v50, %v374_v33  ;;  %v470_v25 = vld [vmem:[#allocation11 + $0x620] sm:$0xff]  ;;  %v16783_v46 = vld [vmem:[#allocation5 + $0x8] ss:$16 sps:$4 sm:$0xff]  }
 0x1c4   :  { %3783 = vmatpush1.bf16.msra.mxu1 %v13947_v51  ;;  %v498_v51 = vld [vmem:[#allocation11 + $0x700] sm:$0xff]  ;;  %v455_v56 = vld [vmem:[#allocation11 + $0x5a8] sm:$0xff] }
 0x1c5   :  { %3784 = vmatprep.subr.bf16.mxu1 %v13940_v57  ;;  %v13876_v57 = vcombine.high %v370_v50, %v374_v33  ;;  %v14003_v1 = vcombine.low %v498_v51, %v502_v53  ;;  %v16779_v12 = vld [vmem:[#allocation5] ss:$16 sps:$4 sm:$0xff]   ;;  %v315_v33 = vld [vmem:[#allocation11 + $0x148] sm:$0xff] }
 0x1c6   :  { %3742 = vmatpush1.bf16.msra.mxu0 %v13811_v60  ;;  %v366_v60 = vld [vmem:[#allocation11 + $0x2e0] sm:$0xff] }
 0x1c7   :  { %3743 = vmatprep.subr.bf16.mxu0 %v13804_v62  ;;  %v14004_v62 = vcombine.high %v498_v51, %v502_v53  ;;  %v13867_v8 = vcombine.low %v362_v58, %v366_v60  ;;  %v319_v51 = vld [vmem:[#allocation11 + $0x168] sm:$0xff]  ;;  %v16787_v53 = vpop.f32.mrf.mxu1 }
 0x1c8   :  { %3785 = vmatpush1.bf16.msra.mxu1 %v13939_v61  ;;  %v490_v61 = vld [vmem:[#allocation11 + $0x6c0] sm:$0xff] }
 0x1c9   :  { %3786 = vmatprep.subr.bf16.mxu1 %v13932_v2  ;;  %v13868_v2 = vcombine.high %v362_v58, %v366_v60  ;;  %v13995_v9 = vcombine.low %v490_v61, %v494_v63 }
 0x1ca   :  { %3744 = vmatpush1.bf16.msra.mxu0 %v13803_v4  ;;  %v358_v4 = vld [vmem:[#allocation11 + $0x2a0] sm:$0xff] }
 0x1cb   :  { %3745 = vmatprep.subr.bf16.mxu0 %v13796_v6  ;;  %v13996_v6 = vcombine.high %v490_v61, %v494_v63  ;;  %v13859_v18 = vcombine.low %v354_v3, %v358_v4  ;;  %v13957_v63 = vcombine.low %v451_v44, %v455_v56 }
 0x1cc   :  { %3787 = vmatpush1.bf16.msra.mxu1 %v13931_v5  ;;  %v482_v5 = vld [vmem:[#allocation11 + $0x680] sm:$0xff] }
 0x1cd   :  { %3788 = vmatprep.subr.bf16.mxu1 %v13924_v10  ;;  %v13860_v10 = vcombine.high %v354_v3, %v358_v4  ;;  %v13987_v19 = vcombine.low %v482_v5, %v486_v7  ;;  %v435_v3 = vld [vmem:[#allocation11 + $0x508] sm:$0xff] }
 0x1ce   :  { %3746 = vmatpush1.bf16.msra.mxu0 %v13795_v13  ;;  %v350_v13 = vld [vmem:[#allocation11 + $0x260] sm:$0xff] }
 0x1cf   :  { %3747 = vmatprep.subr.bf16.mxu0 %v13788_v16  ;;  %v13988_v16 = vcombine.high %v482_v5, %v486_v7  ;;  %v13851_v26 = vcombine.low %v346_v11, %v350_v13 }
 0x1d0   :  { %3789 = vmatpush1.bf16.msra.mxu1 %v13923_v14  ;;  %v474_v14 = vld [vmem:[#allocation11 + $0x640] sm:$0xff] }
 0x1d1   :  { %3790 = vmatprep.subr.bf16.mxu1 %v13916_v20  ;;  %v13852_v20 = vcombine.high %v346_v11, %v350_v13  ;;  %v13979_v27 = vcombine.low %v474_v14, %v478_v17 }
 0x1d2   :  { %3748 = vmatpush1.bf16.msra.mxu0 %v13787_v22  ;;  %v342_v22 = vld [vmem:[#allocation11 + $0x220] sm:$0xff] }
 0x1d3   :  { %3749 = vmatprep.subr.bf16.mxu0 %v13780_v24  ;;  %v13980_v24 = vcombine.high %v474_v14, %v478_v17  ;;  %v13843_v36 = vcombine.low %v338_v21, %v342_v22  ;;  %v299_v17 = vld [vmem:[#allocation11 + $0xc8] sm:$0xff] }
 0x1d4   :  { %3791 = vmatpush1.bf16.msra.mxu1 %v13915_v23  ;;  %v466_v23 = vld [vmem:[#allocation11 + $0x600] sm:$0xff] }
 0x1d5   :  { %3792 = vmatprep.subr.bf16.mxu1 %v13908_v28  ;;  %v13844_v28 = vcombine.high %v338_v21, %v342_v22  ;;  %v431_v21 = vld [vmem:[#allocation11 + $0x4e8] sm:$0xff] }
 0x1d6   :  { %3750 = vmatpush1.bf16.msra.mxu0 %v13779_v31  ;;  %v335_v31 = vld [vmem:[#allocation11 + $0x1e8] sm:$0xff] }
 0x1d7   :  { %3751 = vmatprep.subr.bf16.mxu0 %v13900_v34  ;;  %v13972_v34 = vcombine.high %v466_v23, %v470_v25 }
 0x1d8   :  { %3793 = vmatpush1.bf16.msra.mxu1 %v13907_v32  ;;  %v459_v32 = vld [vmem:[#allocation11 + $0x5c8] sm:$0xff] }
 0x1d9   :  { %3794 = vmatprep.subr.bf16.mxu1 %v14028_v38  ;;  %v13971_v38 = vcombine.low %v466_v23, %v470_v25  ;;  %v291_v25 = vld [vmem:[#allocation11 + $0x88] sm:$0xff] }
 0x1da   :  { %3752 = vmatpush2.bf16.msra.mxu0 %v13899_v40  ;;  %v13838_v40 = vcombine.high %v331_v29, %v335_v31 }
 0x1db   :  { %3753 = vmatprep.subr.bf16.mxu0 %v13892_v42  ;;  %v327_v42 = vld [vmem:[#allocation11 + $0x1a8] sm:$0xff] }
 0x1dc   :  { %3795 = vmatpush2.bf16.msra.mxu1 %v14027_v41  ;;  %v323_v41 = vld [vmem:[#allocation11 + $0x188] sm:$0xff] }
 0x1dd   :  { %3796 = vmatprep.subr.bf16.mxu1 %v14020_v47  ;;  %v13966_v47 = vcombine.high %v459_v32, %v463_v35  ;;  %v13830_v50 = vcombine.high %v323_v41, %v327_v42  ;;  %v13829_v60 = vcombine.low %v323_v41, %v327_v42  ;;  %v415_v41 = vld [vmem:[#allocation11 + $0x468] sm:$0xff] }
 0x1de   :  { %3754 = vmatpush2.bf16.msra.mxu0 %v13891_v48  ;;  %v13837_v48 = vcombine.low %v331_v29, %v335_v31  ;;  %v423_v29 = vld [vmem:[#allocation11 + $0x4a8] sm:$0xff] }
 0x1df   :  { %3755 = vmatprep.subr.bf16.mxu0 %v13884_v49  ;;  %v13965_v49 = vcombine.low %v459_v32, %v463_v35  ;;  %v283_v35 = vld [vmem:[#allocation11 + $0x48] sm:$0xff] }
 0x1e0   :  { %3797 = vmatpush2.bf16.msra.mxu1 %v14019_v59  ;;  %v16785_v59 = vpop.f32.mrf.mxu0 }
 0x1e1   :  { %3798 = vmatprep.subr.bf16.mxu1 %v14012_v52  ;;  %v443_v52 = vld [vmem:[#allocation11 + $0x548] sm:$0xff] }
 0x1e2   :  { %3756 = vmatpush2.bf16.msra.mxu0 %v13883_v54  ;;  %v13958_v54 = vcombine.high %v451_v44, %v455_v56  ;;  %v275_v56 = vld [vmem:[#allocation11 + $0x8] sm:$0xff] }
 0x1e3   :  { %3757 = vmatprep.subr.bf16.mxu0 %v13876_v57 }
 0x1e4   :  { %3799 = vmatpush2.bf16.msra.mxu1 %v14011_v55  ;;  %v447_v55 = vld [vmem:[#allocation11 + $0x568] sm:$0xff] }
 0x1e5   :  { %3800 = vmatprep.subr.bf16.mxu1 %v14004_v62  ;;  %v13950_v5 = vcombine.high %v443_v52, %v447_v55  ;;  %v13949_v14 = vcombine.low %v443_v52, %v447_v55  ;;  %v395_v55 = vld [vmem:[#allocation11 + $0x3c8] sm:$0xff] }
 0x1e6   :  { %3758 = vmatpush2.bf16.msra.mxu0 %v13875_v0  ;;  %v13822_v0 = vcombine.high %v315_v33, %v319_v51 }
 0x1e7   :  { %3759 = vmatprep.subr.bf16.mxu0 %v13868_v2  ;;  %v311_v2 = vld [vmem:[#allocation11 + $0x128] sm:$0xff] }
 0x1e8   :  { %3801 = vmatpush2.bf16.msra.mxu1 %v14003_v1  ;;  %v307_v1 = vld [vmem:[#allocation11 + $0x108] sm:$0xff] }
 0x1e9   :  { %3802 = vmatprep.subr.bf16.mxu1 %v13996_v6  ;;  %v439_v6 = vld [vmem:[#allocation11 + $0x528] sm:$0xff] }
 0x1ea   :  { %3760 = vmatpush2.bf16.msra.mxu0 %v13867_v8  ;;  %v13941_v23 = vcombine.low %v435_v3, %v439_v6 }
 0x1eb   :  { %3761 = vmatprep.subr.bf16.mxu0 %v13860_v10  ;;  %v13821_v10 = vcombine.low %v315_v33, %v319_v51  ;;  %v407_v33 = vld [vmem:[#allocation11 + $0x428] sm:$0xff] }
 0x1ec   :  { %3803 = vmatpush2.bf16.msra.mxu1 %v13995_v9 }
 0x1ed   :  { %3804 = vmatprep.subr.bf16.mxu1 %v13988_v16  ;;  %v13814_v16 = vcombine.high %v307_v1, %v311_v2 }
 0x1ee   :  { %3762 = vmatpush2.bf16.msra.mxu0 %v13859_v18  ;;  %v303_v18 = vld [vmem:[#allocation11 + $0xe8] sm:$0xff] }
 0x1ef   :  { %3763 = vmatprep.subr.bf16.mxu0 %v13852_v20  ;;  %v13805_v31 = vcombine.low %v299_v17, %v303_v18 }
 0x1f0   :  { %3805 = vmatpush2.bf16.msra.mxu1 %v13987_v19  ;;  %v427_v19 = vld [vmem:[#allocation11 + $0x4c8] sm:$0xff] }
 0x1f1   :  { %3806 = vmatprep.subr.bf16.mxu1 %v13980_v24  ;;  %v13806_v24 = vcombine.high %v299_v17, %v303_v18  ;;  %v13933_v32 = vcombine.low %v427_v19, %v431_v21  ;;  %v511_v18 = vld [vmem:[#allocation11 + $0x768] sm:$0xff] }
 0x1f2   :  { %3764 = vmatpush2.bf16.msra.mxu0 %v13851_v26  ;;  %v295_v26 = vld [vmem:[#allocation11 + $0xa8] sm:$0xff] }
 0x1f3   :  { %3765 = vmatprep.subr.bf16.mxu0 %v13844_v28  ;;  %v13934_v28 = vcombine.high %v427_v19, %v431_v21  ;;  %v13797_v42 = vcombine.low %v291_v25, %v295_v26  ;;  %v371_v21 = vld [vmem:[#allocation11 + $0x308] sm:$0xff] }
 0x1f4   :  { %3807 = vmatpush2.bf16.msra.mxu1 %v13979_v27  ;;  %v419_v27 = vld [vmem:[#allocation11 + $0x488] sm:$0xff] }
 0x1f5   :  { %3808 = vmatprep.subr.bf16.mxu1 %v13972_v34  ;;  %v13798_v34 = vcombine.high %v291_v25, %v295_v26  ;;  %v13925_v44 = vcombine.low %v419_v27, %v423_v29  ;;  %v503_v25 = vld [vmem:[#allocation11 + $0x728] sm:$0xff] }
 0x1f6   :  { %3766 = vmatpush2.bf16.msra.mxu0 %v13843_v36  ;;  %v287_v36 = vld [vmem:[#allocation11 + $0x68] sm:$0xff] }
 0x1f7   :  { %3821 = vmatprep.subr.bf16.mxu0 %v13838_v40  ;;  %v13926_v40 = vcombine.high %v419_v27, %v423_v29  ;;  %v13789_v51 = vcombine.low %v283_v35, %v287_v36  ;;  %v363_v29 = vld [vmem:[#allocation11 + $0x2c8] sm:$0xff] }
 0x1f8   :  { %3809 = vmatpush2.bf16.msra.mxu1 %v13971_v38  ;;  %v411_v38 = vld [vmem:[#allocation11 + $0x448] sm:$0xff] }
 0x1f9   :  { %3864 = vmatprep.subr.bf16.mxu1 %v13966_v47  ;;  %v2211_v57 = vpop.f32.mrf.mxu0  ;;  %3768 = vmatmul.mubr.bf16.vlgmr.msra.gmra.mxu0 %v16779_v12  ;;  %v13790_v47 = vcombine.high %v283_v35, %v287_v36  ;;  %v13917_v52 = vcombine.low %v411_v38, %v415_v41  ;;  %v495_v35 = vld [vmem:[#allocation11 + $0x6e8] sm:$0xff] }
 0x1fa   :  { %3822 = vmatpush1.bf16.msra.mxu0 %v13837_v48  ;;  %3853 = vmatprep.mubr.bf16.mxu0 %v16765_v39  ;;  %v13942_v39 = vcombine.high %v435_v3, %v439_v6  ;;  %v279_v48 = vld [vmem:[#allocation11 + $0x28] sm:$0xff] }
 0x1fb   :  { %v2254_v58 = vpop.f32.mrf.mxu1  ;;  %3811 = vmatmul.mubr.bf16.vlgmr.msra.gmra.mxu1 %v16783_v46  ;;  %v2213_v62 = vpop.f32.mrf.mxu0  ;;  %3823 = vmatprep.subr.bf16.mxu0 %v13830_v50  ;;  %v13918_v50 = vcombine.high %v411_v38, %v415_v41  ;;  %v391_v3 = vld [vmem:[#allocation11 + $0x3a8] sm:$0xff] }
 0x1fc   :  { %v16791_v61 = vadd.f32 %v2254_v58, %v2211_v57  ;;  %3865 = vmatpush1.bf16.msra.mxu1 %v13965_v49  ;;  %3896 = vmatprep.mubr.bf16.mxu1 %v16767_v15  ;;  %v13813_v15 = vcombine.low %v307_v1, %v311_v2  ;;  %v403_v49 = vld [vmem:[#allocation11 + $0x408] sm:$0xff] }
 0x1fd   :  { %v2256_v4 = vpop.f32.mrf.mxu1  ;;  %3866 = vmatprep.subr.bf16.mxu1 %v13958_v54  ;;  %v2215_v8 = vpop.f32.mrf.mxu0  ;;  %v13782_v54 = vcombine.high %v275_v56, %v279_v48  ;;  %v399_v57 = vld [vmem:[#allocation11 + $0x3e8] sm:$0xff] }
 0x1fe   :  { %v16794_v7 = vadd.f32 %v2256_v4, %v2213_v62  ;;  %3824 = vmatpush1.bf16.msra.mxu0 %v13829_v60  ;;  %v523_v58 = vld [vmem:[#allocation11 + $0x7c8] sm:$0xff]  ;;  %v13910_v60 = vcombine.high %v403_v49, %v407_v33  ;;  %v13902_v1 = vcombine.high %v395_v55, %v399_v57 }
 0x1ff   :  { %v2258_v9 = vpop.f32.mrf.mxu1  ;;  %v2217_v13 = vpop.f32.mrf.mxu0  ;;  %3825 = vmatprep.subr.bf16.mxu0 %v13822_v0  ;;  %v527_v62 = vld [vmem:[#allocation11 + $0x7e8] sm:$0xff]  ;;  %v13909_v0 = vcombine.low %v403_v49, %v407_v33 }
 0x200   :  { %v16797_v11 = vadd.f32 %v2258_v9, %v2215_v8  ;;  %3867 = vmatpush1.bf16.msra.mxu1 %v13957_v63  ;;  %v13781_v63 = vcombine.low %v275_v56, %v279_v48  ;;  %v387_v2 = vld [vmem:[#allocation11 + $0x388] sm:$0xff]  ;;  %v13901_v8 = vcombine.low %v395_v55, %v399_v57  ;;  %v14029_v9 = vcombine.low %v523_v58, %v527_v62 }
 0x201   :  { %v2260_v20 = vpop.f32.mrf.mxu1  ;;  %3868 = vmatprep.subr.bf16.mxu1 %v13950_v5  ;;  %v515_v4 = vld [vmem:[#allocation11 + $0x788] sm:$0xff]  ;;  %v14030_v5 = vcombine.high %v523_v58, %v527_v62  ;;  %v13893_v19 = vcombine.low %v387_v2, %v391_v3 }
 0x202   :  { %v16799_v22 = vadd.f32 %v2260_v20, %v2217_v13  ;;  %3826 = vmatpush1.bf16.msra.mxu0 %v13821_v10  ;;  %v519_v6 = vld [vmem:[#allocation11 + $0x7a8] sm:$0xff]  ;;  %v13894_v10 = vcombine.high %v387_v2, %v391_v3 }
 0x203   :  { %3827 = vmatprep.subr.bf16.mxu0 %v13814_v16  ;;  %v379_v13 = vld [vmem:[#allocation11 + $0x348] sm:$0xff]  ;;  %v14022_v17 = vcombine.high %v515_v4, %v519_v6  ;;  %v14021_v20 = vcombine.low %v515_v4, %v519_v6  ;;  %v332_v6 = vld [vmem:[#allocation11 + $0x1d0] sm:$0xff] }
 0x204   :  { %3869 = vmatpush1.bf16.msra.mxu1 %v13949_v14  ;;  %v383_v14 = vld [vmem:[#allocation11 + $0x368] sm:$0xff] }
 0x205   :  { %3870 = vmatprep.subr.bf16.mxu1 %v13942_v39  ;;  %v507_v16 = vld [vmem:[#allocation11 + $0x748] sm:$0xff]  ;;  %v13886_v39 = vcombine.high %v379_v13, %v383_v14  ;;  %v13885_v26 = vcombine.low %v379_v13, %v383_v14  ;;  %v464_v13 = vld [vmem:[#allocation11 + $0x5f0] sm:$0xff] }
 0x206   :  { %3828 = vmatpush1.bf16.msra.mxu0 %v13813_v15  ;;  %v375_v15 = vld [vmem:[#allocation11 + $0x328] sm:$0xff]  ;;  %v14013_v27 = vcombine.low %v507_v16, %v511_v18 }
 0x207   :  { %3829 = vmatprep.subr.bf16.mxu0 %v13806_v24  ;;  %v14014_v24 = vcombine.high %v507_v16, %v511_v18  ;;  %v13877_v36 = vcombine.low %v371_v21, %v375_v15  ;;  %v355_v41 = vld [vmem:[#allocation11 + $0x288] sm:$0xff]  ;;  %v324_v18 = vld [vmem:[#allocation11 + $0x190] sm:$0xff] }
 0x208   :  { %3871 = vmatpush1.bf16.msra.mxu1 %v13941_v23  ;;  %v499_v23 = vld [vmem:[#allocation11 + $0x708] sm:$0xff] }
 0x209   :  { %3872 = vmatprep.subr.bf16.mxu1 %v13934_v28  ;;  %v13878_v28 = vcombine.high %v371_v21, %v375_v15  ;;  %v14005_v38 = vcombine.low %v499_v23, %v503_v25  ;;  %v487_v56 = vld [vmem:[#allocation11 + $0x6a8] sm:$0xff]  ;;  %v456_v21 = vld [vmem:[#allocation11 + $0x5b0] sm:$0xff] }
 0x20a   :  { %3830 = vmatpush1.bf16.msra.mxu0 %v13805_v31  ;;  %v367_v31 = vld [vmem:[#allocation11 + $0x2e8] sm:$0xff] }
 0x20b   :  { %3831 = vmatprep.subr.bf16.mxu0 %v13798_v34  ;;  %v14006_v34 = vcombine.high %v499_v23, %v503_v25  ;;  %v13869_v48 = vcombine.low %v363_v29, %v367_v31  ;;  %v347_v33 = vld [vmem:[#allocation11 + $0x248] sm:$0xff]  ;;  %v316_v25 = vld [vmem:[#allocation11 + $0x150] sm:$0xff] }
 0x20c   :  { %3873 = vmatpush1.bf16.msra.mxu1 %v13933_v32  ;;  %v491_v32 = vld [vmem:[#allocation11 + $0x6c8] sm:$0xff] }
 0x20d   :  { %3874 = vmatprep.subr.bf16.mxu1 %v13926_v40  ;;  %v13870_v40 = vcombine.high %v363_v29, %v367_v31  ;;  %v13997_v49 = vcombine.low %v491_v32, %v495_v35  ;;  %v479_v55 = vld [vmem:[#allocation11 + $0x668] sm:$0xff]  ;;  %v448_v29 = vld [vmem:[#allocation11 + $0x570] sm:$0xff] }
 0x20e   :  { %3832 = vmatpush1.bf16.msra.mxu0 %v13797_v42  ;;  %v359_v42 = vld [vmem:[#allocation11 + $0x2a8] sm:$0xff] }
 0x20f   :  { %3833 = vmatprep.subr.bf16.mxu0 %v13790_v47  ;;  %v13998_v47 = vcombine.high %v491_v32, %v495_v35  ;;  %v13861_v57 = vcombine.low %v355_v41, %v359_v42  ;;  %v339_v62 = vld [vmem:[#allocation11 + $0x208] sm:$0xff] }
 0x210   :  { %3875 = vmatpush1.bf16.msra.mxu1 %v13925_v44  ;;  %v483_v44 = vld [vmem:[#allocation11 + $0x688] sm:$0xff] }
 0x211   :  { %3876 = vmatprep.subr.bf16.mxu1 %v13918_v50  ;;  %v13862_v50 = vcombine.high %v355_v41, %v359_v42  ;;  %v13989_v58 = vcombine.low %v483_v44, %v487_v56  ;;  %v471_v2 = vld [vmem:[#allocation11 + $0x628] sm:$0xff]  ;;  %v308_v41 = vld [vmem:[#allocation11 + $0x110] sm:$0xff] }
 0x212   :  { %3834 = vmatpush1.bf16.msra.mxu0 %v13789_v51  ;;  %v351_v51 = vld [vmem:[#allocation11 + $0x268] sm:$0xff]  ;;  %v312_v42 = vld [vmem:[#allocation11 + $0x130] sm:$0xff] }
 0x213   :  { %3835 = vmatprep.subr.bf16.mxu0 %v13782_v54  ;;  %v13990_v54 = vcombine.high %v483_v44, %v487_v56  ;;  %v13853_v3 = vcombine.low %v347_v33, %v351_v51  ;;  %v436_v44 = vld [vmem:[#allocation11 + $0x510] sm:$0xff] }
 0x214   :  { %3877 = vmatpush1.bf16.msra.mxu1 %v13917_v52  ;;  %v475_v52 = vld [vmem:[#allocation11 + $0x648] sm:$0xff] }
 0x215   :  { %3878 = vmatprep.subr.bf16.mxu1 %v13910_v60  ;;  %v13854_v60 = vcombine.high %v347_v33, %v351_v51  ;;  %v13981_v4 = vcombine.low %v475_v52, %v479_v55 }
 0x216   :  { %3836 = vmatpush1.bf16.msra.mxu0 %v13781_v63  ;;  %v343_v63 = vld [vmem:[#allocation11 + $0x228] sm:$0xff] }
 0x217   :  { %3837 = vmatprep.subr.bf16.mxu0 %v13902_v1  ;;  %v13982_v1 = vcombine.high %v475_v52, %v479_v55  ;;  %v13845_v14 = vcombine.low %v339_v62, %v343_v63 }
 0x218   :  { %3879 = vmatpush1.bf16.msra.mxu1 %v13909_v0  ;;  %v467_v0 = vld [vmem:[#allocation11 + $0x608] sm:$0xff] }
 0x219   :  { %3880 = vmatprep.subr.bf16.mxu1 %v14030_v5  ;;  %v13846_v5 = vcombine.high %v339_v62, %v343_v63  ;;  %v13973_v16 = vcombine.low %v467_v0, %v471_v2  ;;  %v300_v62 = vld [vmem:[#allocation11 + $0xd0] sm:$0xff] }
 0x21a   :  { %3838 = vmatpush2.bf16.msra.mxu0 %v13901_v8  ;;  %v336_v8 = vld [vmem:[#allocation11 + $0x1f0] sm:$0xff] }
 0x21b   :  { %3839 = vmatprep.subr.bf16.mxu0 %v13894_v10  ;;  %v13974_v10 = vcombine.high %v467_v0, %v471_v2  ;;  %v13839_v15 = vcombine.low %v332_v6, %v336_v8  ;;  %v304_v63 = vld [vmem:[#allocation11 + $0xf0] sm:$0xff] }
 0x21c   :  { %3881 = vmatpush2.bf16.msra.mxu1 %v14029_v9  ;;  %v460_v9 = vld [vmem:[#allocation11 + $0x5d0] sm:$0xff] }
 0x21d   :  { %3882 = vmatprep.subr.bf16.mxu1 %v14022_v17  ;;  %v13840_v17 = vcombine.high %v332_v6, %v336_v8  ;;  %v13967_v23 = vcombine.low %v460_v9, %v464_v13  ;;  %v432_v2 = vld [vmem:[#allocation11 + $0x4f0] sm:$0xff] }
 0x21e   :  { %3840 = vmatpush2.bf16.msra.mxu0 %v13893_v19  ;;  %v328_v19 = vld [vmem:[#allocation11 + $0x1b0] sm:$0xff] }
 0x21f   :  { %3841 = vmatprep.subr.bf16.mxu0 %v13886_v39  ;;  %v13968_v39 = vcombine.high %v460_v9, %v464_v13  ;;  %v292_v8 = vld [vmem:[#allocation11 + $0x90] sm:$0xff] }
 0x220   :  { %3883 = vmatpush2.bf16.msra.mxu1 %v14021_v20  ;;  %v452_v20 = vld [vmem:[#allocation11 + $0x590] sm:$0xff] }
 0x221   :  { %3884 = vmatprep.subr.bf16.mxu1 %v14014_v24  ;;  %v13832_v24 = vcombine.high %v324_v18, %v328_v19  ;;  %v296_v9 = vld [vmem:[#allocation11 + $0xb0] sm:$0xff] }
 0x222   :  { %3842 = vmatpush2.bf16.msra.mxu0 %v13885_v26  ;;  %v320_v26 = vld [vmem:[#allocation11 + $0x170] sm:$0xff] }
 0x223   :  { %3843 = vmatprep.subr.bf16.mxu0 %v13878_v28  ;;  %v13960_v28 = vcombine.high %v452_v20, %v456_v21  ;;  %v13823_v51 = vcombine.low %v316_v25, %v320_v26  ;;  %v424_v13 = vld [vmem:[#allocation11 + $0x4b0] sm:$0xff] }
 0x224   :  { %3885 = vmatpush2.bf16.msra.mxu1 %v14013_v27  ;;  %v444_v27 = vld [vmem:[#allocation11 + $0x550] sm:$0xff] }
 0x225   :  { %3886 = vmatprep.subr.bf16.mxu1 %v14006_v34  ;;  %v13831_v34 = vcombine.low %v324_v18, %v328_v19  ;;  %v13952_v56 = vcombine.high %v444_v27, %v448_v29  ;;  %v13951_v55 = vcombine.low %v444_v27, %v448_v29  ;;  %v284_v19 = vld [vmem:[#allocation11 + $0x50] sm:$0xff] }
 0x226   :  { %3844 = vmatpush2.bf16.msra.mxu0 %v13877_v36  ;;  %v280_v27 = vld [vmem:[#allocation11 + $0x30] sm:$0xff] }
 0x227   :  { %3845 = vmatprep.subr.bf16.mxu0 %v13870_v40  ;;  %v13824_v40 = vcombine.high %v316_v25, %v320_v26  ;;  %v276_v26 = vld [vmem:[#allocation11 + $0x10] sm:$0xff] }
 0x228   :  { %3887 = vmatpush2.bf16.msra.mxu1 %v14005_v38  ;;  %v13959_v38 = vcombine.low %v452_v20, %v456_v21  ;;  %v288_v20 = vld [vmem:[#allocation11 + $0x70] sm:$0xff] }
 0x229   :  { %3888 = vmatprep.subr.bf16.mxu1 %v13998_v47  ;;  %v416_v21 = vld [vmem:[#allocation11 + $0x470] sm:$0xff] }
 0x22a   :  { %3846 = vmatpush2.bf16.msra.mxu0 %v13869_v48  ;;  %v440_v48 = vld [vmem:[#allocation11 + $0x530] sm:$0xff] }
 0x22b   :  { %3847 = vmatprep.subr.bf16.mxu0 %v13862_v50  ;;  %v16810_v50 = vld [vmem:[#allocation5 + $0xc] ss:$16 sps:$4 sm:$0xff]   ;;  %v408_v29 = vld [vmem:[#allocation11 + $0x430] sm:$0xff] }
 0x22c   :  { %3889 = vmatpush2.bf16.msra.mxu1 %v13997_v49 }
 0x22d   :  { %3890 = vmatprep.subr.bf16.mxu1 %v13990_v54 }
 0x22e   :  { %3848 = vmatpush2.bf16.msra.mxu0 %v13861_v57  ;;  %v13816_v57 = vcombine.high %v308_v41, %v312_v42 }
 0x22f   :  { %3849 = vmatprep.subr.bf16.mxu0 %v13854_v60  ;;  %v13944_v60 = vcombine.high %v436_v44, %v440_v48 }
 0x230   :  { %3891 = vmatpush2.bf16.msra.mxu1 %v13989_v58 }
 0x231   :  { %3892 = vmatprep.subr.bf16.mxu1 %v13982_v1  ;;  %v428_v1 = vld [vmem:[#allocation11 + $0x4d0] sm:$0xff] }
 0x232   :  { %3850 = vmatpush2.bf16.msra.mxu0 %v13853_v3  ;;  %v13815_v3 = vcombine.low %v308_v41, %v312_v42  ;;  %v13936_v6 = vcombine.high %v428_v1, %v432_v2  ;;  %v524_v41 = vld [vmem:[#allocation11 + $0x7d0] sm:$0xff] }
 0x233   :  { %3851 = vmatprep.subr.bf16.mxu0 %v13846_v5  ;;  %v13808_v5 = vcombine.high %v300_v62, %v304_v63  ;;  %v528_v42 = vld [vmem:[#allocation11 + $0x7f0] sm:$0xff] }
 0x234   :  { %3893 = vmatpush2.bf16.msra.mxu1 %v13981_v4  ;;  %v13943_v4 = vcombine.low %v436_v44, %v440_v48  ;;  %v13783_v44 = vcombine.low %v276_v26, %v280_v27  ;;  %v14032_v48 = vcombine.high %v524_v41, %v528_v42 }
 0x235   :  { %3894 = vmatprep.subr.bf16.mxu1 %v13974_v10  ;;  %v420_v10 = vld [vmem:[#allocation11 + $0x490] sm:$0xff] }
 0x236   :  { %3852 = vmatpush2.bf16.msra.mxu0 %v13845_v14  ;;  %v13807_v14 = vcombine.low %v300_v62, %v304_v63  ;;  %v13928_v18 = vcombine.high %v420_v10, %v424_v13  ;;  %v380_v62 = vld [vmem:[#allocation11 + $0x350] sm:$0xff] }
 0x237   :  { %3907 = vmatprep.subr.bf16.mxu0 %v13840_v17  ;;  %v13800_v17 = vcombine.high %v292_v8, %v296_v9  ;;  %v384_v63 = vld [vmem:[#allocation11 + $0x370] sm:$0xff] }
 0x238   :  { %3895 = vmatpush2.bf16.msra.mxu1 %v13973_v16  ;;  %v13935_v16 = vcombine.low %v428_v1, %v432_v2  ;;  %v508_v1 = vld [vmem:[#allocation11 + $0x750] sm:$0xff] }
 0x239   :  { %3950 = vmatprep.subr.bf16.mxu1 %v13968_v39  ;;  %v2297_v31 = vpop.f32.mrf.mxu0  ;;  %3854 = vmatmul.mubr.bf16.vlgmr.msra.gmra.mxu0 %v16779_v12  ;;  %v16805_v12 = vld [vmem:[#allocation5 + $0x4] ss:$16 sps:$4 sm:$0xff]  }
 0x23a   :  { %3908 = vmatpush1.bf16.msra.mxu0 %v13839_v15  ;;  %3939 = vmatprep.mubr.bf16.mxu0 %v16805_v12  ;;  %v412_v39 = vld [vmem:[#allocation11 + $0x450] sm:$0xff]  ;;  %v13799_v15 = vcombine.low %v292_v8, %v296_v9 }
 0x23b   :  { %v2340_v32 = vpop.f32.mrf.mxu1  ;;  %3897 = vmatmul.mubr.bf16.vlgmr.msra.gmra.mxu1 %v16783_v46  ;;  %v2299_v36 = vpop.f32.mrf.mxu0  ;;  %3909 = vmatprep.subr.bf16.mxu0 %v13832_v24  ;;  %v13792_v24 = vcombine.high %v284_v19, %v288_v20  ;;  %v13920_v25 = vcombine.high %v412_v39, %v416_v21  ;;  %v512_v2 = vld [vmem:[#allocation11 + $0x770] sm:$0xff] }
 0x23c   :  { %v16803_v35 = vadd.f32 %v2340_v32, %v2297_v31  ;;  %3951 = vmatpush1.bf16.msra.mxu1 %v13967_v23  ;;  %3982 = vmatprep.mubr.bf16.mxu1 %v16810_v50  ;;  %v13927_v23 = vcombine.low %v420_v10, %v424_v13  ;;  %v13791_v31 = vcombine.low %v284_v19, %v288_v20  ;;  %v372_v8 = vld [vmem:[#allocation11 + $0x310] sm:$0xff] }
 0x23d   :  { %v2342_v47 = vpop.f32.mrf.mxu1  ;;  %3952 = vmatprep.subr.bf16.mxu1 %v13960_v28  ;;  %v2301_v49 = vpop.f32.mrf.mxu0  ;;  %v404_v28 = vld [vmem:[#allocation11 + $0x410] sm:$0xff]  ;;  %v13919_v32 = vcombine.low %v412_v39, %v416_v21 }
 0x23e   :  { %v16808_v46 = vadd.f32 %v2342_v47, %v2299_v36  ;;  %3910 = vmatpush1.bf16.msra.mxu0 %v13831_v34  ;;  %v13784_v34 = vcombine.high %v276_v26, %v280_v27  ;;  %v13912_v36 = vcombine.high %v404_v28, %v408_v29  ;;  %v13911_v47 = vcombine.low %v404_v28, %v408_v29  ;;  %v376_v9 = vld [vmem:[#allocation11 + $0x330] sm:$0xff] }
 0x23f   :  { %v2344_v33 = vpop.f32.mrf.mxu1  ;;  %v2303_v54 = vpop.f32.mrf.mxu0  ;;  %3911 = vmatprep.subr.bf16.mxu0 %v13824_v40  ;;  %v400_v40 = vld [vmem:[#allocation11 + $0x3f0] sm:$0xff] }
 0x240   :  { %v16813_v52 = vadd.f32 %v2344_v33, %v2301_v49  ;;  %3953 = vmatpush1.bf16.msra.mxu1 %v13959_v38  ;;  %v396_v38 = vld [vmem:[#allocation11 + $0x3d0] sm:$0xff] }
 0x241   :  { %v2346_v58 = vpop.f32.mrf.mxu1  ;;  %3954 = vmatprep.subr.bf16.mxu1 %v13952_v56  ;;  %v13904_v56 = vcombine.high %v396_v38, %v400_v40  ;;  %v388_v49 = vld [vmem:[#allocation11 + $0x390] sm:$0xff] }
 0x242   :  { %v16815_v0 = vadd.f32 %v2346_v58, %v2303_v54  ;;  %3912 = vmatpush1.bf16.msra.mxu0 %v13823_v51  ;;  %v392_v33 = vld [vmem:[#allocation11 + $0x3b0] sm:$0xff] }
 0x243   :  { %3913 = vmatprep.subr.bf16.mxu0 %v13816_v57  ;;  %v516_v51 = vld [vmem:[#allocation11 + $0x790] sm:$0xff]  ;;  %v14031_v57 = vcombine.low %v524_v41, %v528_v42  ;;  %v13896_v58 = vcombine.high %v388_v49, %v392_v33 }
 0x244   :  { %3955 = vmatpush1.bf16.msra.mxu1 %v13951_v55  ;;  %v520_v54 = vld [vmem:[#allocation11 + $0x7b0] sm:$0xff]  ;;  %v13903_v55 = vcombine.low %v396_v38, %v400_v40 }
 0x245   :  { %3956 = vmatprep.subr.bf16.mxu1 %v13944_v60  ;;  %v14024_v60 = vcombine.high %v516_v51, %v520_v54  ;;  %v500_v10 = vld [vmem:[#allocation11 + $0x710] sm:$0xff] }
 0x246   :  { %3914 = vmatpush1.bf16.msra.mxu0 %v13815_v3  ;;  %v13895_v3 = vcombine.low %v388_v49, %v392_v33  ;;  %v504_v13 = vld [vmem:[#allocation11 + $0x730] sm:$0xff] }
 0x247   :  { %3915 = vmatprep.subr.bf16.mxu0 %v13808_v5  ;;  %v13888_v5 = vcombine.high %v380_v62, %v384_v63  ;;  %v364_v19 = vld [vmem:[#allocation11 + $0x2d0] sm:$0xff] }
 0x248   :  { %3957 = vmatpush1.bf16.msra.mxu1 %v13943_v4  ;;  %v14023_v4 = vcombine.low %v516_v51, %v520_v54  ;;  %v368_v20 = vld [vmem:[#allocation11 + $0x2f0] sm:$0xff] }
 0x249   :  { %3958 = vmatprep.subr.bf16.mxu1 %v13936_v6  ;;  %v14016_v6 = vcombine.high %v508_v1, %v512_v2  ;;  %v492_v39 = vld [vmem:[#allocation11 + $0x6d0] sm:$0xff] }
 0x24a   :  { %3916 = vmatpush1.bf16.msra.mxu0 %v13807_v14  ;;  %v13887_v14 = vcombine.low %v380_v62, %v384_v63  ;;  %v496_v21 = vld [vmem:[#allocation11 + $0x6f0] sm:$0xff]  ;;  %v333_v62 = vld [vmem:[#allocation11 + $0x1d8] sm:$0xff] }
 0x24b   :  { %3917 = vmatprep.subr.bf16.mxu0 %v13800_v17  ;;  %v13880_v17 = vcombine.high %v372_v8, %v376_v9  ;;  %v356_v26 = vld [vmem:[#allocation11 + $0x290] sm:$0xff]  ;;  %v337_v63 = vld [vmem:[#allocation11 + $0x1f8] sm:$0xff] }
 0x24c   :  { %3959 = vmatpush1.bf16.msra.mxu1 %v13935_v16  ;;  %v14015_v16 = vcombine.low %v508_v1, %v512_v2  ;;  %v360_v27 = vld [vmem:[#allocation11 + $0x2b0] sm:$0xff]  ;;  %v461_v1 = vld [vmem:[#allocation11 + $0x5d8] sm:$0xff] }
 0x24d   :  { %3960 = vmatprep.subr.bf16.mxu1 %v13928_v18  ;;  %v14008_v18 = vcombine.high %v500_v10, %v504_v13  ;;  %v484_v28 = vld [vmem:[#allocation11 + $0x690] sm:$0xff]  ;;  %v465_v2 = vld [vmem:[#allocation11 + $0x5f8] sm:$0xff] }
 0x24e   :  { %3918 = vmatpush1.bf16.msra.mxu0 %v13799_v15  ;;  %v13879_v15 = vcombine.low %v372_v8, %v376_v9  ;;  %v488_v29 = vld [vmem:[#allocation11 + $0x6b0] sm:$0xff]  ;;  %v325_v8 = vld [vmem:[#allocation11 + $0x198] sm:$0xff] }
 0x24f   :  { %3919 = vmatprep.subr.bf16.mxu0 %v13792_v24  ;;  %v13872_v24 = vcombine.high %v364_v19, %v368_v20  ;;  %v348_v38 = vld [vmem:[#allocation11 + $0x250] sm:$0xff]  ;;  %v329_v9 = vld [vmem:[#allocation11 + $0x1b8] sm:$0xff] }
 0x250   :  { %3961 = vmatpush1.bf16.msra.mxu1 %v13927_v23  ;;  %v14007_v23 = vcombine.low %v500_v10, %v504_v13  ;;  %v352_v40 = vld [vmem:[#allocation11 + $0x270] sm:$0xff]  ;;  %v453_v10 = vld [vmem:[#allocation11 + $0x598] sm:$0xff] }
 0x251   :  { %3962 = vmatprep.subr.bf16.mxu1 %v13920_v25  ;;  %v14000_v25 = vcombine.high %v492_v39, %v496_v21  ;;  %v476_v41 = vld [vmem:[#allocation11 + $0x650] sm:$0xff]  ;;  %v457_v13 = vld [vmem:[#allocation11 + $0x5b8] sm:$0xff] }
 0x252   :  { %3920 = vmatpush1.bf16.msra.mxu0 %v13791_v31  ;;  %v13871_v31 = vcombine.low %v364_v19, %v368_v20  ;;  %v480_v42 = vld [vmem:[#allocation11 + $0x670] sm:$0xff]  ;;  %v317_v19 = vld [vmem:[#allocation11 + $0x158] sm:$0xff] }
 0x253   :  { %3921 = vmatprep.subr.bf16.mxu0 %v13784_v34  ;;  %v13864_v34 = vcombine.high %v356_v26, %v360_v27  ;;  %v340_v49 = vld [vmem:[#allocation11 + $0x210] sm:$0xff]  ;;  %v321_v20 = vld [vmem:[#allocation11 + $0x178] sm:$0xff] }
 0x254   :  { %3963 = vmatpush1.bf16.msra.mxu1 %v13919_v32  ;;  %v13999_v32 = vcombine.low %v492_v39, %v496_v21  ;;  %v344_v33 = vld [vmem:[#allocation11 + $0x230] sm:$0xff] }
 0x255   :  { %3964 = vmatprep.subr.bf16.mxu1 %v13912_v36  ;;  %v13992_v36 = vcombine.high %v484_v28, %v488_v29  ;;  %v468_v51 = vld [vmem:[#allocation11 + $0x610] sm:$0xff] }
 0x256   :  { %3922 = vmatpush1.bf16.msra.mxu0 %v13783_v44  ;;  %v13863_v44 = vcombine.low %v356_v26, %v360_v27  ;;  %v472_v54 = vld [vmem:[#allocation11 + $0x630] sm:$0xff]  ;;  %v13833_v26 = vcombine.low %v325_v8, %v329_v9 }
 0x257   :  { %3923 = vmatprep.subr.bf16.mxu0 %v13904_v56  ;;  %v13856_v56 = vcombine.high %v348_v38, %v352_v40  ;;  %v16817_v21 = vld [vmem:[#allocation5] ss:$16 sps:$4 sm:$0xff]  }
 0x258   :  { %3965 = vmatpush1.bf16.msra.mxu1 %v13911_v47  ;;  %v13991_v47 = vcombine.low %v484_v28, %v488_v29  ;;  %v13961_v29 = vcombine.low %v453_v10, %v457_v13 }
 0x259   :  { %3966 = vmatprep.subr.bf16.mxu1 %v14032_v48  ;;  %v13984_v48 = vcombine.high %v476_v41, %v480_v42 }
 0x25a   :  { %3924 = vmatpush2.bf16.msra.mxu0 %v13903_v55  ;;  %v13855_v55 = vcombine.low %v348_v38, %v352_v40  ;;  %v313_v38 = vld [vmem:[#allocation11 + $0x138] sm:$0xff] }
 0x25b   :  { %3925 = vmatprep.subr.bf16.mxu0 %v13896_v58  ;;  %v13848_v58 = vcombine.high %v340_v49, %v344_v33 }
 0x25c   :  { %3967 = vmatpush2.bf16.msra.mxu1 %v14031_v57  ;;  %v13983_v57 = vcombine.low %v476_v41, %v480_v42  ;;  %v437_v42 = vld [vmem:[#allocation11 + $0x518] sm:$0xff] }
 0x25d   :  { %3968 = vmatprep.subr.bf16.mxu1 %v14024_v60  ;;  %v13976_v60 = vcombine.high %v468_v51, %v472_v54 }
 0x25e   :  { %3926 = vmatpush2.bf16.msra.mxu0 %v13895_v3  ;;  %v13847_v3 = vcombine.low %v340_v49, %v344_v33 }
 0x25f   :  { %3927 = vmatprep.subr.bf16.mxu0 %v13888_v5  ;;  %v13842_v5 = vcombine.high %v333_v62, %v337_v63 }
 0x260   :  { %3969 = vmatpush2.bf16.msra.mxu1 %v14023_v4  ;;  %v13975_v4 = vcombine.low %v468_v51, %v472_v54 }
 0x261   :  { %3970 = vmatprep.subr.bf16.mxu1 %v14016_v6  ;;  %v13970_v6 = vcombine.high %v461_v1, %v465_v2 }
 0x262   :  { %3928 = vmatpush2.bf16.msra.mxu0 %v13887_v14  ;;  %v13841_v14 = vcombine.low %v333_v62, %v337_v63  ;;  %v433_v62 = vld [vmem:[#allocation11 + $0x4f8] sm:$0xff] }
 0x263   :  { %3929 = vmatprep.subr.bf16.mxu0 %v13880_v17  ;;  %v13834_v17 = vcombine.high %v325_v8, %v329_v9 }
 0x264   :  { %3971 = vmatpush2.bf16.msra.mxu1 %v14015_v16  ;;  %v13969_v16 = vcombine.low %v461_v1, %v465_v2 }
 0x265   :  { %3972 = vmatprep.subr.bf16.mxu1 %v14008_v18  ;;  %v13962_v18 = vcombine.high %v453_v10, %v457_v13 }
 0x266   :  { %3930 = vmatpush2.bf16.msra.mxu0 %v13879_v15  ;;  %v445_v15 = vld [vmem:[#allocation11 + $0x558] sm:$0xff] }
 0x267   :  { %3931 = vmatprep.subr.bf16.mxu0 %v13872_v24 }
 0x268   :  { %3973 = vmatpush2.bf16.msra.mxu1 %v14007_v23  ;;  %v449_v23 = vld [vmem:[#allocation11 + $0x578] sm:$0xff] }
 0x269   :  { %3974 = vmatprep.subr.bf16.mxu1 %v14000_v25  ;;  %v16820_v25 = vld [vmem:[#allocation5 + $0x8] ss:$16 sps:$4 sm:$0xff]   ;;  %v13953_v33 = vcombine.low %v445_v15, %v449_v23 }
 0x26a   :  { %3932 = vmatpush2.bf16.msra.mxu0 %v13871_v31  ;;  %v13826_v31 = vcombine.high %v317_v19, %v321_v20 }
 0x26b   :  { %3933 = vmatprep.subr.bf16.mxu0 %v13864_v34  ;;  %v13954_v34 = vcombine.high %v445_v15, %v449_v23  ;;  %v277_v23 = vld [vmem:[#allocation11 + $0x18] sm:$0xff] }
 0x26c   :  { %3975 = vmatpush2.bf16.msra.mxu1 %v13999_v32 }
 0x26d   :  { %3976 = vmatprep.subr.bf16.mxu1 %v13992_v36  ;;  %v309_v36 = vld [vmem:[#allocation11 + $0x118] sm:$0xff] }
 0x26e   :  { %3934 = vmatpush2.bf16.msra.mxu0 %v13863_v44  ;;  %v441_v44 = vld [vmem:[#allocation11 + $0x538] sm:$0xff]  ;;  %v13818_v51 = vcombine.high %v309_v36, %v313_v38 }
 0x26f   :  { %3935 = vmatprep.subr.bf16.mxu0 %v13856_v56  ;;  %v13825_v56 = vcombine.low %v317_v19, %v321_v20  ;;  %v13945_v63 = vcombine.low %v437_v42, %v441_v44 }
 0x270   :  { %3977 = vmatpush2.bf16.msra.mxu1 %v13991_v47 }
 0x271   :  { %3978 = vmatprep.subr.bf16.mxu1 %v13984_v48 }
 0x272   :  { %3936 = vmatpush2.bf16.msra.mxu0 %v13855_v55  ;;  %v301_v55 = vld [vmem:[#allocation11 + $0xd8] sm:$0xff] }
 0x273   :  { %3937 = vmatprep.subr.bf16.mxu0 %v13848_v58 }
 0x274   :  { %3979 = vmatpush2.bf16.msra.mxu1 %v13983_v57  ;;  %v305_v57 = vld [vmem:[#allocation11 + $0xf8] sm:$0xff] }
 0x275   :  { %3980 = vmatprep.subr.bf16.mxu1 %v13976_v60  ;;  %v429_v60 = vld [vmem:[#allocation11 + $0x4d8] sm:$0xff]  ;;  %v13810_v1 = vcombine.high %v301_v55, %v305_v57  ;;  %v13809_v8 = vcombine.low %v301_v55, %v305_v57 }
 0x276   :  { %3938 = vmatpush2.bf16.msra.mxu0 %v13847_v3  ;;  %v13938_v2 = vcombine.high %v429_v60, %v433_v62  ;;  %v293_v3 = vld [vmem:[#allocation11 + $0x98] sm:$0xff]  ;;  %v13937_v9 = vcombine.low %v429_v60, %v433_v62 }
 0x277   :  { %3993 = vmatprep.subr.bf16.mxu0 %v13842_v5  ;;  %v421_v5 = vld [vmem:[#allocation11 + $0x498] sm:$0xff] }
 0x278   :  { %3981 = vmatpush2.bf16.msra.mxu1 %v13975_v4  ;;  %v297_v4 = vld [vmem:[#allocation11 + $0xb8] sm:$0xff] }
 0x279   :  { %4036 = vmatprep.subr.bf16.mxu1 %v13970_v6  ;;  %v2383_v39 = vpop.f32.mrf.mxu0  ;;  %3940 = vmatmul.mubr.bf16.vlgmr.msra.gmra.mxu0 %v16817_v21  ;;  %v425_v6 = vld [vmem:[#allocation11 + $0x4b8] sm:$0xff]  ;;  %v13802_v10 = vcombine.high %v293_v3, %v297_v4  ;;  %v13801_v19 = vcombine.low %v293_v3, %v297_v4 }
 0x27a   :  { %3994 = vmatpush1.bf16.msra.mxu0 %v13841_v14  ;;  %4025 = vmatprep.mubr.bf16.mxu0 %v16805_v12  ;;  %v13946_v12 = vcombine.high %v437_v42, %v441_v44  ;;  %v13930_v13 = vcombine.high %v421_v5, %v425_v6  ;;  %v285_v14 = vld [vmem:[#allocation11 + $0x58] sm:$0xff]  ;;  %v13929_v20 = vcombine.low %v421_v5, %v425_v6 }
 0x27b   :  { %v2426_v24 = vpop.f32.mrf.mxu1  ;;  %3983 = vmatmul.mubr.bf16.vlgmr.msra.gmra.mxu1 %v16820_v25  ;;  %v2385_v28 = vpop.f32.mrf.mxu0  ;;  %3995 = vmatprep.subr.bf16.mxu0 %v13834_v17  ;;  %v413_v17 = vld [vmem:[#allocation11 + $0x458] sm:$0xff] }
 0x27c   :  { %v16823_v27 = vadd.f32 %v2426_v24, %v2383_v39  ;;  %4037 = vmatpush1.bf16.msra.mxu1 %v13969_v16  ;;  %4068 = vmatprep.mubr.bf16.mxu1 %v16810_v50  ;;  %v13817_v50 = vcombine.low %v309_v36, %v313_v38  ;;  %v289_v16 = vld [vmem:[#allocation11 + $0x78] sm:$0xff] }
 0x27d   :  { %v2428_v32 = vpop.f32.mrf.mxu1  ;;  %4038 = vmatprep.subr.bf16.mxu1 %v13962_v18  ;;  %v2387_v41 = vpop.f32.mrf.mxu0  ;;  %v417_v18 = vld [vmem:[#allocation11 + $0x478] sm:$0xff]  ;;  %v13794_v39 = vcombine.high %v285_v14, %v289_v16 }
 0x27e   :  { %v16826_v40 = vadd.f32 %v2428_v32, %v2385_v28  ;;  %3996 = vmatpush1.bf16.msra.mxu0 %v13833_v26  ;;  %v13922_v15 = vcombine.high %v413_v17, %v417_v18  ;;  %v281_v24 = vld [vmem:[#allocation11 + $0x38] sm:$0xff] }
 0x27f   :  { %v2430_v47 = vpop.f32.mrf.mxu1  ;;  %v2389_v49 = vpop.f32.mrf.mxu0  ;;  %3997 = vmatprep.subr.bf16.mxu0 %v13826_v31  ;;  %v405_v26 = vld [vmem:[#allocation11 + $0x418] sm:$0xff]  ;;  %v13921_v31 = vcombine.low %v413_v17, %v417_v18  ;;  %v13786_v32 = vcombine.high %v277_v23, %v281_v24  ;;  %v13785_v44 = vcombine.low %v277_v23, %v281_v24 }
 0x280   :  { %v16829_v48 = vadd.f32 %v2430_v47, %v2387_v41  ;;  %4039 = vmatpush1.bf16.msra.mxu1 %v13961_v29  ;;  %v409_v28 = vld [vmem:[#allocation11 + $0x438] sm:$0xff]  ;;  %v13793_v29 = vcombine.low %v285_v14, %v289_v16 }
 0x281   :  { %v2432_v54 = vpop.f32.mrf.mxu1  ;;  %4040 = vmatprep.subr.bf16.mxu1 %v13954_v34  ;;  %v13914_v34 = vcombine.high %v405_v26, %v409_v28  ;;  %v397_v36 = vld [vmem:[#allocation11 + $0x3d8] sm:$0xff]  ;;  %v13913_v47 = vcombine.low %v405_v26, %v409_v28 }
 0x282   :  { %v16831_v58 = vadd.f32 %v2432_v54, %v2389_v49  ;;  %3998 = vmatpush1.bf16.msra.mxu0 %v13825_v56  ;;  %v401_v38 = vld [vmem:[#allocation11 + $0x3f8] sm:$0xff] }
 0x283   :  { %3999 = vmatprep.subr.bf16.mxu0 %v13818_v51  ;;  %v525_v41 = vld [vmem:[#allocation11 + $0x7d8] sm:$0xff]  ;;  %v13906_v56 = vcombine.high %v397_v36, %v401_v38  ;;  %v13905_v55 = vcombine.low %v397_v36, %v401_v38 }
 0x284   :  { %4041 = vmatpush1.bf16.msra.mxu1 %v13953_v33  ;;  %v529_v42 = vld [vmem:[#allocation11 + $0x7f8] sm:$0xff] }
 0x285   :  { %4042 = vmatprep.subr.bf16.mxu1 %v13946_v12  ;;  %v14034_v49 = vcombine.high %v525_v41, %v529_v42  ;;  %v389_v33 = vld [vmem:[#allocation11 + $0x398] sm:$0xff]  ;;  %v14033_v57 = vcombine.low %v525_v41, %v529_v42 }
 0x286   :  { %4000 = vmatpush1.bf16.msra.mxu0 %v13817_v50  ;;  %v393_v51 = vld [vmem:[#allocation11 + $0x3b8] sm:$0xff] }
 0x287   :  { %4001 = vmatprep.subr.bf16.mxu0 %v13810_v1  ;;  %v517_v54 = vld [vmem:[#allocation11 + $0x798] sm:$0xff]  ;;  %v13898_v60 = vcombine.high %v389_v33, %v393_v51  ;;  %v13897_v3 = vcombine.low %v389_v33, %v393_v51 }
 0x288   :  { %4043 = vmatpush1.bf16.msra.mxu1 %v13945_v63  ;;  %v521_v12 = vld [vmem:[#allocation11 + $0x7b8] sm:$0xff] }
 0x289   :  { %4044 = vmatprep.subr.bf16.mxu1 %v13938_v2  ;;  %v14026_v62 = vcombine.high %v517_v54, %v521_v12  ;;  %v381_v50 = vld [vmem:[#allocation11 + $0x358] sm:$0xff]  ;;  %v14025_v4 = vcombine.low %v517_v54, %v521_v12 }
 0x28a   :  { %4002 = vmatpush1.bf16.msra.mxu0 %v13809_v8  ;;  %v385_v63 = vld [vmem:[#allocation11 + $0x378] sm:$0xff] }
 0x28b   :  { %4003 = vmatprep.subr.bf16.mxu0 %v13802_v10  ;;  %v509_v1 = vld [vmem:[#allocation11 + $0x758] sm:$0xff]  ;;  %v13890_v5 = vcombine.high %v381_v50, %v385_v63  ;;  %v13889_v14 = vcombine.low %v381_v50, %v385_v63 }
 0x28c   :  { %4045 = vmatpush1.bf16.msra.mxu1 %v13937_v9  ;;  %v513_v2 = vld [vmem:[#allocation11 + $0x778] sm:$0xff] }
 0x28d   :  { %4046 = vmatprep.subr.bf16.mxu1 %v13930_v13  ;;  %v14018_v6 = vcombine.high %v509_v1, %v513_v2  ;;  %v373_v8 = vld [vmem:[#allocation11 + $0x318] sm:$0xff]  ;;  %v14017_v16 = vcombine.low %v509_v1, %v513_v2 }
 0x28e   :  { %4004 = vmatpush1.bf16.msra.mxu0 %v13801_v19  ;;  %v377_v9 = vld [vmem:[#allocation11 + $0x338] sm:$0xff] }
 0x28f   :  { %4005 = vmatprep.subr.bf16.mxu0 %v13794_v39  ;;  %v501_v10 = vld [vmem:[#allocation11 + $0x718] sm:$0xff]  ;;  %v13882_v17 = vcombine.high %v373_v8, %v377_v9  ;;  %v13881_v23 = vcombine.low %v373_v8, %v377_v9 }
 0x290   :  { %4047 = vmatpush1.bf16.msra.mxu1 %v13929_v20  ;;  %v505_v13 = vld [vmem:[#allocation11 + $0x738] sm:$0xff] }
 0x291   :  { %4048 = vmatprep.subr.bf16.mxu1 %v13922_v15  ;;  %v14010_v18 = vcombine.high %v501_v10, %v505_v13  ;;  %v365_v19 = vld [vmem:[#allocation11 + $0x2d8] sm:$0xff]  ;;  %v14009_v24 = vcombine.low %v501_v10, %v505_v13 }
 0x292   :  { %4006 = vmatpush1.bf16.msra.mxu0 %v13793_v29  ;;  %v369_v20 = vld [vmem:[#allocation11 + $0x2f8] sm:$0xff] }
 0x293   :  { %4007 = vmatprep.subr.bf16.mxu0 %v13786_v32  ;;  %v493_v39 = vld [vmem:[#allocation11 + $0x6d8] sm:$0xff]  ;;  %v13874_v26 = vcombine.high %v365_v19, %v369_v20  ;;  %v13873_v36 = vcombine.low %v365_v19, %v369_v20 }
 0x294   :  { %4049 = vmatpush1.bf16.msra.mxu1 %v13921_v31  ;;  %v497_v15 = vld [vmem:[#allocation11 + $0x6f8] sm:$0xff] }
 0x295   :  { %4050 = vmatprep.subr.bf16.mxu1 %v13914_v34  ;;  %v14002_v28 = vcombine.high %v493_v39, %v497_v15  ;;  %v357_v29 = vld [vmem:[#allocation11 + $0x298] sm:$0xff]  ;;  %v14001_v38 = vcombine.low %v493_v39, %v497_v15 }
 0x296   :  { %4008 = vmatpush1.bf16.msra.mxu0 %v13785_v44  ;;  %v361_v31 = vld [vmem:[#allocation11 + $0x2b8] sm:$0xff] }
 0x297   :  { %4009 = vmatprep.subr.bf16.mxu0 %v13906_v56  ;;  %v485_v32 = vld [vmem:[#allocation11 + $0x698] sm:$0xff]  ;;  %v13866_v41 = vcombine.high %v357_v29, %v361_v31  ;;  %v13865_v33 = vcombine.low %v357_v29, %v361_v31  ;;  %v4256_v29 = vld [vmem:[#allocation11 + $0x1560] sm:$0xff] }
 0x298   :  { %4051 = vmatpush1.bf16.msra.mxu1 %v13913_v47  ;;  %v489_v34 = vld [vmem:[#allocation11 + $0x6b8] sm:$0xff] }
 0x299   :  { %4052 = vmatprep.subr.bf16.mxu1 %v14034_v49  ;;  %v13994_v42 = vcombine.high %v485_v32, %v489_v34  ;;  %v349_v44 = vld [vmem:[#allocation11 + $0x258] sm:$0xff]  ;;  %v13993_v51 = vcombine.low %v485_v32, %v489_v34 }
 0x29a   :  { %4010 = vmatpush2.bf16.msra.mxu0 %v13905_v55  ;;  %v353_v47 = vld [vmem:[#allocation11 + $0x278] sm:$0xff] }
 0x29b   :  { %4011 = vmatprep.subr.bf16.mxu0 %v13898_v60  ;;  %v477_v56 = vld [vmem:[#allocation11 + $0x658] sm:$0xff]  ;;  %v13858_v54 = vcombine.high %v349_v44, %v353_v47  ;;  %v13857_v50 = vcombine.low %v349_v44, %v353_v47  ;;  %v4244_v44 = vld [vmem:[#allocation11 + $0x1500] sm:$0xff] }
 0x29c   :  { %4053 = vmatpush2.bf16.msra.mxu1 %v14033_v57  ;;  %v481_v49 = vld [vmem:[#allocation11 + $0x678] sm:$0xff] }
 0x29d   :  { %4054 = vmatprep.subr.bf16.mxu1 %v14026_v62  ;;  %v13986_v12 = vcombine.high %v477_v56, %v481_v49  ;;  %v341_v55 = vld [vmem:[#allocation11 + $0x218] sm:$0xff]  ;;  %v13985_v63 = vcombine.low %v477_v56, %v481_v49 }
 0x29e   :  { %4012 = vmatpush2.bf16.msra.mxu0 %v13897_v3  ;;  %v345_v57 = vld [vmem:[#allocation11 + $0x238] sm:$0xff]  ;;  %v4140_v3 = vld [vmem:[#allocation11 + $0x11c0] sm:$0xff] }
 0x29f   :  { %4013 = vmatprep.subr.bf16.mxu0 %v13890_v5  ;;  %v469_v60 = vld [vmem:[#allocation11 + $0x618] sm:$0xff]  ;;  %v13850_v1 = vcombine.high %v341_v55, %v345_v57  ;;  %v4268_v5 = vld [vmem:[#allocation11 + $0x15c0] sm:$0xff]  ;;  %v13849_v8 = vcombine.low %v341_v55, %v345_v57 }
 0x2a0   :  { %4055 = vmatpush2.bf16.msra.mxu1 %v14025_v4  ;;  %v473_v62 = vld [vmem:[#allocation11 + $0x638] sm:$0xff]  ;;  %v4144_v4 = vld [vmem:[#allocation11 + $0x11e0] sm:$0xff] }
 0x2a1   :  { %4056 = vmatprep.subr.bf16.mxu1 %v14018_v6  ;;  %v13978_v2 = vcombine.high %v469_v60, %v473_v62  ;;  %v4272_v6 = vld [vmem:[#allocation11 + $0x15e0] sm:$0xff]  ;;  %v13977_v9 = vcombine.low %v469_v60, %v473_v62  ;;  %v14096_v10 = vcombine.high %v4140_v3, %v4144_v4  ;;  %v14095_v19 = vcombine.low %v4140_v3, %v4144_v4  ;;  %v16836_v31 = vld [vmem:[#allocation8 + $0xc] ss:$16 sps:$4 sm:$0xff]  }
 0x2a2   :  { %4014 = vmatpush2.bf16.msra.mxu0 %v13889_v14  ;;  %v14224_v13 = vcombine.high %v4268_v5, %v4272_v6  ;;  %v4132_v14 = vld [vmem:[#allocation11 + $0x1180] sm:$0xff]  ;;  %v14223_v20 = vcombine.low %v4268_v5, %v4272_v6 }
 0x2a3   :  { %4015 = vmatprep.subr.bf16.mxu0 %v13882_v17  ;;  %v4260_v17 = vld [vmem:[#allocation11 + $0x1580] sm:$0xff] }
 0x2a4   :  { %4057 = vmatpush2.bf16.msra.mxu1 %v14017_v16  ;;  %v4136_v16 = vld [vmem:[#allocation11 + $0x11a0] sm:$0xff] }
 0x2a5   :  { %4058 = vmatprep.subr.bf16.mxu1 %v14010_v18  ;;  %v4264_v18 = vld [vmem:[#allocation11 + $0x15a0] sm:$0xff]  ;;  %v14088_v39 = vcombine.high %v4132_v14, %v4136_v16  ;;  %v14087_v32 = vcombine.low %v4132_v14, %v4136_v16 }
 0x2a6   :  { %4016 = vmatpush2.bf16.msra.mxu0 %v13881_v23  ;;  %v14216_v15 = vcombine.high %v4260_v17, %v4264_v18  ;;  %v4124_v23 = vld [vmem:[#allocation11 + $0x1140] sm:$0xff]  ;;  %v14215_v34 = vcombine.low %v4260_v17, %v4264_v18 }
 0x2a7   :  { %4017 = vmatprep.subr.bf16.mxu0 %v13874_v26  ;;  %v16833_v26 = vld [vmem:[#allocation8 + $0x4] ss:$16 sps:$4 sm:$0xff]  }
 0x2a8   :  { %4059 = vmatpush2.bf16.msra.mxu1 %v14009_v24  ;;  %v4128_v24 = vld [vmem:[#allocation11 + $0x1160] sm:$0xff] }
 0x2a9   :  { %4060 = vmatprep.subr.bf16.mxu1 %v14002_v28  ;;  %v4252_v28 = vld [vmem:[#allocation11 + $0x1540] sm:$0xff]  ;;  %v14079_v47 = vcombine.low %v4124_v23, %v4128_v24 }
 0x2aa   :  { %4018 = vmatpush2.bf16.msra.mxu0 %v13873_v36  ;;  %v14080_v36 = vcombine.high %v4124_v23, %v4128_v24 }
 0x2ab   :  { %4019 = vmatprep.subr.bf16.mxu0 %v13866_v41  ;;  %v4116_v41 = vld [vmem:[#allocation11 + $0x1100] sm:$0xff] }
 0x2ac   :  { %4061 = vmatpush2.bf16.msra.mxu1 %v14001_v38  ;;  %v14208_v38 = vcombine.high %v4252_v28, %v4256_v29 }
 0x2ad   :  { %4062 = vmatprep.subr.bf16.mxu1 %v13994_v42  ;;  %v4120_v42 = vld [vmem:[#allocation11 + $0x1120] sm:$0xff] }
 0x2ae   :  { %4020 = vmatpush2.bf16.msra.mxu0 %v13865_v33  ;;  %v14072_v56 = vcombine.high %v4116_v41, %v4120_v42  ;;  %v4108_v33 = vld [vmem:[#allocation11 + $0x10c0] sm:$0xff]  ;;  %v14071_v55 = vcombine.low %v4116_v41, %v4120_v42 }
 0x2af   :  { %4021 = vmatprep.subr.bf16.mxu0 %v13858_v54  ;;  %v4236_v54 = vld [vmem:[#allocation11 + $0x14c0] sm:$0xff] }
 0x2b0   :  { %4063 = vmatpush2.bf16.msra.mxu1 %v13993_v51  ;;  %v4112_v51 = vld [vmem:[#allocation11 + $0x10e0] sm:$0xff] }
 0x2b1   :  { %4064 = vmatprep.subr.bf16.mxu1 %v13986_v12  ;;  %v4240_v12 = vld [vmem:[#allocation11 + $0x14e0] sm:$0xff]  ;;  %v14064_v60 = vcombine.high %v4108_v33, %v4112_v51  ;;  %v14063_v3 = vcombine.low %v4108_v33, %v4112_v51 }
 0x2b2   :  { %4022 = vmatpush2.bf16.msra.mxu0 %v13857_v50  ;;  %v14192_v62 = vcombine.high %v4236_v54, %v4240_v12  ;;  %v4100_v50 = vld [vmem:[#allocation11 + $0x1080] sm:$0xff]  ;;  %v14191_v4 = vcombine.low %v4236_v54, %v4240_v12 }
 0x2b3   :  { %4023 = vmatprep.subr.bf16.mxu0 %v13850_v1  ;;  %v4228_v1 = vld [vmem:[#allocation11 + $0x1480] sm:$0xff] }
 0x2b4   :  { %4065 = vmatpush2.bf16.msra.mxu1 %v13985_v63  ;;  %v4104_v63 = vld [vmem:[#allocation11 + $0x10a0] sm:$0xff] }
 0x2b5   :  { %4066 = vmatprep.subr.bf16.mxu1 %v13978_v2  ;;  %v4232_v2 = vld [vmem:[#allocation11 + $0x14a0] sm:$0xff]  ;;  %v14056_v5 = vcombine.high %v4100_v50, %v4104_v63  ;;  %v14055_v14 = vcombine.low %v4100_v50, %v4104_v63 }
 0x2b6   :  { %4024 = vmatpush2.bf16.msra.mxu0 %v13849_v8  ;;  %v14184_v6 = vcombine.high %v4228_v1, %v4232_v2  ;;  %v4092_v8 = vld [vmem:[#allocation11 + $0x1040] sm:$0xff]  ;;  %v14183_v16 = vcombine.low %v4228_v1, %v4232_v2 }
 0x2b7   :  { %5640 = vmatprep.subr.bf16.mxu0 %v14096_v10  ;;  %v4220_v10 = vld [vmem:[#allocation11 + $0x1440] sm:$0xff] }
 0x2b8   :  { %4067 = vmatpush2.bf16.msra.mxu1 %v13977_v9  ;;  %v4096_v9 = vld [vmem:[#allocation11 + $0x1060] sm:$0xff] }
 0x2b9   :  { %5683 = vmatprep.subr.bf16.mxu1 %v14224_v13  ;;  %4026 = vmatmul.mubr.bf16.vlgmr.msra.gmra.mxu0 %v16817_v21  ;;  %v4248_v21 = vld [vmem:[#allocation11 + $0x1520] sm:$0xff]  ;;  %v14048_v17 = vcombine.high %v4092_v8, %v4096_v9  ;;  %v14047_v23 = vcombine.low %v4092_v8, %v4096_v9 }
 0x2ba   :  { %5641 = vmatpush1.bf16.msra.mxu0 %v14095_v19  ;;  %5672 = vmatprep.mubr.bf16.mxu0 %v16833_v26  ;;  %v14200_v49 = vcombine.high %v4244_v44, %v4248_v21  ;;  %v14199_v57 = vcombine.low %v4244_v44, %v4248_v21  ;;  %v4224_v13 = vld [vmem:[#allocation11 + $0x1460] sm:$0xff] }
 0x2bb   :  { %4069 = vmatmul.mubr.bf16.vlgmr.msra.gmra.mxu1 %v16820_v25  ;;  %5642 = vmatprep.subr.bf16.mxu0 %v14088_v39  ;;  %v14207_v25 = vcombine.low %v4252_v28, %v4256_v29  ;;  %v14176_v18 = vcombine.high %v4220_v10, %v4224_v13  ;;  %v4084_v19 = vld [vmem:[#allocation11 + $0x1000] sm:$0xff]  ;;  %v14175_v24 = vcombine.low %v4220_v10, %v4224_v13 }
 0x2bc   :  { %5684 = vmatpush1.bf16.msra.mxu1 %v14223_v20  ;;  %5715 = vmatprep.mubr.bf16.mxu1 %v16836_v31  ;;  %v4088_v20 = vld [vmem:[#allocation11 + $0x1020] sm:$0xff] }
 0x2bd   :  { %5685 = vmatprep.subr.bf16.mxu1 %v14216_v15  ;;  %v4212_v39 = vld [vmem:[#allocation11 + $0x1400] sm:$0xff]  ;;  %v14040_v28 = vcombine.high %v4084_v19, %v4088_v20  ;;  %v14039_v41 = vcombine.low %v4084_v19, %v4088_v20 }
 0x2be   :  { %5643 = vmatpush1.bf16.msra.mxu0 %v14087_v32  ;;  %v4216_v15 = vld [vmem:[#allocation11 + $0x1420] sm:$0xff] }
 0x2bf   :  { %5644 = vmatprep.subr.bf16.mxu0 %v14080_v36  ;;  %v14168_v29 = vcombine.high %v4212_v39, %v4216_v15  ;;  %v4204_v32 = vld [vmem:[#allocation11 + $0x13c0] sm:$0xff]  ;;  %v14167_v42 = vcombine.low %v4212_v39, %v4216_v15 }
 0x2c0   :  { %5686 = vmatpush1.bf16.msra.mxu1 %v14215_v34  ;;  %v4208_v34 = vld [vmem:[#allocation11 + $0x13e0] sm:$0xff] }
 0x2c1   :  { %5687 = vmatprep.subr.bf16.mxu1 %v14208_v38  ;;  %v4332_v36 = vld [vmem:[#allocation11 + $0x17c0] sm:$0xff]  ;;  %v14160_v44 = vcombine.high %v4204_v32, %v4208_v34  ;;  %v14159_v33 = vcombine.low %v4204_v32, %v4208_v34 }
 0x2c2   :  { %5645 = vmatpush1.bf16.msra.mxu0 %v14079_v47  ;;  %v4336_v38 = vld [vmem:[#allocation11 + $0x17e0] sm:$0xff] }
 0x2c3   :  { %5646 = vmatprep.subr.bf16.mxu0 %v14072_v56  ;;  %v14288_v21 = vcombine.high %v4332_v36, %v4336_v38  ;;  %v4196_v47 = vld [vmem:[#allocation11 + $0x1380] sm:$0xff]  ;;  %v14287_v51 = vcombine.low %v4332_v36, %v4336_v38 }
 0x2c4   :  { %5688 = vmatpush1.bf16.msra.mxu1 %v14207_v25  ;;  %v4200_v25 = vld [vmem:[#allocation11 + $0x13a0] sm:$0xff] }
 0x2c5   :  { %5689 = vmatprep.subr.bf16.mxu1 %v14200_v49  ;;  %v4324_v56 = vld [vmem:[#allocation11 + $0x1780] sm:$0xff]  ;;  %v14152_v54 = vcombine.high %v4196_v47, %v4200_v25  ;;  %v14151_v50 = vcombine.low %v4196_v47, %v4200_v25  ;;  %v16841_v25 = vpop.f32.mrf.mxu0 }
 0x2c6   :  { %5647 = vmatpush1.bf16.msra.mxu0 %v14071_v55  ;;  %v4328_v49 = vld [vmem:[#allocation11 + $0x17a0] sm:$0xff] }
 0x2c7   :  { %5648 = vmatprep.subr.bf16.mxu0 %v14064_v60  ;;  %v14280_v12 = vcombine.high %v4324_v56, %v4328_v49  ;;  %v4188_v55 = vld [vmem:[#allocation11 + $0x1340] sm:$0xff]  ;;  %v14279_v63 = vcombine.low %v4324_v56, %v4328_v49 }
 0x2c8   :  { %5690 = vmatpush1.bf16.msra.mxu1 %v14199_v57  ;;  %v4192_v57 = vld [vmem:[#allocation11 + $0x1360] sm:$0xff] }
 0x2c9   :  { %5691 = vmatprep.subr.bf16.mxu1 %v14192_v62  ;;  %v4316_v60 = vld [vmem:[#allocation11 + $0x1740] sm:$0xff]  ;;  %v14144_v1 = vcombine.high %v4188_v55, %v4192_v57  ;;  %v14143_v8 = vcombine.low %v4188_v55, %v4192_v57 }
 0x2ca   :  { %5649 = vmatpush1.bf16.msra.mxu0 %v14063_v3  ;;  %v4320_v62 = vld [vmem:[#allocation11 + $0x1760] sm:$0xff] }
 0x2cb   :  { %5650 = vmatprep.subr.bf16.mxu0 %v14056_v5  ;;  %v14272_v2 = vcombine.high %v4316_v60, %v4320_v62  ;;  %v4180_v3 = vld [vmem:[#allocation11 + $0x1300] sm:$0xff]  ;;  %v14271_v9 = vcombine.low %v4316_v60, %v4320_v62  ;;  %v16845_v62 = vpop.f32.mrf.mxu0 }
 0x2cc   :  { %5692 = vmatpush1.bf16.msra.mxu1 %v14191_v4  ;;  %v4184_v4 = vld [vmem:[#allocation11 + $0x1320] sm:$0xff] }
 0x2cd   :  { %5693 = vmatprep.subr.bf16.mxu1 %v14184_v6  ;;  %v4308_v5 = vld [vmem:[#allocation11 + $0x1700] sm:$0xff]  ;;  %v14136_v10 = vcombine.high %v4180_v3, %v4184_v4  ;;  %v14135_v19 = vcombine.low %v4180_v3, %v4184_v4  ;;  %v4141_v3 = vld [vmem:[#allocation11 + $0x11c8] sm:$0xff] }
 0x2ce   :  { %5651 = vmatpush1.bf16.msra.mxu0 %v14055_v14  ;;  %v4312_v6 = vld [vmem:[#allocation11 + $0x1720] sm:$0xff]  ;;  %v4145_v4 = vld [vmem:[#allocation11 + $0x11e8] sm:$0xff] }
 0x2cf   :  { %5652 = vmatprep.subr.bf16.mxu0 %v14048_v17  ;;  %v14264_v13 = vcombine.high %v4308_v5, %v4312_v6  ;;  %v4172_v14 = vld [vmem:[#allocation11 + $0x12c0] sm:$0xff]  ;;  %v14263_v20 = vcombine.low %v4308_v5, %v4312_v6  ;;  %v4269_v5 = vld [vmem:[#allocation11 + $0x15c8] sm:$0xff] }
 0x2d0   :  { %5694 = vmatpush1.bf16.msra.mxu1 %v14183_v16  ;;  %v4176_v16 = vld [vmem:[#allocation11 + $0x12e0] sm:$0xff]  ;;  %v4273_v6 = vld [vmem:[#allocation11 + $0x15e8] sm:$0xff] }
 0x2d1   :  { %5695 = vmatprep.subr.bf16.mxu1 %v14176_v18  ;;  %v4300_v17 = vld [vmem:[#allocation11 + $0x16c0] sm:$0xff]  ;;  %v14128_v39 = vcombine.high %v4172_v14, %v4176_v16  ;;  %v14127_v32 = vcombine.low %v4172_v14, %v4176_v16  ;;  %v14226_v16 = vcombine.high %v4269_v5, %v4273_v6 }
 0x2d2   :  { %5653 = vmatpush1.bf16.msra.mxu0 %v14047_v23  ;;  %v4304_v18 = vld [vmem:[#allocation11 + $0x16e0] sm:$0xff] }
 0x2d3   :  { %5654 = vmatprep.subr.bf16.mxu0 %v14040_v28  ;;  %v14256_v15 = vcombine.high %v4300_v17, %v4304_v18  ;;  %v4164_v23 = vld [vmem:[#allocation11 + $0x1280] sm:$0xff]  ;;  %v14255_v34 = vcombine.low %v4300_v17, %v4304_v18  ;;  %v4133_v17 = vld [vmem:[#allocation11 + $0x1188] sm:$0xff] }
 0x2d4   :  { %5696 = vmatpush1.bf16.msra.mxu1 %v14175_v24  ;;  %v4168_v24 = vld [vmem:[#allocation11 + $0x12a0] sm:$0xff]  ;;  %v4137_v18 = vld [vmem:[#allocation11 + $0x11a8] sm:$0xff] }
 0x2d5   :  { %5697 = vmatprep.subr.bf16.mxu1 %v14168_v29  ;;  %v4292_v28 = vld [vmem:[#allocation11 + $0x1680] sm:$0xff]  ;;  %v14120_v36 = vcombine.high %v4164_v23, %v4168_v24  ;;  %v14119_v47 = vcombine.low %v4164_v23, %v4168_v24  ;;  %v14097_v23 = vcombine.low %v4141_v3, %v4145_v4 }
 0x2d6   :  { %5655 = vmatpush1.bf16.msra.mxu0 %v14039_v41  ;;  %v4296_v29 = vld [vmem:[#allocation11 + $0x16a0] sm:$0xff] }
 0x2d7   :  { %5656 = vmatprep.subr.bf16.mxu0 %v14160_v44  ;;  %v14248_v38 = vcombine.high %v4292_v28, %v4296_v29  ;;  %v4156_v41 = vld [vmem:[#allocation11 + $0x1240] sm:$0xff]  ;;  %v14247_v56 = vcombine.low %v4292_v28, %v4296_v29  ;;  %v14225_v28 = vcombine.low %v4269_v5, %v4273_v6  ;;  %v14090_v29 = vcombine.high %v4133_v17, %v4137_v18 }
 0x2d8   :  { %5698 = vmatpush1.bf16.msra.mxu1 %v14167_v42  ;;  %v4160_v42 = vld [vmem:[#allocation11 + $0x1260] sm:$0xff] }
 0x2d9   :  { %5699 = vmatprep.subr.bf16.mxu1 %v14288_v21  ;;  %v4284_v44 = vld [vmem:[#allocation11 + $0x1640] sm:$0xff]  ;;  %v14112_v49 = vcombine.high %v4156_v41, %v4160_v42  ;;  %v14111_v60 = vcombine.low %v4156_v41, %v4160_v42  ;;  %v4253_v42 = vld [vmem:[#allocation11 + $0x1548] sm:$0xff] }
 0x2da   :  { %5657 = vmatpush2.bf16.msra.mxu0 %v14159_v33  ;;  %v4288_v21 = vld [vmem:[#allocation11 + $0x1660] sm:$0xff]  ;;  %v16843_v33 = vpop.f32.mrf.mxu1 }
 0x2db   :  { %5658 = vmatprep.subr.bf16.mxu0 %v14152_v54  ;;  %v4148_v54 = vld [vmem:[#allocation11 + $0x1200] sm:$0xff] }
 0x2dc   :  { %5700 = vmatpush2.bf16.msra.mxu1 %v14287_v51  ;;  %v14240_v51 = vcombine.high %v4284_v44, %v4288_v21  ;;  %v4276_v55 = vld [vmem:[#allocation11 + $0x1600] sm:$0xff] }
 0x2dd   :  { %5701 = vmatprep.subr.bf16.mxu1 %v14280_v12  ;;  %v4152_v12 = vld [vmem:[#allocation11 + $0x1220] sm:$0xff] }
 0x2de   :  { %5659 = vmatpush2.bf16.msra.mxu0 %v14151_v50  ;;  %v4280_v57 = vld [vmem:[#allocation11 + $0x1620] sm:$0xff]  ;;  %v14239_v50 = vcombine.low %v4284_v44, %v4288_v21  ;;  %v4257_v44 = vld [vmem:[#allocation11 + $0x1568] sm:$0xff] }
 0x2df   :  { %5660 = vmatprep.subr.bf16.mxu0 %v14144_v1  ;;  %v16847_v1 = vpop.f32.mrf.mxu1 }
 0x2e0   :  { %5702 = vmatpush2.bf16.msra.mxu1 %v14279_v63  ;;  %v14104_v63 = vcombine.high %v4148_v54, %v4152_v12 }
 0x2e1   :  { %5703 = vmatprep.subr.bf16.mxu1 %v14272_v2  ;;  %v14232_v2 = vcombine.high %v4276_v55, %v4280_v57  ;;  %v16851_v14 = vpop.f32.mrf.mxu1 }
 0x2e2   :  { %5661 = vmatpush2.bf16.msra.mxu0 %v14143_v8  ;;  %v14103_v8 = vcombine.low %v4148_v54, %v4152_v12 }
 0x2e3   :  { %5662 = vmatprep.subr.bf16.mxu0 %v14136_v10  ;;  %v14231_v10 = vcombine.low %v4276_v55, %v4280_v57 }
 0x2e4   :  { %5704 = vmatpush2.bf16.msra.mxu1 %v14271_v9  ;;  %v16849_v9 = vpop.f32.mrf.mxu0 }
 0x2e5   :  { %5705 = vmatprep.subr.bf16.mxu1 %v14264_v13  ;;  %v14098_v13 = vcombine.high %v4141_v3, %v4145_v4  ;;  %v4249_v3 = vld [vmem:[#allocation11 + $0x1528] sm:$0xff] }
 0x2e6   :  { %5663 = vmatpush2.bf16.msra.mxu0 %v14135_v19  ;;  %v16853_v19 = vld [vmem:[#allocation8] ss:$16 sps:$4 sm:$0xff]   ;;  %v16857_v24 = vpop.f32.mrf.mxu0 }
 0x2e7   :  { %5664 = vmatprep.subr.bf16.mxu0 %v14128_v39  ;;  %v4265_v39 = vld [vmem:[#allocation11 + $0x15a8] sm:$0xff] }
 0x2e8   :  { %5706 = vmatpush2.bf16.msra.mxu1 %v14263_v20  ;;  %v4261_v20 = vld [vmem:[#allocation11 + $0x1588] sm:$0xff] }
 0x2e9   :  { %5707 = vmatprep.subr.bf16.mxu1 %v14256_v15  ;;  %v16855_v15 = vld [vmem:[#allocation8 + $0x8] ss:$16 sps:$4 sm:$0xff]  }
 0x2ea   :  { %5665 = vmatpush2.bf16.msra.mxu0 %v14127_v32  ;;  %v16859_v32 = vpop.f32.mrf.mxu1 }
 0x2eb   :  { %5666 = vmatprep.subr.bf16.mxu0 %v14120_v36  ;;  %v4125_v36 = vld [vmem:[#allocation11 + $0x1148] sm:$0xff] }
 0x2ec   :  { %5708 = vmatpush2.bf16.msra.mxu1 %v14255_v34  ;;  %v14218_v34 = vcombine.high %v4261_v20, %v4265_v39 }
 0x2ed   :  { %5709 = vmatprep.subr.bf16.mxu1 %v14248_v38  ;;  %v4129_v38 = vld [vmem:[#allocation11 + $0x1168] sm:$0xff] }
 0x2ee   :  { %5667 = vmatpush2.bf16.msra.mxu0 %v14119_v47  ;;  %v14082_v54 = vcombine.high %v4125_v36, %v4129_v38 }
 0x2ef   :  { %5668 = vmatprep.subr.bf16.mxu0 %v14112_v49 }
 0x2f0   :  { %5710 = vmatpush2.bf16.msra.mxu1 %v14247_v56  ;;  %v14089_v56 = vcombine.low %v4133_v17, %v4137_v18 }
 0x2f1   :  { %5711 = vmatprep.subr.bf16.mxu1 %v14240_v51  ;;  %v14217_v51 = vcombine.low %v4261_v20, %v4265_v39  ;;  %v4109_v20 = vld [vmem:[#allocation11 + $0x10c8] sm:$0xff] }
 0x2f2   :  { %5669 = vmatpush2.bf16.msra.mxu0 %v14111_v60  ;;  %v14210_v60 = vcombine.high %v4253_v42, %v4257_v44  ;;  %v4113_v39 = vld [vmem:[#allocation11 + $0x10e8] sm:$0xff] }
 0x2f3   :  { %5670 = vmatprep.subr.bf16.mxu0 %v14104_v63  ;;  %v4121_v63 = vld [vmem:[#allocation11 + $0x1128] sm:$0xff] }
 0x2f4   :  { %5712 = vmatpush2.bf16.msra.mxu1 %v14239_v50  ;;  %v4117_v50 = vld [vmem:[#allocation11 + $0x1108] sm:$0xff] }
 0x2f5   :  { %5713 = vmatprep.subr.bf16.mxu1 %v14232_v2  ;;  %v4245_v2 = vld [vmem:[#allocation11 + $0x1508] sm:$0xff] }
 0x2f6   :  { %5671 = vmatpush2.bf16.msra.mxu0 %v14103_v8  ;;  %v14081_v8 = vcombine.low %v4125_v36, %v4129_v38  ;;  %v14202_v18 = vcombine.high %v4245_v2, %v4249_v3  ;;  %v14201_v36 = vcombine.low %v4245_v2, %v4249_v3  ;;  %v14066_v38 = vcombine.high %v4109_v20, %v4113_v39  ;;  %v4085_v3 = vld [vmem:[#allocation11 + $0x1008] sm:$0xff] }
 0x2f7   :  { %5726 = vmatprep.subr.bf16.mxu0 %v14098_v13  ;;  %v14074_v13 = vcombine.high %v4117_v50, %v4121_v63 }
 0x2f8   :  { %5714 = vmatpush2.bf16.msra.mxu1 %v14231_v10  ;;  %v14209_v10 = vcombine.low %v4253_v42, %v4257_v44  ;;  %v4101_v42 = vld [vmem:[#allocation11 + $0x1088] sm:$0xff] }
 0x2f9   :  { %5769 = vmatprep.subr.bf16.mxu1 %v14226_v16  ;;  %v3855_v41 = vpop.f32.mrf.mxu0  ;;  %5673 = vmatmul.mubr.bf16.vlgmr.msra.gmra.mxu0 %v16853_v19  ;;  %v4105_v44 = vld [vmem:[#allocation11 + $0x10a8] sm:$0xff] }
 0x2fa   :  { %v3856_v21 = vadd.f32 %v3855_v41, %v16791_v61  ;;  %5727 = vmatpush1.bf16.msra.mxu0 %v14097_v23  ;;  %5758 = vmatprep.mubr.bf16.mxu0 %v16833_v26 }
 0x2fb   :  { %v3898_v47 = vpop.f32.mrf.mxu1  ;;  %5716 = vmatmul.mubr.bf16.vlgmr.msra.gmra.mxu1 %v16855_v15  ;;  %v3857_v49 = vpop.f32.mrf.mxu0  ;;  %5728 = vmatprep.subr.bf16.mxu0 %v14090_v29  ;;  %v4241_v29 = vld [vmem:[#allocation11 + $0x14e8] sm:$0xff] }
 0x2fc   :  { %5770 = vmatpush1.bf16.msra.mxu1 %v14225_v28  ;;  %v16864_v12 = vadd.f32 %v3898_v47, %v3856_v21  ;;  %v3858_v55 = vadd.f32 %v3857_v49, %v16794_v7  ;;  %5801 = vmatprep.mubr.bf16.mxu1 %v16836_v31  ;;  %v4237_v28 = vld [vmem:[#allocation11 + $0x14c8] sm:$0xff]  ;;  %v14065_v47 = vcombine.low %v4109_v20, %v4113_v39 }
 0x2fd   :  { %v3900_v57 = vpop.f32.mrf.mxu1  ;;  %5771 = vmatprep.subr.bf16.mxu1 %v14218_v34  ;;  %v3859_v61 = vpop.f32.mrf.mxu0  ;;  %v14073_v34 = vcombine.low %v4117_v50, %v4121_v63  ;;  %v14194_v41 = vcombine.high %v4237_v28, %v4241_v29  ;;  %v4233_v21 = vld [vmem:[#allocation11 + $0x14a8] sm:$0xff]  ;;  %v14058_v49 = vcombine.high %v4101_v42, %v4105_v44  ;;  %v14057_v50 = vcombine.low %v4101_v42, %v4105_v44 }
 0x2fe   :  { %v16869_v4 = vadd.f32 %v3900_v57, %v3858_v55  ;;  %v3860_v5 = vadd.f32 %v3859_v61, %v16797_v11  ;;  %5729 = vmatpush1.bf16.msra.mxu0 %v14089_v56  ;;  %v14193_v56 = vcombine.low %v4237_v28, %v4241_v29  ;;  %v4097_v55 = vld [vmem:[#allocation11 + $0x1068] sm:$0xff] }
 0x2ff   :  { %v3902_v6 = vpop.f32.mrf.mxu1  ;;  %v3861_v7 = vpop.f32.mrf.mxu0  ;;  %5730 = vmatprep.subr.bf16.mxu0 %v14082_v54  ;;  %v4093_v54 = vld [vmem:[#allocation11 + $0x1048] sm:$0xff] }
 0x300   :  { %5772 = vmatpush1.bf16.msra.mxu1 %v14217_v51  ;;  %v16872_v16 = vadd.f32 %v3902_v6, %v3860_v5  ;;  %v3862_v17 = vadd.f32 %v3861_v7, %v16799_v22  ;;  %v4229_v22 = vld [vmem:[#allocation11 + $0x1488] sm:$0xff]  ;;  %v14050_v61 = vcombine.high %v4093_v54, %v4097_v55  ;;  %v14049_v7 = vcombine.low %v4093_v54, %v4097_v55 }
 0x301   :  { %5773 = vmatprep.subr.bf16.mxu1 %v14210_v60  ;;  %v3904_v23 = vpop.f32.mrf.mxu1  ;;  %v14186_v51 = vcombine.high %v4229_v22, %v4233_v21  ;;  %v4221_v57 = vld [vmem:[#allocation11 + $0x1448] sm:$0xff]  ;;  %v14185_v63 = vcombine.low %v4229_v22, %v4233_v21 }
 0x302   :  { %v16875_v11 = vadd.f32 %v3904_v23, %v3862_v17  ;;  %5731 = vmatpush1.bf16.msra.mxu0 %v14081_v8  ;;  %v4225_v60 = vld [vmem:[#allocation11 + $0x1468] sm:$0xff] }
 0x303   :  { %5732 = vmatprep.subr.bf16.mxu0 %v14074_v13  ;;  %v14178_v2 = vcombine.high %v4221_v57, %v4225_v60  ;;  %v4089_v5 = vld [vmem:[#allocation11 + $0x1028] sm:$0xff] }
 0x304   :  { %5774 = vmatpush1.bf16.msra.mxu1 %v14209_v10  ;;  %v4213_v6 = vld [vmem:[#allocation11 + $0x1408] sm:$0xff]  ;;  %v14177_v10 = vcombine.low %v4221_v57, %v4225_v60  ;;  %v14042_v13 = vcombine.high %v4085_v3, %v4089_v5  ;;  %v14041_v28 = vcombine.low %v4085_v3, %v4089_v5 }
 0x305   :  { %5775 = vmatprep.subr.bf16.mxu1 %v14202_v18  ;;  %v4217_v8 = vld [vmem:[#allocation11 + $0x1428] sm:$0xff] }
 0x306   :  { %5733 = vmatpush1.bf16.msra.mxu0 %v14073_v34  ;;  %v14170_v17 = vcombine.high %v4213_v6, %v4217_v8  ;;  %v4205_v18 = vld [vmem:[#allocation11 + $0x13c8] sm:$0xff]  ;;  %v14169_v29 = vcombine.low %v4213_v6, %v4217_v8 }
 0x307   :  { %5734 = vmatprep.subr.bf16.mxu0 %v14066_v38  ;;  %v4209_v20 = vld [vmem:[#allocation11 + $0x13e8] sm:$0xff] }
 0x308   :  { %5776 = vmatpush1.bf16.msra.mxu1 %v14201_v36  ;;  %v4333_v39 = vld [vmem:[#allocation11 + $0x17c8] sm:$0xff]  ;;  %v14162_v34 = vcombine.high %v4205_v18, %v4209_v20  ;;  %v14161_v22 = vcombine.low %v4205_v18, %v4209_v20 }
 0x309   :  { %5777 = vmatprep.subr.bf16.mxu1 %v14194_v41  ;;  %v4337_v23 = vld [vmem:[#allocation11 + $0x17e8] sm:$0xff] }
 0x30a   :  { %5735 = vmatpush1.bf16.msra.mxu0 %v14065_v47  ;;  %v14290_v36 = vcombine.high %v4333_v39, %v4337_v23  ;;  %v4197_v38 = vld [vmem:[#allocation11 + $0x1388] sm:$0xff]  ;;  %v14289_v21 = vcombine.low %v4333_v39, %v4337_v23 }
 0x30b   :  { %5736 = vmatprep.subr.bf16.mxu0 %v14058_v49  ;;  %v4201_v41 = vld [vmem:[#allocation11 + $0x13a8] sm:$0xff] }
 0x30c   :  { %5778 = vmatpush1.bf16.msra.mxu1 %v14193_v56  ;;  %v4325_v42 = vld [vmem:[#allocation11 + $0x1788] sm:$0xff]  ;;  %v14154_v47 = vcombine.high %v4197_v38, %v4201_v41  ;;  %v14153_v57 = vcombine.low %v4197_v38, %v4201_v41 }
 0x30d   :  { %5779 = vmatprep.subr.bf16.mxu1 %v14186_v51  ;;  %v4329_v44 = vld [vmem:[#allocation11 + $0x17a8] sm:$0xff] }
 0x30e   :  { %5737 = vmatpush1.bf16.msra.mxu0 %v14057_v50  ;;  %v14282_v56 = vcombine.high %v4325_v42, %v4329_v44  ;;  %v4189_v49 = vld [vmem:[#allocation11 + $0x1348] sm:$0xff]  ;;  %v14281_v60 = vcombine.low %v4325_v42, %v4329_v44 }
 0x30f   :  { %5738 = vmatprep.subr.bf16.mxu0 %v14050_v61  ;;  %v4193_v51 = vld [vmem:[#allocation11 + $0x1368] sm:$0xff] }
 0x310   :  { %5780 = vmatpush1.bf16.msra.mxu1 %v14185_v63  ;;  %v4317_v54 = vld [vmem:[#allocation11 + $0x1748] sm:$0xff]  ;;  %v14146_v50 = vcombine.high %v4189_v49, %v4193_v51  ;;  %v14145_v6 = vcombine.low %v4189_v49, %v4193_v51 }
 0x311   :  { %5781 = vmatprep.subr.bf16.mxu1 %v14178_v2  ;;  %v4321_v55 = vld [vmem:[#allocation11 + $0x1768] sm:$0xff] }
 0x312   :  { %5739 = vmatpush1.bf16.msra.mxu0 %v14049_v7  ;;  %v14274_v63 = vcombine.high %v4317_v54, %v4321_v55  ;;  %v4181_v61 = vld [vmem:[#allocation11 + $0x1308] sm:$0xff]  ;;  %v14273_v8 = vcombine.low %v4317_v54, %v4321_v55 }
 0x313   :  { %5740 = vmatprep.subr.bf16.mxu0 %v14042_v13  ;;  %v4185_v2 = vld [vmem:[#allocation11 + $0x1328] sm:$0xff] }
 0x314   :  { %5782 = vmatpush1.bf16.msra.mxu1 %v14177_v10  ;;  %v4309_v3 = vld [vmem:[#allocation11 + $0x1708] sm:$0xff]  ;;  %v14138_v7 = vcombine.high %v4181_v61, %v4185_v2  ;;  %v14137_v39 = vcombine.low %v4181_v61, %v4185_v2 }
 0x315   :  { %5783 = vmatprep.subr.bf16.mxu1 %v14170_v17  ;;  %v4313_v5 = vld [vmem:[#allocation11 + $0x1728] sm:$0xff] }
 0x316   :  { %5741 = vmatpush1.bf16.msra.mxu0 %v14041_v28  ;;  %v14266_v10 = vcombine.high %v4309_v3, %v4313_v5  ;;  %v4173_v13 = vld [vmem:[#allocation11 + $0x12c8] sm:$0xff]  ;;  %v14265_v23 = vcombine.low %v4309_v3, %v4313_v5 }
 0x317   :  { %5742 = vmatprep.subr.bf16.mxu0 %v14162_v34  ;;  %v4177_v17 = vld [vmem:[#allocation11 + $0x12e8] sm:$0xff] }
 0x318   :  { %5784 = vmatpush1.bf16.msra.mxu1 %v14169_v29  ;;  %v4301_v18 = vld [vmem:[#allocation11 + $0x16c8] sm:$0xff]  ;;  %v14130_v28 = vcombine.high %v4173_v13, %v4177_v17  ;;  %v14129_v42 = vcombine.low %v4173_v13, %v4177_v17  ;;  %v4270_v13 = vld [vmem:[#allocation11 + $0x15d0] sm:$0xff] }
 0x319   :  { %5785 = vmatprep.subr.bf16.mxu1 %v14290_v36  ;;  %v4305_v20 = vld [vmem:[#allocation11 + $0x16e8] sm:$0xff]  ;;  %v4274_v17 = vld [vmem:[#allocation11 + $0x15f0] sm:$0xff] }
 0x31a   :  { %5743 = vmatpush2.bf16.msra.mxu0 %v14161_v22  ;;  %v14258_v29 = vcombine.high %v4301_v18, %v4305_v20  ;;  %v4165_v34 = vld [vmem:[#allocation11 + $0x1288] sm:$0xff]  ;;  %v14257_v44 = vcombine.low %v4301_v18, %v4305_v20 }
 0x31b   :  { %5744 = vmatprep.subr.bf16.mxu0 %v14154_v47  ;;  %v4169_v36 = vld [vmem:[#allocation11 + $0x12a8] sm:$0xff] }
 0x31c   :  { %5786 = vmatpush2.bf16.msra.mxu1 %v14289_v21  ;;  %v4293_v38 = vld [vmem:[#allocation11 + $0x1688] sm:$0xff]  ;;  %v14122_v22 = vcombine.high %v4165_v34, %v4169_v36  ;;  %v14121_v54 = vcombine.low %v4165_v34, %v4169_v36  ;;  %v4262_v34 = vld [vmem:[#allocation11 + $0x1590] sm:$0xff] }
 0x31d   :  { %5787 = vmatprep.subr.bf16.mxu1 %v14282_v56  ;;  %v4297_v41 = vld [vmem:[#allocation11 + $0x16a8] sm:$0xff]  ;;  %v4266_v36 = vld [vmem:[#allocation11 + $0x15b0] sm:$0xff] }
 0x31e   :  { %5745 = vmatpush2.bf16.msra.mxu0 %v14153_v57  ;;  %v14250_v21 = vcombine.high %v4293_v38, %v4297_v41  ;;  %v4157_v47 = vld [vmem:[#allocation11 + $0x1248] sm:$0xff]  ;;  %v14249_v55 = vcombine.low %v4293_v38, %v4297_v41  ;;  %v14227_v41 = vcombine.low %v4270_v13, %v4274_v17 }
 0x31f   :  { %5746 = vmatprep.subr.bf16.mxu0 %v14146_v50  ;;  %v4161_v56 = vld [vmem:[#allocation11 + $0x1268] sm:$0xff] }
 0x320   :  { %5788 = vmatpush2.bf16.msra.mxu1 %v14281_v60  ;;  %v4285_v49 = vld [vmem:[#allocation11 + $0x1648] sm:$0xff]  ;;  %v14114_v57 = vcombine.high %v4157_v47, %v4161_v56  ;;  %v14113_v3 = vcombine.low %v4157_v47, %v4161_v56  ;;  %v4254_v56 = vld [vmem:[#allocation11 + $0x1550] sm:$0xff] }
 0x321   :  { %5789 = vmatprep.subr.bf16.mxu1 %v14274_v63  ;;  %v4289_v51 = vld [vmem:[#allocation11 + $0x1668] sm:$0xff] }
 0x322   :  { %5747 = vmatpush2.bf16.msra.mxu0 %v14145_v6  ;;  %v14242_v60 = vcombine.high %v4285_v49, %v4289_v51  ;;  %v4149_v50 = vld [vmem:[#allocation11 + $0x1208] sm:$0xff]  ;;  %v14241_v5 = vcombine.low %v4285_v49, %v4289_v51  ;;  %v4258_v49 = vld [vmem:[#allocation11 + $0x1570] sm:$0xff] }
 0x323   :  { %5748 = vmatprep.subr.bf16.mxu0 %v14138_v7  ;;  %v4153_v63 = vld [vmem:[#allocation11 + $0x1228] sm:$0xff]  ;;  %v4142_v7 = vld [vmem:[#allocation11 + $0x11d0] sm:$0xff] }
 0x324   :  { %5790 = vmatpush2.bf16.msra.mxu1 %v14273_v8  ;;  %v4277_v61 = vld [vmem:[#allocation11 + $0x1608] sm:$0xff]  ;;  %v14106_v6 = vcombine.high %v4149_v50, %v4153_v63  ;;  %v14105_v18 = vcombine.low %v4149_v50, %v4153_v63 }
 0x325   :  { %5791 = vmatprep.subr.bf16.mxu1 %v14266_v10  ;;  %v4281_v2 = vld [vmem:[#allocation11 + $0x1628] sm:$0xff]  ;;  %v4146_v10 = vld [vmem:[#allocation11 + $0x11f0] sm:$0xff] }
 0x326   :  { %5749 = vmatpush2.bf16.msra.mxu0 %v14137_v39  ;;  %v14234_v8 = vcombine.high %v4277_v61, %v4281_v2  ;;  %v14233_v20 = vcombine.low %v4277_v61, %v4281_v2  ;;  %v14100_v39 = vcombine.high %v4142_v7, %v4146_v10  ;;  %v14099_v38 = vcombine.low %v4142_v7, %v4146_v10  ;;  %v4250_v7 = vld [vmem:[#allocation11 + $0x1530] sm:$0xff] }
 0x327   :  { %5750 = vmatprep.subr.bf16.mxu0 %v14130_v28  ;;  %v4134_v28 = vld [vmem:[#allocation11 + $0x1190] sm:$0xff] }
 0x328   :  { %5792 = vmatpush2.bf16.msra.mxu1 %v14265_v23  ;;  %v14228_v23 = vcombine.high %v4270_v13, %v4274_v17 }
 0x329   :  { %5793 = vmatprep.subr.bf16.mxu1 %v14258_v29  ;;  %v4138_v29 = vld [vmem:[#allocation11 + $0x11b0] sm:$0xff] }
 0x32a   :  { %5751 = vmatpush2.bf16.msra.mxu0 %v14129_v42  ;;  %v14092_v42 = vcombine.high %v4134_v28, %v4138_v29 }
 0x32b   :  { %5752 = vmatprep.subr.bf16.mxu0 %v14122_v22  ;;  %v4126_v22 = vld [vmem:[#allocation11 + $0x1150] sm:$0xff] }
 0x32c   :  { %5794 = vmatpush2.bf16.msra.mxu1 %v14257_v44  ;;  %v14220_v44 = vcombine.high %v4262_v34, %v4266_v36 }
 0x32d   :  { %5795 = vmatprep.subr.bf16.mxu1 %v14250_v21  ;;  %v4130_v21 = vld [vmem:[#allocation11 + $0x1170] sm:$0xff] }
 0x32e   :  { %5753 = vmatpush2.bf16.msra.mxu0 %v14121_v54  ;;  %v14084_v50 = vcombine.high %v4126_v22, %v4130_v21 }
 0x32f   :  { %5754 = vmatprep.subr.bf16.mxu0 %v14114_v57 }
 0x330   :  { %5796 = vmatpush2.bf16.msra.mxu1 %v14249_v55  ;;  %v14091_v55 = vcombine.low %v4134_v28, %v4138_v29  ;;  %v4110_v29 = vld [vmem:[#allocation11 + $0x10d0] sm:$0xff] }
 0x331   :  { %5797 = vmatprep.subr.bf16.mxu1 %v14242_v60  ;;  %v14219_v60 = vcombine.low %v4262_v34, %v4266_v36  ;;  %v4238_v36 = vld [vmem:[#allocation11 + $0x14d0] sm:$0xff] }
 0x332   :  { %5755 = vmatpush2.bf16.msra.mxu0 %v14113_v3  ;;  %v14212_v3 = vcombine.high %v4254_v56, %v4258_v49 }
 0x333   :  { %5756 = vmatprep.subr.bf16.mxu0 %v14106_v6  ;;  %v4122_v6 = vld [vmem:[#allocation11 + $0x1130] sm:$0xff] }
 0x334   :  { %5798 = vmatpush2.bf16.msra.mxu1 %v14241_v5  ;;  %v4118_v5 = vld [vmem:[#allocation11 + $0x1110] sm:$0xff] }
 0x335   :  { %5799 = vmatprep.subr.bf16.mxu1 %v14234_v8  ;;  %v4246_v8 = vld [vmem:[#allocation11 + $0x1510] sm:$0xff] }
 0x336   :  { %5757 = vmatpush2.bf16.msra.mxu0 %v14105_v18  ;;  %v14083_v18 = vcombine.low %v4126_v22, %v4130_v21  ;;  %v14204_v28 = vcombine.high %v4246_v8, %v4250_v7  ;;  %v4102_v21 = vld [vmem:[#allocation11 + $0x1090] sm:$0xff] }
 0x337   :  { %5812 = vmatprep.subr.bf16.mxu0 %v14100_v39  ;;  %v14076_v39 = vcombine.high %v4118_v5, %v4122_v6 }
 0x338   :  { %5800 = vmatpush2.bf16.msra.mxu1 %v14233_v20  ;;  %v14211_v20 = vcombine.low %v4254_v56, %v4258_v49  ;;  %v4234_v56 = vld [vmem:[#allocation11 + $0x14b0] sm:$0xff] }
 0x339   :  { %5855 = vmatprep.subr.bf16.mxu1 %v14228_v23  ;;  %v3941_v47 = vpop.f32.mrf.mxu0  ;;  %5759 = vmatmul.mubr.bf16.vlgmr.msra.gmra.mxu0 %v16853_v19 }
 0x33a   :  { %v3942_v51 = vadd.f32 %v3941_v47, %v16803_v35  ;;  %5813 = vmatpush1.bf16.msra.mxu0 %v14099_v38  ;;  %5844 = vmatprep.mubr.bf16.mxu0 %v16833_v26  ;;  %v4242_v38 = vld [vmem:[#allocation11 + $0x14f0] sm:$0xff] }
 0x33b   :  { %v3984_v54 = vpop.f32.mrf.mxu1  ;;  %5802 = vmatmul.mubr.bf16.vlgmr.msra.gmra.mxu1 %v16855_v15  ;;  %v3943_v57 = vpop.f32.mrf.mxu0  ;;  %5814 = vmatprep.subr.bf16.mxu0 %v14092_v42  ;;  %v14203_v42 = vcombine.low %v4246_v8, %v4250_v7  ;;  %v14196_v22 = vcombine.high %v4238_v36, %v4242_v38  ;;  %v4106_v47 = vld [vmem:[#allocation11 + $0x10b0] sm:$0xff] }
 0x33c   :  { %5856 = vmatpush1.bf16.msra.mxu1 %v14227_v41  ;;  %v16880_v63 = vadd.f32 %v3984_v54, %v3942_v51  ;;  %v3944_v61 = vadd.f32 %v3943_v57, %v16808_v46  ;;  %5887 = vmatprep.mubr.bf16.mxu1 %v16836_v31  ;;  %v4114_v31 = vld [vmem:[#allocation11 + $0x10f0] sm:$0xff]  ;;  %v14075_v41 = vcombine.low %v4118_v5, %v4122_v6 }
 0x33d   :  { %v3986_v2 = vpop.f32.mrf.mxu1  ;;  %5857 = vmatprep.subr.bf16.mxu1 %v14220_v44  ;;  %v3945_v35 = vpop.f32.mrf.mxu0  ;;  %v14068_v44 = vcombine.high %v4110_v29, %v4114_v31  ;;  %v14067_v49 = vcombine.low %v4110_v29, %v4114_v31  ;;  %v14195_v51 = vcombine.low %v4238_v36, %v4242_v38  ;;  %v14060_v54 = vcombine.high %v4102_v21, %v4106_v47  ;;  %v4094_v57 = vld [vmem:[#allocation11 + $0x1050] sm:$0xff] }
 0x33e   :  { %v16885_v10 = vadd.f32 %v3986_v2, %v3944_v61  ;;  %v3946_v13 = vadd.f32 %v3945_v35, %v16813_v52  ;;  %5815 = vmatpush1.bf16.msra.mxu0 %v14091_v55  ;;  %v4226_v61 = vld [vmem:[#allocation11 + $0x1470] sm:$0xff]  ;;  %v14059_v2 = vcombine.low %v4102_v21, %v4106_v47 }
 0x33f   :  { %v3988_v17 = vpop.f32.mrf.mxu1  ;;  %v3947_v46 = vpop.f32.mrf.mxu0  ;;  %5816 = vmatprep.subr.bf16.mxu0 %v14084_v50  ;;  %v4222_v50 = vld [vmem:[#allocation11 + $0x1450] sm:$0xff] }
 0x340   :  { %5858 = vmatpush1.bf16.msra.mxu1 %v14219_v60  ;;  %v16888_v23 = vadd.f32 %v3988_v17, %v3946_v13  ;;  %v3948_v26 = vadd.f32 %v3947_v46, %v16815_v0  ;;  %v4230_v0 = vld [vmem:[#allocation11 + $0x1490] sm:$0xff]  ;;  %v14180_v6 = vcombine.high %v4222_v50, %v4226_v61 }
 0x341   :  { %5859 = vmatprep.subr.bf16.mxu1 %v14212_v3  ;;  %v3990_v34 = vpop.f32.mrf.mxu1  ;;  %v14188_v55 = vcombine.high %v4230_v0, %v4234_v56  ;;  %v4098_v60 = vld [vmem:[#allocation11 + $0x1070] sm:$0xff]  ;;  %v14187_v3 = vcombine.low %v4230_v0, %v4234_v56 }
 0x342   :  { %v16891_v52 = vadd.f32 %v3990_v34, %v3948_v26  ;;  %5817 = vmatpush1.bf16.msra.mxu0 %v14083_v18  ;;  %v14052_v5 = vcombine.high %v4094_v57, %v4098_v60  ;;  %v4086_v35 = vld [vmem:[#allocation11 + $0x1010] sm:$0xff]  ;;  %v14051_v17 = vcombine.low %v4094_v57, %v4098_v60  ;;  %v14179_v18 = vcombine.low %v4222_v50, %v4226_v61 }
 0x343   :  { %5818 = vmatprep.subr.bf16.mxu0 %v14076_v39  ;;  %v4090_v8 = vld [vmem:[#allocation11 + $0x1030] sm:$0xff] }
 0x344   :  { %5860 = vmatpush1.bf16.msra.mxu1 %v14211_v20  ;;  %v4214_v7 = vld [vmem:[#allocation11 + $0x1410] sm:$0xff]  ;;  %v14044_v46 = vcombine.high %v4086_v35, %v4090_v8  ;;  %v14043_v31 = vcombine.low %v4086_v35, %v4090_v8 }
 0x345   :  { %5861 = vmatprep.subr.bf16.mxu1 %v14204_v28  ;;  %v4218_v13 = vld [vmem:[#allocation11 + $0x1430] sm:$0xff] }
 0x346   :  { %5819 = vmatpush1.bf16.msra.mxu0 %v14075_v41  ;;  %v14172_v20 = vcombine.high %v4214_v7, %v4218_v13  ;;  %v4206_v39 = vld [vmem:[#allocation11 + $0x13d0] sm:$0xff]  ;;  %v14171_v34 = vcombine.low %v4214_v7, %v4218_v13 }
 0x347   :  { %5820 = vmatprep.subr.bf16.mxu0 %v14068_v44  ;;  %v4210_v26 = vld [vmem:[#allocation11 + $0x13f0] sm:$0xff] }
 0x348   :  { %5862 = vmatpush1.bf16.msra.mxu1 %v14203_v42  ;;  %v4334_v28 = vld [vmem:[#allocation11 + $0x17d0] sm:$0xff]  ;;  %v14164_v36 = vcombine.high %v4206_v39, %v4210_v26  ;;  %v14163_v21 = vcombine.low %v4206_v39, %v4210_v26 }
 0x349   :  { %5863 = vmatprep.subr.bf16.mxu1 %v14196_v22  ;;  %v4338_v29 = vld [vmem:[#allocation11 + $0x17f0] sm:$0xff] }
 0x34a   :  { %5821 = vmatpush1.bf16.msra.mxu0 %v14067_v49  ;;  %v14292_v38 = vcombine.high %v4334_v28, %v4338_v29  ;;  %v4198_v41 = vld [vmem:[#allocation11 + $0x1390] sm:$0xff]  ;;  %v14291_v47 = vcombine.low %v4334_v28, %v4338_v29 }
 0x34b   :  { %5822 = vmatprep.subr.bf16.mxu0 %v14060_v54  ;;  %v4202_v42 = vld [vmem:[#allocation11 + $0x13b0] sm:$0xff] }
 0x34c   :  { %5864 = vmatpush1.bf16.msra.mxu1 %v14195_v51  ;;  %v4326_v44 = vld [vmem:[#allocation11 + $0x1790] sm:$0xff]  ;;  %v14156_v0 = vcombine.high %v4198_v41, %v4202_v42  ;;  %v14155_v57 = vcombine.low %v4198_v41, %v4202_v42 }
 0x34d   :  { %5865 = vmatprep.subr.bf16.mxu1 %v14188_v55  ;;  %v4330_v22 = vld [vmem:[#allocation11 + $0x17b0] sm:$0xff] }
 0x34e   :  { %5823 = vmatpush1.bf16.msra.mxu0 %v14059_v2  ;;  %v14284_v56 = vcombine.high %v4326_v44, %v4330_v22  ;;  %v4190_v49 = vld [vmem:[#allocation11 + $0x1350] sm:$0xff]  ;;  %v14283_v60 = vcombine.low %v4326_v44, %v4330_v22 }
 0x34f   :  { %5824 = vmatprep.subr.bf16.mxu0 %v14052_v5  ;;  %v4194_v51 = vld [vmem:[#allocation11 + $0x1370] sm:$0xff] }
 0x350   :  { %5866 = vmatpush1.bf16.msra.mxu1 %v14187_v3  ;;  %v4318_v54 = vld [vmem:[#allocation11 + $0x1750] sm:$0xff]  ;;  %v14148_v50 = vcombine.high %v4190_v49, %v4194_v51  ;;  %v14147_v35 = vcombine.low %v4190_v49, %v4194_v51 }
 0x351   :  { %5867 = vmatprep.subr.bf16.mxu1 %v14180_v6  ;;  %v4322_v55 = vld [vmem:[#allocation11 + $0x1770] sm:$0xff] }
 0x352   :  { %5825 = vmatpush1.bf16.msra.mxu0 %v14051_v17  ;;  %v14276_v61 = vcombine.high %v4318_v54, %v4322_v55  ;;  %v4182_v2 = vld [vmem:[#allocation11 + $0x1310] sm:$0xff]  ;;  %v14275_v8 = vcombine.low %v4318_v54, %v4322_v55 }
 0x353   :  { %5826 = vmatprep.subr.bf16.mxu0 %v14044_v46  ;;  %v4186_v3 = vld [vmem:[#allocation11 + $0x1330] sm:$0xff] }
 0x354   :  { %5868 = vmatpush1.bf16.msra.mxu1 %v14179_v18  ;;  %v4310_v5 = vld [vmem:[#allocation11 + $0x1710] sm:$0xff]  ;;  %v14140_v7 = vcombine.high %v4182_v2, %v4186_v3  ;;  %v14139_v39 = vcombine.low %v4182_v2, %v4186_v3 }
 0x355   :  { %5869 = vmatprep.subr.bf16.mxu1 %v14172_v20  ;;  %v4314_v6 = vld [vmem:[#allocation11 + $0x1730] sm:$0xff] }
 0x356   :  { %5827 = vmatpush1.bf16.msra.mxu0 %v14043_v31  ;;  %v14268_v13 = vcombine.high %v4310_v5, %v4314_v6  ;;  %v4174_v17 = vld [vmem:[#allocation11 + $0x12d0] sm:$0xff]  ;;  %v14267_v26 = vcombine.low %v4310_v5, %v4314_v6 }
 0x357   :  { %5828 = vmatprep.subr.bf16.mxu0 %v14164_v36  ;;  %v4178_v18 = vld [vmem:[#allocation11 + $0x12f0] sm:$0xff] }
 0x358   :  { %5870 = vmatpush1.bf16.msra.mxu1 %v14171_v34  ;;  %v4302_v46 = vld [vmem:[#allocation11 + $0x16d0] sm:$0xff]  ;;  %v14132_v28 = vcombine.high %v4174_v17, %v4178_v18  ;;  %v14131_v41 = vcombine.low %v4174_v17, %v4178_v18 }
 0x359   :  { %5871 = vmatprep.subr.bf16.mxu1 %v14292_v38  ;;  %v4306_v20 = vld [vmem:[#allocation11 + $0x16f0] sm:$0xff] }
 0x35a   :  { %5829 = vmatpush2.bf16.msra.mxu0 %v14163_v21  ;;  %v14260_v29 = vcombine.high %v4302_v46, %v4306_v20  ;;  %v4166_v31 = vld [vmem:[#allocation11 + $0x1290] sm:$0xff]  ;;  %v14259_v42 = vcombine.low %v4302_v46, %v4306_v20 }
 0x35b   :  { %5830 = vmatprep.subr.bf16.mxu0 %v14156_v0  ;;  %v4170_v34 = vld [vmem:[#allocation11 + $0x12b0] sm:$0xff] }
 0x35c   :  { %5872 = vmatpush2.bf16.msra.mxu1 %v14291_v47  ;;  %v4294_v36 = vld [vmem:[#allocation11 + $0x1690] sm:$0xff]  ;;  %v14124_v44 = vcombine.high %v4166_v31, %v4170_v34  ;;  %v14123_v49 = vcombine.low %v4166_v31, %v4170_v34 }
 0x35d   :  { %5873 = vmatprep.subr.bf16.mxu1 %v14284_v56  ;;  %v4298_v38 = vld [vmem:[#allocation11 + $0x16b0] sm:$0xff] }
 0x35e   :  { %5831 = vmatpush2.bf16.msra.mxu0 %v14155_v57  ;;  %v14252_v22 = vcombine.high %v4294_v36, %v4298_v38  ;;  %v4158_v21 = vld [vmem:[#allocation11 + $0x1250] sm:$0xff]  ;;  %v14251_v51 = vcombine.low %v4294_v36, %v4298_v38 }
 0x35f   :  { %5832 = vmatprep.subr.bf16.mxu0 %v14148_v50  ;;  %v4162_v47 = vld [vmem:[#allocation11 + $0x1270] sm:$0xff] }
 0x360   :  { %5874 = vmatpush2.bf16.msra.mxu1 %v14283_v60  ;;  %v4286_v0 = vld [vmem:[#allocation11 + $0x1650] sm:$0xff]  ;;  %v14116_v54 = vcombine.high %v4158_v21, %v4162_v47  ;;  %v14115_v2 = vcombine.low %v4158_v21, %v4162_v47  ;;  %v4259_v21 = vld [vmem:[#allocation11 + $0x1578] sm:$0xff] }
 0x361   :  { %5875 = vmatprep.subr.bf16.mxu1 %v14276_v61  ;;  %v4290_v56 = vld [vmem:[#allocation11 + $0x1670] sm:$0xff] }
 0x362   :  { %5833 = vmatpush2.bf16.msra.mxu0 %v14147_v35  ;;  %v14244_v55 = vcombine.high %v4286_v0, %v4290_v56  ;;  %v4150_v57 = vld [vmem:[#allocation11 + $0x1210] sm:$0xff]  ;;  %v14243_v3 = vcombine.low %v4286_v0, %v4290_v56  ;;  %v4143_v35 = vld [vmem:[#allocation11 + $0x11d8] sm:$0xff] }
 0x363   :  { %5834 = vmatprep.subr.bf16.mxu0 %v14140_v7  ;;  %v4154_v60 = vld [vmem:[#allocation11 + $0x1230] sm:$0xff]  ;;  %v4271_v7 = vld [vmem:[#allocation11 + $0x15d8] sm:$0xff] }
 0x364   :  { %5876 = vmatpush2.bf16.msra.mxu1 %v14275_v8  ;;  %v4278_v50 = vld [vmem:[#allocation11 + $0x1610] sm:$0xff]  ;;  %v14108_v5 = vcombine.high %v4150_v57, %v4154_v60  ;;  %v4147_v8 = vld [vmem:[#allocation11 + $0x11f8] sm:$0xff]  ;;  %v14107_v17 = vcombine.low %v4150_v57, %v4154_v60 }
 0x365   :  { %5877 = vmatprep.subr.bf16.mxu1 %v14268_v13  ;;  %v4282_v61 = vld [vmem:[#allocation11 + $0x1630] sm:$0xff]  ;;  %v4275_v13 = vld [vmem:[#allocation11 + $0x15f8] sm:$0xff]  ;;  %v14102_v46 = vcombine.high %v4143_v35, %v4147_v8  ;;  %v14101_v31 = vcombine.low %v4143_v35, %v4147_v8 }
 0x366   :  { %5835 = vmatpush2.bf16.msra.mxu0 %v14139_v39  ;;  %v14236_v6 = vcombine.high %v4278_v50, %v4282_v61  ;;  %v14235_v18 = vcombine.low %v4278_v50, %v4282_v61  ;;  %v14230_v20 = vcombine.high %v4271_v7, %v4275_v13  ;;  %v4135_v39 = vld [vmem:[#allocation11 + $0x1198] sm:$0xff]  ;;  %v14229_v34 = vcombine.low %v4271_v7, %v4275_v13 }
 0x367   :  { %5836 = vmatprep.subr.bf16.mxu0 %v14132_v28  ;;  %v4263_v28 = vld [vmem:[#allocation11 + $0x1598] sm:$0xff] }
 0x368   :  { %5878 = vmatpush2.bf16.msra.mxu1 %v14267_v26  ;;  %v4139_v26 = vld [vmem:[#allocation11 + $0x11b8] sm:$0xff] }
 0x369   :  { %5879 = vmatprep.subr.bf16.mxu1 %v14260_v29  ;;  %v4267_v29 = vld [vmem:[#allocation11 + $0x15b8] sm:$0xff]  ;;  %v14094_v36 = vcombine.high %v4135_v39, %v4139_v26  ;;  %v14093_v56 = vcombine.low %v4135_v39, %v4139_v26 }
 0x36a   :  { %5837 = vmatpush2.bf16.msra.mxu0 %v14131_v41  ;;  %v14222_v38 = vcombine.high %v4263_v28, %v4267_v29  ;;  %v4127_v41 = vld [vmem:[#allocation11 + $0x1158] sm:$0xff] }
 0x36b   :  { %5838 = vmatprep.subr.bf16.mxu0 %v14124_v44  ;;  %v4119_v50 = vld [vmem:[#allocation11 + $0x1118] sm:$0xff] }
 0x36c   :  { %5880 = vmatpush2.bf16.msra.mxu1 %v14259_v42  ;;  %v4131_v42 = vld [vmem:[#allocation11 + $0x1178] sm:$0xff] }
 0x36d   :  { %5881 = vmatprep.subr.bf16.mxu1 %v14252_v22  ;;  %v4255_v22 = vld [vmem:[#allocation11 + $0x1558] sm:$0xff]  ;;  %v14085_v7 = vcombine.low %v4127_v41, %v4131_v42 }
 0x36e   :  { %5839 = vmatpush2.bf16.msra.mxu0 %v14123_v49  ;;  %v4123_v61 = vld [vmem:[#allocation11 + $0x1138] sm:$0xff]  ;;  %v14213_v13 = vcombine.low %v4255_v22, %v4259_v21 }
 0x36f   :  { %5840 = vmatprep.subr.bf16.mxu0 %v14116_v54  ;;  %v14086_v54 = vcombine.high %v4127_v41, %v4131_v42  ;;  %v4111_v39 = vld [vmem:[#allocation11 + $0x10d8] sm:$0xff] }
 0x370   :  { %5882 = vmatpush2.bf16.msra.mxu1 %v14251_v51  ;;  %v14221_v51 = vcombine.low %v4263_v28, %v4267_v29  ;;  %v4115_v26 = vld [vmem:[#allocation11 + $0x10f8] sm:$0xff] }
 0x371   :  { %5883 = vmatprep.subr.bf16.mxu1 %v14244_v55  ;;  %v4239_v29 = vld [vmem:[#allocation11 + $0x14d8] sm:$0xff] }
 0x372   :  { %5841 = vmatpush2.bf16.msra.mxu0 %v14115_v2  ;;  %v4103_v42 = vld [vmem:[#allocation11 + $0x1098] sm:$0xff] }
 0x373   :  { %5842 = vmatprep.subr.bf16.mxu0 %v14108_v5  ;;  %v16213_v5 = vld [vmem:[#allocation8 + $0xc] ss:$16 sps:$4 sm:$0xff]  }
 0x374   :  { %5884 = vmatpush2.bf16.msra.mxu1 %v14243_v3  ;;  %v4251_v3 = vld [vmem:[#allocation11 + $0x1538] sm:$0xff] }
 0x375   :  { %5885 = vmatprep.subr.bf16.mxu1 %v14236_v6 }
 0x376   :  { %5843 = vmatpush2.bf16.msra.mxu0 %v14107_v17  ;;  %v14078_v17 = vcombine.high %v4119_v50, %v4123_v61 }
 0x377   :  { %5898 = vmatprep.subr.bf16.mxu0 %v14102_v46 }
 0x378   :  { %5886 = vmatpush2.bf16.msra.mxu1 %v14235_v18 }
 0x379   :  { %5941 = vmatprep.subr.bf16.mxu1 %v14230_v20  ;;  %v4027_v44 = vpop.f32.mrf.mxu0  ;;  %5845 = vmatmul.mubr.bf16.vlgmr.msra.gmra.mxu0 %v16853_v19  ;;  %v14214_v19 = vcombine.high %v4255_v22, %v4259_v21  ;;  %v4235_v22 = vld [vmem:[#allocation11 + $0x14b8] sm:$0xff]  ;;  %v14069_v21 = vcombine.low %v4111_v39, %v4115_v26 }
 0x37a   :  { %v4028_v47 = vadd.f32 %v4027_v44, %v16823_v27  ;;  %5899 = vmatpush1.bf16.msra.mxu0 %v14101_v31  ;;  %v16212_v27 = vld [vmem:[#allocation8 + $0x4] ss:$16 sps:$4 sm:$0xff]   ;;  %v4243_v31 = vld [vmem:[#allocation11 + $0x14f8] sm:$0xff] }
 0x37b   :  { %v4070_v0 = vpop.f32.mrf.mxu1  ;;  %5888 = vmatmul.mubr.bf16.vlgmr.msra.gmra.mxu1 %v16855_v15  ;;  %v4029_v49 = vpop.f32.mrf.mxu0  ;;  %5900 = vmatprep.subr.bf16.mxu0 %v14094_v36  ;;  %v4247_v15 = vld [vmem:[#allocation11 + $0x1518] sm:$0xff]  ;;  %v14198_v41 = vcombine.high %v4239_v29, %v4243_v31 }
 0x37c   :  { %5942 = vmatpush1.bf16.msra.mxu1 %v14229_v34  ;;  %v16896_v55 = vadd.f32 %v4070_v0, %v4028_v47  ;;  %v4030_v57 = vadd.f32 %v4029_v49, %v16826_v40  ;;  %5930 = vmatprep.mubr.bf16.mxu0 %v16212_v27  ;;  %v14206_v20 = vcombine.high %v4247_v15, %v4251_v3  ;;  %v4107_v44 = vld [vmem:[#allocation11 + $0x10b8] sm:$0xff] }
 0x37d   :  { %v4072_v60 = vpop.f32.mrf.mxu1  ;;  %5943 = vmatprep.subr.bf16.mxu1 %v14222_v38  ;;  %v4031_v2 = vpop.f32.mrf.mxu0  ;;  %5973 = vmatprep.mubr.bf16.mxu1 %v16213_v5  ;;  %v14077_v34 = vcombine.low %v4119_v50, %v4123_v61  ;;  %v14205_v36 = vcombine.low %v4247_v15, %v4251_v3  ;;  %v14070_v38 = vcombine.high %v4111_v39, %v4115_v26  ;;  %v4095_v49 = vld [vmem:[#allocation11 + $0x1058] sm:$0xff] }
 0x37e   :  { %v16899_v6 = vadd.f32 %v4072_v60, %v4030_v57  ;;  %v4032_v35 = vadd.f32 %v4031_v2, %v16829_v48  ;;  %5901 = vmatpush1.bf16.msra.mxu0 %v14093_v56  ;;  %v14197_v47 = vcombine.low %v4239_v29, %v4243_v31  ;;  %v14062_v0 = vcombine.high %v4103_v42, %v4107_v44  ;;  %v4227_v57 = vld [vmem:[#allocation11 + $0x1478] sm:$0xff] }
 0x37f   :  { %v4074_v8 = vpop.f32.mrf.mxu1  ;;  %v4033_v40 = vpop.f32.mrf.mxu0  ;;  %5902 = vmatprep.subr.bf16.mxu0 %v14086_v54  ;;  %v4223_v54 = vld [vmem:[#allocation11 + $0x1458] sm:$0xff]  ;;  %v14061_v60 = vcombine.low %v4103_v42, %v4107_v44 }
 0x380   :  { %5944 = vmatpush1.bf16.msra.mxu1 %v14221_v51  ;;  %v16902_v18 = vadd.f32 %v4074_v8, %v4032_v35  ;;  %v4034_v46 = vadd.f32 %v4033_v40, %v16831_v58  ;;  %v4231_v58 = vld [vmem:[#allocation11 + $0x1498] sm:$0xff]  ;;  %v14182_v61 = vcombine.high %v4223_v54, %v4227_v57  ;;  %v14181_v35 = vcombine.low %v4223_v54, %v4227_v57 }
 0x381   :  { %5945 = vmatprep.subr.bf16.mxu1 %v14214_v19  ;;  %v4076_v28 = vpop.f32.mrf.mxu1  ;;  %v14190_v56 = vcombine.high %v4231_v58, %v4235_v22  ;;  %v4099_v51 = vld [vmem:[#allocation11 + $0x1078] sm:$0xff]  ;;  %v14189_v19 = vcombine.low %v4231_v58, %v4235_v22 }
 0x382   :  { %v16905_v48 = vadd.f32 %v4076_v28, %v4034_v46  ;;  %5903 = vmatpush1.bf16.msra.mxu0 %v14085_v7  ;;  %v14054_v50 = vcombine.high %v4095_v49, %v4099_v51  ;;  %v4087_v27 = vld [vmem:[#allocation11 + $0x1018] sm:$0xff]  ;;  %v14053_v5 = vcombine.low %v4095_v49, %v4099_v51 }
 0x383   :  { %5904 = vmatprep.subr.bf16.mxu0 %v14078_v17  ;;  %v4091_v2 = vld [vmem:[#allocation11 + $0x1038] sm:$0xff] }
 0x384   :  { %5946 = vmatpush1.bf16.msra.mxu1 %v14213_v13  ;;  %v4215_v15 = vld [vmem:[#allocation11 + $0x1418] sm:$0xff]  ;;  %v14046_v8 = vcombine.high %v4087_v27, %v4091_v2 }
 0x385   :  { %5947 = vmatprep.subr.bf16.mxu1 %v14206_v20  ;;  %v4219_v3 = vld [vmem:[#allocation11 + $0x1438] sm:$0xff]  ;;  %v14045_v20 = vcombine.low %v4087_v27, %v4091_v2 }
 0x386   :  { %5905 = vmatpush1.bf16.msra.mxu0 %v14077_v34  ;;  %v14174_v7 = vcombine.high %v4215_v15, %v4219_v3  ;;  %v4207_v40 = vld [vmem:[#allocation11 + $0x13d8] sm:$0xff]  ;;  %v14173_v39 = vcombine.low %v4215_v15, %v4219_v3 }
 0x387   :  { %5906 = vmatprep.subr.bf16.mxu0 %v14070_v38  ;;  %v4211_v13 = vld [vmem:[#allocation11 + $0x13f8] sm:$0xff] }
 0x388   :  { %5948 = vmatpush1.bf16.msra.mxu1 %v14205_v36  ;;  %v4335_v17 = vld [vmem:[#allocation11 + $0x17d8] sm:$0xff]  ;;  %v14166_v26 = vcombine.high %v4207_v40, %v4211_v13  ;;  %v14165_v38 = vcombine.low %v4207_v40, %v4211_v13 }
 0x389   :  { %5949 = vmatprep.subr.bf16.mxu1 %v14198_v41  ;;  %v4339_v46 = vld [vmem:[#allocation11 + $0x17f8] sm:$0xff] }
 0x38a   :  { %5907 = vmatpush1.bf16.msra.mxu0 %v14069_v21  ;;  %v14294_v28 = vcombine.high %v4335_v17, %v4339_v46  ;;  %v4199_v29 = vld [vmem:[#allocation11 + $0x1398] sm:$0xff]  ;;  %v14293_v41 = vcombine.low %v4335_v17, %v4339_v46 }
 0x38b   :  { %5908 = vmatprep.subr.bf16.mxu0 %v14062_v0  ;;  %v4203_v31 = vld [vmem:[#allocation11 + $0x13b8] sm:$0xff] }
 0x38c   :  { %5950 = vmatpush1.bf16.msra.mxu1 %v14197_v47  ;;  %v4327_v34 = vld [vmem:[#allocation11 + $0x1798] sm:$0xff]  ;;  %v14158_v42 = vcombine.high %v4199_v29, %v4203_v31  ;;  %v14157_v0 = vcombine.low %v4199_v29, %v4203_v31 }
 0x38d   :  { %5951 = vmatprep.subr.bf16.mxu1 %v14190_v56  ;;  %v4331_v36 = vld [vmem:[#allocation11 + $0x17b8] sm:$0xff] }
 0x38e   :  { %5909 = vmatpush1.bf16.msra.mxu0 %v14061_v60  ;;  %v14286_v44 = vcombine.high %v4327_v34, %v4331_v36  ;;  %v4191_v58 = vld [vmem:[#allocation11 + $0x1358] sm:$0xff]  ;;  %v14285_v56 = vcombine.low %v4327_v34, %v4331_v36 }
 0x38f   :  { %5910 = vmatprep.subr.bf16.mxu0 %v14054_v50  ;;  %v4195_v22 = vld [vmem:[#allocation11 + $0x1378] sm:$0xff] }
 0x390   :  { %5952 = vmatpush1.bf16.msra.mxu1 %v14189_v19  ;;  %v4319_v21 = vld [vmem:[#allocation11 + $0x1758] sm:$0xff]  ;;  %v14150_v49 = vcombine.high %v4191_v58, %v4195_v22  ;;  %v14149_v50 = vcombine.low %v4191_v58, %v4195_v22 }
 0x391   :  { %5953 = vmatprep.subr.bf16.mxu1 %v14182_v61  ;;  %v4323_v47 = vld [vmem:[#allocation11 + $0x1778] sm:$0xff] }
 0x392   :  { %5911 = vmatpush1.bf16.msra.mxu0 %v14053_v5  ;;  %v14278_v51 = vcombine.high %v4319_v21, %v4323_v47  ;;  %v4183_v54 = vld [vmem:[#allocation11 + $0x1318] sm:$0xff]  ;;  %v14277_v61 = vcombine.low %v4319_v21, %v4323_v47 }
 0x393   :  { %5912 = vmatprep.subr.bf16.mxu0 %v14046_v8  ;;  %v4187_v57 = vld [vmem:[#allocation11 + $0x1338] sm:$0xff] }
 0x394   :  { %5954 = vmatpush1.bf16.msra.mxu1 %v14181_v35  ;;  %v4311_v60 = vld [vmem:[#allocation11 + $0x1718] sm:$0xff]  ;;  %v14142_v27 = vcombine.high %v4183_v54, %v4187_v57  ;;  %v14141_v8 = vcombine.low %v4183_v54, %v4187_v57 }
 0x395   :  { %5955 = vmatprep.subr.bf16.mxu1 %v14174_v7  ;;  %v4315_v19 = vld [vmem:[#allocation11 + $0x1738] sm:$0xff] }
 0x396   :  { %5913 = vmatpush1.bf16.msra.mxu0 %v14045_v20  ;;  %v14270_v2 = vcombine.high %v4311_v60, %v4315_v19  ;;  %v4175_v15 = vld [vmem:[#allocation11 + $0x12d8] sm:$0xff]  ;;  %v14269_v7 = vcombine.low %v4311_v60, %v4315_v19 }
 0x397   :  { %5914 = vmatprep.subr.bf16.mxu0 %v14166_v26  ;;  %v4179_v3 = vld [vmem:[#allocation11 + $0x12f8] sm:$0xff] }
 0x398   :  { %5956 = vmatpush1.bf16.msra.mxu1 %v14173_v39  ;;  %v4303_v5 = vld [vmem:[#allocation11 + $0x16d8] sm:$0xff]  ;;  %v14134_v40 = vcombine.high %v4175_v15, %v4179_v3  ;;  %v14133_v26 = vcombine.low %v4175_v15, %v4179_v3  ;;  %v16214_v3 = vld [vmem:[#allocation8] ss:$16 sps:$4 sm:$0xff]  }
 0x399   :  { %5957 = vmatprep.subr.bf16.mxu1 %v14294_v28  ;;  %v4307_v35 = vld [vmem:[#allocation11 + $0x16f8] sm:$0xff] }
 0x39a   :  { %5915 = vmatpush2.bf16.msra.mxu0 %v14165_v38  ;;  %v14262_v13 = vcombine.high %v4303_v5, %v4307_v35  ;;  %v4167_v17 = vld [vmem:[#allocation11 + $0x1298] sm:$0xff]  ;;  %v14261_v28 = vcombine.low %v4303_v5, %v4307_v35  ;;  %v3770_v5 = vadd.f32 %v16841_v25, %v16771_v43  ;;  %v16926_v25 = vld [vmem:[#allocation13] sm:$0xff] }
 0x39b   :  { %5916 = vmatprep.subr.bf16.mxu0 %v14158_v42  ;;  %v4171_v46 = vld [vmem:[#allocation11 + $0x12b8] sm:$0xff] }
 0x39c   :  { %5958 = vmatpush2.bf16.msra.mxu1 %v14293_v41  ;;  %v4295_v20 = vld [vmem:[#allocation11 + $0x1698] sm:$0xff]  ;;  %v14126_v29 = vcombine.high %v4167_v17, %v4171_v46  ;;  %v14125_v42 = vcombine.low %v4167_v17, %v4171_v46 }
 0x39d   :  { %5959 = vmatprep.subr.bf16.mxu1 %v14286_v44  ;;  %v4299_v39 = vld [vmem:[#allocation11 + $0x16b8] sm:$0xff] }
 0x39e   :  { %5917 = vmatpush2.bf16.msra.mxu0 %v14157_v0  ;;  %v14254_v31 = vcombine.high %v4295_v20, %v4299_v39  ;;  %v4159_v34 = vld [vmem:[#allocation11 + $0x1258] sm:$0xff]  ;;  %v14253_v44 = vcombine.low %v4295_v20, %v4299_v39 }
 0x39f   :  { %5918 = vmatprep.subr.bf16.mxu0 %v14150_v49  ;;  %v4163_v36 = vld [vmem:[#allocation11 + $0x1278] sm:$0xff] }
 0x3a0   :  { %5960 = vmatpush2.bf16.msra.mxu1 %v14285_v56  ;;  %v4287_v38 = vld [vmem:[#allocation11 + $0x1658] sm:$0xff]  ;;  %v14118_v58 = vcombine.high %v4159_v34, %v4163_v36  ;;  %v14117_v49 = vcombine.low %v4159_v34, %v4163_v36 }
 0x3a1   :  { %5961 = vmatprep.subr.bf16.mxu1 %v14278_v51  ;;  %v4291_v41 = vld [vmem:[#allocation11 + $0x1678] sm:$0xff] }
 0x3a2   :  { %5919 = vmatpush2.bf16.msra.mxu0 %v14149_v50  ;;  %v14246_v22 = vcombine.high %v4287_v38, %v4291_v41  ;;  %v4151_v21 = vld [vmem:[#allocation11 + $0x1218] sm:$0xff]  ;;  %v14245_v51 = vcombine.low %v4287_v38, %v4291_v41  ;;  %v6002_v50 = vlaneseq }
 0x3a3   :  { %5920 = vmatprep.subr.bf16.mxu0 %v14142_v27  ;;  %v4155_v47 = vld [vmem:[#allocation11 + $0x1238] sm:$0xff]  ;;  %v2173_v27 = vadd.f32 %v16781_v45, %v16777_v37 }
 0x3a4   :  { %5962 = vmatpush2.bf16.msra.mxu1 %v14277_v61  ;;  %v4279_v0 = vld [vmem:[#allocation11 + $0x1618] sm:$0xff]  ;;  %v14110_v54 = vcombine.high %v4151_v21, %v4155_v47  ;;  %v14109_v60 = vcombine.low %v4151_v21, %v4155_v47  ;;  %v16907_v61 = vshrl.u32 %v6002_v50, 7 }
 0x3a5   :  { %5963 = vmatprep.subr.bf16.mxu1 %v14270_v2  ;;  %v4283_v56 = vld [vmem:[#allocation11 + $0x1638] sm:$0xff]  ;;  %v3772_v2 = vadd.f32 %v16845_v62, %v16774_v30 }
 0x3a6   :  { %5921 = vmatpush2.bf16.msra.mxu0 %v14141_v8  ;;  %v14238_v57 = vcombine.high %v4279_v0, %v4283_v56  ;;  %v14237_v19 = vcombine.low %v4279_v0, %v4283_v56  ;;  %v16215_v8 = vld [vmem:[#allocation8 + $0x8] ss:$16 sps:$4 sm:$0xff]   ;;  %v16919_v37 = vsub.s32 1, %v16907_v61  ;;  %v16922_v30 = vsub.s32 0, %v16907_v61 }
 0x3a7   :  { %5922 = vmatprep.subr.bf16.mxu0 %v14134_v40  ;;  %v3774_v40 = vadd.f32 %v16849_v9, %v2173_v27  ;;  %v3815_v17 = vadd.f32 %v16847_v1, %v3772_v2  ;;  %v16585_v0 = vmov 0   ;;  %v16949_v2 = vsub.s32 3, %v16907_v61 }
 0x3a8   :  { %5964 = vmatpush2.bf16.msra.mxu1 %v14269_v7  ;;  %v2175_v7 = vadd.f32 %v16787_v53, %v16785_v59  ;;  %v3813_v59 = vadd.f32 %v16843_v33, %v3770_v5  ;;  %v6005_v1 = vrot.slane %v16926_v25, %v16922_v30 }
 0x3a9   :  { %5965 = vmatprep.subr.bf16.mxu1 %v14262_v13  ;;  %v3817_v9 = vadd.f32 %v16851_v14, %v3774_v40 }
 0x3aa   :  { %5923 = vmatpush2.bf16.msra.mxu0 %v14133_v26  ;;  %v3776_v43 = vadd.f32 %v16857_v24, %v2175_v7  ;;  %v6009_v26 = vrot.slane %v16926_v25, %v16919_v37 }
 0x3ab   :  { %5924 = vmatprep.subr.bf16.mxu0 %v14126_v29 }
 0x3ac   :  { %5966 = vmatpush2.bf16.msra.mxu1 %v14261_v28  ;;  %v3819_v34 = vadd.f32 %v16859_v32, %v3776_v43 }
 0x3ad   :  { %5967 = vmatprep.subr.bf16.mxu1 %v14254_v31 }
 0x3ae   :  { %5925 = vmatpush2.bf16.msra.mxu0 %v14125_v42 }
 0x3af   :  { %5926 = vmatprep.subr.bf16.mxu0 %v14118_v58 }
 0x3b0   :  { %5968 = vmatpush2.bf16.msra.mxu1 %v14253_v44 }
 0x3b1   :  { %5969 = vmatprep.subr.bf16.mxu1 %v14246_v22 }
 0x3b2   :  { %5927 = vmatpush2.bf16.msra.mxu0 %v14117_v49  ;;  %v16935_v49 = vld [vmem:[#allocation10] sm:$0xff] }
 0x3b3   :  { %5928 = vmatprep.subr.bf16.mxu0 %v14110_v54 }
 0x3b4   :  { %5970 = vmatpush2.bf16.msra.mxu1 %v14245_v51  ;;  %v16937_v51 = vld [vmem:[#allocation10 + $0x8] sm:$0xff] }
 0x3b5   :  { %5971 = vmatprep.subr.bf16.mxu1 %v14238_v57  ;;  %v16941_v54 = vpack.c.bf16 %v16937_v51, %v16935_v49 }
 0x3b6   :  { %5929 = vmatpush2.bf16.msra.mxu0 %v14109_v60  ;;  %v16946_v60 = vsub.s32 2, %v16907_v61 }
 0x3b8   :  { %5972 = vmatpush2.bf16.msra.mxu1 %v14237_v19  ;;  %v6013_v5 = vrot.slane %v16926_v25, %v16946_v60 }
 0x3b9   :  { %v5674_v15 = vpop.f32.mrf.mxu0  ;;  %5931 = vmatmul.mubr.bf16.vlgmr.msra.gmra.mxu0 %v16214_v3 }
 0x3ba   :  { %6118 = vmatprep.mubr.bf16.mxu0 %v16585_v0 }
 0x3bb   :  { %v5717_v35 = vpop.f32.mrf.mxu1  ;;  %5974 = vmatmul.mubr.bf16.vlgmr.msra.gmra.mxu1 %v16215_v8  ;;  %v5676_v13 = vpop.f32.mrf.mxu0 }
 0x3bc   :  { %v5718_v45 = vadd.f32 %v5717_v35, %v5674_v15  ;;  %6161 = vmatprep.mubr.bf16.mxu1 %v16585_v0 }
 0x3bd   :  { %v5719_v62 = vpop.f32.mrf.mxu1  ;;  %v5678_v20 = vpop.f32.mrf.mxu0 }
 0x3be   :  { %v5720_v46 = vadd.f32 %v5719_v62, %v5676_v13  ;;  %v5984_v31 = vadd.f32 %v5718_v45, %v3813_v59  ;;  %v6017_v13 = vrot.slane %v16926_v25, %v16949_v2 }
 0x3bf   :  { %v5721_v53 = vpop.f32.mrf.mxu1  ;;  %v5680_v29 = vpop.f32.mrf.mxu0 }
 0x3c0   :  { %v5985_v39 = vadd.f32 %v5720_v46, %v3815_v17  ;;  %v5722_v28 = vadd.f32 %v5721_v53, %v5678_v20  ;;  %v6042_v44 = vadd.f32 %v6005_v1, %v5984_v31 }
 0x3c1   :  { %v5723_v24 = vpop.f32.mrf.mxu1 }
 0x3c2   :  { %v5992_v36 = vadd.f32 %v5722_v28, %v3817_v9  ;;  %v5724_v38 = vadd.f32 %v5723_v24, %v5680_v29  ;;  %v6043_v41 = vadd.f32 %v6009_v26, %v5985_v39  ;;  %v6058_v47 = vmax.f32 %v6042_v44, 0.0 }
 0x3c4   :  { %v6050_v33 = vadd.f32 %v6005_v1, %v5992_v36  ;;  %v5993_v42 = vadd.f32 %v5724_v38, %v3819_v34  ;;  %v6059_v22 = vmax.f32 %v6043_v41, 0.0 }
 0x3c6   :  { %v6051_v14 = vadd.f32 %v6009_v26, %v5993_v42  ;;  %v6066_v58 = vmax.f32 %v6050_v33, 0.0 }
 0x3c8   :  { %v6067_v21 = vmax.f32 %v6051_v14, 0.0  ;;  %v6075_v32 = vpack.c.bf16 %v6066_v58, %v6058_v47 }
 0x3ca   :  { %v6076_v56 = vpack.c.bf16 %v6067_v21, %v6059_v22 }
 0x3cc   :  { %6100 = vmatprep.subr.bf16.mxu0 %v6076_v56 }
 0x3cd   :  { %6101 = vmatpush1.bf16.msra.mxu0 %v6075_v32 }
 0x3d0   :  { %14295 = vmatmul.mubr.msk.bf16.vlgmr.msra.gmra.mxu0 %vm259_vm0, %v16941_v54 }
 0x3d1   :  { %6204 = vmatprep.mubr.bf16.mxu0 %v16585_v0 }
 0x3f9   :  { %v5760_v57 = vpop.f32.mrf.mxu0 }
 0x3fb   :  { %v5803_v19 = vpop.f32.mrf.mxu1  ;;  %v5762_v27 = vpop.f32.mrf.mxu0 }
 0x3fc   :  { %v5804_v50 = vadd.f32 %v5803_v19, %v5760_v57 }
 0x3fd   :  { %v5805_v15 = vpop.f32.mrf.mxu1  ;;  %v5764_v8 = vpop.f32.mrf.mxu0 }
 0x3fe   :  { %v5986_v3 = vadd.f32 %v5804_v50, %v16864_v12  ;;  %v5806_v35 = vadd.f32 %v5805_v15, %v5762_v27 }
 0x3ff   :  { %v5807_v7 = vpop.f32.mrf.mxu1  ;;  %v5766_v62 = vpop.f32.mrf.mxu0 }
 0x400   :  { %v5987_v40 = vadd.f32 %v5806_v35, %v16869_v4  ;;  %v5808_v45 = vadd.f32 %v5807_v7, %v5764_v8  ;;  %v6044_v43 = vadd.f32 %v6013_v5, %v5986_v3  ;;  %v15242_v7 = vld [vmem:[#allocation14 + $0xe4] ss:$16 sps:$4 sm:$0xff]  }
 0x401   :  { %v5809_v17 = vpop.f32.mrf.mxu1 }
 0x402   :  { %v5994_v46 = vadd.f32 %v5808_v45, %v16872_v16  ;;  %v5810_v20 = vadd.f32 %v5809_v17, %v5766_v62  ;;  %v6045_v59 = vadd.f32 %v6017_v13, %v5987_v40  ;;  %v6060_v9 = vmax.f32 %v6044_v43, 0.0  ;;  %v250_v40 = vld [vmem:[#allocation2 + $0x8] sm:$0xff] }
 0x403   :  { %v6020_v16 = vsub.s32 4, %v16907_v61  ;;  %v15240_v45 = vld [vmem:[#allocation14 + $0xe0] ss:$16 sps:$4 sm:$0xff]   ;;  %v15251_v17 = vld [vmem:[#allocation14 + $0xa4] ss:$16 sps:$4 sm:$0xff]  }
 0x404   :  { %v6052_v12 = vadd.f32 %v6013_v5, %v5994_v46  ;;  %v5995_v53 = vadd.f32 %v5810_v20, %v16875_v11  ;;  %v6061_v28 = vmax.f32 %v6045_v59, 0.0  ;;  %v6024_v11 = vsub.s32 5, %v16907_v61  ;;  %v15249_v43 = vld [vmem:[#allocation14 + $0xa0] ss:$16 sps:$4 sm:$0xff]   ;;  %v15257_v46 = vld [vmem:[#allocation14 + $0x84] ss:$16 sps:$4 sm:$0xff]  }
 0x405   :  { %v6021_v33 = vrot.slane %v16926_v25, %v6020_v16  ;;  %v15255_v20 = vld [vmem:[#allocation14 + $0x80] ss:$16 sps:$4 sm:$0xff]   ;;  %v15263_v59 = vld [vmem:[#allocation14 + $0x64] ss:$16 sps:$4 sm:$0xff]  }
 0x406   :  { %v6068_v39 = vmax.f32 %v6052_v12, 0.0  ;;  %v6053_v26 = vadd.f32 %v6017_v13, %v5995_v53  ;;  %v6025_v22 = vrot.slane %v16926_v25, %v6024_v11  ;;  %v254_v13 = vld [vmem:[#allocation2 + $0x28] sm:$0xff] }
 0x407   :  { %v16973_v62 = vpack.c.bf16 %v254_v13, %v250_v40  ;;  %v15261_v12 = vld [vmem:[#allocation14 + $0x60] ss:$16 sps:$4 sm:$0xff]   ;;  %v15269_v53 = vld [vmem:[#allocation14 + $0x44] ss:$16 sps:$4 sm:$0xff]  }
 0x408   :  { %v6077_v29 = vpack.c.bf16 %v6068_v39, %v6060_v9  ;;  %v6069_v4 = vmax.f32 %v6053_v26, 0.0  ;;  %v15267_v9 = vld [vmem:[#allocation14 + $0x40] ss:$16 sps:$4 sm:$0xff]   ;;  %v15275_v39 = vld [vmem:[#allocation14 + $0x24] ss:$16 sps:$4 sm:$0xff]  }
 0x409   :  { %v15273_v26 = vld [vmem:[#allocation14 + $0x20] ss:$16 sps:$4 sm:$0xff]   ;;  %v15323_v40 = vld [vmem:[#allocation14 + $0x124] ss:$16 sps:$4 sm:$0xff]  }
 0x40a   :  { %v6078_v31 = vpack.c.bf16 %v6069_v4, %v6061_v28  ;;  %v15281_v28 = vld [vmem:[#allocation14 + $0x4] ss:$16 sps:$4 sm:$0xff]  }
 0x40b   :  { %v15287_v4 = vld [vmem:[#allocation14 + $0x1e4] ss:$16 sps:$4 sm:$0xff]  }
 0x40c   :  { %6143 = vmatprep.subr.bf16.mxu1 %v6078_v31  ;;  %v15285_v31 = vld [vmem:[#allocation14 + $0x1e0] ss:$16 sps:$4 sm:$0xff]  }
 0x40d   :  { %6144 = vmatpush1.bf16.msra.mxu1 %v6077_v29  ;;  %v15279_v29 = vld [vmem:[#allocation14] ss:$16 sps:$4 sm:$0xff]  }
 0x410   :  { %14296 = vmatmul.mubr.msk.bf16.vlgmr.msra.gmra.mxu1 %vm259_vm0, %v16941_v54 }
 0x411   :  { %6247 = vmatprep.mubr.bf16.mxu1 %v16585_v0 }
 0x439   :  { %v5846_v1 = vpop.f32.mrf.mxu0 }
 0x43b   :  { %v5889_v24 = vpop.f32.mrf.mxu1  ;;  %v5848_v36 = vpop.f32.mrf.mxu0 }
 0x43c   :  { %v5890_v34 = vadd.f32 %v5889_v24, %v5846_v1  ;;  %v15293_v1 = vld [vmem:[#allocation14 + $0x1c4] ss:$16 sps:$4 sm:$0xff]   ;;  %v15291_v24 = vld [vmem:[#allocation14 + $0x1c0] ss:$16 sps:$4 sm:$0xff]  }
 0x43d   :  { %v5891_v38 = vpop.f32.mrf.mxu1  ;;  %v5850_v44 = vpop.f32.mrf.mxu0 }
 0x43e   :  { %v5988_v41 = vadd.f32 %v5890_v34, %v16880_v63  ;;  %v5892_v42 = vadd.f32 %v5891_v38, %v5848_v36  ;;  %v15299_v34 = vld [vmem:[#allocation14 + $0x1a4] ss:$16 sps:$4 sm:$0xff]   ;;  %v15297_v36 = vld [vmem:[#allocation14 + $0x1a0] ss:$16 sps:$4 sm:$0xff]  }
 0x43f   :  { %v5893_v14 = vpop.f32.mrf.mxu1  ;;  %v5852_v47 = vpop.f32.mrf.mxu0  ;;  %v15305_v38 = vld [vmem:[#allocation14 + $0x184] ss:$16 sps:$4 sm:$0xff]  }
 0x440   :  { %v5989_v58 = vadd.f32 %v5892_v42, %v16885_v10  ;;  %v5894_v21 = vadd.f32 %v5893_v14, %v5850_v44  ;;  %v6046_v56 = vadd.f32 %v6021_v33, %v5988_v41  ;;  %v15303_v41 = vld [vmem:[#allocation14 + $0x180] ss:$16 sps:$4 sm:$0xff]   ;;  %v6028_v44 = vsub.s32 6, %v16907_v61  ;;  %v15311_v14 = vld [vmem:[#allocation14 + $0x164] ss:$16 sps:$4 sm:$0xff]  }
 0x441   :  { %v5895_v0 = vpop.f32.mrf.mxu1 }
 0x442   :  { %v5996_v32 = vadd.f32 %v5894_v21, %v16888_v23  ;;  %v5896_v63 = vadd.f32 %v5895_v0, %v5852_v47  ;;  %v6047_v57 = vadd.f32 %v6025_v22, %v5989_v58  ;;  %v6062_v27 = vmax.f32 %v6046_v56, 0.0  ;;  %v15245_v23 = vld [vmem:[#allocation14 + $0xc4] ss:$16 sps:$4 sm:$0xff]   ;;  %v15309_v56 = vld [vmem:[#allocation14 + $0x160] ss:$16 sps:$4 sm:$0xff]  }
 0x443   :  { %v6032_v47 = vsub.s32 7, %v16907_v61 }
 0x444   :  { %v6054_v19 = vadd.f32 %v6021_v33, %v5996_v32  ;;  %v5997_v50 = vadd.f32 %v5896_v63, %v16891_v52  ;;  %v6063_v5 = vmax.f32 %v6047_v57, 0.0  ;;  %v15243_v52 = vld [vmem:[#allocation14 + $0xc0] ss:$16 sps:$4 sm:$0xff]   ;;  %v260_v33 = vsel %vm259_vm0, %v16935_v49, 0.0 }
 0x445   :  { %261 = vadd.xlane.f32.xlu0 %v260_v33  ;;  %v263_v32 = vsel %vm259_vm0, %v16937_v51, 0.0  ;;  %v6029_v49 = vrot.slane %v16926_v25, %v6028_v44  ;;  %v15347_v33 = vld [vmem:[#allocation14 + $0xac] ss:$16 sps:$4 sm:$0xff]  }
 0x446   :  { %v6070_v15 = vmax.f32 %v6054_v19, 0.0  ;;  %v6055_v3 = vadd.f32 %v6025_v22, %v5997_v50  ;;  %v15317_v50 = vld [vmem:[#allocation14 + $0x144] ss:$16 sps:$4 sm:$0xff]  }
 0x448   :  { %v6079_v10 = vpack.c.bf16 %v6070_v15, %v6062_v27  ;;  %v6071_v35 = vmax.f32 %v6055_v3, 0.0  ;;  %v6033_v3 = vrot.slane %v16926_v25, %v6032_v47 }
 0x449   :  { %264 = vadd.xlane.f32.xlu0 %v263_v32  ;;  %v15270_v32 = vld [vmem:[#allocation14 + $0x260] ss:$16 sps:$4 sm:$0xff]  }
 0x44a   :  { %v6080_v8 = vpack.c.bf16 %v6071_v35, %v6063_v5 }
 0x44c   :  { %6186 = vmatprep.subr.bf16.mxu0 %v6080_v8 }
 0x44d   :  { %6187 = vmatpush1.bf16.msra.mxu0 %v6079_v10 }
 0x44e   :  { %7052 = vmatprep.subr.bf16.mxu0 %v15242_v7 }
 0x450   :  { %14297 = vmatmul.mubr.msk.bf16.vlgmr.msra.gmra.mxu0 %vm259_vm0, %v16941_v54 }
 0x451   :  { %7053 = vmatpush1.bf16.msra.mxu0 %v15240_v45  ;;  %7084 = vmatprep.mubr.bf16.mxu0 %v16973_v62 }
 0x452   :  { %7054 = vmatprep.subr.bf16.mxu0 %v15245_v23 }
 0x455   :  { %7055 = vmatpush1.bf16.msra.mxu0 %v15243_v52 }
 0x456   :  { %7056 = vmatprep.subr.bf16.mxu0 %v15251_v17 }
 0x459   :  { %7057 = vmatpush1.bf16.msra.mxu0 %v15249_v43  ;;  %v15329_v43 = vld [vmem:[#allocation14 + $0x104] ss:$16 sps:$4 sm:$0xff]  }
 0x45a   :  { %7058 = vmatprep.subr.bf16.mxu0 %v15257_v46 }
 0x45d   :  { %7059 = vmatpush1.bf16.msra.mxu0 %v15255_v20 }
 0x45e   :  { %7060 = vmatprep.subr.bf16.mxu0 %v15263_v59 }
 0x461   :  { %7061 = vmatpush1.bf16.msra.mxu0 %v15261_v12  ;;  %v15327_v12 = vld [vmem:[#allocation14 + $0x100] ss:$16 sps:$4 sm:$0xff]  }
 0x462   :  { %7062 = vmatprep.subr.bf16.mxu0 %v15269_v53  ;;  %v253_v53 = vld [vmem:[#allocation2 + $0x20] sm:$0xff] }
 0x465   :  { %7063 = vmatpush1.bf16.msra.mxu0 %v15267_v9 }
 0x466   :  { %7064 = vmatprep.subr.bf16.mxu0 %v15275_v39  ;;  %v15248_v39 = vld [vmem:[#allocation14 + $0x2e4] ss:$16 sps:$4 sm:$0xff]  }
 0x469   :  { %7065 = vmatpush1.bf16.msra.mxu0 %v15273_v26  ;;  %v15338_v26 = vld [vmem:[#allocation14 + $0xec] ss:$16 sps:$4 sm:$0xff]  }
 0x46a   :  { %7066 = vmatprep.subr.bf16.mxu0 %v15281_v28  ;;  %v252_v28 = vld [vmem:[#allocation2 + $0x18] sm:$0xff] }
 0x46d   :  { %7067 = vmatpush1.bf16.msra.mxu0 %v15279_v29 }
 0x46e   :  { %7068 = vmatprep.subr.bf16.mxu0 %v15287_v4  ;;  %v15246_v4 = vld [vmem:[#allocation14 + $0x2e0] ss:$16 sps:$4 sm:$0xff]  }
 0x471   :  { %7069 = vmatpush2.bf16.msra.mxu0 %v15285_v31  ;;  %v15336_v31 = vld [vmem:[#allocation14 + $0xe8] ss:$16 sps:$4 sm:$0xff]  }
 0x472   :  { %7070 = vmatprep.subr.bf16.mxu0 %v15293_v1  ;;  %v15254_v1 = vld [vmem:[#allocation14 + $0x2c4] ss:$16 sps:$4 sm:$0xff]  }
 0x475   :  { %7071 = vmatpush2.bf16.msra.mxu0 %v15291_v24 }
 0x476   :  { %7072 = vmatprep.subr.bf16.mxu0 %v15299_v34  ;;  %v15341_v34 = vld [vmem:[#allocation14 + $0xcc] ss:$16 sps:$4 sm:$0xff]  }
 0x479   :  { %7073 = vmatpush2.bf16.msra.mxu0 %v15297_v36  ;;  %v5932_v42 = vpop.f32.mrf.mxu0  ;;  %v15252_v36 = vld [vmem:[#allocation14 + $0x2c0] ss:$16 sps:$4 sm:$0xff]  }
 0x47a   :  { %7074 = vmatprep.subr.bf16.mxu0 %v15305_v38  ;;  %v15339_v38 = vld [vmem:[#allocation14 + $0xc8] ss:$16 sps:$4 sm:$0xff]  }
 0x47b   :  { %v5975_v58 = vpop.f32.mrf.mxu1  ;;  %v5934_v21 = vpop.f32.mrf.mxu0 }
 0x47c   :  { %v5976_v22 = vadd.f32 %v5975_v58, %v5932_v42  ;;  %v15258_v42 = vld [vmem:[#allocation14 + $0x2a0] ss:$16 sps:$4 sm:$0xff]   ;;  %v15353_v58 = vld [vmem:[#allocation14 + $0x8c] ss:$16 sps:$4 sm:$0xff]  }
 0x47d   :  { %v5977_v0 = vpop.f32.mrf.mxu1  ;;  %7075 = vmatpush2.bf16.msra.mxu0 %v15303_v41  ;;  %v5936_v19 = vpop.f32.mrf.mxu0  ;;  %v15260_v41 = vld [vmem:[#allocation14 + $0x2a4] ss:$16 sps:$4 sm:$0xff]  }
 0x47e   :  { %v5990_v63 = vadd.f32 %v5976_v22, %v16896_v55  ;;  %v5978_v57 = vadd.f32 %v5977_v0, %v5934_v21  ;;  %7076 = vmatprep.subr.bf16.mxu0 %v15311_v14  ;;  %v15315_v55 = vld [vmem:[#allocation14 + $0x140] ss:$16 sps:$4 sm:$0xff]   ;;  %v15345_v14 = vld [vmem:[#allocation14 + $0xa8] ss:$16 sps:$4 sm:$0xff]   ;;  %v15272_v0 = vld [vmem:[#allocation14 + $0x264] ss:$16 sps:$4 sm:$0xff]  }
 0x47f   :  { %v5979_v27 = vpop.f32.mrf.mxu1  ;;  %v5938_v51 = vpop.f32.mrf.mxu0  ;;  %v15264_v22 = vld [vmem:[#allocation14 + $0x280] ss:$16 sps:$4 sm:$0xff]   ;;  %v15351_v21 = vld [vmem:[#allocation14 + $0x88] ss:$16 sps:$4 sm:$0xff]  }
 0x480   :  { %v5991_v15 = vadd.f32 %v5978_v57, %v16899_v6  ;;  %v5980_v5 = vadd.f32 %v5979_v27, %v5936_v19  ;;  %v6048_v35 = vadd.f32 %v6029_v49, %v5990_v63  ;;  %v15321_v6 = vld [vmem:[#allocation14 + $0x120] ss:$16 sps:$4 sm:$0xff]   ;;  %v15278_v63 = vld [vmem:[#allocation14 + $0x244] ss:$16 sps:$4 sm:$0xff]   ;;  %v15363_v19 = vld [vmem:[#allocation14 + $0x48] ss:$16 sps:$4 sm:$0xff]  }
 0x481   :  { %v5981_v10 = vpop.f32.mrf.mxu1  ;;  %7077 = vmatpush2.bf16.msra.mxu0 %v15309_v56  ;;  %v15359_v56 = vld [vmem:[#allocation14 + $0x6c] ss:$16 sps:$4 sm:$0xff]   ;;  %v15276_v57 = vld [vmem:[#allocation14 + $0x240] ss:$16 sps:$4 sm:$0xff]  }
 0x482   :  { %v5998_v8 = vadd.f32 %v5980_v5, %v16902_v18  ;;  %v5982_v7 = vadd.f32 %v5981_v10, %v5938_v51  ;;  %7078 = vmatprep.subr.bf16.mxu0 %v15317_v50  ;;  %v6049_v13 = vadd.f32 %v6033_v3, %v5991_v15  ;;  %v6064_v52 = vmax.f32 %v6048_v35, 0.0  ;;  %v249_v18 = vld [vmem:[#allocation2] sm:$0xff]  ;;  %v15284_v50 = vld [vmem:[#allocation14 + $0x224] ss:$16 sps:$4 sm:$0xff]   ;;  %v15282_v15 = vld [vmem:[#allocation14 + $0x220] ss:$16 sps:$4 sm:$0xff]  }
 0x483   :  { %v16994_v29 = vpack.c.bf16 %v253_v53, %v249_v18  ;;  %v15371_v27 = vld [vmem:[#allocation14 + $0x2c] ss:$16 sps:$4 sm:$0xff]   ;;  %v15290_v5 = vld [vmem:[#allocation14 + $0x204] ss:$16 sps:$4 sm:$0xff]   ;;  %v15288_v10 = vld [vmem:[#allocation14 + $0x200] ss:$16 sps:$4 sm:$0xff]  }
 0x484   :  { %v6056_v45 = vadd.f32 %v6029_v49, %v5998_v8  ;;  %v5999_v23 = vadd.f32 %v5982_v7, %v16905_v48  ;;  %v6065_v46 = vmax.f32 %v6049_v13, 0.0  ;;  %v256_v48 = vld [vmem:[#allocation2 + $0x38] sm:$0xff]  ;;  %v15365_v49 = vld [vmem:[#allocation14 + $0x4c] ss:$16 sps:$4 sm:$0xff]  }
 0x485   :  { %7079 = vmatpush2.bf16.msra.mxu0 %v15315_v55  ;;  %v16996_v24 = vpack.c.bf16 %v256_v48, %v252_v28  ;;  %v15377_v51 = vld [vmem:[#allocation14 + $0xc] ss:$16 sps:$4 sm:$0xff]   ;;  %v15375_v55 = vld [vmem:[#allocation14 + $0x8] ss:$16 sps:$4 sm:$0xff]   ;;  %v15296_v35 = vld [vmem:[#allocation14 + $0x3e4] ss:$16 sps:$4 sm:$0xff]  }
 0x486   :  { %v6072_v17 = vmax.f32 %v6056_v45, 0.0  ;;  %v6057_v25 = vadd.f32 %v6033_v3, %v5999_v23  ;;  %7080 = vmatprep.subr.bf16.mxu0 %v15323_v40  ;;  %v15369_v3 = vld [vmem:[#allocation14 + $0x28] ss:$16 sps:$4 sm:$0xff]   ;;  %v15383_v8 = vld [vmem:[#allocation14 + $0x1ec] ss:$16 sps:$4 sm:$0xff]  }
 0x487   :  { %v15294_v7 = vld [vmem:[#allocation14 + $0x3e0] ss:$16 sps:$4 sm:$0xff]   ;;  %v15381_v40 = vld [vmem:[#allocation14 + $0x1e8] ss:$16 sps:$4 sm:$0xff]   ;;  %v15302_v13 = vld [vmem:[#allocation14 + $0x3c4] ss:$16 sps:$4 sm:$0xff]  }
 0x488   :  { %v6081_v20 = vpack.c.bf16 %v6072_v17, %v6064_v52  ;;  %v6073_v59 = vmax.f32 %v6057_v25, 0.0  ;;  %v15389_v45 = vld [vmem:[#allocation14 + $0x1cc] ss:$16 sps:$4 sm:$0xff]   ;;  %v15300_v23 = vld [vmem:[#allocation14 + $0x3c0] ss:$16 sps:$4 sm:$0xff]  }
 0x489   :  { %7081 = vmatpush2.bf16.msra.mxu0 %v15321_v6  ;;  %v15387_v6 = vld [vmem:[#allocation14 + $0x1c8] ss:$16 sps:$4 sm:$0xff]   ;;  %v15308_v52 = vld [vmem:[#allocation14 + $0x3a4] ss:$16 sps:$4 sm:$0xff]   ;;  %v15395_v17 = vld [vmem:[#allocation14 + $0x1ac] ss:$16 sps:$4 sm:$0xff]  }
 0x48a   :  { %v6082_v9 = vpack.c.bf16 %v6073_v59, %v6065_v46  ;;  %7082 = vmatprep.subr.bf16.mxu0 %v15329_v43  ;;  %v15306_v25 = vld [vmem:[#allocation14 + $0x3a0] ss:$16 sps:$4 sm:$0xff]   ;;  %v15393_v43 = vld [vmem:[#allocation14 + $0x1a8] ss:$16 sps:$4 sm:$0xff]   ;;  %v15314_v46 = vld [vmem:[#allocation14 + $0x384] ss:$16 sps:$4 sm:$0xff]  }
 0x48b   :  { %v15312_v59 = vld [vmem:[#allocation14 + $0x380] ss:$16 sps:$4 sm:$0xff]   ;;  %v15320_v18 = vld [vmem:[#allocation14 + $0x364] ss:$16 sps:$4 sm:$0xff]   ;;  %v15407_v53 = vld [vmem:[#allocation14 + $0x16c] ss:$16 sps:$4 sm:$0xff]  }
 0x48c   :  { %6229 = vmatprep.subr.bf16.mxu1 %v6082_v9  ;;  %v15318_v9 = vld [vmem:[#allocation14 + $0x360] ss:$16 sps:$4 sm:$0xff]   ;;  %v15413_v28 = vld [vmem:[#allocation14 + $0x14c] ss:$16 sps:$4 sm:$0xff]  }
 0x48d   :  { %6230 = vmatpush1.bf16.msra.mxu1 %v6081_v20  ;;  %7083 = vmatpush2.bf16.msra.mxu0 %v15327_v12  ;;  %v15401_v20 = vld [vmem:[#allocation14 + $0x18c] ss:$16 sps:$4 sm:$0xff]   ;;  %v15399_v12 = vld [vmem:[#allocation14 + $0x188] ss:$16 sps:$4 sm:$0xff]   ;;  %v15324_v48 = vld [vmem:[#allocation14 + $0x340] ss:$16 sps:$4 sm:$0xff]  }
 0x48e   :  { %7095 = vmatprep.subr.bf16.mxu1 %v15248_v39  ;;  %7138 = vmatprep.subr.bf16.mxu0 %v15338_v26  ;;  %v15405_v39 = vld [vmem:[#allocation14 + $0x168] ss:$16 sps:$4 sm:$0xff]   ;;  %v15326_v26 = vld [vmem:[#allocation14 + $0x344] ss:$16 sps:$4 sm:$0xff]  }
 0x490   :  { %14298 = vmatmul.mubr.msk.bf16.vlgmr.msra.gmra.mxu1 %vm259_vm0, %v16941_v54  ;;  %7085 = vmatmul.mubr.bf16.vlgmr.msra.gmra.mxu0 %v16994_v29  ;;  %v15266_v54 = vld [vmem:[#allocation14 + $0x284] ss:$16 sps:$4 sm:$0xff]  }
 0x491   :  { %7096 = vmatpush1.bf16.msra.mxu1 %v15246_v4  ;;  %7139 = vmatpush1.bf16.msra.mxu0 %v15336_v31  ;;  %v15411_v4 = vld [vmem:[#allocation14 + $0x148] ss:$16 sps:$4 sm:$0xff]   ;;  %v15332_v31 = vld [vmem:[#allocation14 + $0x324] ss:$16 sps:$4 sm:$0xff]  }
 0x492   :  { %7097 = vmatprep.subr.bf16.mxu1 %v15254_v1  ;;  %7127 = vmatprep.mubr.bf16.mxu1 %v16996_v24  ;;  %v15419_v1 = vld [vmem:[#allocation14 + $0x12c] ss:$16 sps:$4 sm:$0xff]  }
 0x493   :  { %7140 = vmatprep.subr.bf16.mxu0 %v15341_v34  ;;  %7170 = vmatprep.mubr.bf16.mxu0 %v16973_v62  ;;  %v15357_v62 = vld [vmem:[#allocation14 + $0x68] ss:$16 sps:$4 sm:$0xff]   ;;  %v15330_v34 = vld [vmem:[#allocation14 + $0x320] ss:$16 sps:$4 sm:$0xff]  }
 0x495   :  { %7098 = vmatpush1.bf16.msra.mxu1 %v15252_v36  ;;  %7141 = vmatpush1.bf16.msra.mxu0 %v15339_v38  ;;  %v15417_v36 = vld [vmem:[#allocation14 + $0x128] ss:$16 sps:$4 sm:$0xff]   ;;  %v15335_v38 = vld [vmem:[#allocation14 + $0x304] ss:$16 sps:$4 sm:$0xff]  }
 0x496   :  { %7099 = vmatprep.subr.bf16.mxu1 %v15260_v41  ;;  %7142 = vmatprep.subr.bf16.mxu0 %v15347_v33  ;;  %v15425_v41 = vld [vmem:[#allocation14 + $0x10c] ss:$16 sps:$4 sm:$0xff]   ;;  %v15333_v33 = vld [vmem:[#allocation14 + $0x300] ss:$16 sps:$4 sm:$0xff]  }
 0x499   :  { %7100 = vmatpush1.bf16.msra.mxu1 %v15258_v42  ;;  %7143 = vmatpush1.bf16.msra.mxu0 %v15345_v14  ;;  %v251_v42 = vld [vmem:[#allocation2 + $0x10] sm:$0xff] }
 0x49a   :  { %7101 = vmatprep.subr.bf16.mxu1 %v15266_v54  ;;  %7144 = vmatprep.subr.bf16.mxu0 %v15353_v58  ;;  %v255_v14 = vld [vmem:[#allocation2 + $0x30] sm:$0xff] }
 0x49b   :  { %v15423_v54 = vld [vmem:[#allocation14 + $0x108] ss:$16 sps:$4 sm:$0xff]   ;;  %v15344_v58 = vld [vmem:[#allocation14 + $0x2ec] ss:$16 sps:$4 sm:$0xff]  }
 0x49d   :  { %7102 = vmatpush1.bf16.msra.mxu1 %v15264_v22  ;;  %7145 = vmatpush1.bf16.msra.mxu0 %v15351_v21  ;;  %v17003_v22 = vpack.c.bf16 %v255_v14, %v251_v42  ;;  %v15342_v21 = vld [vmem:[#allocation14 + $0x2e8] ss:$16 sps:$4 sm:$0xff]   ;;  %v15464_v14 = vld [vmem:[#allocation17 + $0x1a4] ss:$16 sps:$4 sm:$0xff]  }
 0x49e   :  { %7103 = vmatprep.subr.bf16.mxu1 %v15272_v0  ;;  %7146 = vmatprep.subr.bf16.mxu0 %v15359_v56  ;;  %v15350_v0 = vld [vmem:[#allocation14 + $0x2cc] ss:$16 sps:$4 sm:$0xff]   ;;  %v15348_v56 = vld [vmem:[#allocation14 + $0x2c8] ss:$16 sps:$4 sm:$0xff]  }
 0x49f   :  { %v15459_v42 = vld [vmem:[#allocation17 + $0x1c0] ss:$16 sps:$4 sm:$0xff]  }
 0x4a1   :  { %7104 = vmatpush1.bf16.msra.mxu1 %v15270_v32  ;;  %7147 = vmatpush1.bf16.msra.mxu0 %v15357_v62  ;;  %v15356_v32 = vld [vmem:[#allocation14 + $0x2ac] ss:$16 sps:$4 sm:$0xff]   ;;  %v15354_v62 = vld [vmem:[#allocation14 + $0x2a8] ss:$16 sps:$4 sm:$0xff]  }
 0x4a2   :  { %7105 = vmatprep.subr.bf16.mxu1 %v15278_v63  ;;  %7148 = vmatprep.subr.bf16.mxu0 %v15365_v49  ;;  %v15362_v63 = vld [vmem:[#allocation14 + $0x28c] ss:$16 sps:$4 sm:$0xff]   ;;  %v15432_v49 = vld [vmem:[#allocation17 + $0xe0] ss:$16 sps:$4 sm:$0xff]  }
 0x4a5   :  { %7106 = vmatpush1.bf16.msra.mxu1 %v15276_v57  ;;  %7149 = vmatpush1.bf16.msra.mxu0 %v15363_v19  ;;  %v15434_v57 = vld [vmem:[#allocation17 + $0xe4] ss:$16 sps:$4 sm:$0xff]  }
 0x4a6   :  { %7107 = vmatprep.subr.bf16.mxu1 %v15284_v50  ;;  %7150 = vmatprep.subr.bf16.mxu0 %v15371_v27  ;;  %v15437_v19 = vld [vmem:[#allocation17 + $0xc4] ss:$16 sps:$4 sm:$0xff]   ;;  %v15360_v50 = vld [vmem:[#allocation14 + $0x288] ss:$16 sps:$4 sm:$0xff]  }
 0x4a7   :  { %v15435_v27 = vld [vmem:[#allocation17 + $0xc0] ss:$16 sps:$4 sm:$0xff]  }
 0x4a9   :  { %7108 = vmatpush1.bf16.msra.mxu1 %v15282_v15  ;;  %7151 = vmatpush1.bf16.msra.mxu0 %v15369_v3  ;;  %v15440_v15 = vld [vmem:[#allocation17 + $0xa4] ss:$16 sps:$4 sm:$0xff]   ;;  %v15438_v3 = vld [vmem:[#allocation17 + $0xa0] ss:$16 sps:$4 sm:$0xff]  }
 0x4aa   :  { %7109 = vmatprep.subr.bf16.mxu1 %v15290_v5  ;;  %7152 = vmatprep.subr.bf16.mxu0 %v15377_v51  ;;  %v15374_v5 = vld [vmem:[#allocation14 + $0x24c] ss:$16 sps:$4 sm:$0xff]  }
 0x4ab   :  { %v15443_v51 = vld [vmem:[#allocation17 + $0x84] ss:$16 sps:$4 sm:$0xff]  }
 0x4ad   :  { %7110 = vmatpush1.bf16.msra.mxu1 %v15288_v10  ;;  %7153 = vmatpush1.bf16.msra.mxu0 %v15375_v55  ;;  %v15372_v10 = vld [vmem:[#allocation14 + $0x248] ss:$16 sps:$4 sm:$0xff]  }
 0x4ae   :  { %7111 = vmatprep.subr.bf16.mxu1 %v15296_v35  ;;  %7154 = vmatprep.subr.bf16.mxu0 %v15383_v8  ;;  %v15441_v55 = vld [vmem:[#allocation17 + $0x80] ss:$16 sps:$4 sm:$0xff]   ;;  %v15380_v35 = vld [vmem:[#allocation14 + $0x22c] ss:$16 sps:$4 sm:$0xff]  }
 0x4af   :  { %v15446_v8 = vld [vmem:[#allocation17 + $0x64] ss:$16 sps:$4 sm:$0xff]  }
 0x4b1   :  { %7112 = vmatpush2.bf16.msra.mxu1 %v15294_v7  ;;  %7155 = vmatpush2.bf16.msra.mxu0 %v15381_v40  ;;  %v15378_v7 = vld [vmem:[#allocation14 + $0x228] ss:$16 sps:$4 sm:$0xff]  }
 0x4b2   :  { %7113 = vmatprep.subr.bf16.mxu1 %v15302_v13  ;;  %7156 = vmatprep.subr.bf16.mxu0 %v15389_v45  ;;  %v15444_v40 = vld [vmem:[#allocation17 + $0x60] ss:$16 sps:$4 sm:$0xff]   ;;  %v15386_v13 = vld [vmem:[#allocation14 + $0x20c] ss:$16 sps:$4 sm:$0xff]  }
 0x4b3   :  { %v15449_v45 = vld [vmem:[#allocation17 + $0x44] ss:$16 sps:$4 sm:$0xff]  }
 0x4b5   :  { %7114 = vmatpush2.bf16.msra.mxu1 %v15300_v23  ;;  %7157 = vmatpush2.bf16.msra.mxu0 %v15387_v6  ;;  %v15384_v23 = vld [vmem:[#allocation14 + $0x208] ss:$16 sps:$4 sm:$0xff]  }
 0x4b6   :  { %7115 = vmatprep.subr.bf16.mxu1 %v15308_v52  ;;  %7158 = vmatprep.subr.bf16.mxu0 %v15395_v17  ;;  %v15447_v6 = vld [vmem:[#allocation17 + $0x40] ss:$16 sps:$4 sm:$0xff]   ;;  %v15392_v52 = vld [vmem:[#allocation14 + $0x3ec] ss:$16 sps:$4 sm:$0xff]  }
 0x4b7   :  { %v15452_v17 = vld [vmem:[#allocation17 + $0x24] ss:$16 sps:$4 sm:$0xff]  }
 0x4b9   :  { %7116 = vmatpush2.bf16.msra.mxu1 %v15306_v25  ;;  %7159 = vmatpush2.bf16.msra.mxu0 %v15393_v43  ;;  %v15390_v25 = vld [vmem:[#allocation14 + $0x3e8] ss:$16 sps:$4 sm:$0xff]  }
 0x4ba   :  { %7117 = vmatprep.subr.bf16.mxu1 %v15314_v46  ;;  %7160 = vmatprep.subr.bf16.mxu0 %v15401_v20  ;;  %v15450_v43 = vld [vmem:[#allocation17 + $0x20] ss:$16 sps:$4 sm:$0xff]   ;;  %v15398_v46 = vld [vmem:[#allocation14 + $0x3cc] ss:$16 sps:$4 sm:$0xff]  }
 0x4bb   :  { %v15455_v20 = vld [vmem:[#allocation17 + $0x4] ss:$16 sps:$4 sm:$0xff]  }
 0x4bd   :  { %7118 = vmatpush2.bf16.msra.mxu1 %v15312_v59  ;;  %7161 = vmatpush2.bf16.msra.mxu0 %v15399_v12  ;;  %v15396_v59 = vld [vmem:[#allocation14 + $0x3c8] ss:$16 sps:$4 sm:$0xff]  }
 0x4be   :  { %7119 = vmatprep.subr.bf16.mxu1 %v15320_v18  ;;  %7162 = vmatprep.subr.bf16.mxu0 %v15407_v53  ;;  %v15453_v12 = vld [vmem:[#allocation17] ss:$16 sps:$4 sm:$0xff]   ;;  %v15404_v18 = vld [vmem:[#allocation14 + $0x3ac] ss:$16 sps:$4 sm:$0xff]  }
 0x4bf   :  { %v15402_v53 = vld [vmem:[#allocation14 + $0x3a8] ss:$16 sps:$4 sm:$0xff]  }
 0x4c1   :  { %7120 = vmatpush2.bf16.msra.mxu1 %v15318_v9  ;;  %7163 = vmatpush2.bf16.msra.mxu0 %v15405_v39  ;;  %v15410_v9 = vld [vmem:[#allocation14 + $0x38c] ss:$16 sps:$4 sm:$0xff]   ;;  %v15408_v39 = vld [vmem:[#allocation14 + $0x388] ss:$16 sps:$4 sm:$0xff]  }
 0x4c2   :  { %7121 = vmatprep.subr.bf16.mxu1 %v15326_v26  ;;  %7164 = vmatprep.subr.bf16.mxu0 %v15413_v28  ;;  %v15416_v26 = vld [vmem:[#allocation14 + $0x36c] ss:$16 sps:$4 sm:$0xff]   ;;  %v15414_v28 = vld [vmem:[#allocation14 + $0x368] ss:$16 sps:$4 sm:$0xff]  }
 0x4c5   :  { %7122 = vmatpush2.bf16.msra.mxu1 %v15324_v48  ;;  %7165 = vmatpush2.bf16.msra.mxu0 %v15411_v4  ;;  %v15422_v48 = vld [vmem:[#allocation14 + $0x34c] ss:$16 sps:$4 sm:$0xff]   ;;  %v15420_v4 = vld [vmem:[#allocation14 + $0x348] ss:$16 sps:$4 sm:$0xff]  }
 0x4c6   :  { %7123 = vmatprep.subr.bf16.mxu1 %v15332_v31  ;;  %7166 = vmatprep.subr.bf16.mxu0 %v15419_v1  ;;  %v15428_v31 = vld [vmem:[#allocation14 + $0x32c] ss:$16 sps:$4 sm:$0xff]   ;;  %v15426_v1 = vld [vmem:[#allocation14 + $0x328] ss:$16 sps:$4 sm:$0xff]  }
 0x4c9   :  { %7124 = vmatpush2.bf16.msra.mxu1 %v15330_v34  ;;  %7167 = vmatpush2.bf16.msra.mxu0 %v15417_v36  ;;  %v15431_v34 = vld [vmem:[#allocation14 + $0x30c] ss:$16 sps:$4 sm:$0xff]   ;;  %v15429_v36 = vld [vmem:[#allocation14 + $0x308] ss:$16 sps:$4 sm:$0xff]  }
 0x4ca   :  { %7125 = vmatprep.subr.bf16.mxu1 %v15335_v38  ;;  %7168 = vmatprep.subr.bf16.mxu0 %v15425_v41  ;;  %v15458_v38 = vld [vmem:[#allocation17 + $0x1e4] ss:$16 sps:$4 sm:$0xff]   ;;  %v15456_v41 = vld [vmem:[#allocation17 + $0x1e0] ss:$16 sps:$4 sm:$0xff]  }
 0x4cd   :  { %7126 = vmatpush2.bf16.msra.mxu1 %v15333_v33  ;;  %7169 = vmatpush2.bf16.msra.mxu0 %v15423_v54  ;;  %v15461_v33 = vld [vmem:[#allocation17 + $0x1c4] ss:$16 sps:$4 sm:$0xff]   ;;  %v15462_v54 = vld [vmem:[#allocation17 + $0x1a0] ss:$16 sps:$4 sm:$0xff]  }
 0x4ce   :  { %7181 = vmatprep.subr.bf16.mxu1 %v15344_v58  ;;  %8123 = vmatprep.subr.bf16.mxu0 %v15434_v57  ;;  %v15467_v58 = vld [vmem:[#allocation17 + $0x184] ss:$16 sps:$4 sm:$0xff]  }
 0x4cf   :  { %v15479_v57 = vld [vmem:[#allocation17 + $0x104] ss:$16 sps:$4 sm:$0xff]  }
 0x4d0   :  { %7128 = vmatmul.mubr.bf16.vlgmr.msra.gmra.mxu1 %v17003_v22  ;;  %7171 = vmatmul.mubr.bf16.vlgmr.msra.gmra.mxu0 %v16994_v29  ;;  %v15368_v29 = vld [vmem:[#allocation14 + $0x26c] ss:$16 sps:$4 sm:$0xff]  }
 0x4d1   :  { %7182 = vmatpush1.bf16.msra.mxu1 %v15342_v21  ;;  %7213 = vmatprep.mubr.bf16.mxu1 %v16996_v24  ;;  %v15366_v24 = vld [vmem:[#allocation14 + $0x268] ss:$16 sps:$4 sm:$0xff]  }
 0x4d2   :  { %7183 = vmatprep.subr.bf16.mxu1 %v15350_v0  ;;  %8124 = vmatpush1.bf16.msra.mxu0 %v15432_v49  ;;  %v15465_v21 = vld [vmem:[#allocation17 + $0x180] ss:$16 sps:$4 sm:$0xff]   ;;  %v15470_v0 = vld [vmem:[#allocation17 + $0x164] ss:$16 sps:$4 sm:$0xff]  }
 0x4d3   :  { %8125 = vmatprep.subr.bf16.mxu0 %v15437_v19  ;;  %v15477_v49 = vld [vmem:[#allocation17 + $0x100] ss:$16 sps:$4 sm:$0xff]   ;;  %v15482_v19 = vld [vmem:[#allocation17 + $0x2e4] ss:$16 sps:$4 sm:$0xff]  }
 0x4d5   :  { %7184 = vmatpush1.bf16.msra.mxu1 %v15348_v56  ;;  %v15468_v56 = vld [vmem:[#allocation17 + $0x160] ss:$16 sps:$4 sm:$0xff]  }
 0x4d6   :  { %7185 = vmatprep.subr.bf16.mxu1 %v15356_v32  ;;  %8126 = vmatpush1.bf16.msra.mxu0 %v15435_v27  ;;  %v15471_v32 = vld [vmem:[#allocation17 + $0x140] ss:$16 sps:$4 sm:$0xff]  }
 0x4d7   :  { %8127 = vmatprep.subr.bf16.mxu0 %v15440_v15  ;;  %v15480_v27 = vld [vmem:[#allocation17 + $0x2e0] ss:$16 sps:$4 sm:$0xff]   ;;  %v15488_v15 = vld [vmem:[#allocation17 + $0x2c4] ss:$16 sps:$4 sm:$0xff]  }
 0x4d9   :  { %7186 = vmatpush1.bf16.msra.mxu1 %v15354_v62  ;;  %v15476_v62 = vld [vmem:[#allocation17 + $0x124] ss:$16 sps:$4 sm:$0xff]  }
 0x4da   :  { %7187 = vmatprep.subr.bf16.mxu1 %v15362_v63  ;;  %8128 = vmatpush1.bf16.msra.mxu0 %v15438_v3  ;;  %v15474_v63 = vld [vmem:[#allocation17 + $0x120] ss:$16 sps:$4 sm:$0xff]   ;;  %v15494_v3 = vld [vmem:[#allocation17 + $0x2a4] ss:$16 sps:$4 sm:$0xff]  }
 0x4db   :  { %8129 = vmatprep.subr.bf16.mxu0 %v15443_v51  ;;  %v15500_v51 = vld [vmem:[#allocation17 + $0x284] ss:$16 sps:$4 sm:$0xff]  }
 0x4dd   :  { %7188 = vmatpush1.bf16.msra.mxu1 %v15360_v50  ;;  %v15485_v50 = vld [vmem:[#allocation17 + $0xec] ss:$16 sps:$4 sm:$0xff]  }
 0x4de   :  { %7189 = vmatprep.subr.bf16.mxu1 %v15368_v29  ;;  %8130 = vmatpush1.bf16.msra.mxu0 %v15441_v55  ;;  %v15486_v29 = vld [vmem:[#allocation17 + $0x2c0] ss:$16 sps:$4 sm:$0xff]   ;;  %v15506_v55 = vld [vmem:[#allocation17 + $0x264] ss:$16 sps:$4 sm:$0xff]  }
 0x4df   :  { %8131 = vmatprep.subr.bf16.mxu0 %v15446_v8  ;;  %v15512_v8 = vld [vmem:[#allocation17 + $0x244] ss:$16 sps:$4 sm:$0xff]  }
 0x4e1   :  { %7190 = vmatpush1.bf16.msra.mxu1 %v15366_v24  ;;  %v15492_v24 = vld [vmem:[#allocation17 + $0x2a0] ss:$16 sps:$4 sm:$0xff]  }
 0x4e2   :  { %7191 = vmatprep.subr.bf16.mxu1 %v15374_v5  ;;  %8132 = vmatpush1.bf16.msra.mxu0 %v15444_v40  ;;  %v15498_v5 = vld [vmem:[#allocation17 + $0x280] ss:$16 sps:$4 sm:$0xff]   ;;  %v15518_v40 = vld [vmem:[#allocation17 + $0x224] ss:$16 sps:$4 sm:$0xff]  }
 0x4e3   :  { %8133 = vmatprep.subr.bf16.mxu0 %v15449_v45  ;;  %v15524_v45 = vld [vmem:[#allocation17 + $0x204] ss:$16 sps:$4 sm:$0xff]  }
 0x4e5   :  { %7192 = vmatpush1.bf16.msra.mxu1 %v15372_v10  ;;  %v15504_v10 = vld [vmem:[#allocation17 + $0x260] ss:$16 sps:$4 sm:$0xff]  }
 0x4e6   :  { %7193 = vmatprep.subr.bf16.mxu1 %v15380_v35  ;;  %8134 = vmatpush1.bf16.msra.mxu0 %v15447_v6  ;;  %v15510_v35 = vld [vmem:[#allocation17 + $0x240] ss:$16 sps:$4 sm:$0xff]  }
 0x4e7   :  { %8135 = vmatprep.subr.bf16.mxu0 %v15452_v17  ;;  %v15528_v6 = vld [vmem:[#allocation17 + $0x3e0] ss:$16 sps:$4 sm:$0xff]  }
 0x4e8   :  { %v15534_v17 = vld [vmem:[#allocation17 + $0x3c0] ss:$16 sps:$4 sm:$0xff]  }
 0x4e9   :  { %7194 = vmatpush1.bf16.msra.mxu1 %v15378_v7  ;;  %v15516_v7 = vld [vmem:[#allocation17 + $0x220] ss:$16 sps:$4 sm:$0xff]  }
 0x4ea   :  { %7195 = vmatprep.subr.bf16.mxu1 %v15386_v13  ;;  %8136 = vmatpush1.bf16.msra.mxu0 %v15450_v43  ;;  %v15522_v13 = vld [vmem:[#allocation17 + $0x200] ss:$16 sps:$4 sm:$0xff]  }
 0x4eb   :  { %8137 = vmatprep.subr.bf16.mxu0 %v15455_v20  ;;  %v15540_v43 = vld [vmem:[#allocation17 + $0x3a0] ss:$16 sps:$4 sm:$0xff]  }
 0x4ec   :  { %v15546_v20 = vld [vmem:[#allocation17 + $0x380] ss:$16 sps:$4 sm:$0xff]  }
 0x4ed   :  { %7196 = vmatpush1.bf16.msra.mxu1 %v15384_v23  ;;  %v15530_v23 = vld [vmem:[#allocation17 + $0x3e4] ss:$16 sps:$4 sm:$0xff]  }
 0x4ee   :  { %7197 = vmatprep.subr.bf16.mxu1 %v15392_v52  ;;  %8138 = vmatpush1.bf16.msra.mxu0 %v15453_v12  ;;  %v15536_v52 = vld [vmem:[#allocation17 + $0x3c4] ss:$16 sps:$4 sm:$0xff]   ;;  %v15552_v12 = vld [vmem:[#allocation17 + $0x360] ss:$16 sps:$4 sm:$0xff]  }
 0x4ef   :  { %8139 = vmatprep.subr.bf16.mxu0 %v15458_v38 }
 0x4f1   :  { %7198 = vmatpush2.bf16.msra.mxu1 %v15390_v25  ;;  %v15542_v25 = vld [vmem:[#allocation17 + $0x3a4] ss:$16 sps:$4 sm:$0xff]  }
 0x4f2   :  { %7199 = vmatprep.subr.bf16.mxu1 %v15398_v46  ;;  %8140 = vmatpush2.bf16.msra.mxu0 %v15456_v41  ;;  %v15548_v46 = vld [vmem:[#allocation17 + $0x384] ss:$16 sps:$4 sm:$0xff]  }
 0x4f3   :  { %8141 = vmatprep.subr.bf16.mxu0 %v15461_v33 }
 0x4f5   :  { %7200 = vmatpush2.bf16.msra.mxu1 %v15396_v59  ;;  %v15554_v59 = vld [vmem:[#allocation17 + $0x364] ss:$16 sps:$4 sm:$0xff]  }
 0x4f6   :  { %7201 = vmatprep.subr.bf16.mxu1 %v15404_v18  ;;  %8142 = vmatpush2.bf16.msra.mxu0 %v15459_v42  ;;  %v15560_v18 = vld [vmem:[#allocation17 + $0x344] ss:$16 sps:$4 sm:$0xff]  }
 0x4f7   :  { %8143 = vmatprep.subr.bf16.mxu0 %v15464_v14  ;;  %v262_v14 = vpop.xlane.xlu0 %261 }
 0x4f9   :  { %7202 = vmatpush2.bf16.msra.mxu1 %v15402_v53  ;;  %v15558_v53 = vld [vmem:[#allocation17 + $0x340] ss:$16 sps:$4 sm:$0xff]  }
 0x4fa   :  { %7203 = vmatprep.subr.bf16.mxu1 %v15410_v9  ;;  %8144 = vmatpush2.bf16.msra.mxu0 %v15462_v54  ;;  %v6120_v9 = vpop.f32.mrf.mxu0 }
 0x4fb   :  { %8145 = vmatprep.subr.bf16.mxu0 %v15467_v58 }
 0x4fd   :  { %7204 = vmatpush2.bf16.msra.mxu1 %v15408_v39  ;;  %v15566_v39 = vld [vmem:[#allocation17 + $0x324] ss:$16 sps:$4 sm:$0xff]  }
 0x4fe   :  { %7205 = vmatprep.subr.bf16.mxu1 %v15416_v26  ;;  %8146 = vmatpush2.bf16.msra.mxu0 %v15465_v21  ;;  %v15564_v26 = vld [vmem:[#allocation17 + $0x320] ss:$16 sps:$4 sm:$0xff]   ;;  %v266_v21 = vadd.f32 1e-09, %v262_v14 }
 0x4ff   :  { %8147 = vmatprep.subr.bf16.mxu0 %v15470_v0 }
 0x500   :  { %16200 = vrcp.f32 %v266_v21 }
 0x501   :  { %7206 = vmatpush2.bf16.msra.mxu1 %v15414_v28  ;;  %v6122_v28 = vpop.f32.mrf.mxu0 }
 0x502   :  { %7207 = vmatprep.subr.bf16.mxu1 %v15422_v48  ;;  %8148 = vmatpush2.bf16.msra.mxu0 %v15468_v56  ;;  %v15570_v48 = vld [vmem:[#allocation17 + $0x300] ss:$16 sps:$4 sm:$0xff]   ;;  %v265_v56 = vpop.xlane.xlu0 %264 }
 0x505   :  { %7208 = vmatpush2.bf16.msra.mxu1 %v15420_v4  ;;  %v15572_v4 = vld [vmem:[#allocation17 + $0x304] ss:$16 sps:$4 sm:$0xff]  }
 0x506   :  { %7209 = vmatprep.subr.bf16.mxu1 %v15428_v31  ;;  %v6124_v31 = vpop.f32.mrf.mxu0 }
 0x509   :  { %7210 = vmatpush2.bf16.msra.mxu1 %v15426_v1  ;;  %v15578_v1 = vld [vmem:[#allocation17 + $0x2ec] ss:$16 sps:$4 sm:$0xff]  }
 0x50a   :  { %7211 = vmatprep.subr.bf16.mxu1 %v15431_v34  ;;  %v17009_v34 = vpop.f32.mrf.mxu1 }
 0x50c   :  { %v17011_v38 = vpop.f32.mrf.mxu1 }
 0x50d   :  { %7212 = vmatpush2.bf16.msra.mxu1 %v15429_v36  ;;  %v6126_v36 = vpop.f32.mrf.mxu0 }
 0x50e   :  { %8164 = vmatprep.subr.bf16.mxu1 %v15482_v19  ;;  %v17015_v33 = vpop.f32.mrf.mxu1 }
 0x510   :  { %7214 = vmatmul.mubr.bf16.vlgmr.msra.gmra.mxu1 %v17003_v22  ;;  %v15473_v22 = vld [vmem:[#allocation17 + $0x144] ss:$16 sps:$4 sm:$0xff]   ;;  %v17013_v41 = vpop.f32.mrf.mxu0  ;;  %v17019_v54 = vpop.f32.mrf.mxu1 }
 0x511   :  { %8149 = vmatprep.subr.bf16.mxu0 %v15473_v22  ;;  %8165 = vmatpush1.bf16.msra.mxu1 %v15480_v27 }
 0x512   :  { %8150 = vmatpush2.bf16.msra.mxu0 %v15471_v32  ;;  %8166 = vmatprep.subr.bf16.mxu1 %v15488_v15  ;;  %v17017_v42 = vpop.f32.mrf.mxu0  ;;  %v267_v32 = vadd.f32 1e-09, %v265_v56 }
 0x513   :  { %8151 = vmatprep.subr.bf16.mxu0 %v15476_v62 }
 0x514   :  { %v17021_v58 = vpop.f32.mrf.mxu0  ;;  %16202 = vrcp.f32 %v267_v32 }
 0x515   :  { %8167 = vmatpush1.bf16.msra.mxu1 %v15486_v29 }
 0x516   :  { %8152 = vmatpush2.bf16.msra.mxu0 %v15474_v63  ;;  %8168 = vmatprep.subr.bf16.mxu1 %v15494_v3  ;;  %v17025_v22 = vpop.f32.mrf.mxu0  ;;  %v17029_v63 = vld [vmem:[#allocation16] sm:$0xf] }
 0x517   :  { %8153 = vmatprep.subr.bf16.mxu0 %v15479_v57  ;;  %v6395_v57 = vrot.slane %v17029_v63, %v16922_v30  ;;  %v6399_v27 = vrot.slane %v17029_v63, %v16919_v37 }
 0x519   :  { %8169 = vmatpush1.bf16.msra.mxu1 %v15492_v24 }
 0x51a   :  { %8154 = vmatpush2.bf16.msra.mxu0 %v15477_v49  ;;  %8170 = vmatprep.subr.bf16.mxu1 %v15500_v51 }
 0x51b   :  { %8205 = vmatprep.subr.bf16.mxu0 %v15485_v50 }
 0x51d   :  { %8171 = vmatpush1.bf16.msra.mxu1 %v15498_v5 }
 0x51e   :  { %8172 = vmatprep.subr.bf16.mxu1 %v15506_v55 }
 0x521   :  { %8173 = vmatpush1.bf16.msra.mxu1 %v15504_v10  ;;  %v17039_v10 = vpop.eup %16200 }
 0x522   :  { %8174 = vmatprep.subr.bf16.mxu1 %v15512_v8 }
 0x525   :  { %8175 = vmatpush1.bf16.msra.mxu1 %v15510_v35 }
 0x526   :  { %8176 = vmatprep.subr.bf16.mxu1 %v15518_v40 }
 0x529   :  { %8177 = vmatpush1.bf16.msra.mxu1 %v15516_v7 }
 0x52a   :  { %8178 = vmatprep.subr.bf16.mxu1 %v15524_v45 }
 0x52d   :  { %8179 = vmatpush1.bf16.msra.mxu1 %v15522_v13 }
 0x52e   :  { %8180 = vmatprep.subr.bf16.mxu1 %v15530_v23 }
 0x531   :  { %8181 = vmatpush2.bf16.msra.mxu1 %v15528_v6 }
 0x532   :  { %8182 = vmatprep.subr.bf16.mxu1 %v15536_v52 }
 0x535   :  { %8183 = vmatpush2.bf16.msra.mxu1 %v15534_v17  ;;  %v17042_v17 = vpop.eup %16202 }
 0x536   :  { %8184 = vmatprep.subr.bf16.mxu1 %v15542_v25 }
 0x539   :  { %8185 = vmatpush2.bf16.msra.mxu1 %v15540_v43 }
 0x53a   :  { %8186 = vmatprep.subr.bf16.mxu1 %v15548_v46 }
 0x53d   :  { %8187 = vmatpush2.bf16.msra.mxu1 %v15546_v20 }
 0x53e   :  { %8188 = vmatprep.subr.bf16.mxu1 %v15554_v59 }
 0x541   :  { %8189 = vmatpush2.bf16.msra.mxu1 %v15552_v12 }
 0x542   :  { %8190 = vmatprep.subr.bf16.mxu1 %v15560_v18 }
 0x545   :  { %8191 = vmatpush2.bf16.msra.mxu1 %v15558_v53 }
 0x546   :  { %8192 = vmatprep.subr.bf16.mxu1 %v15566_v39 }
 0x549   :  { %8193 = vmatpush2.bf16.msra.mxu1 %v15564_v26 }
 0x54a   :  { %8194 = vmatprep.subr.bf16.mxu1 %v15572_v4 }
 0x54d   :  { %8195 = vmatpush2.bf16.msra.mxu1 %v15570_v48 }
 0x54e   :  { %8246 = vmatprep.subr.bf16.mxu1 %v15578_v1 }
 0x550   :  { %v17023_v0 = vpop.f32.mrf.mxu1  ;;  %v7086_v49 = vpop.f32.mrf.mxu0 }
 0x551   :  { %v7087_v29 = vadd.f32 %v7086_v49, %v6395_v57 }
 0x552   :  { %v17027_v62 = vpop.f32.mrf.mxu1  ;;  %v7088_v50 = vpop.f32.mrf.mxu0 }
 0x553   :  { %v7089_v3 = vadd.f32 %v7088_v50, %v6399_v27 }
 0x554   :  { %v17033_v19 = vpop.f32.mrf.mxu1  ;;  %v7090_v24 = vpop.f32.mrf.mxu0 }
 0x555   :  { %v7091_v7 = vadd.f32 %v7090_v24, %v6395_v57 }
 0x556   :  { %v17037_v15 = vpop.f32.mrf.mxu1  ;;  %v7092_v35 = vpop.f32.mrf.mxu0 }
 0x557   :  { %v7093_v6 = vadd.f32 %v7092_v35, %v6399_v27 }
 0x590   :  { %v7129_v5 = vpop.f32.mrf.mxu1 }
 0x591   :  { %v7130_v51 = vadd.f32 %v7129_v5, %v7087_v29 }
 0x592   :  { %v7131_v55 = vpop.f32.mrf.mxu1 }
 0x593   :  { %v7224_v8 = vmax.f32 %v7130_v51, 0.0  ;;  %v7132_v40 = vadd.f32 %v7131_v55, %v7089_v3 }
 0x594   :  { %v7133_v13 = vpop.f32.mrf.mxu1 }
 0x595   :  { %v7232_v45 = vmul.f32 %v17039_v10, %v7224_v8  ;;  %v7225_v23 = vmax.f32 %v7132_v40, 0.0  ;;  %v7134_v52 = vadd.f32 %v7133_v13, %v7091_v7 }
 0x596   :  { %v7135_v25 = vpop.f32.mrf.mxu1 }
 0x597   :  { %v7240_v43 = vmul.f32 %v7232_v45, %v6120_v9  ;;  %v7233_v46 = vmul.f32 %v17039_v10, %v7225_v23  ;;  %v7228_v20 = vmax.f32 %v7134_v52, 0.0  ;;  %v7136_v59 = vadd.f32 %v7135_v25, %v7093_v6 }
 0x599   :  { %v7248_v12 = vrot.slane %v7240_v43, 4  ;;  %v7241_v18 = vmul.f32 %v7233_v46, %v6122_v28  ;;  %v7236_v53 = vmul.f32 %v17042_v17, %v7228_v20  ;;  %v7229_v39 = vmax.f32 %v7136_v59, 0.0 }
 0x59b   :  { %v7249_v26 = vadd.f32 %v7248_v12, %v7240_v43  ;;  %v7254_v48 = vrot.slane %v7241_v18, 4  ;;  %v7244_v4 = vmul.f32 %v7236_v53, %v6124_v31  ;;  %v7237_v1 = vmul.f32 %v17042_v17, %v7229_v39  ;;  %v15491_v39 = vld [vmem:[#allocation17 + $0xcc] ss:$16 sps:$4 sm:$0xff]  }
 0x59d   :  { %v7250_v14 = vrot.slane %v7249_v26, 2  ;;  %v7255_v21 = vadd.f32 %v7254_v48, %v7241_v18  ;;  %v7272_v56 = vrot.slane %v7244_v4, 4  ;;  %v7245_v32 = vmul.f32 %v7237_v1, %v6126_v36  ;;  %v15483_v18 = vld [vmem:[#allocation17 + $0xe8] ss:$16 sps:$4 sm:$0xff]   ;;  %v15497_v48 = vld [vmem:[#allocation17 + $0xac] ss:$16 sps:$4 sm:$0xff]  }
 0x59e   :  { %v15503_v1 = vld [vmem:[#allocation17 + $0x8c] ss:$16 sps:$4 sm:$0xff]  }
 0x59f   :  { %v7251_v49 = vadd.f32 %v7250_v14, %v7249_v26  ;;  %v7256_v9 = vrot.slane %v7255_v21, 2  ;;  %v7273_v57 = vadd.f32 %v7272_v56, %v7244_v4  ;;  %v7278_v50 = vrot.slane %v7245_v32, 4  ;;  %v15489_v26 = vld [vmem:[#allocation17 + $0xc8] ss:$16 sps:$4 sm:$0xff]  }
 0x5a0   :  { %v15495_v4 = vld [vmem:[#allocation17 + $0xa8] ss:$16 sps:$4 sm:$0xff]  }
 0x5a1   :  { %v7252_v27 = vrot.slane %v7251_v49, 1  ;;  %v7257_v29 = vadd.f32 %v7256_v9, %v7255_v21  ;;  %v7274_v24 = vrot.slane %v7273_v57, 2  ;;  %v7279_v28 = vadd.f32 %v7278_v50, %v7245_v32  ;;  %v15501_v14 = vld [vmem:[#allocation17 + $0x88] ss:$16 sps:$4 sm:$0xff]   ;;  %v15509_v21 = vld [vmem:[#allocation17 + $0x6c] ss:$16 sps:$4 sm:$0xff]  }
 0x5a2   :  { %v15507_v56 = vld [vmem:[#allocation17 + $0x68] ss:$16 sps:$4 sm:$0xff]   ;;  %v15515_v32 = vld [vmem:[#allocation17 + $0x4c] ss:$16 sps:$4 sm:$0xff]  }
 0x5a3   :  { %v7258_v3 = vrot.slane %v7257_v29, 1  ;;  %v7275_v5 = vadd.f32 %v7274_v24, %v7273_v57  ;;  %v7280_v51 = vrot.slane %v7279_v28, 2  ;;  %v7253_v55 = vadd.f32 %v7252_v27, %v7251_v49  ;;  %v15513_v49 = vld [vmem:[#allocation17 + $0x48] ss:$16 sps:$4 sm:$0xff]   ;;  %v15521_v9 = vld [vmem:[#allocation17 + $0x2c] ss:$16 sps:$4 sm:$0xff]   ;;  %v7172_v57 = vpop.f32.mrf.mxu0 }
 0x5a4   :  { %v15519_v50 = vld [vmem:[#allocation17 + $0x28] ss:$16 sps:$4 sm:$0xff]   ;;  %v6403_v27 = vrot.slane %v17029_v63, %v16946_v60 }
 0x5a5   :  { %v7276_v35 = vrot.slane %v7275_v5, 1  ;;  %v7281_v31 = vadd.f32 %v7280_v51, %v7279_v28  ;;  %v7259_v8 = vadd.f32 %v7258_v3, %v7257_v29  ;;  %v7296_v13 = vpack.c.bf16 %v7253_v55, %v7253_v55  ;;  %v15527_v29 = vld [vmem:[#allocation17 + $0xc] ss:$16 sps:$4 sm:$0xff]   ;;  %v7174_v24 = vpop.f32.mrf.mxu0  ;;  %v15525_v28 = vld [vmem:[#allocation17 + $0x8] ss:$16 sps:$4 sm:$0xff]  }
 0x5a6   :  { %v7173_v3 = vadd.f32 %v7172_v57, %v6403_v27  ;;  %v15533_v51 = vld [vmem:[#allocation17 + $0x1ec] ss:$16 sps:$4 sm:$0xff]  }
 0x5a7   :  { %v7277_v7 = vadd.f32 %v7276_v35, %v7275_v5  ;;  %v7282_v40 = vrot.slane %v7281_v31, 1  ;;  %v7297_v23 = vpack.c.bf16 %v7259_v8, %v7259_v8  ;;  %v7462_v25 = vunpack.c.l.b16 %v7296_v13  ;;  %v7176_v55 = vpop.f32.mrf.mxu0 }
 0x5a8   :  { %v6407_v5 = vrot.slane %v17029_v63, %v16949_v2 }
 0x5a9   :  { %v7300_v45 = vpack.c.bf16 %v7277_v7, %v7277_v7  ;;  %v7283_v36 = vadd.f32 %v7282_v40, %v7281_v31  ;;  %v7463_v43 = vunpack.c.l.b16 %v7297_v23  ;;  %v15531_v31 = vld [vmem:[#allocation17 + $0x1e8] ss:$16 sps:$4 sm:$0xff]   ;;  %v15539_v40 = vld [vmem:[#allocation17 + $0x1cc] ss:$16 sps:$4 sm:$0xff]   ;;  %v7178_v13 = vpop.f32.mrf.mxu0 }
 0x5aa   :  { %v7175_v8 = vadd.f32 %v7174_v24, %v6407_v5 }
 0x5ab   :  { %v7466_v6 = vunpack.c.l.b16 %v7300_v45  ;;  %v7301_v52 = vpack.c.bf16 %v7283_v36, %v7283_v36  ;;  %v7177_v36 = vadd.f32 %v7176_v55, %v6403_v27 }
 0x5ad   :  { %v7467_v46 = vunpack.c.l.b16 %v7301_v52  ;;  %v7471_v20 = vsel %vm7470_vm1, %v7466_v6, %v7462_v25  ;;  %v15537_v25 = vld [vmem:[#allocation17 + $0x1c8] ss:$16 sps:$4 sm:$0xff]  }
 0x5ae   :  { %v17049_v53 = vpack.c.b16 %v7471_v20, %v7471_v20 }
 0x5af   :  { %v7472_v59 = vsel %vm7470_vm1, %v7467_v46, %v7463_v43  ;;  %v7179_v43 = vadd.f32 %v7178_v13, %v6407_v5 }
 0x5b0   :  { %v7476_v12 = vpack.c.b16 %v7472_v59, %v7472_v59  ;;  %v15545_v59 = vld [vmem:[#allocation17 + $0x1ac] ss:$16 sps:$4 sm:$0xff]  }
 0x5b2   :  { %8155 = vmatprep.mubr.bf16.mxu0 %v7476_v12 }
 0x5b3   :  { %8156 = vmatmul.mubr.bf16.vlgmr.msra.gmra.mxu0 %v17049_v53 }
 0x5b4   :  { %8206 = vmatpush1.bf16.msra.mxu0 %v15483_v18  ;;  %8237 = vmatprep.mubr.bf16.mxu0 %v7476_v12 }
 0x5b5   :  { %8207 = vmatprep.subr.bf16.mxu0 %v15491_v39 }
 0x5b8   :  { %8208 = vmatpush1.bf16.msra.mxu0 %v15489_v26 }
 0x5b9   :  { %8209 = vmatprep.subr.bf16.mxu0 %v15497_v48 }
 0x5bc   :  { %8210 = vmatpush1.bf16.msra.mxu0 %v15495_v4  ;;  %v15543_v4 = vld [vmem:[#allocation17 + $0x1a8] ss:$16 sps:$4 sm:$0xff]  }
 0x5bd   :  { %8211 = vmatprep.subr.bf16.mxu0 %v15503_v1 }
 0x5c0   :  { %8212 = vmatpush1.bf16.msra.mxu0 %v15501_v14 }
 0x5c1   :  { %8213 = vmatprep.subr.bf16.mxu0 %v15509_v21 }
 0x5c4   :  { %8214 = vmatpush1.bf16.msra.mxu0 %v15507_v56 }
 0x5c5   :  { %8215 = vmatprep.subr.bf16.mxu0 %v15515_v32  ;;  %v15551_v32 = vld [vmem:[#allocation17 + $0x18c] ss:$16 sps:$4 sm:$0xff]  }
 0x5c8   :  { %8216 = vmatpush1.bf16.msra.mxu0 %v15513_v49 }
 0x5c9   :  { %8217 = vmatprep.subr.bf16.mxu0 %v15521_v9 }
 0x5cc   :  { %8218 = vmatpush1.bf16.msra.mxu0 %v15519_v50  ;;  %v15549_v50 = vld [vmem:[#allocation17 + $0x188] ss:$16 sps:$4 sm:$0xff]  }
 0x5cd   :  { %8219 = vmatprep.subr.bf16.mxu0 %v15527_v29 }
 0x5d0   :  { %8220 = vmatpush1.bf16.msra.mxu0 %v15525_v28  ;;  %v7215_v35 = vpop.f32.mrf.mxu1 }
 0x5d1   :  { %v7216_v7 = vadd.f32 %v7215_v35, %v7173_v3  ;;  %8221 = vmatprep.subr.bf16.mxu0 %v15533_v51  ;;  %v15555_v35 = vld [vmem:[#allocation17 + $0x168] ss:$16 sps:$4 sm:$0xff]  }
 0x5d2   :  { %v7217_v45 = vpop.f32.mrf.mxu1 }
 0x5d3   :  { %v7226_v23 = vmax.f32 %v7216_v7, 0.0  ;;  %v7218_v6 = vadd.f32 %v7217_v45, %v7175_v8 }
 0x5d4   :  { %8222 = vmatpush2.bf16.msra.mxu0 %v15531_v31  ;;  %v7219_v52 = vpop.f32.mrf.mxu1 }
 0x5d5   :  { %v7234_v63 = vmul.f32 %v17039_v10, %v7226_v23  ;;  %v7227_v46 = vmax.f32 %v7218_v6, 0.0  ;;  %v7220_v20 = vadd.f32 %v7219_v52, %v7177_v36  ;;  %8223 = vmatprep.subr.bf16.mxu0 %v15539_v40  ;;  %v15563_v40 = vld [vmem:[#allocation17 + $0x14c] ss:$16 sps:$4 sm:$0xff]  }
 0x5d6   :  { %v7221_v12 = vpop.f32.mrf.mxu1 }
 0x5d7   :  { %v7242_v18 = vmul.f32 %v7234_v63, %v17009_v34  ;;  %v7235_v39 = vmul.f32 %v17039_v10, %v7227_v46  ;;  %v7230_v26 = vmax.f32 %v7220_v20, 0.0  ;;  %v7222_v48 = vadd.f32 %v7221_v12, %v7179_v43 }
 0x5d8   :  { %8224 = vmatpush2.bf16.msra.mxu0 %v15537_v25  ;;  %v15569_v25 = vld [vmem:[#allocation17 + $0x12c] ss:$16 sps:$4 sm:$0xff]  }
 0x5d9   :  { %v7260_v1 = vrot.slane %v7242_v18, 4  ;;  %v7243_v14 = vmul.f32 %v7235_v39, %v17011_v38  ;;  %v7238_v21 = vmul.f32 %v17042_v17, %v7230_v26  ;;  %v7231_v56 = vmax.f32 %v7222_v48, 0.0  ;;  %8225 = vmatprep.subr.bf16.mxu0 %v15545_v59  ;;  %v15557_v38 = vld [vmem:[#allocation17 + $0x16c] ss:$16 sps:$4 sm:$0xff]   ;;  %v15567_v59 = vld [vmem:[#allocation17 + $0x128] ss:$16 sps:$4 sm:$0xff]  }
 0x5db   :  { %v7261_v49 = vadd.f32 %v7260_v1, %v7242_v18  ;;  %v7266_v9 = vrot.slane %v7243_v14, 4  ;;  %v7246_v57 = vmul.f32 %v7238_v21, %v17015_v33  ;;  %v7239_v34 = vmul.f32 %v17042_v17, %v7231_v56  ;;  %v15575_v18 = vld [vmem:[#allocation17 + $0x10c] ss:$16 sps:$4 sm:$0xff]  }
 0x5dc   :  { %8226 = vmatpush2.bf16.msra.mxu0 %v15543_v4 }
 0x5dd   :  { %v7262_v27 = vrot.slane %v7261_v49, 2  ;;  %v7267_v29 = vadd.f32 %v7266_v9, %v7243_v14  ;;  %v7284_v24 = vrot.slane %v7246_v57, 4  ;;  %v7247_v28 = vmul.f32 %v7239_v34, %v17019_v54  ;;  %8227 = vmatprep.subr.bf16.mxu0 %v15551_v32  ;;  %v15561_v54 = vld [vmem:[#allocation17 + $0x148] ss:$16 sps:$4 sm:$0xff]  }
 0x5de   :  { %v15573_v14 = vld [vmem:[#allocation17 + $0x108] ss:$16 sps:$4 sm:$0xff]  }
 0x5df   :  { %v7263_v3 = vadd.f32 %v7262_v27, %v7261_v49  ;;  %v7268_v5 = vrot.slane %v7267_v29, 2  ;;  %v7285_v51 = vadd.f32 %v7284_v24, %v7246_v57  ;;  %v7290_v55 = vrot.slane %v7247_v28, 4  ;;  %v15576_v57 = vld [vmem:[#allocation17 + $0x2e8] ss:$16 sps:$4 sm:$0xff]  }
 0x5e0   :  { %8228 = vmatpush2.bf16.msra.mxu0 %v15549_v50  ;;  %v15581_v50 = vld [vmem:[#allocation17 + $0x2cc] ss:$16 sps:$4 sm:$0xff]   ;;  %v15579_v27 = vld [vmem:[#allocation17 + $0x2c8] ss:$16 sps:$4 sm:$0xff]  }
 0x5e1   :  { %v7264_v31 = vrot.slane %v7263_v3, 1  ;;  %v7269_v8 = vadd.f32 %v7268_v5, %v7267_v29  ;;  %v7286_v33 = vrot.slane %v7285_v51, 2  ;;  %v7291_v7 = vadd.f32 %v7290_v55, %v7247_v28  ;;  %8229 = vmatprep.subr.bf16.mxu0 %v15557_v38  ;;  %v15584_v29 = vld [vmem:[#allocation17 + $0x2ac] ss:$16 sps:$4 sm:$0xff]   ;;  %v15582_v24 = vld [vmem:[#allocation17 + $0x2a8] ss:$16 sps:$4 sm:$0xff]  }
 0x5e2   :  { %v15587_v28 = vld [vmem:[#allocation17 + $0x28c] ss:$16 sps:$4 sm:$0xff]   ;;  %v15585_v38 = vld [vmem:[#allocation17 + $0x288] ss:$16 sps:$4 sm:$0xff]  }
 0x5e3   :  { %v7270_v13 = vrot.slane %v7269_v8, 1  ;;  %v7287_v45 = vadd.f32 %v7286_v33, %v7285_v51  ;;  %v7292_v36 = vrot.slane %v7291_v7, 2  ;;  %v7265_v23 = vadd.f32 %v7264_v31, %v7263_v3  ;;  %v15590_v3 = vld [vmem:[#allocation17 + $0x26c] ss:$16 sps:$4 sm:$0xff]   ;;  %v15588_v5 = vld [vmem:[#allocation17 + $0x268] ss:$16 sps:$4 sm:$0xff]  }
 0x5e4   :  { %8230 = vmatpush2.bf16.msra.mxu0 %v15555_v35  ;;  %v15593_v51 = vld [vmem:[#allocation17 + $0x24c] ss:$16 sps:$4 sm:$0xff]   ;;  %v15594_v35 = vld [vmem:[#allocation17 + $0x228] ss:$16 sps:$4 sm:$0xff]  }
 0x5e5   :  { %v7288_v6 = vrot.slane %v7287_v45, 1  ;;  %v7293_v52 = vadd.f32 %v7292_v36, %v7291_v7  ;;  %8231 = vmatprep.subr.bf16.mxu0 %v15563_v40  ;;  %v7271_v63 = vadd.f32 %v7270_v13, %v7269_v8  ;;  %v7298_v20 = vpack.c.bf16 %v7265_v23, %v7265_v23  ;;  %v15596_v55 = vld [vmem:[#allocation17 + $0x22c] ss:$16 sps:$4 sm:$0xff]   ;;  %v15597_v8 = vld [vmem:[#allocation17 + $0x208] ss:$16 sps:$4 sm:$0xff]  }
 0x5e6   :  { %v15599_v31 = vld [vmem:[#allocation17 + $0x20c] ss:$16 sps:$4 sm:$0xff]   ;;  %v15600_v7 = vld [vmem:[#allocation17 + $0x3e8] ss:$16 sps:$4 sm:$0xff]  }
 0x5e7   :  { %v7289_v43 = vadd.f32 %v7288_v6, %v7287_v45  ;;  %v7294_v46 = vrot.slane %v7293_v52, 1  ;;  %v7299_v26 = vpack.c.bf16 %v7271_v63, %v7271_v63  ;;  %v7464_v1 = vunpack.c.l.b16 %v7298_v20  ;;  %v15602_v33 = vld [vmem:[#allocation17 + $0x3ec] ss:$16 sps:$4 sm:$0xff]   ;;  %v15603_v13 = vld [vmem:[#allocation17 + $0x3c8] ss:$16 sps:$4 sm:$0xff]  }
 0x5e8   :  { %8232 = vmatpush2.bf16.msra.mxu0 %v15561_v54  ;;  %v15605_v40 = vld [vmem:[#allocation17 + $0x3cc] ss:$16 sps:$4 sm:$0xff]   ;;  %v15606_v36 = vld [vmem:[#allocation17 + $0x3a8] ss:$16 sps:$4 sm:$0xff]  }
 0x5e9   :  { %v7302_v12 = vpack.c.bf16 %v7289_v43, %v7289_v43  ;;  %8233 = vmatprep.subr.bf16.mxu0 %v15569_v25  ;;  %v7295_v39 = vadd.f32 %v7294_v46, %v7293_v52  ;;  %v7465_v21 = vunpack.c.l.b16 %v7299_v26  ;;  %v15608_v45 = vld [vmem:[#allocation17 + $0x3ac] ss:$16 sps:$4 sm:$0xff]   ;;  %v15609_v54 = vld [vmem:[#allocation17 + $0x388] ss:$16 sps:$4 sm:$0xff]  }
 0x5ea   :  { %v15611_v23 = vld [vmem:[#allocation17 + $0x38c] ss:$16 sps:$4 sm:$0xff]   ;;  %v15612_v52 = vld [vmem:[#allocation17 + $0x368] ss:$16 sps:$4 sm:$0xff]  }
 0x5eb   :  { %v7468_v48 = vunpack.c.l.b16 %v7302_v12  ;;  %v7303_v4 = vpack.c.bf16 %v7295_v39, %v7295_v39  ;;  %v15614_v6 = vld [vmem:[#allocation17 + $0x36c] ss:$16 sps:$4 sm:$0xff]   ;;  %v15615_v63 = vld [vmem:[#allocation17 + $0x348] ss:$16 sps:$4 sm:$0xff]  }
 0x5ec   :  { %8234 = vmatpush2.bf16.msra.mxu0 %v15567_v59  ;;  %v15617_v25 = vld [vmem:[#allocation17 + $0x34c] ss:$16 sps:$4 sm:$0xff]   ;;  %v15618_v46 = vld [vmem:[#allocation17 + $0x328] ss:$16 sps:$4 sm:$0xff]  }
 0x5ed   :  { %8235 = vmatprep.subr.bf16.mxu0 %v15575_v18  ;;  %v7469_v56 = vunpack.c.l.b16 %v7303_v4  ;;  %v7473_v32 = vsel %vm7470_vm1, %v7468_v48, %v7464_v1  ;;  %v15620_v43 = vld [vmem:[#allocation17 + $0x32c] ss:$16 sps:$4 sm:$0xff]   ;;  %v15621_v59 = vld [vmem:[#allocation17 + $0x308] ss:$16 sps:$4 sm:$0xff]  }
 0x5ee   :  { %v17066_v34 = vpack.c.b16 %v7473_v32, %v7473_v32  ;;  %v15623_v20 = vld [vmem:[#allocation17 + $0x30c] ss:$16 sps:$4 sm:$0xff]   ;;  %v15624_v12 = vld [vmem:[#allocation14 + $0x4e0] ss:$16 sps:$4 sm:$0xff]  }
 0x5ef   :  { %v7474_v49 = vsel %vm7470_vm1, %v7469_v56, %v7465_v21  ;;  %v15626_v18 = vld [vmem:[#allocation14 + $0x4e4] ss:$16 sps:$4 sm:$0xff]   ;;  %v15627_v39 = vld [vmem:[#allocation14 + $0x6e0] ss:$16 sps:$4 sm:$0xff]  }
 0x5f0   :  { %8236 = vmatpush2.bf16.msra.mxu0 %v15573_v14  ;;  %v7478_v9 = vpack.c.b16 %v7474_v49, %v7474_v49  ;;  %v15629_v26 = vld [vmem:[#allocation14 + $0x6e4] ss:$16 sps:$4 sm:$0xff]   ;;  %v15630_v1 = vld [vmem:[#allocation14 + $0x4c0] ss:$16 sps:$4 sm:$0xff]  }
 0x5f1   :  { %v15632_v48 = vld [vmem:[#allocation14 + $0x4c4] ss:$16 sps:$4 sm:$0xff]   ;;  %9167 = vmatprep.subr.bf16.mxu0 %v15626_v18  ;;  %v15633_v14 = vld [vmem:[#allocation14 + $0x6c0] ss:$16 sps:$4 sm:$0xff]  }
 0x5f2   :  { %8196 = vmatprep.mubr.bf16.mxu1 %v7478_v9  ;;  %v15635_v4 = vld [vmem:[#allocation14 + $0x6c4] ss:$16 sps:$4 sm:$0xff]   ;;  %v15636_v32 = vld [vmem:[#allocation14 + $0x4a0] ss:$16 sps:$4 sm:$0xff]  }
 0x5f3   :  { %8238 = vmatmul.mubr.bf16.vlgmr.msra.gmra.mxu0 %v17049_v53  ;;  %8197 = vmatmul.mubr.bf16.vlgmr.msra.gmra.mxu1 %v17066_v34  ;;  %v15591_v53 = vld [vmem:[#allocation17 + $0x248] ss:$16 sps:$4 sm:$0xff]   ;;  %v15638_v21 = vld [vmem:[#allocation14 + $0x4a4] ss:$16 sps:$4 sm:$0xff]  }
 0x5f4   :  { %8247 = vmatpush1.bf16.msra.mxu1 %v15576_v57  ;;  %8278 = vmatprep.mubr.bf16.mxu1 %v7478_v9  ;;  %v15641_v56 = vld [vmem:[#allocation14 + $0x6a4] ss:$16 sps:$4 sm:$0xff]   ;;  %v15639_v49 = vld [vmem:[#allocation14 + $0x6a0] ss:$16 sps:$4 sm:$0xff]  }
 0x5f5   :  { %8248 = vmatprep.subr.bf16.mxu1 %v15581_v50  ;;  %9168 = vmatpush1.bf16.msra.mxu0 %v15624_v12  ;;  %v15644_v9 = vld [vmem:[#allocation14 + $0x484] ss:$16 sps:$4 sm:$0xff]   ;;  %v15645_v50 = vld [vmem:[#allocation14 + $0x680] ss:$16 sps:$4 sm:$0xff]  }
 0x5f6   :  { %9169 = vmatprep.subr.bf16.mxu0 %v15632_v48  ;;  %v15647_v57 = vld [vmem:[#allocation14 + $0x684] ss:$16 sps:$4 sm:$0xff]   ;;  %v15690_v18 = vld [vmem:[#allocation14 + $0x580] ss:$16 sps:$4 sm:$0xff]  }
 0x5f7   :  { %v15695_v12 = vld [vmem:[#allocation14 + $0x784] ss:$16 sps:$4 sm:$0xff]  }
 0x5f8   :  { %8249 = vmatpush1.bf16.msra.mxu1 %v15579_v27  ;;  %v15650_v27 = vld [vmem:[#allocation14 + $0x464] ss:$16 sps:$4 sm:$0xff]  }
 0x5f9   :  { %8250 = vmatprep.subr.bf16.mxu1 %v15584_v29  ;;  %9170 = vmatpush1.bf16.msra.mxu0 %v15630_v1  ;;  %v15653_v29 = vld [vmem:[#allocation14 + $0x664] ss:$16 sps:$4 sm:$0xff]  }
 0x5fa   :  { %9171 = vmatprep.subr.bf16.mxu0 %v15638_v21  ;;  %v15698_v48 = vld [vmem:[#allocation14 + $0x564] ss:$16 sps:$4 sm:$0xff]   ;;  %v15699_v21 = vld [vmem:[#allocation14 + $0x760] ss:$16 sps:$4 sm:$0xff]  }
 0x5fc   :  { %8251 = vmatpush1.bf16.msra.mxu1 %v15582_v24  ;;  %v15648_v24 = vld [vmem:[#allocation14 + $0x460] ss:$16 sps:$4 sm:$0xff]  }
 0x5fd   :  { %8252 = vmatprep.subr.bf16.mxu1 %v15587_v28  ;;  %9172 = vmatpush1.bf16.msra.mxu0 %v15636_v32  ;;  %v15651_v28 = vld [vmem:[#allocation14 + $0x660] ss:$16 sps:$4 sm:$0xff]   ;;  %v15704_v32 = vld [vmem:[#allocation14 + $0x544] ss:$16 sps:$4 sm:$0xff]  }
 0x5fe   :  { %9173 = vmatprep.subr.bf16.mxu0 %v15644_v9 }
 0x600   :  { %8253 = vmatpush1.bf16.msra.mxu1 %v15585_v38  ;;  %v15656_v38 = vld [vmem:[#allocation14 + $0x444] ss:$16 sps:$4 sm:$0xff]  }
 0x601   :  { %8254 = vmatprep.subr.bf16.mxu1 %v15590_v3  ;;  %v15659_v3 = vld [vmem:[#allocation14 + $0x644] ss:$16 sps:$4 sm:$0xff]  }
 0x604   :  { %8255 = vmatpush1.bf16.msra.mxu1 %v15588_v5  ;;  %v15654_v5 = vld [vmem:[#allocation14 + $0x440] ss:$16 sps:$4 sm:$0xff]  }
 0x605   :  { %8256 = vmatprep.subr.bf16.mxu1 %v15593_v51  ;;  %v15657_v51 = vld [vmem:[#allocation14 + $0x640] ss:$16 sps:$4 sm:$0xff]  }
 0x608   :  { %8257 = vmatpush1.bf16.msra.mxu1 %v15591_v53  ;;  %v15662_v53 = vld [vmem:[#allocation14 + $0x424] ss:$16 sps:$4 sm:$0xff]  }
 0x609   :  { %8258 = vmatprep.subr.bf16.mxu1 %v15596_v55  ;;  %v15665_v55 = vld [vmem:[#allocation14 + $0x624] ss:$16 sps:$4 sm:$0xff]  }
 0x60c   :  { %8259 = vmatpush1.bf16.msra.mxu1 %v15594_v35  ;;  %v15660_v35 = vld [vmem:[#allocation14 + $0x420] ss:$16 sps:$4 sm:$0xff]  }
 0x60d   :  { %8260 = vmatprep.subr.bf16.mxu1 %v15599_v31  ;;  %v15663_v31 = vld [vmem:[#allocation14 + $0x620] ss:$16 sps:$4 sm:$0xff]  }
 0x610   :  { %8261 = vmatpush1.bf16.msra.mxu1 %v15597_v8  ;;  %v15668_v8 = vld [vmem:[#allocation14 + $0x404] ss:$16 sps:$4 sm:$0xff]  }
 0x611   :  { %8262 = vmatprep.subr.bf16.mxu1 %v15602_v33  ;;  %v15671_v33 = vld [vmem:[#allocation14 + $0x604] ss:$16 sps:$4 sm:$0xff]  }
 0x614   :  { %8263 = vmatpush2.bf16.msra.mxu1 %v15600_v7  ;;  %v15666_v7 = vld [vmem:[#allocation14 + $0x400] ss:$16 sps:$4 sm:$0xff]  }
 0x615   :  { %8264 = vmatprep.subr.bf16.mxu1 %v15605_v40  ;;  %v15669_v40 = vld [vmem:[#allocation14 + $0x600] ss:$16 sps:$4 sm:$0xff]  }
 0x618   :  { %8265 = vmatpush2.bf16.msra.mxu1 %v15603_v13  ;;  %v15674_v13 = vld [vmem:[#allocation14 + $0x5e4] ss:$16 sps:$4 sm:$0xff]  }
 0x619   :  { %8266 = vmatprep.subr.bf16.mxu1 %v15608_v45  ;;  %v15677_v45 = vld [vmem:[#allocation14 + $0x7e4] ss:$16 sps:$4 sm:$0xff]  }
 0x61c   :  { %8267 = vmatpush2.bf16.msra.mxu1 %v15606_v36  ;;  %v15672_v36 = vld [vmem:[#allocation14 + $0x5e0] ss:$16 sps:$4 sm:$0xff]  }
 0x61d   :  { %8268 = vmatprep.subr.bf16.mxu1 %v15611_v23  ;;  %v15675_v23 = vld [vmem:[#allocation14 + $0x7e0] ss:$16 sps:$4 sm:$0xff]  }
 0x620   :  { %8269 = vmatpush2.bf16.msra.mxu1 %v15609_v54  ;;  %v15680_v54 = vld [vmem:[#allocation14 + $0x5c4] ss:$16 sps:$4 sm:$0xff]  }
 0x621   :  { %8270 = vmatprep.subr.bf16.mxu1 %v15614_v6  ;;  %v15683_v6 = vld [vmem:[#allocation14 + $0x7c4] ss:$16 sps:$4 sm:$0xff]  }
 0x624   :  { %8271 = vmatpush2.bf16.msra.mxu1 %v15612_v52  ;;  %v15678_v52 = vld [vmem:[#allocation14 + $0x5c0] ss:$16 sps:$4 sm:$0xff]  }
 0x625   :  { %8272 = vmatprep.subr.bf16.mxu1 %v15617_v25  ;;  %v15681_v25 = vld [vmem:[#allocation14 + $0x7c0] ss:$16 sps:$4 sm:$0xff]  }
 0x628   :  { %8273 = vmatpush2.bf16.msra.mxu1 %v15615_v63  ;;  %v15686_v63 = vld [vmem:[#allocation14 + $0x5a4] ss:$16 sps:$4 sm:$0xff]  }
 0x629   :  { %8274 = vmatprep.subr.bf16.mxu1 %v15620_v43  ;;  %v15689_v43 = vld [vmem:[#allocation14 + $0x7a4] ss:$16 sps:$4 sm:$0xff]  }
 0x62c   :  { %8275 = vmatpush2.bf16.msra.mxu1 %v15618_v46  ;;  %v15684_v46 = vld [vmem:[#allocation14 + $0x5a0] ss:$16 sps:$4 sm:$0xff]  }
 0x62d   :  { %8276 = vmatprep.subr.bf16.mxu1 %v15623_v20  ;;  %v15687_v20 = vld [vmem:[#allocation14 + $0x7a0] ss:$16 sps:$4 sm:$0xff]  }
 0x630   :  { %8277 = vmatpush2.bf16.msra.mxu1 %v15621_v59  ;;  %v15692_v59 = vld [vmem:[#allocation14 + $0x584] ss:$16 sps:$4 sm:$0xff]  }
 0x631   :  { %9210 = vmatprep.subr.bf16.mxu1 %v15629_v26 }
 0x633   :  { %8279 = vmatmul.mubr.bf16.vlgmr.msra.gmra.mxu1 %v17066_v34  ;;  %v15642_v34 = vld [vmem:[#allocation14 + $0x480] ss:$16 sps:$4 sm:$0xff]  }
 0x634   :  { %9211 = vmatpush1.bf16.msra.mxu1 %v15627_v39  ;;  %9174 = vmatpush1.bf16.msra.mxu0 %v15642_v34  ;;  %v15693_v39 = vld [vmem:[#allocation14 + $0x780] ss:$16 sps:$4 sm:$0xff]  }
 0x635   :  { %9212 = vmatprep.subr.bf16.mxu1 %v15635_v4  ;;  %9175 = vmatprep.subr.bf16.mxu0 %v15650_v27  ;;  %v15701_v4 = vld [vmem:[#allocation14 + $0x764] ss:$16 sps:$4 sm:$0xff]   ;;  %v15705_v34 = vld [vmem:[#allocation14 + $0x740] ss:$16 sps:$4 sm:$0xff]  }
 0x636   :  { %v15713_v27 = vld [vmem:[#allocation14 + $0x724] ss:$16 sps:$4 sm:$0xff]  }
 0x638   :  { %9213 = vmatpush1.bf16.msra.mxu1 %v15633_v14  ;;  %9176 = vmatpush1.bf16.msra.mxu0 %v15648_v24  ;;  %v15696_v14 = vld [vmem:[#allocation14 + $0x560] ss:$16 sps:$4 sm:$0xff]  }
 0x639   :  { %9214 = vmatprep.subr.bf16.mxu1 %v15641_v56  ;;  %9177 = vmatprep.subr.bf16.mxu0 %v15656_v38  ;;  %v15711_v24 = vld [vmem:[#allocation14 + $0x720] ss:$16 sps:$4 sm:$0xff]  }
 0x63a   :  { %v15714_v38 = vld [vmem:[#allocation14 + $0x500] ss:$16 sps:$4 sm:$0xff]  }
 0x63c   :  { %9215 = vmatpush1.bf16.msra.mxu1 %v15639_v49  ;;  %9178 = vmatpush1.bf16.msra.mxu0 %v15654_v5  ;;  %v15707_v49 = vld [vmem:[#allocation14 + $0x744] ss:$16 sps:$4 sm:$0xff]  }
 0x63d   :  { %9216 = vmatprep.subr.bf16.mxu1 %v15647_v57  ;;  %9179 = vmatprep.subr.bf16.mxu0 %v15662_v53  ;;  %v15702_v57 = vld [vmem:[#allocation14 + $0x540] ss:$16 sps:$4 sm:$0xff]   ;;  %v15719_v5 = vld [vmem:[#allocation14 + $0x704] ss:$16 sps:$4 sm:$0xff]   ;;  %v15725_v53 = vld [vmem:[#allocation14 + $0x6ec] ss:$16 sps:$4 sm:$0xff]  }
 0x640   :  { %9217 = vmatpush1.bf16.msra.mxu1 %v15645_v50  ;;  %9180 = vmatpush1.bf16.msra.mxu0 %v15660_v35  ;;  %v15710_v50 = vld [vmem:[#allocation14 + $0x524] ss:$16 sps:$4 sm:$0xff]  }
 0x641   :  { %9218 = vmatprep.subr.bf16.mxu1 %v15653_v29  ;;  %9181 = vmatprep.subr.bf16.mxu0 %v15668_v8  ;;  %v15708_v29 = vld [vmem:[#allocation14 + $0x520] ss:$16 sps:$4 sm:$0xff]  }
 0x644   :  { %9219 = vmatpush1.bf16.msra.mxu1 %v15651_v28  ;;  %9182 = vmatpush1.bf16.msra.mxu0 %v15666_v7  ;;  %v15716_v28 = vld [vmem:[#allocation14 + $0x504] ss:$16 sps:$4 sm:$0xff]  }
 0x645   :  { %9220 = vmatprep.subr.bf16.mxu1 %v15659_v3  ;;  %9183 = vmatprep.subr.bf16.mxu0 %v15674_v13  ;;  %v15717_v3 = vld [vmem:[#allocation14 + $0x700] ss:$16 sps:$4 sm:$0xff]  }
 0x648   :  { %9221 = vmatpush1.bf16.msra.mxu1 %v15657_v51  ;;  %9184 = vmatpush2.bf16.msra.mxu0 %v15672_v36  ;;  %v15722_v51 = vld [vmem:[#allocation14 + $0x4ec] ss:$16 sps:$4 sm:$0xff]  }
 0x649   :  { %9222 = vmatprep.subr.bf16.mxu1 %v15665_v55  ;;  %9185 = vmatprep.subr.bf16.mxu0 %v15680_v54  ;;  %v7432_v55 = vld [vmem:[#allocation19] sm:$0xf] }
 0x64a   :  { %v7437_v35 = vrot.slane %v7432_v55, %v16922_v30 }
 0x64c   :  { %9223 = vmatpush1.bf16.msra.mxu1 %v15663_v31  ;;  %9186 = vmatpush2.bf16.msra.mxu0 %v15678_v52  ;;  %v7441_v31 = vrot.slane %v7432_v55, %v16919_v37 }
 0x64d   :  { %9224 = vmatprep.subr.bf16.mxu1 %v15671_v33  ;;  %9187 = vmatprep.subr.bf16.mxu0 %v15686_v63 }
 0x650   :  { %9225 = vmatpush1.bf16.msra.mxu1 %v15669_v40  ;;  %9188 = vmatpush2.bf16.msra.mxu0 %v15684_v46 }
 0x651   :  { %9226 = vmatprep.subr.bf16.mxu1 %v15677_v45  ;;  %9189 = vmatprep.subr.bf16.mxu0 %v15692_v59  ;;  %v7449_v59 = vrot.slane %v7432_v55, %v16949_v2 }
 0x654   :  { %9227 = vmatpush2.bf16.msra.mxu1 %v15675_v23  ;;  %9190 = vmatpush2.bf16.msra.mxu0 %v15690_v18 }
 0x655   :  { %9228 = vmatprep.subr.bf16.mxu1 %v15683_v6  ;;  %9191 = vmatprep.subr.bf16.mxu0 %v15698_v48 }
 0x658   :  { %9229 = vmatpush2.bf16.msra.mxu1 %v15681_v25  ;;  %9192 = vmatpush2.bf16.msra.mxu0 %v15696_v14 }
 0x659   :  { %9230 = vmatprep.subr.bf16.mxu1 %v15689_v43  ;;  %9193 = vmatprep.subr.bf16.mxu0 %v15704_v32  ;;  %v16586_v43 = vmov 1966171168  }
 0x65a   :  { %v8294_v46 = vunpack.c.l.s4 %v16586_v43 }
 0x65c   :  { %9231 = vmatpush2.bf16.msra.mxu1 %v15687_v20  ;;  %9194 = vmatpush2.bf16.msra.mxu0 %v15702_v57  ;;  %v7445_v20 = vrot.slane %v7432_v55, %v16946_v60  ;;  %v16216_v55 = vld [vmem:[#allocation2 + $0x8] sm:$0xff] }
 0x65d   :  { %9232 = vmatprep.subr.bf16.mxu1 %v15695_v12  ;;  %9195 = vmatprep.subr.bf16.mxu0 %v15710_v50  ;;  %v8295_v12 = vunpack.c.0.s8 %v8294_v46 }
 0x660   :  { %9233 = vmatpush2.bf16.msra.mxu1 %v15693_v39  ;;  %9196 = vmatpush2.bf16.msra.mxu0 %v15708_v29 }
 0x661   :  { %9234 = vmatprep.subr.bf16.mxu1 %v15701_v4  ;;  %9197 = vmatprep.subr.bf16.mxu0 %v15716_v28  ;;  %v17076_v4 = vsub.s32 %v8295_v12, %v16907_v61 }
 0x664   :  { %9235 = vmatpush2.bf16.msra.mxu1 %v15699_v21  ;;  %9198 = vmatpush2.bf16.msra.mxu0 %v15714_v38 }
 0x665   :  { %9236 = vmatprep.subr.bf16.mxu1 %v15707_v49  ;;  %9253 = vmatprep.subr.bf16.mxu0 %v15722_v51 }
 0x668   :  { %9237 = vmatpush2.bf16.msra.mxu1 %v15705_v34 }
 0x669   :  { %9238 = vmatprep.subr.bf16.mxu1 %v15713_v27 }
 0x66c   :  { %9239 = vmatpush2.bf16.msra.mxu1 %v15711_v24 }
 0x66d   :  { %9240 = vmatprep.subr.bf16.mxu1 %v15719_v5 }
 0x670   :  { %9241 = vmatpush2.bf16.msra.mxu1 %v15717_v3 }
 0x671   :  { %9296 = vmatprep.subr.bf16.mxu1 %v15725_v53 }
 0x673   :  { %v8157_v26 = vpop.f32.mrf.mxu0 }
 0x674   :  { %v8158_v8 = vadd.f32 %v8157_v26, %v7437_v35 }
 0x675   :  { %v8159_v1 = vpop.f32.mrf.mxu0 }
 0x676   :  { %v8160_v40 = vadd.f32 %v8159_v1, %v7441_v31  ;;  %v16217_v31 = vld [vmem:[#allocation2 + $0x28] sm:$0xff] }
 0x677   :  { %v8161_v56 = vpop.f32.mrf.mxu0 }
 0x679   :  { %v8162_v9 = vpop.f32.mrf.mxu0 }
 0x6b3   :  { %v8239_v33 = vpop.f32.mrf.mxu0  ;;  %v8198_v7 = vpop.f32.mrf.mxu1 }
 0x6b4   :  { %v8199_v13 = vadd.f32 %v8198_v7, %v8158_v8  ;;  %v8240_v39 = vadd.f32 %v8239_v33, %v7445_v20  ;;  %v16218_v33 = vld [vmem:[#allocation2 + $0x18] sm:$0xff]  ;;  %v15720_v20 = vld [vmem:[#allocation14 + $0x4e8] ss:$16 sps:$4 sm:$0xff]  }
 0x6b5   :  { %v8241_v45 = vpop.f32.mrf.mxu0  ;;  %v8200_v36 = vpop.f32.mrf.mxu1 }
 0x6b6   :  { %v8201_v23 = vadd.f32 %v8200_v36, %v8160_v40  ;;  %v8242_v26 = vadd.f32 %v8241_v45, %v7449_v59  ;;  %v16219_v40 = vld [vmem:[#allocation2 + $0x38] sm:$0xff]  ;;  %v16220_v45 = vld [vmem:[#allocation2] sm:$0xff] }
 0x6b7   :  { %v8243_v54 = vpop.f32.mrf.mxu0  ;;  %v8202_v6 = vpop.f32.mrf.mxu1  ;;  %v15723_v59 = vld [vmem:[#allocation14 + $0x6e8] ss:$16 sps:$4 sm:$0xff]  }
 0x6b8   :  { %v8291_v52 = vcombine.low %v8199_v13, %v8201_v23  ;;  %v16221_v23 = vld [vmem:[#allocation2 + $0x20] sm:$0xff]  ;;  %v16222_v6 = vld [vmem:[#allocation2 + $0x10] sm:$0xff] }
 0x6b9   :  { %v8244_v25 = vpop.f32.mrf.mxu0  ;;  %v8203_v63 = vpop.f32.mrf.mxu1 }
 0x6ba   :  { %v8299_v49 = vrot.slane %v8291_v52, %v17076_v4  ;;  %v16223_v25 = vld [vmem:[#allocation2 + $0x30] sm:$0xff] }
 0x6f3   :  { %v8280_v18 = vpop.f32.mrf.mxu1 }
 0x6f4   :  { %v8281_v1 = vadd.f32 %v8280_v18, %v8240_v39  ;;  %v15728_v39 = vld [vmem:[#allocation14 + $0x4cc] ss:$16 sps:$4 sm:$0xff]  }
 0x6f5   :  { %v8282_v48 = vpop.f32.mrf.mxu1 }
 0x6f6   :  { %v8283_v14 = vadd.f32 %v8282_v48, %v8242_v26  ;;  %v15731_v26 = vld [vmem:[#allocation14 + $0x6cc] ss:$16 sps:$4 sm:$0xff]   ;;  %v15726_v48 = vld [vmem:[#allocation14 + $0x4c8] ss:$16 sps:$4 sm:$0xff]  }
 0x6f7   :  { %v8284_v21 = vpop.f32.mrf.mxu1 }
 0x6f8   :  { %v8292_v56 = vcombine.low %v8281_v1, %v8283_v14  ;;  %v15729_v1 = vld [vmem:[#allocation14 + $0x6c8] ss:$16 sps:$4 sm:$0xff]   ;;  %v15734_v14 = vld [vmem:[#allocation14 + $0x4ac] ss:$16 sps:$4 sm:$0xff]  }
 0x6f9   :  { %v8285_v32 = vpop.f32.mrf.mxu1  ;;  %v15737_v21 = vld [vmem:[#allocation14 + $0x6ac] ss:$16 sps:$4 sm:$0xff]  }
 0x6fa   :  { %v8306_v9 = vrot.slane %v8292_v56, %v17076_v4  ;;  %v15732_v56 = vld [vmem:[#allocation14 + $0x4a8] ss:$16 sps:$4 sm:$0xff]  }
 0x6fb   :  { %v15735_v32 = vld [vmem:[#allocation14 + $0x6a8] ss:$16 sps:$4 sm:$0xff]  }
 0x6fc   :  { %v8307_v57 = vcombine.low %v8299_v49, %v8306_v9  ;;  %v8308_v34 = vcombine.high %v8299_v49, %v8306_v9  ;;  %v15740_v49 = vld [vmem:[#allocation14 + $0x48c] ss:$16 sps:$4 sm:$0xff]  }
 0x6fd   :  { %v15743_v9 = vld [vmem:[#allocation14 + $0x68c] ss:$16 sps:$4 sm:$0xff]  }
 0x6fe   :  { %v8315_v50 = vrot.slane %v8307_v57, %v17076_v4  ;;  %v8322_v27 = vrot.slane %v8308_v34, %v17076_v4  ;;  %v15738_v57 = vld [vmem:[#allocation14 + $0x488] ss:$16 sps:$4 sm:$0xff]  }
 0x6ff   :  { %v15741_v34 = vld [vmem:[#allocation14 + $0x688] ss:$16 sps:$4 sm:$0xff]  }
 0x700   :  { %v8330_v29 = vrot.slane %v8315_v50, %v16919_v37  ;;  %v8346_v24 = vrot.slane %v8322_v27, %v16919_v37  ;;  %v8338_v28 = vrot.slane %v8315_v50, %v16949_v2  ;;  %v8354_v38 = vrot.slane %v8322_v27, %v16949_v2 }
 0x701   :  { %v8326_v3 = vrot.slane %v8315_v50, %v16922_v30  ;;  %v8342_v5 = vrot.slane %v8322_v27, %v16922_v30  ;;  %v8334_v51 = vrot.slane %v8315_v50, %v16946_v60  ;;  %v8350_v53 = vrot.slane %v8322_v27, %v16946_v60  ;;  %v15746_v50 = vld [vmem:[#allocation14 + $0x46c] ss:$16 sps:$4 sm:$0xff]  }
 0x702   :  { %v17090_v35 = vadd.f32 %v16216_v55, %v8330_v29  ;;  %v17092_v8 = vadd.f32 %v16217_v31, %v8346_v24  ;;  %v17094_v7 = vadd.f32 %v16218_v33, %v8338_v28  ;;  %v17096_v13 = vadd.f32 %v16219_v40, %v8354_v38  ;;  %v15749_v27 = vld [vmem:[#allocation14 + $0x66c] ss:$16 sps:$4 sm:$0xff]   ;;  %v15744_v29 = vld [vmem:[#allocation14 + $0x468] ss:$16 sps:$4 sm:$0xff]  }
 0x703   :  { %v17098_v36 = vadd.f32 %v16220_v45, %v8326_v3  ;;  %v17100_v54 = vadd.f32 %v16221_v23, %v8342_v5  ;;  %v17102_v52 = vadd.f32 %v16222_v6, %v8334_v51  ;;  %v17104_v63 = vadd.f32 %v16223_v25, %v8350_v53  ;;  %v15747_v24 = vld [vmem:[#allocation14 + $0x668] ss:$16 sps:$4 sm:$0xff]   ;;  %v15752_v28 = vld [vmem:[#allocation14 + $0x44c] ss:$16 sps:$4 sm:$0xff]  }
 0x704   :  { %v8372_v43 = vpack.c.bf16 %v17092_v8, %v17090_v35  ;;  %v8374_v46 = vpack.c.bf16 %v17096_v13, %v17094_v7  ;;  %v15755_v38 = vld [vmem:[#allocation14 + $0x64c] ss:$16 sps:$4 sm:$0xff]   ;;  %v15750_v3 = vld [vmem:[#allocation14 + $0x448] ss:$16 sps:$4 sm:$0xff]  }
 0x705   :  { %v17112_v12 = vpack.c.bf16 %v17100_v54, %v17098_v36  ;;  %v17116_v18 = vpack.c.bf16 %v17104_v63, %v17102_v52  ;;  %v15753_v5 = vld [vmem:[#allocation14 + $0x648] ss:$16 sps:$4 sm:$0xff]   ;;  %v15758_v51 = vld [vmem:[#allocation14 + $0x42c] ss:$16 sps:$4 sm:$0xff]  }
 0x706   :  { %9199 = vmatprep.mubr.bf16.mxu0 %v8372_v43  ;;  %9242 = vmatprep.mubr.bf16.mxu1 %v8374_v46  ;;  %v15761_v53 = vld [vmem:[#allocation14 + $0x62c] ss:$16 sps:$4 sm:$0xff]   ;;  %v15756_v55 = vld [vmem:[#allocation14 + $0x428] ss:$16 sps:$4 sm:$0xff]  }
 0x707   :  { %9200 = vmatmul.mubr.bf16.vlgmr.msra.gmra.mxu0 %v17112_v12  ;;  %9243 = vmatmul.mubr.bf16.vlgmr.msra.gmra.mxu1 %v17116_v18  ;;  %v15759_v31 = vld [vmem:[#allocation14 + $0x628] ss:$16 sps:$4 sm:$0xff]   ;;  %v15764_v33 = vld [vmem:[#allocation14 + $0x40c] ss:$16 sps:$4 sm:$0xff]  }
 0x708   :  { %9254 = vmatpush1.bf16.msra.mxu0 %v15720_v20  ;;  %9297 = vmatpush1.bf16.msra.mxu1 %v15723_v59  ;;  %v15767_v40 = vld [vmem:[#allocation14 + $0x60c] ss:$16 sps:$4 sm:$0xff]   ;;  %v15762_v45 = vld [vmem:[#allocation14 + $0x408] ss:$16 sps:$4 sm:$0xff]  }
 0x709   :  { %9285 = vmatprep.mubr.bf16.mxu0 %v8372_v43  ;;  %9328 = vmatprep.mubr.bf16.mxu1 %v8374_v46  ;;  %v15765_v23 = vld [vmem:[#allocation14 + $0x608] ss:$16 sps:$4 sm:$0xff]   ;;  %v15770_v6 = vld [vmem:[#allocation14 + $0x5ec] ss:$16 sps:$4 sm:$0xff]  }
 0x70a   :  { %9255 = vmatprep.subr.bf16.mxu0 %v15728_v39  ;;  %9298 = vmatprep.subr.bf16.mxu1 %v15731_v26  ;;  %v15773_v25 = vld [vmem:[#allocation14 + $0x7ec] ss:$16 sps:$4 sm:$0xff]   ;;  %v15768_v43 = vld [vmem:[#allocation14 + $0x5e8] ss:$16 sps:$4 sm:$0xff]  }
 0x70b   :  { %v15771_v46 = vld [vmem:[#allocation14 + $0x7e8] ss:$16 sps:$4 sm:$0xff]   ;;  %v15776_v20 = vld [vmem:[#allocation14 + $0x5cc] ss:$16 sps:$4 sm:$0xff]  }
 0x70c   :  { %9256 = vmatpush1.bf16.msra.mxu0 %v15726_v48  ;;  %9299 = vmatpush1.bf16.msra.mxu1 %v15729_v1  ;;  %v15779_v59 = vld [vmem:[#allocation14 + $0x7cc] ss:$16 sps:$4 sm:$0xff]   ;;  %v15774_v39 = vld [vmem:[#allocation14 + $0x5c8] ss:$16 sps:$4 sm:$0xff]  }
 0x70d   :  { %9257 = vmatprep.subr.bf16.mxu0 %v15734_v14  ;;  %9300 = vmatprep.subr.bf16.mxu1 %v15737_v21  ;;  %v15777_v26 = vld [vmem:[#allocation14 + $0x7c8] ss:$16 sps:$4 sm:$0xff]   ;;  %v15782_v48 = vld [vmem:[#allocation14 + $0x5ac] ss:$16 sps:$4 sm:$0xff]  }
 0x70e   :  { %v15785_v1 = vld [vmem:[#allocation14 + $0x7ac] ss:$16 sps:$4 sm:$0xff]   ;;  %v15780_v14 = vld [vmem:[#allocation14 + $0x5a8] ss:$16 sps:$4 sm:$0xff]  }
 0x70f   :  { %v15783_v21 = vld [vmem:[#allocation14 + $0x7a8] ss:$16 sps:$4 sm:$0xff]  }
 0x710   :  { %9258 = vmatpush1.bf16.msra.mxu0 %v15732_v56  ;;  %9301 = vmatpush1.bf16.msra.mxu1 %v15735_v32  ;;  %v15788_v56 = vld [vmem:[#allocation14 + $0x58c] ss:$16 sps:$4 sm:$0xff]  }
 0x711   :  { %9259 = vmatprep.subr.bf16.mxu0 %v15740_v49  ;;  %9302 = vmatprep.subr.bf16.mxu1 %v15743_v9  ;;  %v15791_v32 = vld [vmem:[#allocation14 + $0x78c] ss:$16 sps:$4 sm:$0xff]   ;;  %v15786_v49 = vld [vmem:[#allocation14 + $0x588] ss:$16 sps:$4 sm:$0xff]  }
 0x712   :  { %v15789_v9 = vld [vmem:[#allocation14 + $0x788] ss:$16 sps:$4 sm:$0xff]  }
 0x714   :  { %9260 = vmatpush1.bf16.msra.mxu0 %v15738_v57  ;;  %9303 = vmatpush1.bf16.msra.mxu1 %v15741_v34  ;;  %v15794_v57 = vld [vmem:[#allocation14 + $0x56c] ss:$16 sps:$4 sm:$0xff]  }
 0x715   :  { %9261 = vmatprep.subr.bf16.mxu0 %v15746_v50  ;;  %9304 = vmatprep.subr.bf16.mxu1 %v15749_v27  ;;  %v15797_v34 = vld [vmem:[#allocation14 + $0x76c] ss:$16 sps:$4 sm:$0xff]   ;;  %v15792_v50 = vld [vmem:[#allocation14 + $0x568] ss:$16 sps:$4 sm:$0xff]  }
 0x716   :  { %v15795_v27 = vld [vmem:[#allocation14 + $0x768] ss:$16 sps:$4 sm:$0xff]  }
 0x718   :  { %9262 = vmatpush1.bf16.msra.mxu0 %v15744_v29  ;;  %9305 = vmatpush1.bf16.msra.mxu1 %v15747_v24  ;;  %v15800_v29 = vld [vmem:[#allocation14 + $0x54c] ss:$16 sps:$4 sm:$0xff]  }
 0x719   :  { %9263 = vmatprep.subr.bf16.mxu0 %v15752_v28  ;;  %9306 = vmatprep.subr.bf16.mxu1 %v15755_v38  ;;  %v15803_v24 = vld [vmem:[#allocation14 + $0x74c] ss:$16 sps:$4 sm:$0xff]   ;;  %v15798_v28 = vld [vmem:[#allocation14 + $0x548] ss:$16 sps:$4 sm:$0xff]  }
 0x71a   :  { %v15801_v38 = vld [vmem:[#allocation14 + $0x748] ss:$16 sps:$4 sm:$0xff]  }
 0x71c   :  { %9264 = vmatpush1.bf16.msra.mxu0 %v15750_v3  ;;  %9307 = vmatpush1.bf16.msra.mxu1 %v15753_v5  ;;  %v15806_v3 = vld [vmem:[#allocation14 + $0x52c] ss:$16 sps:$4 sm:$0xff]  }
 0x71d   :  { %9265 = vmatprep.subr.bf16.mxu0 %v15758_v51  ;;  %9308 = vmatprep.subr.bf16.mxu1 %v15761_v53  ;;  %v15809_v5 = vld [vmem:[#allocation14 + $0x72c] ss:$16 sps:$4 sm:$0xff]   ;;  %v15804_v51 = vld [vmem:[#allocation14 + $0x528] ss:$16 sps:$4 sm:$0xff]  }
 0x71e   :  { %v15807_v53 = vld [vmem:[#allocation14 + $0x728] ss:$16 sps:$4 sm:$0xff]  }
 0x720   :  { %9266 = vmatpush1.bf16.msra.mxu0 %v15756_v55  ;;  %9309 = vmatpush1.bf16.msra.mxu1 %v15759_v31  ;;  %v15812_v55 = vld [vmem:[#allocation14 + $0x50c] ss:$16 sps:$4 sm:$0xff]  }
 0x721   :  { %9267 = vmatprep.subr.bf16.mxu0 %v15764_v33  ;;  %9310 = vmatprep.subr.bf16.mxu1 %v15767_v40  ;;  %v15815_v31 = vld [vmem:[#allocation14 + $0x70c] ss:$16 sps:$4 sm:$0xff]   ;;  %v15810_v33 = vld [vmem:[#allocation14 + $0x508] ss:$16 sps:$4 sm:$0xff]  }
 0x722   :  { %v15813_v40 = vld [vmem:[#allocation14 + $0x708] ss:$16 sps:$4 sm:$0xff]  }
 0x724   :  { %9268 = vmatpush1.bf16.msra.mxu0 %v15762_v45  ;;  %9311 = vmatpush1.bf16.msra.mxu1 %v15765_v23  ;;  %v15818_v45 = vld [vmem:[#allocation17 + $0x4e4] ss:$16 sps:$4 sm:$0xff]   ;;  %v15816_v23 = vld [vmem:[#allocation17 + $0x4e0] ss:$16 sps:$4 sm:$0xff]  }
 0x725   :  { %9269 = vmatprep.subr.bf16.mxu0 %v15770_v6  ;;  %9312 = vmatprep.subr.bf16.mxu1 %v15773_v25  ;;  %v15821_v6 = vld [vmem:[#allocation17 + $0x4c4] ss:$16 sps:$4 sm:$0xff]   ;;  %v15819_v25 = vld [vmem:[#allocation17 + $0x4c0] ss:$16 sps:$4 sm:$0xff]  }
 0x728   :  { %9270 = vmatpush2.bf16.msra.mxu0 %v15768_v43  ;;  %9313 = vmatpush2.bf16.msra.mxu1 %v15771_v46  ;;  %v15824_v43 = vld [vmem:[#allocation17 + $0x4a4] ss:$16 sps:$4 sm:$0xff]   ;;  %v15822_v46 = vld [vmem:[#allocation17 + $0x4a0] ss:$16 sps:$4 sm:$0xff]  }
 0x729   :  { %9271 = vmatprep.subr.bf16.mxu0 %v15776_v20  ;;  %9314 = vmatprep.subr.bf16.mxu1 %v15779_v59  ;;  %v15827_v20 = vld [vmem:[#allocation17 + $0x484] ss:$16 sps:$4 sm:$0xff]   ;;  %v15825_v59 = vld [vmem:[#allocation17 + $0x480] ss:$16 sps:$4 sm:$0xff]  }
 0x72c   :  { %9272 = vmatpush2.bf16.msra.mxu0 %v15774_v39  ;;  %9315 = vmatpush2.bf16.msra.mxu1 %v15777_v26  ;;  %v15830_v39 = vld [vmem:[#allocation17 + $0x464] ss:$16 sps:$4 sm:$0xff]   ;;  %v15828_v26 = vld [vmem:[#allocation17 + $0x460] ss:$16 sps:$4 sm:$0xff]  }
 0x72d   :  { %9273 = vmatprep.subr.bf16.mxu0 %v15782_v48  ;;  %9316 = vmatprep.subr.bf16.mxu1 %v15785_v1  ;;  %v15833_v48 = vld [vmem:[#allocation17 + $0x444] ss:$16 sps:$4 sm:$0xff]   ;;  %v15834_v1 = vld [vmem:[#allocation17 + $0x420] ss:$16 sps:$4 sm:$0xff]  }
 0x730   :  { %9274 = vmatpush2.bf16.msra.mxu0 %v15780_v14  ;;  %9317 = vmatpush2.bf16.msra.mxu1 %v15783_v21  ;;  %v15839_v14 = vld [vmem:[#allocation17 + $0x404] ss:$16 sps:$4 sm:$0xff]   ;;  %v15837_v21 = vld [vmem:[#allocation17 + $0x400] ss:$16 sps:$4 sm:$0xff]  }
 0x731   :  { %9275 = vmatprep.subr.bf16.mxu0 %v15788_v56  ;;  %9318 = vmatprep.subr.bf16.mxu1 %v15791_v32  ;;  %v15842_v56 = vld [vmem:[#allocation17 + $0x5e4] ss:$16 sps:$4 sm:$0xff]   ;;  %v15840_v32 = vld [vmem:[#allocation17 + $0x5e0] ss:$16 sps:$4 sm:$0xff]  }
 0x734   :  { %9276 = vmatpush2.bf16.msra.mxu0 %v15786_v49  ;;  %9319 = vmatpush2.bf16.msra.mxu1 %v15789_v9  ;;  %v15864_v49 = vld [vmem:[#allocation17 + $0x6e0] ss:$16 sps:$4 sm:$0xff]   ;;  %v15845_v9 = vld [vmem:[#allocation17 + $0x5c4] ss:$16 sps:$4 sm:$0xff]  }
 0x735   :  { %9277 = vmatprep.subr.bf16.mxu0 %v15794_v57  ;;  %9320 = vmatprep.subr.bf16.mxu1 %v15797_v34  ;;  %v15866_v57 = vld [vmem:[#allocation17 + $0x6e4] ss:$16 sps:$4 sm:$0xff]   ;;  %v15843_v34 = vld [vmem:[#allocation17 + $0x5c0] ss:$16 sps:$4 sm:$0xff]  }
 0x738   :  { %9278 = vmatpush2.bf16.msra.mxu0 %v15792_v50  ;;  %9321 = vmatpush2.bf16.msra.mxu1 %v15795_v27  ;;  %v15848_v50 = vld [vmem:[#allocation17 + $0x5a4] ss:$16 sps:$4 sm:$0xff]   ;;  %v15846_v27 = vld [vmem:[#allocation17 + $0x5a0] ss:$16 sps:$4 sm:$0xff]  }
 0x739   :  { %9279 = vmatprep.subr.bf16.mxu0 %v15800_v29  ;;  %9322 = vmatprep.subr.bf16.mxu1 %v15803_v24  ;;  %v15851_v29 = vld [vmem:[#allocation17 + $0x584] ss:$16 sps:$4 sm:$0xff]   ;;  %v15870_v24 = vld [vmem:[#allocation17 + $0x6c0] ss:$16 sps:$4 sm:$0xff]  }
 0x73c   :  { %9280 = vmatpush2.bf16.msra.mxu0 %v15798_v28  ;;  %9323 = vmatpush2.bf16.msra.mxu1 %v15801_v38  ;;  %v15872_v28 = vld [vmem:[#allocation17 + $0x6c4] ss:$16 sps:$4 sm:$0xff]   ;;  %v15849_v38 = vld [vmem:[#allocation17 + $0x580] ss:$16 sps:$4 sm:$0xff]  }
 0x73d   :  { %9281 = vmatprep.subr.bf16.mxu0 %v15806_v3  ;;  %9324 = vmatprep.subr.bf16.mxu1 %v15809_v5  ;;  %v15854_v3 = vld [vmem:[#allocation17 + $0x564] ss:$16 sps:$4 sm:$0xff]   ;;  %v15876_v5 = vld [vmem:[#allocation17 + $0x6a0] ss:$16 sps:$4 sm:$0xff]  }
 0x740   :  { %9282 = vmatpush2.bf16.msra.mxu0 %v15804_v51  ;;  %9325 = vmatpush2.bf16.msra.mxu1 %v15807_v53  ;;  %v15878_v51 = vld [vmem:[#allocation17 + $0x6a4] ss:$16 sps:$4 sm:$0xff]   ;;  %v15852_v53 = vld [vmem:[#allocation17 + $0x560] ss:$16 sps:$4 sm:$0xff]  }
 0x741   :  { %9283 = vmatprep.subr.bf16.mxu0 %v15812_v55  ;;  %9326 = vmatprep.subr.bf16.mxu1 %v15815_v31  ;;  %v15857_v55 = vld [vmem:[#allocation17 + $0x544] ss:$16 sps:$4 sm:$0xff]   ;;  %v15882_v31 = vld [vmem:[#allocation17 + $0x680] ss:$16 sps:$4 sm:$0xff]  }
 0x744   :  { %9284 = vmatpush2.bf16.msra.mxu0 %v15810_v33  ;;  %9327 = vmatpush2.bf16.msra.mxu1 %v15813_v40  ;;  %v15884_v33 = vld [vmem:[#allocation17 + $0x684] ss:$16 sps:$4 sm:$0xff]   ;;  %v15855_v40 = vld [vmem:[#allocation17 + $0x540] ss:$16 sps:$4 sm:$0xff]  }
 0x745   :  { %10239 = vmatprep.subr.bf16.mxu0 %v15818_v45  ;;  %10280 = vmatprep.subr.bf16.mxu1 %v15866_v57  ;;  %v15860_v45 = vld [vmem:[#allocation17 + $0x524] ss:$16 sps:$4 sm:$0xff]   ;;  %v15930_v57 = vld [vmem:[#allocation17 + $0x780] ss:$16 sps:$4 sm:$0xff]  }
 0x747   :  { %9286 = vmatmul.mubr.bf16.vlgmr.msra.gmra.mxu0 %v17112_v12  ;;  %9329 = vmatmul.mubr.bf16.vlgmr.msra.gmra.mxu1 %v17116_v18  ;;  %v15831_v12 = vld [vmem:[#allocation17 + $0x440] ss:$16 sps:$4 sm:$0xff]   ;;  %v15836_v18 = vld [vmem:[#allocation17 + $0x424] ss:$16 sps:$4 sm:$0xff]  }
 0x748   :  { %10240 = vmatpush1.bf16.msra.mxu0 %v15816_v23  ;;  %10281 = vmatpush1.bf16.msra.mxu1 %v15864_v49  ;;  %v15888_v23 = vld [vmem:[#allocation17 + $0x660] ss:$16 sps:$4 sm:$0xff]  }
 0x749   :  { %10241 = vmatprep.subr.bf16.mxu0 %v15821_v6  ;;  %10282 = vmatprep.subr.bf16.mxu1 %v15872_v28  ;;  %v15890_v6 = vld [vmem:[#allocation17 + $0x664] ss:$16 sps:$4 sm:$0xff]   ;;  %v15924_v49 = vld [vmem:[#allocation17 + $0x7a0] ss:$16 sps:$4 sm:$0xff]  }
 0x74a   :  { %v15948_v28 = vld [vmem:[#allocation17 + $0x720] ss:$16 sps:$4 sm:$0xff]  }
 0x74c   :  { %10242 = vmatpush1.bf16.msra.mxu0 %v15819_v25  ;;  %10283 = vmatpush1.bf16.msra.mxu1 %v15870_v24  ;;  %v15858_v25 = vld [vmem:[#allocation17 + $0x520] ss:$16 sps:$4 sm:$0xff]   ;;  %v15950_v24 = vld [vmem:[#allocation17 + $0x724] ss:$16 sps:$4 sm:$0xff]  }
 0x74d   :  { %10243 = vmatprep.subr.bf16.mxu0 %v15824_v43  ;;  %10284 = vmatprep.subr.bf16.mxu1 %v15878_v51  ;;  %v15863_v43 = vld [vmem:[#allocation17 + $0x504] ss:$16 sps:$4 sm:$0xff]   ;;  %v17122_v51 = vld [vmem:[#allocation16 + $0x4] sm:$0xf] }
 0x750   :  { %10244 = vmatpush1.bf16.msra.mxu0 %v15822_v46  ;;  %10285 = vmatpush1.bf16.msra.mxu1 %v15876_v5  ;;  %v15894_v46 = vld [vmem:[#allocation17 + $0x640] ss:$16 sps:$4 sm:$0xff]   ;;  %v15962_v5 = vld [vmem:[#allocation17 + $0x6ec] ss:$16 sps:$4 sm:$0xff]  }
 0x751   :  { %10245 = vmatprep.subr.bf16.mxu0 %v15827_v20  ;;  %10286 = vmatprep.subr.bf16.mxu1 %v15884_v33  ;;  %v15896_v20 = vld [vmem:[#allocation17 + $0x644] ss:$16 sps:$4 sm:$0xff]  }
 0x754   :  { %10246 = vmatpush1.bf16.msra.mxu0 %v15825_v59  ;;  %10287 = vmatpush1.bf16.msra.mxu1 %v15882_v31  ;;  %v15861_v59 = vld [vmem:[#allocation17 + $0x500] ss:$16 sps:$4 sm:$0xff]  }
 0x755   :  { %10247 = vmatprep.subr.bf16.mxu0 %v15830_v39  ;;  %10288 = vmatprep.subr.bf16.mxu1 %v15890_v6  ;;  %v15869_v39 = vld [vmem:[#allocation17 + $0x4ec] ss:$16 sps:$4 sm:$0xff]  }
 0x758   :  { %10248 = vmatpush1.bf16.msra.mxu0 %v15828_v26  ;;  %10289 = vmatpush1.bf16.msra.mxu1 %v15888_v23  ;;  %v15900_v26 = vld [vmem:[#allocation17 + $0x620] ss:$16 sps:$4 sm:$0xff]  }
 0x759   :  { %10249 = vmatprep.subr.bf16.mxu0 %v15833_v48  ;;  %10290 = vmatprep.subr.bf16.mxu1 %v15896_v20  ;;  %v15902_v48 = vld [vmem:[#allocation17 + $0x624] ss:$16 sps:$4 sm:$0xff]  }
 0x75c   :  { %10250 = vmatpush1.bf16.msra.mxu0 %v15831_v12  ;;  %10291 = vmatpush1.bf16.msra.mxu1 %v15894_v46  ;;  %v15908_v12 = vld [vmem:[#allocation17 + $0x604] ss:$16 sps:$4 sm:$0xff]  }
 0x75d   :  { %10251 = vmatprep.subr.bf16.mxu0 %v15836_v18  ;;  %10292 = vmatprep.subr.bf16.mxu1 %v15902_v48  ;;  %v15906_v18 = vld [vmem:[#allocation17 + $0x600] ss:$16 sps:$4 sm:$0xff]  }
 0x760   :  { %10252 = vmatpush1.bf16.msra.mxu0 %v15834_v1  ;;  %10293 = vmatpush1.bf16.msra.mxu1 %v15900_v26  ;;  %v15914_v1 = vld [vmem:[#allocation17 + $0x7e4] ss:$16 sps:$4 sm:$0xff]  }
 0x761   :  { %10253 = vmatprep.subr.bf16.mxu0 %v15839_v14  ;;  %10294 = vmatprep.subr.bf16.mxu1 %v15908_v12  ;;  %v15912_v14 = vld [vmem:[#allocation17 + $0x7e0] ss:$16 sps:$4 sm:$0xff]  }
 0x764   :  { %10254 = vmatpush1.bf16.msra.mxu0 %v15837_v21  ;;  %10295 = vmatpush1.bf16.msra.mxu1 %v15906_v18  ;;  %v15920_v21 = vld [vmem:[#allocation17 + $0x7c4] ss:$16 sps:$4 sm:$0xff]  }
 0x765   :  { %10255 = vmatprep.subr.bf16.mxu0 %v15842_v56  ;;  %10296 = vmatprep.subr.bf16.mxu1 %v15914_v1  ;;  %v15918_v56 = vld [vmem:[#allocation17 + $0x7c0] ss:$16 sps:$4 sm:$0xff]  }
 0x768   :  { %10256 = vmatpush2.bf16.msra.mxu0 %v15840_v32  ;;  %10297 = vmatpush2.bf16.msra.mxu1 %v15912_v14  ;;  %v15926_v32 = vld [vmem:[#allocation17 + $0x7a4] ss:$16 sps:$4 sm:$0xff]  }
 0x769   :  { %10257 = vmatprep.subr.bf16.mxu0 %v15845_v9  ;;  %10298 = vmatprep.subr.bf16.mxu1 %v15920_v21  ;;  %v15932_v9 = vld [vmem:[#allocation17 + $0x784] ss:$16 sps:$4 sm:$0xff]  }
 0x76c   :  { %10258 = vmatpush2.bf16.msra.mxu0 %v15843_v34  ;;  %10299 = vmatpush2.bf16.msra.mxu1 %v15918_v56  ;;  %v15938_v34 = vld [vmem:[#allocation17 + $0x764] ss:$16 sps:$4 sm:$0xff]  }
 0x76d   :  { %10259 = vmatprep.subr.bf16.mxu0 %v15848_v50  ;;  %10300 = vmatprep.subr.bf16.mxu1 %v15926_v32  ;;  %v15936_v50 = vld [vmem:[#allocation17 + $0x760] ss:$16 sps:$4 sm:$0xff]  }
 0x770   :  { %10260 = vmatpush2.bf16.msra.mxu0 %v15846_v27  ;;  %10301 = vmatpush2.bf16.msra.mxu1 %v15924_v49  ;;  %v15944_v27 = vld [vmem:[#allocation17 + $0x744] ss:$16 sps:$4 sm:$0xff]  }
 0x771   :  { %10261 = vmatprep.subr.bf16.mxu0 %v15851_v29  ;;  %10302 = vmatprep.subr.bf16.mxu1 %v15932_v9  ;;  %v15942_v29 = vld [vmem:[#allocation17 + $0x740] ss:$16 sps:$4 sm:$0xff]  }
 0x774   :  { %10262 = vmatpush2.bf16.msra.mxu0 %v15849_v38  ;;  %10303 = vmatpush2.bf16.msra.mxu1 %v15930_v57  ;;  %v15954_v38 = vld [vmem:[#allocation17 + $0x700] ss:$16 sps:$4 sm:$0xff]  }
 0x775   :  { %10263 = vmatprep.subr.bf16.mxu0 %v15854_v3  ;;  %10304 = vmatprep.subr.bf16.mxu1 %v15938_v34  ;;  %v15956_v3 = vld [vmem:[#allocation17 + $0x704] ss:$16 sps:$4 sm:$0xff]  }
 0x778   :  { %10264 = vmatpush2.bf16.msra.mxu0 %v15852_v53  ;;  %10305 = vmatpush2.bf16.msra.mxu1 %v15936_v50  ;;  %v8510_v53 = vrot.slane %v17122_v51, %v16922_v30 }
 0x779   :  { %10265 = vmatprep.subr.bf16.mxu0 %v15857_v55  ;;  %10306 = vmatprep.subr.bf16.mxu1 %v15944_v27  ;;  %v8514_v55 = vrot.slane %v17122_v51, %v16919_v37 }
 0x77c   :  { %10266 = vmatpush2.bf16.msra.mxu0 %v15855_v40  ;;  %10307 = vmatpush2.bf16.msra.mxu1 %v15942_v29 }
 0x77d   :  { %10267 = vmatprep.subr.bf16.mxu0 %v15860_v45  ;;  %10308 = vmatprep.subr.bf16.mxu1 %v15950_v24 }
 0x780   :  { %10268 = vmatpush2.bf16.msra.mxu0 %v15858_v25  ;;  %10309 = vmatpush2.bf16.msra.mxu1 %v15948_v28 }
 0x781   :  { %10269 = vmatprep.subr.bf16.mxu0 %v15863_v43  ;;  %10310 = vmatprep.subr.bf16.mxu1 %v15956_v3 }
 0x784   :  { %10270 = vmatpush2.bf16.msra.mxu0 %v15861_v59  ;;  %10311 = vmatpush2.bf16.msra.mxu1 %v15954_v38 }
 0x785   :  { %10321 = vmatprep.subr.bf16.mxu0 %v15869_v39  ;;  %10362 = vmatprep.subr.bf16.mxu1 %v15962_v5 }
 0x7c7   :  { %v9201_v31 = vpop.f32.mrf.mxu0  ;;  %v9244_v33 = vpop.f32.mrf.mxu1 }
 0x7c8   :  { %v9202_v40 = vadd.f32 %v9201_v31, %v8510_v53 }
 0x7c9   :  { %v9203_v45 = vpop.f32.mrf.mxu0  ;;  %v9246_v23 = vpop.f32.mrf.mxu1 }
 0x7ca   :  { %v9245_v6 = vadd.f32 %v9244_v33, %v9202_v40  ;;  %v9204_v25 = vadd.f32 %v9203_v45, %v8514_v55 }
 0x7cb   :  { %v9205_v43 = vpop.f32.mrf.mxu0  ;;  %v9248_v46 = vpop.f32.mrf.mxu1 }
 0x7cc   :  { %v9339_v20 = vmax.f32 %v9245_v6, 0.0  ;;  %v9247_v59 = vadd.f32 %v9246_v23, %v9204_v25  ;;  %v9206_v39 = vadd.f32 %v9205_v43, %v8510_v53 }
 0x7cd   :  { %v9207_v26 = vpop.f32.mrf.mxu0  ;;  %v9250_v14 = vpop.f32.mrf.mxu1 }
 0x7ce   :  { %v9347_v48 = vmul.f32 %v17039_v10, %v9339_v20  ;;  %v9340_v12 = vmax.f32 %v9247_v59, 0.0  ;;  %v9249_v18 = vadd.f32 %v9248_v46, %v9206_v39  ;;  %v9208_v1 = vadd.f32 %v9207_v26, %v8514_v55 }
 0x7d0   :  { %v9355_v21 = vmul.f32 %v9347_v48, %v17013_v41  ;;  %v9348_v56 = vmul.f32 %v17039_v10, %v9340_v12  ;;  %v9343_v32 = vmax.f32 %v9249_v18, 0.0  ;;  %v9251_v49 = vadd.f32 %v9250_v14, %v9208_v1 }
 0x7d2   :  { %v9363_v9 = vrot.slane %v9355_v21, 4  ;;  %v9356_v57 = vmul.f32 %v9348_v56, %v17017_v42  ;;  %v9351_v34 = vmul.f32 %v17042_v17, %v9343_v32  ;;  %v9344_v50 = vmax.f32 %v9251_v49, 0.0 }
 0x7d4   :  { %v9364_v27 = vadd.f32 %v9363_v9, %v9355_v21  ;;  %v9369_v29 = vrot.slane %v9356_v57, 4  ;;  %v9359_v24 = vmul.f32 %v9351_v34, %v17021_v58  ;;  %v9352_v28 = vmul.f32 %v17042_v17, %v9344_v50  ;;  %v15867_v34 = vld [vmem:[#allocation17 + $0x4e8] ss:$16 sps:$4 sm:$0xff]  }
 0x7d6   :  { %v9365_v38 = vrot.slane %v9364_v27, 2  ;;  %v9370_v3 = vadd.f32 %v9369_v29, %v9356_v57  ;;  %v9387_v5 = vrot.slane %v9359_v24, 4  ;;  %v9360_v41 = vmul.f32 %v9352_v28, %v17025_v22  ;;  %v15873_v29 = vld [vmem:[#allocation17 + $0x4c8] ss:$16 sps:$4 sm:$0xff]  }
 0x7d7   :  { %v15879_v28 = vld [vmem:[#allocation17 + $0x4a8] ss:$16 sps:$4 sm:$0xff]  }
 0x7d8   :  { %v9366_v53 = vadd.f32 %v9365_v38, %v9364_v27  ;;  %v9371_v55 = vrot.slane %v9370_v3, 2  ;;  %v9388_v31 = vadd.f32 %v9387_v5, %v9359_v24  ;;  %v9393_v33 = vrot.slane %v9360_v41, 4  ;;  %v15875_v27 = vld [vmem:[#allocation17 + $0x4cc] ss:$16 sps:$4 sm:$0xff]  }
 0x7d9   :  { %v15881_v24 = vld [vmem:[#allocation17 + $0x4ac] ss:$16 sps:$4 sm:$0xff]  }
 0x7da   :  { %v9367_v40 = vrot.slane %v9366_v53, 1  ;;  %v9372_v42 = vadd.f32 %v9371_v55, %v9370_v3  ;;  %v9389_v45 = vrot.slane %v9388_v31, 2  ;;  %v9394_v23 = vadd.f32 %v9393_v33, %v9360_v41  ;;  %v15887_v38 = vld [vmem:[#allocation17 + $0x48c] ss:$16 sps:$4 sm:$0xff]   ;;  %v15885_v3 = vld [vmem:[#allocation17 + $0x488] ss:$16 sps:$4 sm:$0xff]  }
 0x7db   :  { %v15893_v5 = vld [vmem:[#allocation17 + $0x46c] ss:$16 sps:$4 sm:$0xff]   ;;  %v15891_v41 = vld [vmem:[#allocation17 + $0x468] ss:$16 sps:$4 sm:$0xff]  }
 0x7dc   :  { %v9373_v6 = vrot.slane %v9372_v42, 1  ;;  %v9390_v25 = vadd.f32 %v9389_v45, %v9388_v31  ;;  %v9395_v43 = vrot.slane %v9394_v23, 2  ;;  %v9368_v46 = vadd.f32 %v9367_v40, %v9366_v53  ;;  %v15899_v53 = vld [vmem:[#allocation17 + $0x44c] ss:$16 sps:$4 sm:$0xff]   ;;  %v15897_v55 = vld [vmem:[#allocation17 + $0x448] ss:$16 sps:$4 sm:$0xff]  }
 0x7dd   :  { %v15905_v31 = vld [vmem:[#allocation17 + $0x42c] ss:$16 sps:$4 sm:$0xff]   ;;  %v15903_v33 = vld [vmem:[#allocation17 + $0x428] ss:$16 sps:$4 sm:$0xff]  }
 0x7de   :  { %v9391_v58 = vrot.slane %v9390_v25, 1  ;;  %v9396_v20 = vadd.f32 %v9395_v43, %v9394_v23  ;;  %v9374_v59 = vadd.f32 %v9373_v6, %v9372_v42  ;;  %v9411_v48 = vpack.c.bf16 %v9368_v46, %v9368_v46  ;;  %v15911_v40 = vld [vmem:[#allocation17 + $0x40c] ss:$16 sps:$4 sm:$0xff]   ;;  %v15909_v45 = vld [vmem:[#allocation17 + $0x408] ss:$16 sps:$4 sm:$0xff]  }
 0x7df   :  { %v8518_v42 = vrot.slane %v17122_v51, %v16946_v60  ;;  %v8522_v23 = vrot.slane %v17122_v51, %v16949_v2  ;;  %v15917_v6 = vld [vmem:[#allocation17 + $0x5ec] ss:$16 sps:$4 sm:$0xff]   ;;  %v15921_v51 = vld [vmem:[#allocation17 + $0x5c8] ss:$16 sps:$4 sm:$0xff]  }
 0x7e0   :  { %v9392_v39 = vadd.f32 %v9391_v58, %v9390_v25  ;;  %v9397_v26 = vrot.slane %v9396_v20, 1  ;;  %v9412_v18 = vpack.c.bf16 %v9374_v59, %v9374_v59  ;;  %v9579_v21 = vunpack.c.l.b16 %v9411_v48  ;;  %v15915_v59 = vld [vmem:[#allocation17 + $0x5e8] ss:$16 sps:$4 sm:$0xff]   ;;  %v15923_v48 = vld [vmem:[#allocation17 + $0x5cc] ss:$16 sps:$4 sm:$0xff]  }
 0x7e2   :  { %v9415_v12 = vpack.c.bf16 %v9392_v39, %v9392_v39  ;;  %v9398_v22 = vadd.f32 %v9397_v26, %v9396_v20  ;;  %v9580_v56 = vunpack.c.l.b16 %v9412_v18 }
 0x7e4   :  { %v9583_v1 = vunpack.c.l.b16 %v9415_v12  ;;  %v9416_v14 = vpack.c.bf16 %v9398_v22, %v9398_v22 }
 0x7e6   :  { %v9584_v32 = vunpack.c.l.b16 %v9416_v14  ;;  %v9587_v49 = vsel %vm7470_vm1, %v9583_v1, %v9579_v21 }
 0x7e7   :  { %v17138_v50 = vpack.c.b16 %v9587_v49, %v9587_v49 }
 0x7e8   :  { %v9588_v9 = vsel %vm7470_vm1, %v9584_v32, %v9580_v56 }
 0x7e9   :  { %v9592_v57 = vpack.c.b16 %v9588_v9, %v9588_v9 }
 0x7eb   :  { %10271 = vmatprep.mubr.bf16.mxu0 %v9592_v57 }
 0x7ec   :  { %10272 = vmatmul.mubr.bf16.vlgmr.msra.gmra.mxu0 %v17138_v50 }
 0x7ed   :  { %10322 = vmatpush1.bf16.msra.mxu0 %v15867_v34  ;;  %10353 = vmatprep.mubr.bf16.mxu0 %v9592_v57  ;;  %v15929_v57 = vld [vmem:[#allocation17 + $0x5ac] ss:$16 sps:$4 sm:$0xff]  }
 0x7ee   :  { %10323 = vmatprep.subr.bf16.mxu0 %v15875_v27 }
 0x7f1   :  { %10324 = vmatpush1.bf16.msra.mxu0 %v15873_v29 }
 0x7f2   :  { %10325 = vmatprep.subr.bf16.mxu0 %v15881_v24 }
 0x7f5   :  { %10326 = vmatpush1.bf16.msra.mxu0 %v15879_v28 }
 0x7f6   :  { %10327 = vmatprep.subr.bf16.mxu0 %v15887_v38  ;;  %v15927_v38 = vld [vmem:[#allocation17 + $0x5a8] ss:$16 sps:$4 sm:$0xff]  }
 0x7f9   :  { %10328 = vmatpush1.bf16.msra.mxu0 %v15885_v3 }
 0x7fa   :  { %10329 = vmatprep.subr.bf16.mxu0 %v15893_v5 }
 0x7fd   :  { %10330 = vmatpush1.bf16.msra.mxu0 %v15891_v41 }
 0x7fe   :  { %10331 = vmatprep.subr.bf16.mxu0 %v15899_v53 }
 0x801   :  { %10332 = vmatpush1.bf16.msra.mxu0 %v15897_v55  ;;  %v15935_v55 = vld [vmem:[#allocation17 + $0x58c] ss:$16 sps:$4 sm:$0xff]  }
 0x802   :  { %10333 = vmatprep.subr.bf16.mxu0 %v15905_v31 }
 0x805   :  { %10334 = vmatpush1.bf16.msra.mxu0 %v15903_v33 }
 0x806   :  { %10335 = vmatprep.subr.bf16.mxu0 %v15911_v40 }
 0x807   :  { %v9287_v25 = vpop.f32.mrf.mxu0  ;;  %v9330_v43 = vpop.f32.mrf.mxu1 }
 0x808   :  { %v9288_v46 = vadd.f32 %v9287_v25, %v8518_v42 }
 0x809   :  { %v9289_v58 = vpop.f32.mrf.mxu0  ;;  %v9332_v20 = vpop.f32.mrf.mxu1  ;;  %10336 = vmatpush1.bf16.msra.mxu0 %v15909_v45 }
 0x80a   :  { %v9331_v39 = vadd.f32 %v9330_v43, %v9288_v46  ;;  %v9290_v26 = vadd.f32 %v9289_v58, %v8522_v23  ;;  %10337 = vmatprep.subr.bf16.mxu0 %v15917_v6 }
 0x80b   :  { %v9291_v12 = vpop.f32.mrf.mxu0  ;;  %v9334_v22 = vpop.f32.mrf.mxu1 }
 0x80c   :  { %v9341_v18 = vmax.f32 %v9331_v39, 0.0  ;;  %v9333_v1 = vadd.f32 %v9332_v20, %v9290_v26  ;;  %v9292_v14 = vadd.f32 %v9291_v12, %v8518_v42  ;;  %v15939_v20 = vld [vmem:[#allocation17 + $0x568] ss:$16 sps:$4 sm:$0xff]  }
 0x80d   :  { %v9293_v21 = vpop.f32.mrf.mxu0  ;;  %10338 = vmatpush2.bf16.msra.mxu0 %v15915_v59  ;;  %v9336_v34 = vpop.f32.mrf.mxu1 }
 0x80e   :  { %v9349_v56 = vmul.f32 %v17039_v10, %v9341_v18  ;;  %v9342_v32 = vmax.f32 %v9333_v1, 0.0  ;;  %v9335_v49 = vadd.f32 %v9334_v22, %v9292_v14  ;;  %v9294_v9 = vadd.f32 %v9293_v21, %v8522_v23  ;;  %10339 = vmatprep.subr.bf16.mxu0 %v15923_v48  ;;  %v15953_v21 = vld [vmem:[#allocation17 + $0x52c] ss:$16 sps:$4 sm:$0xff]  }
 0x810   :  { %v9357_v27 = vmul.f32 %v9349_v56, %v17023_v0  ;;  %v9350_v29 = vmul.f32 %v17039_v10, %v9342_v32  ;;  %v9345_v24 = vmax.f32 %v9335_v49, 0.0  ;;  %v9337_v28 = vadd.f32 %v9336_v34, %v9294_v9  ;;  %v15933_v10 = vld [vmem:[#allocation17 + $0x588] ss:$16 sps:$4 sm:$0xff]   ;;  %v15959_v34 = vld [vmem:[#allocation17 + $0x50c] ss:$16 sps:$4 sm:$0xff]  }
 0x811   :  { %10340 = vmatpush2.bf16.msra.mxu0 %v15921_v51  ;;  %v15951_v9 = vld [vmem:[#allocation17 + $0x528] ss:$16 sps:$4 sm:$0xff]  }
 0x812   :  { %v9375_v3 = vrot.slane %v9357_v27, 4  ;;  %v9358_v5 = vmul.f32 %v9350_v29, %v17027_v62  ;;  %v9353_v41 = vmul.f32 %v17042_v17, %v9345_v24  ;;  %v9346_v53 = vmax.f32 %v9337_v28, 0.0  ;;  %10341 = vmatprep.subr.bf16.mxu0 %v15929_v57  ;;  %v15941_v62 = vld [vmem:[#allocation17 + $0x56c] ss:$16 sps:$4 sm:$0xff]  }
 0x814   :  { %v9376_v31 = vadd.f32 %v9375_v3, %v9357_v27  ;;  %v9381_v33 = vrot.slane %v9358_v5, 4  ;;  %v9361_v40 = vmul.f32 %v9353_v41, %v17033_v19  ;;  %v9354_v0 = vmul.f32 %v17042_v17, %v9346_v53  ;;  %v15947_v17 = vld [vmem:[#allocation17 + $0x54c] ss:$16 sps:$4 sm:$0xff]   ;;  %v15957_v3 = vld [vmem:[#allocation17 + $0x508] ss:$16 sps:$4 sm:$0xff]  }
 0x815   :  { %10342 = vmatpush2.bf16.msra.mxu0 %v15927_v38 }
 0x816   :  { %v9377_v42 = vrot.slane %v9376_v31, 2  ;;  %v9382_v45 = vadd.f32 %v9381_v33, %v9358_v5  ;;  %v9399_v23 = vrot.slane %v9361_v40, 4  ;;  %v9362_v6 = vmul.f32 %v9354_v0, %v17037_v15  ;;  %10343 = vmatprep.subr.bf16.mxu0 %v15935_v55  ;;  %v15945_v15 = vld [vmem:[#allocation17 + $0x548] ss:$16 sps:$4 sm:$0xff]   ;;  %v15965_v0 = vld [vmem:[#allocation17 + $0x6cc] ss:$16 sps:$4 sm:$0xff]  }
 0x817   :  { %v15960_v33 = vld [vmem:[#allocation17 + $0x6e8] ss:$16 sps:$4 sm:$0xff]  }
 0x818   :  { %v9378_v25 = vadd.f32 %v9377_v42, %v9376_v31  ;;  %v9383_v43 = vrot.slane %v9382_v45, 2  ;;  %v9400_v46 = vadd.f32 %v9399_v23, %v9361_v40  ;;  %v9405_v58 = vrot.slane %v9362_v6, 4  ;;  %v15968_v42 = vld [vmem:[#allocation17 + $0x6ac] ss:$16 sps:$4 sm:$0xff]  }
 0x819   :  { %10344 = vmatpush2.bf16.msra.mxu0 %v15933_v10  ;;  %v15963_v10 = vld [vmem:[#allocation17 + $0x6c8] ss:$16 sps:$4 sm:$0xff]   ;;  %v15971_v23 = vld [vmem:[#allocation17 + $0x68c] ss:$16 sps:$4 sm:$0xff]  }
 0x81a   :  { %v9379_v59 = vrot.slane %v9378_v25, 1  ;;  %v9384_v39 = vadd.f32 %v9383_v43, %v9382_v45  ;;  %v9401_v19 = vrot.slane %v9400_v46, 2  ;;  %v9406_v26 = vadd.f32 %v9405_v58, %v9362_v6  ;;  %10345 = vmatprep.subr.bf16.mxu0 %v15941_v62  ;;  %v15966_v45 = vld [vmem:[#allocation17 + $0x6a8] ss:$16 sps:$4 sm:$0xff]   ;;  %v15974_v62 = vld [vmem:[#allocation17 + $0x66c] ss:$16 sps:$4 sm:$0xff]  }
 0x81b   :  { %v15969_v6 = vld [vmem:[#allocation17 + $0x688] ss:$16 sps:$4 sm:$0xff]   ;;  %v15977_v43 = vld [vmem:[#allocation17 + $0x64c] ss:$16 sps:$4 sm:$0xff]  }
 0x81c   :  { %v9385_v48 = vrot.slane %v9384_v39, 1  ;;  %v9402_v12 = vadd.f32 %v9401_v19, %v9400_v46  ;;  %v9407_v22 = vrot.slane %v9406_v26, 2  ;;  %v9380_v18 = vadd.f32 %v9379_v59, %v9378_v25  ;;  %v15972_v25 = vld [vmem:[#allocation17 + $0x668] ss:$16 sps:$4 sm:$0xff]  }
 0x81d   :  { %10346 = vmatpush2.bf16.msra.mxu0 %v15939_v20  ;;  %v15975_v46 = vld [vmem:[#allocation17 + $0x648] ss:$16 sps:$4 sm:$0xff]   ;;  %v15983_v20 = vld [vmem:[#allocation17 + $0x60c] ss:$16 sps:$4 sm:$0xff]  }
 0x81e   :  { %v9403_v1 = vrot.slane %v9402_v12, 1  ;;  %v9408_v14 = vadd.f32 %v9407_v22, %v9406_v26  ;;  %10347 = vmatprep.subr.bf16.mxu0 %v15947_v17  ;;  %v9386_v51 = vadd.f32 %v9385_v48, %v9384_v39  ;;  %v9413_v49 = vpack.c.bf16 %v9380_v18, %v9380_v18  ;;  %v15978_v58 = vld [vmem:[#allocation17 + $0x628] ss:$16 sps:$4 sm:$0xff]   ;;  %v15986_v39 = vld [vmem:[#allocation17 + $0x7ec] ss:$16 sps:$4 sm:$0xff]  }
 0x81f   :  { %v15981_v59 = vld [vmem:[#allocation17 + $0x608] ss:$16 sps:$4 sm:$0xff]   ;;  %v15989_v26 = vld [vmem:[#allocation17 + $0x7cc] ss:$16 sps:$4 sm:$0xff]  }
 0x820   :  { %v9404_v56 = vadd.f32 %v9403_v1, %v9402_v12  ;;  %v9409_v32 = vrot.slane %v9408_v14, 1  ;;  %v9414_v29 = vpack.c.bf16 %v9386_v51, %v9386_v51  ;;  %v9581_v38 = vunpack.c.l.b16 %v9413_v49  ;;  %v15984_v19 = vld [vmem:[#allocation17 + $0x7e8] ss:$16 sps:$4 sm:$0xff]   ;;  %v15992_v48 = vld [vmem:[#allocation17 + $0x7ac] ss:$16 sps:$4 sm:$0xff]  }
 0x821   :  { %10348 = vmatpush2.bf16.msra.mxu0 %v15945_v15  ;;  %v15987_v17 = vld [vmem:[#allocation17 + $0x7c8] ss:$16 sps:$4 sm:$0xff]   ;;  %v15995_v22 = vld [vmem:[#allocation17 + $0x78c] ss:$16 sps:$4 sm:$0xff]  }
 0x822   :  { %v9417_v57 = vpack.c.bf16 %v9404_v56, %v9404_v56  ;;  %10349 = vmatprep.subr.bf16.mxu0 %v15953_v21  ;;  %v9410_v27 = vadd.f32 %v9409_v32, %v9408_v14  ;;  %v9582_v5 = vunpack.c.l.b16 %v9414_v29  ;;  %v15990_v12 = vld [vmem:[#allocation17 + $0x7a8] ss:$16 sps:$4 sm:$0xff]   ;;  %v15998_v15 = vld [vmem:[#allocation17 + $0x76c] ss:$16 sps:$4 sm:$0xff]  }
 0x823   :  { %v15993_v18 = vld [vmem:[#allocation17 + $0x788] ss:$16 sps:$4 sm:$0xff]   ;;  %v16001_v14 = vld [vmem:[#allocation17 + $0x74c] ss:$16 sps:$4 sm:$0xff]  }
 0x824   :  { %v9585_v24 = vunpack.c.l.b16 %v9417_v57  ;;  %v9418_v28 = vpack.c.bf16 %v9410_v27, %v9410_v27  ;;  %v15996_v1 = vld [vmem:[#allocation17 + $0x768] ss:$16 sps:$4 sm:$0xff]   ;;  %v16004_v51 = vld [vmem:[#allocation17 + $0x72c] ss:$16 sps:$4 sm:$0xff]  }
 0x825   :  { %10350 = vmatpush2.bf16.msra.mxu0 %v15951_v9  ;;  %v15999_v21 = vld [vmem:[#allocation17 + $0x748] ss:$16 sps:$4 sm:$0xff]   ;;  %v16007_v32 = vld [vmem:[#allocation17 + $0x70c] ss:$16 sps:$4 sm:$0xff]  }
 0x826   :  { %10351 = vmatprep.subr.bf16.mxu0 %v15959_v34  ;;  %v9586_v41 = vunpack.c.l.b16 %v9418_v28  ;;  %v9589_v53 = vsel %vm7470_vm1, %v9585_v24, %v9581_v38  ;;  %v16002_v56 = vld [vmem:[#allocation17 + $0x728] ss:$16 sps:$4 sm:$0xff]   ;;  %v16010_v57 = vld [vmem:[#allocation20 + $0xe4] ss:$16 sps:$4 sm:$0xff]  }
 0x827   :  { %v17155_v40 = vpack.c.b16 %v9589_v53, %v9589_v53  ;;  %v16005_v49 = vld [vmem:[#allocation17 + $0x708] ss:$16 sps:$4 sm:$0xff]   ;;  %v16013_v27 = vld [vmem:[#allocation20 + $0x2e4] ss:$16 sps:$4 sm:$0xff]  }
 0x828   :  { %v9590_v55 = vsel %vm7470_vm1, %v9586_v41, %v9582_v5  ;;  %v16008_v9 = vld [vmem:[#allocation20 + $0xe0] ss:$16 sps:$4 sm:$0xff]   ;;  %v16016_v29 = vld [vmem:[#allocation20 + $0xc4] ss:$16 sps:$4 sm:$0xff]  }
 0x829   :  { %10352 = vmatpush2.bf16.msra.mxu0 %v15957_v3  ;;  %v9594_v31 = vpack.c.b16 %v9590_v55, %v9590_v55  ;;  %v16011_v34 = vld [vmem:[#allocation20 + $0x2e0] ss:$16 sps:$4 sm:$0xff]   ;;  %v16019_v24 = vld [vmem:[#allocation20 + $0x2c4] ss:$16 sps:$4 sm:$0xff]  }
 0x82a   :  { %11361 = vmatprep.subr.bf16.mxu0 %v16010_v57  ;;  %v16014_v28 = vld [vmem:[#allocation20 + $0xc0] ss:$16 sps:$4 sm:$0xff]   ;;  %v16022_v3 = vld [vmem:[#allocation20 + $0xa4] ss:$16 sps:$4 sm:$0xff]  }
 0x82b   :  { %10312 = vmatprep.mubr.bf16.mxu1 %v9594_v31  ;;  %v16017_v38 = vld [vmem:[#allocation20 + $0x2c0] ss:$16 sps:$4 sm:$0xff]   ;;  %v16025_v5 = vld [vmem:[#allocation20 + $0x2a4] ss:$16 sps:$4 sm:$0xff]  }
 0x82c   :  { %10313 = vmatmul.mubr.bf16.vlgmr.msra.gmra.mxu1 %v17155_v40  ;;  %10354 = vmatmul.mubr.bf16.vlgmr.msra.gmra.mxu0 %v17138_v50  ;;  %v15980_v50 = vld [vmem:[#allocation17 + $0x62c] ss:$16 sps:$4 sm:$0xff]   ;;  %v16020_v41 = vld [vmem:[#allocation20 + $0xa0] ss:$16 sps:$4 sm:$0xff]  }
 0x82d   :  { %10363 = vmatpush1.bf16.msra.mxu1 %v15960_v33  ;;  %10394 = vmatprep.mubr.bf16.mxu1 %v9594_v31  ;;  %v16023_v53 = vld [vmem:[#allocation20 + $0x2a0] ss:$16 sps:$4 sm:$0xff]   ;;  %v16028_v55 = vld [vmem:[#allocation20 + $0x84] ss:$16 sps:$4 sm:$0xff]  }
 0x82e   :  { %10364 = vmatprep.subr.bf16.mxu1 %v15965_v0  ;;  %11362 = vmatpush1.bf16.msra.mxu0 %v16008_v9  ;;  %v16031_v31 = vld [vmem:[#allocation20 + $0x284] ss:$16 sps:$4 sm:$0xff]   ;;  %v16026_v33 = vld [vmem:[#allocation20 + $0x80] ss:$16 sps:$4 sm:$0xff]  }
 0x82f   :  { %11363 = vmatprep.subr.bf16.mxu0 %v16016_v29  ;;  %v16034_v0 = vld [vmem:[#allocation20 + $0x64] ss:$16 sps:$4 sm:$0xff]   ;;  %v16068_v9 = vld [vmem:[#allocation20 + $0x1a0] ss:$16 sps:$4 sm:$0xff]  }
 0x830   :  { %v16071_v57 = vld [vmem:[#allocation20 + $0x3a0] ss:$16 sps:$4 sm:$0xff]  }
 0x831   :  { %10365 = vmatpush1.bf16.msra.mxu1 %v15963_v10  ;;  %v16037_v10 = vld [vmem:[#allocation20 + $0x264] ss:$16 sps:$4 sm:$0xff]   ;;  %v16074_v29 = vld [vmem:[#allocation20 + $0x180] ss:$16 sps:$4 sm:$0xff]  }
 0x832   :  { %10366 = vmatprep.subr.bf16.mxu1 %v15968_v42  ;;  %11364 = vmatpush1.bf16.msra.mxu0 %v16014_v28  ;;  %v16032_v42 = vld [vmem:[#allocation20 + $0x60] ss:$16 sps:$4 sm:$0xff]   ;;  %v16082_v28 = vld [vmem:[#allocation20 + $0x164] ss:$16 sps:$4 sm:$0xff]  }
 0x833   :  { %11365 = vmatprep.subr.bf16.mxu0 %v16022_v3  ;;  %v16080_v3 = vld [vmem:[#allocation20 + $0x160] ss:$16 sps:$4 sm:$0xff]  }
 0x835   :  { %10367 = vmatpush1.bf16.msra.mxu1 %v15966_v45  ;;  %v16035_v45 = vld [vmem:[#allocation20 + $0x260] ss:$16 sps:$4 sm:$0xff]  }
 0x836   :  { %10368 = vmatprep.subr.bf16.mxu1 %v15971_v23  ;;  %11366 = vmatpush1.bf16.msra.mxu0 %v16020_v41  ;;  %v16040_v23 = vld [vmem:[#allocation20 + $0x44] ss:$16 sps:$4 sm:$0xff]  }
 0x837   :  { %11367 = vmatprep.subr.bf16.mxu0 %v16028_v55  ;;  %v16088_v41 = vld [vmem:[#allocation20 + $0x144] ss:$16 sps:$4 sm:$0xff]   ;;  %v16086_v55 = vld [vmem:[#allocation20 + $0x140] ss:$16 sps:$4 sm:$0xff]  }
 0x839   :  { %10369 = vmatpush1.bf16.msra.mxu1 %v15969_v6  ;;  %v16043_v6 = vld [vmem:[#allocation20 + $0x244] ss:$16 sps:$4 sm:$0xff]  }
 0x83a   :  { %10370 = vmatprep.subr.bf16.mxu1 %v15974_v62  ;;  %11368 = vmatpush1.bf16.msra.mxu0 %v16026_v33  ;;  %v16038_v62 = vld [vmem:[#allocation20 + $0x40] ss:$16 sps:$4 sm:$0xff]   ;;  %v16094_v33 = vld [vmem:[#allocation20 + $0x124] ss:$16 sps:$4 sm:$0xff]  }
 0x83b   :  { %11369 = vmatprep.subr.bf16.mxu0 %v16034_v0  ;;  %v16092_v0 = vld [vmem:[#allocation20 + $0x120] ss:$16 sps:$4 sm:$0xff]  }
 0x83d   :  { %10371 = vmatpush1.bf16.msra.mxu1 %v15972_v25  ;;  %v16041_v25 = vld [vmem:[#allocation20 + $0x240] ss:$16 sps:$4 sm:$0xff]  }
 0x83e   :  { %10372 = vmatprep.subr.bf16.mxu1 %v15977_v43  ;;  %11370 = vmatpush1.bf16.msra.mxu0 %v16032_v42  ;;  %v16046_v43 = vld [vmem:[#allocation20 + $0x24] ss:$16 sps:$4 sm:$0xff]  }
 0x83f   :  { %11371 = vmatprep.subr.bf16.mxu0 %v16040_v23  ;;  %v16100_v42 = vld [vmem:[#allocation20 + $0x104] ss:$16 sps:$4 sm:$0xff]   ;;  %v16098_v23 = vld [vmem:[#allocation20 + $0x100] ss:$16 sps:$4 sm:$0xff]  }
 0x841   :  { %10373 = vmatpush1.bf16.msra.mxu1 %v15975_v46  ;;  %v16049_v46 = vld [vmem:[#allocation20 + $0x224] ss:$16 sps:$4 sm:$0xff]  }
 0x842   :  { %10374 = vmatprep.subr.bf16.mxu1 %v15980_v50  ;;  %11372 = vmatpush1.bf16.msra.mxu0 %v16038_v62  ;;  %v16044_v50 = vld [vmem:[#allocation20 + $0x20] ss:$16 sps:$4 sm:$0xff]   ;;  %v16106_v62 = vld [vmem:[#allocation20 + $0xec] ss:$16 sps:$4 sm:$0xff]  }
 0x843   :  { %11373 = vmatprep.subr.bf16.mxu0 %v16046_v43  ;;  %v9549_v43 = vld [vmem:[#allocation19 + $0x4] sm:$0xf] }
 0x845   :  { %10375 = vmatpush1.bf16.msra.mxu1 %v15978_v58  ;;  %v16047_v58 = vld [vmem:[#allocation20 + $0x220] ss:$16 sps:$4 sm:$0xff]  }
 0x846   :  { %10376 = vmatprep.subr.bf16.mxu1 %v15983_v20  ;;  %11374 = vmatpush1.bf16.msra.mxu0 %v16044_v50  ;;  %v16052_v20 = vld [vmem:[#allocation20 + $0x4] ss:$16 sps:$4 sm:$0xff]   ;;  %v9558_v50 = vrot.slane %v9549_v43, %v16919_v37 }
 0x847   :  { %11375 = vmatprep.subr.bf16.mxu0 %v16052_v20 }
 0x849   :  { %10377 = vmatpush1.bf16.msra.mxu1 %v15981_v59  ;;  %v16055_v59 = vld [vmem:[#allocation20 + $0x204] ss:$16 sps:$4 sm:$0xff]  }
 0x84a   :  { %10378 = vmatprep.subr.bf16.mxu1 %v15986_v39  ;;  %v16050_v39 = vld [vmem:[#allocation20] ss:$16 sps:$4 sm:$0xff]  }
 0x84b   :  { %11376 = vmatpush1.bf16.msra.mxu0 %v16050_v39 }
 0x84d   :  { %10379 = vmatpush2.bf16.msra.mxu1 %v15984_v19  ;;  %v16053_v19 = vld [vmem:[#allocation20 + $0x200] ss:$16 sps:$4 sm:$0xff]  }
 0x84e   :  { %10380 = vmatprep.subr.bf16.mxu1 %v15989_v26 }
 0x851   :  { %10381 = vmatpush2.bf16.msra.mxu1 %v15987_v17 }
 0x852   :  { %10382 = vmatprep.subr.bf16.mxu1 %v15992_v48  ;;  %v16058_v48 = vld [vmem:[#allocation20 + $0x1e4] ss:$16 sps:$4 sm:$0xff]  }
 0x853   :  { %11377 = vmatprep.subr.bf16.mxu0 %v16058_v48 }
 0x855   :  { %10383 = vmatpush2.bf16.msra.mxu1 %v15990_v12  ;;  %v16061_v12 = vld [vmem:[#allocation20 + $0x3e4] ss:$16 sps:$4 sm:$0xff]  }
 0x856   :  { %10384 = vmatprep.subr.bf16.mxu1 %v15995_v22 }
 0x859   :  { %10385 = vmatpush2.bf16.msra.mxu1 %v15993_v18  ;;  %v16056_v18 = vld [vmem:[#allocation20 + $0x1e0] ss:$16 sps:$4 sm:$0xff]  }
 0x85a   :  { %10386 = vmatprep.subr.bf16.mxu1 %v15998_v15  ;;  %v16059_v15 = vld [vmem:[#allocation20 + $0x3e0] ss:$16 sps:$4 sm:$0xff]   ;;  %11378 = vmatpush2.bf16.msra.mxu0 %v16056_v18 }
 0x85d   :  { %10387 = vmatpush2.bf16.msra.mxu1 %v15996_v1 }
 0x85e   :  { %10388 = vmatprep.subr.bf16.mxu1 %v16001_v14  ;;  %v16064_v14 = vld [vmem:[#allocation20 + $0x1c4] ss:$16 sps:$4 sm:$0xff]  }
 0x85f   :  { %11379 = vmatprep.subr.bf16.mxu0 %v16064_v14 }
 0x861   :  { %10389 = vmatpush2.bf16.msra.mxu1 %v15999_v21  ;;  %v16067_v21 = vld [vmem:[#allocation20 + $0x3c4] ss:$16 sps:$4 sm:$0xff]  }
 0x862   :  { %10390 = vmatprep.subr.bf16.mxu1 %v16004_v51  ;;  %v16062_v51 = vld [vmem:[#allocation20 + $0x1c0] ss:$16 sps:$4 sm:$0xff]  }
 0x863   :  { %11380 = vmatpush2.bf16.msra.mxu0 %v16062_v51  ;;  %v9562_v51 = vrot.slane %v9549_v43, %v16946_v60 }
 0x865   :  { %10391 = vmatpush2.bf16.msra.mxu1 %v16002_v56  ;;  %v16065_v56 = vld [vmem:[#allocation20 + $0x3c0] ss:$16 sps:$4 sm:$0xff]  }
 0x866   :  { %10392 = vmatprep.subr.bf16.mxu1 %v16007_v32  ;;  %v16070_v32 = vld [vmem:[#allocation20 + $0x1a4] ss:$16 sps:$4 sm:$0xff]  }
 0x867   :  { %11381 = vmatprep.subr.bf16.mxu0 %v16070_v32 }
 0x868   :  { %11382 = vmatpush2.bf16.msra.mxu0 %v16068_v9 }
 0x869   :  { %10393 = vmatpush2.bf16.msra.mxu1 %v16005_v49  ;;  %v16073_v49 = vld [vmem:[#allocation20 + $0x3a4] ss:$16 sps:$4 sm:$0xff]  }
 0x86a   :  { %11402 = vmatprep.subr.bf16.mxu1 %v16013_v27  ;;  %v16079_v27 = vld [vmem:[#allocation20 + $0x384] ss:$16 sps:$4 sm:$0xff]  }
 0x86c   :  { %10395 = vmatmul.mubr.bf16.vlgmr.msra.gmra.mxu1 %v17155_v40  ;;  %v16029_v40 = vld [vmem:[#allocation20 + $0x280] ss:$16 sps:$4 sm:$0xff]  }
 0x86d   :  { %11403 = vmatpush1.bf16.msra.mxu1 %v16011_v34  ;;  %v16076_v34 = vld [vmem:[#allocation20 + $0x184] ss:$16 sps:$4 sm:$0xff]  }
 0x86e   :  { %11404 = vmatprep.subr.bf16.mxu1 %v16019_v24  ;;  %v16077_v24 = vld [vmem:[#allocation20 + $0x380] ss:$16 sps:$4 sm:$0xff]   ;;  %11383 = vmatprep.subr.bf16.mxu0 %v16076_v34 }
 0x86f   :  { %11384 = vmatpush2.bf16.msra.mxu0 %v16074_v29 }
 0x870   :  { %11385 = vmatprep.subr.bf16.mxu0 %v16082_v28 }
 0x871   :  { %11405 = vmatpush1.bf16.msra.mxu1 %v16017_v38  ;;  %v16085_v38 = vld [vmem:[#allocation20 + $0x364] ss:$16 sps:$4 sm:$0xff]  }
 0x872   :  { %11406 = vmatprep.subr.bf16.mxu1 %v16025_v5  ;;  %v16083_v5 = vld [vmem:[#allocation20 + $0x360] ss:$16 sps:$4 sm:$0xff]  }
 0x873   :  { %11386 = vmatpush2.bf16.msra.mxu0 %v16080_v3 }
 0x874   :  { %11387 = vmatprep.subr.bf16.mxu0 %v16088_v41 }
 0x875   :  { %11407 = vmatpush1.bf16.msra.mxu1 %v16023_v53  ;;  %v16091_v53 = vld [vmem:[#allocation20 + $0x344] ss:$16 sps:$4 sm:$0xff]  }
 0x876   :  { %11408 = vmatprep.subr.bf16.mxu1 %v16031_v31  ;;  %v16089_v31 = vld [vmem:[#allocation20 + $0x340] ss:$16 sps:$4 sm:$0xff]  }
 0x877   :  { %11388 = vmatpush2.bf16.msra.mxu0 %v16086_v55 }
 0x878   :  { %11389 = vmatprep.subr.bf16.mxu0 %v16094_v33 }
 0x879   :  { %11409 = vmatpush1.bf16.msra.mxu1 %v16029_v40  ;;  %v16097_v40 = vld [vmem:[#allocation20 + $0x324] ss:$16 sps:$4 sm:$0xff]  }
 0x87a   :  { %11410 = vmatprep.subr.bf16.mxu1 %v16037_v10  ;;  %v16095_v10 = vld [vmem:[#allocation20 + $0x320] ss:$16 sps:$4 sm:$0xff]  }
 0x87b   :  { %11390 = vmatpush2.bf16.msra.mxu0 %v16092_v0 }
 0x87c   :  { %11391 = vmatprep.subr.bf16.mxu0 %v16100_v42 }
 0x87d   :  { %11411 = vmatpush1.bf16.msra.mxu1 %v16035_v45  ;;  %v16103_v45 = vld [vmem:[#allocation20 + $0x304] ss:$16 sps:$4 sm:$0xff]  }
 0x87e   :  { %11412 = vmatprep.subr.bf16.mxu1 %v16043_v6  ;;  %v16101_v6 = vld [vmem:[#allocation20 + $0x300] ss:$16 sps:$4 sm:$0xff]  }
 0x87f   :  { %11392 = vmatpush2.bf16.msra.mxu0 %v16098_v23 }
 0x880   :  { %11443 = vmatprep.subr.bf16.mxu0 %v16106_v62 }
 0x881   :  { %11413 = vmatpush1.bf16.msra.mxu1 %v16041_v25  ;;  %v16109_v25 = vld [vmem:[#allocation20 + $0x2ec] ss:$16 sps:$4 sm:$0xff]  }
 0x882   :  { %11414 = vmatprep.subr.bf16.mxu1 %v16049_v46  ;;  %v9554_v46 = vrot.slane %v9549_v43, %v16922_v30 }
 0x885   :  { %11415 = vmatpush1.bf16.msra.mxu1 %v16047_v58 }
 0x886   :  { %11416 = vmatprep.subr.bf16.mxu1 %v16055_v59 }
 0x889   :  { %11417 = vmatpush1.bf16.msra.mxu1 %v16053_v19 }
 0x88a   :  { %11418 = vmatprep.subr.bf16.mxu1 %v16061_v12 }
 0x88d   :  { %11419 = vmatpush2.bf16.msra.mxu1 %v16059_v15 }
 0x88e   :  { %11420 = vmatprep.subr.bf16.mxu1 %v16067_v21 }
 0x891   :  { %11421 = vmatpush2.bf16.msra.mxu1 %v16065_v56  ;;  %v9566_v56 = vrot.slane %v9549_v43, %v16949_v2 }
 0x892   :  { %11422 = vmatprep.subr.bf16.mxu1 %v16073_v49 }
 0x895   :  { %11423 = vmatpush2.bf16.msra.mxu1 %v16071_v57 }
 0x896   :  { %11424 = vmatprep.subr.bf16.mxu1 %v16079_v27 }
 0x899   :  { %11425 = vmatpush2.bf16.msra.mxu1 %v16077_v24 }
 0x89a   :  { %11426 = vmatprep.subr.bf16.mxu1 %v16085_v38 }
 0x89d   :  { %11427 = vmatpush2.bf16.msra.mxu1 %v16083_v5 }
 0x89e   :  { %11428 = vmatprep.subr.bf16.mxu1 %v16091_v53 }
 0x8a1   :  { %11429 = vmatpush2.bf16.msra.mxu1 %v16089_v31 }
 0x8a2   :  { %11430 = vmatprep.subr.bf16.mxu1 %v16097_v40 }
 0x8a5   :  { %11431 = vmatpush2.bf16.msra.mxu1 %v16095_v10 }
 0x8a6   :  { %11432 = vmatprep.subr.bf16.mxu1 %v16103_v45 }
 0x8a9   :  { %11433 = vmatpush2.bf16.msra.mxu1 %v16101_v6 }
 0x8aa   :  { %11484 = vmatprep.subr.bf16.mxu1 %v16109_v25 }
 0x8ac   :  { %v17160_v26 = vpop.f32.mrf.mxu0 }
 0x8ad   :  { %v10274_v58 = vadd.f32 %v17160_v26, %v9554_v46 }
 0x8ae   :  { %v17162_v17 = vpop.f32.mrf.mxu0 }
 0x8af   :  { %v10276_v39 = vadd.f32 %v17162_v17, %v9558_v50 }
 0x8b0   :  { %v10277_v22 = vpop.f32.mrf.mxu0 }
 0x8b2   :  { %v10278_v1 = vpop.f32.mrf.mxu0 }
 0x8ec   :  { %v10314_v20 = vpop.f32.mrf.mxu1  ;;  %v10355_v59 = vpop.f32.mrf.mxu0 }
 0x8ed   :  { %v10315_v19 = vadd.f32 %v10314_v20, %v10274_v58  ;;  %v10356_v49 = vadd.f32 %v10355_v59, %v9562_v51 }
 0x8ee   :  { %v10316_v48 = vpop.f32.mrf.mxu1  ;;  %v10357_v12 = vpop.f32.mrf.mxu0 }
 0x8ef   :  { %v10317_v22 = vadd.f32 %v10316_v48, %v10276_v39  ;;  %v10358_v26 = vadd.f32 %v10357_v12, %v9566_v56 }
 0x8f0   :  { %v10318_v18 = vpop.f32.mrf.mxu1  ;;  %v10359_v15 = vpop.f32.mrf.mxu0 }
 0x8f1   :  { %v10407_v1 = vcombine.low %v10315_v19, %v10317_v22 }
 0x8f2   :  { %v10319_v14 = vpop.f32.mrf.mxu1  ;;  %v10360_v21 = vpop.f32.mrf.mxu0 }
 0x8f3   :  { %v10415_v24 = vrot.slane %v10407_v1, %v17076_v4 }
 0x92c   :  { %v10396_v32 = vpop.f32.mrf.mxu1 }
 0x92d   :  { %v10397_v57 = vadd.f32 %v10396_v32, %v10356_v49 }
 0x92e   :  { %v10398_v9 = vpop.f32.mrf.mxu1 }
 0x92f   :  { %v10399_v34 = vadd.f32 %v10398_v9, %v10358_v26 }
 0x930   :  { %v10400_v17 = vpop.f32.mrf.mxu1 }
 0x931   :  { %v10408_v27 = vcombine.low %v10397_v57, %v10399_v34 }
 0x932   :  { %v10401_v29 = vpop.f32.mrf.mxu1 }
 0x933   :  { %v10422_v28 = vrot.slane %v10408_v27, %v17076_v4 }
 0x935   :  { %v10423_v38 = vcombine.low %v10415_v24, %v10422_v28  ;;  %v10424_v3 = vcombine.high %v10415_v24, %v10422_v28 }
 0x937   :  { %v10431_v5 = vrot.slane %v10423_v38, %v17076_v4  ;;  %v10438_v41 = vrot.slane %v10424_v3, %v17076_v4 }
 0x939   :  { %v10442_v53 = vrot.slane %v10431_v5, %v16922_v30  ;;  %v10446_v55 = vrot.slane %v10431_v5, %v16919_v37  ;;  %v10450_v31 = vrot.slane %v10431_v5, %v16946_v60  ;;  %v10454_v33 = vrot.slane %v10431_v5, %v16949_v2 }
 0x93a   :  { %v10458_v40 = vrot.slane %v10438_v41, %v16922_v30  ;;  %v10462_v0 = vrot.slane %v10438_v41, %v16919_v37  ;;  %v10466_v10 = vrot.slane %v10438_v41, %v16946_v60  ;;  %v10470_v42 = vrot.slane %v10438_v41, %v16949_v2 }
 0x93b   :  { %v10479_v45 = vadd.f32 %v10442_v53, %v17098_v36  ;;  %v10481_v4 = vadd.f32 %v10450_v31, %v17102_v52  ;;  %v10480_v23 = vadd.f32 %v10446_v55, %v17090_v35  ;;  %v10482_v6 = vadd.f32 %v10454_v33, %v17094_v7 }
 0x93c   :  { %v10483_v62 = vadd.f32 %v10458_v40, %v17100_v54  ;;  %v10485_v25 = vadd.f32 %v10466_v10, %v17104_v63  ;;  %v10484_v43 = vadd.f32 %v10462_v0, %v17092_v8  ;;  %v10486_v46 = vadd.f32 %v10470_v42, %v17096_v13 }
 0x93d   :  { %v10493_v50 = vrot.slane %v10480_v23, 4  ;;  %v10505_v58 = vrot.slane %v10482_v6, 4  ;;  %v10487_v20 = vrot.slane %v10479_v45, 4  ;;  %v10499_v59 = vrot.slane %v10481_v4, 4 }
 0x93e   :  { %v10517_v39 = vrot.slane %v10484_v43, 4  ;;  %v10529_v36 = vrot.slane %v10486_v46, 4  ;;  %v10511_v19 = vrot.slane %v10483_v62, 4  ;;  %v10523_v52 = vrot.slane %v10485_v25, 4 }
 0x93f   :  { %v10494_v48 = vadd.f32 %v10493_v50, %v10480_v23  ;;  %v10506_v35 = vadd.f32 %v10505_v58, %v10482_v6  ;;  %v10488_v12 = vadd.f32 %v10487_v20, %v10479_v45  ;;  %v10500_v7 = vadd.f32 %v10499_v59, %v10481_v4 }
 0x940   :  { %v10518_v22 = vadd.f32 %v10517_v39, %v10484_v43  ;;  %v10530_v54 = vadd.f32 %v10529_v36, %v10486_v46  ;;  %v10512_v18 = vadd.f32 %v10511_v19, %v10483_v62  ;;  %v10524_v63 = vadd.f32 %v10523_v52, %v10485_v25 }
 0x941   :  { %v10495_v15 = vrot.slane %v10494_v48, 2  ;;  %v10507_v8 = vrot.slane %v10506_v35, 2  ;;  %v10489_v1 = vrot.slane %v10488_v12, 2  ;;  %v10501_v13 = vrot.slane %v10500_v7, 2 }
 0x942   :  { %v10519_v14 = vrot.slane %v10518_v22, 2  ;;  %v10531_v21 = vrot.slane %v10530_v54, 2  ;;  %v10513_v51 = vrot.slane %v10512_v18, 2  ;;  %v10525_v56 = vrot.slane %v10524_v63, 2 }
 0x943   :  { %v10496_v32 = vadd.f32 %v10495_v15, %v10494_v48  ;;  %v10508_v49 = vadd.f32 %v10507_v8, %v10506_v35  ;;  %v10490_v26 = vadd.f32 %v10489_v1, %v10488_v12  ;;  %v10502_v9 = vadd.f32 %v10501_v13, %v10500_v7  ;;  %v16107_v15 = vld [vmem:[#allocation20 + $0x2e8] ss:$16 sps:$4 sm:$0xff]   ;;  %v16112_v13 = vld [vmem:[#allocation20 + $0xcc] ss:$16 sps:$4 sm:$0xff]  }
 0x944   :  { %v10520_v57 = vadd.f32 %v10519_v14, %v10518_v22  ;;  %v10532_v34 = vadd.f32 %v10531_v21, %v10530_v54  ;;  %v10514_v17 = vadd.f32 %v10513_v51, %v10512_v18  ;;  %v10526_v27 = vadd.f32 %v10525_v56, %v10524_v63  ;;  %v16104_v63 = vld [vmem:[#allocation20 + $0xe8] ss:$16 sps:$4 sm:$0xff]   ;;  %v16115_v14 = vld [vmem:[#allocation20 + $0x2cc] ss:$16 sps:$4 sm:$0xff]  }
 0x945   :  { %v10497_v29 = vrot.slane %v10496_v32, 1  ;;  %v10509_v24 = vrot.slane %v10508_v49, 1  ;;  %v10491_v28 = vrot.slane %v10490_v26, 1  ;;  %v10503_v38 = vrot.slane %v10502_v9, 1  ;;  %v16110_v21 = vld [vmem:[#allocation20 + $0xc8] ss:$16 sps:$4 sm:$0xff]  }
 0x946   :  { %v10521_v3 = vrot.slane %v10520_v57, 1  ;;  %v10533_v5 = vrot.slane %v10532_v34, 1  ;;  %v10515_v41 = vrot.slane %v10514_v17, 1  ;;  %v10527_v53 = vrot.slane %v10526_v27, 1  ;;  %v16113_v51 = vld [vmem:[#allocation20 + $0x2c8] ss:$16 sps:$4 sm:$0xff]  }
 0x947   :  { %v10498_v55 = vadd.f32 %v10497_v29, %v10496_v32  ;;  %v10510_v31 = vadd.f32 %v10509_v24, %v10508_v49  ;;  %v10492_v33 = vadd.f32 %v10491_v28, %v10490_v26  ;;  %v10504_v40 = vadd.f32 %v10503_v38, %v10502_v9  ;;  %v16118_v56 = vld [vmem:[#allocation20 + $0xac] ss:$16 sps:$4 sm:$0xff]   ;;  %v16116_v49 = vld [vmem:[#allocation20 + $0xa8] ss:$16 sps:$4 sm:$0xff]  }
 0x948   :  { %v10522_v0 = vadd.f32 %v10521_v3, %v10520_v57  ;;  %v10534_v10 = vadd.f32 %v10533_v5, %v10532_v34  ;;  %v10516_v42 = vadd.f32 %v10515_v41, %v10514_v17  ;;  %v10528_v45 = vadd.f32 %v10527_v53, %v10526_v27  ;;  %v16121_v32 = vld [vmem:[#allocation20 + $0x2ac] ss:$16 sps:$4 sm:$0xff]   ;;  %v16119_v26 = vld [vmem:[#allocation20 + $0x2a8] ss:$16 sps:$4 sm:$0xff]  }
 0x949   :  { %v10536_v4 = vpack.c.bf16 %v10498_v55, %v10498_v55  ;;  %v10538_v23 = vpack.c.bf16 %v10510_v31, %v10510_v31  ;;  %v10535_v6 = vpack.c.bf16 %v10492_v33, %v10492_v33  ;;  %v10537_v62 = vpack.c.bf16 %v10504_v40, %v10504_v40  ;;  %v16124_v9 = vld [vmem:[#allocation20 + $0x8c] ss:$16 sps:$4 sm:$0xff]   ;;  %v16122_v34 = vld [vmem:[#allocation20 + $0x88] ss:$16 sps:$4 sm:$0xff]  }
 0x94a   :  { %v10540_v25 = vpack.c.bf16 %v10522_v0, %v10522_v0  ;;  %v10542_v43 = vpack.c.bf16 %v10534_v10, %v10534_v10  ;;  %v10539_v46 = vpack.c.bf16 %v10516_v42, %v10516_v42  ;;  %v10541_v50 = vpack.c.bf16 %v10528_v45, %v10528_v45  ;;  %v16127_v57 = vld [vmem:[#allocation20 + $0x28c] ss:$16 sps:$4 sm:$0xff]   ;;  %v16125_v17 = vld [vmem:[#allocation20 + $0x288] ss:$16 sps:$4 sm:$0xff]  }
 0x94b   :  { %v10702_v58 = vunpack.c.l.b16 %v10536_v4  ;;  %v10704_v20 = vunpack.c.l.b16 %v10538_v23  ;;  %v10701_v59 = vunpack.c.l.b16 %v10535_v6  ;;  %v10703_v39 = vunpack.c.l.b16 %v10537_v62  ;;  %v16130_v27 = vld [vmem:[#allocation20 + $0x6c] ss:$16 sps:$4 sm:$0xff]   ;;  %v16128_v24 = vld [vmem:[#allocation20 + $0x68] ss:$16 sps:$4 sm:$0xff]  }
 0x94c   :  { %v10706_v36 = vunpack.c.l.b16 %v10540_v25  ;;  %v10708_v19 = vunpack.c.l.b16 %v10542_v43  ;;  %v10705_v52 = vunpack.c.l.b16 %v10539_v46  ;;  %v10707_v48 = vunpack.c.l.b16 %v10541_v50  ;;  %v16133_v29 = vld [vmem:[#allocation20 + $0x26c] ss:$16 sps:$4 sm:$0xff]   ;;  %v16131_v28 = vld [vmem:[#allocation20 + $0x268] ss:$16 sps:$4 sm:$0xff]  }
 0x94d   :  { %v16136_v38 = vld [vmem:[#allocation20 + $0x4c] ss:$16 sps:$4 sm:$0xff]   ;;  %v16134_v5 = vld [vmem:[#allocation20 + $0x48] ss:$16 sps:$4 sm:$0xff]  }
 0x94e   :  { %v10710_v35 = vsel %vm7470_vm1, %v10706_v36, %v10702_v58  ;;  %v10712_v12 = vsel %vm7470_vm1, %v10708_v19, %v10704_v20  ;;  %v10709_v7 = vsel %vm7470_vm1, %v10705_v52, %v10701_v59  ;;  %v10711_v22 = vsel %vm7470_vm1, %v10707_v48, %v10703_v39  ;;  %v16139_v3 = vld [vmem:[#allocation20 + $0x24c] ss:$16 sps:$4 sm:$0xff]   ;;  %v16137_v41 = vld [vmem:[#allocation20 + $0x248] ss:$16 sps:$4 sm:$0xff]  }
 0x94f   :  { %v10714_v54 = vpack.c.b16 %v10710_v35, %v10710_v35  ;;  %v10716_v18 = vpack.c.b16 %v10712_v12, %v10712_v12  ;;  %v17194_v8 = vpack.c.b16 %v10709_v7, %v10709_v7  ;;  %v17196_v1 = vpack.c.b16 %v10711_v22, %v10711_v22  ;;  %v16142_v53 = vld [vmem:[#allocation20 + $0x2c] ss:$16 sps:$4 sm:$0xff]   ;;  %v16140_v31 = vld [vmem:[#allocation20 + $0x28] ss:$16 sps:$4 sm:$0xff]  }
 0x950   :  { %v16145_v55 = vld [vmem:[#allocation20 + $0x22c] ss:$16 sps:$4 sm:$0xff]   ;;  %v16143_v33 = vld [vmem:[#allocation20 + $0x228] ss:$16 sps:$4 sm:$0xff]  }
 0x951   :  { %11393 = vmatprep.mubr.bf16.mxu0 %v10714_v54  ;;  %11434 = vmatprep.mubr.bf16.mxu1 %v10716_v18  ;;  %v16148_v40 = vld [vmem:[#allocation20 + $0xc] ss:$16 sps:$4 sm:$0xff]   ;;  %v16146_v10 = vld [vmem:[#allocation20 + $0x8] ss:$16 sps:$4 sm:$0xff]  }
 0x952   :  { %11394 = vmatmul.mubr.bf16.vlgmr.msra.gmra.mxu0 %v17194_v8  ;;  %11435 = vmatmul.mubr.bf16.vlgmr.msra.gmra.mxu1 %v17196_v1  ;;  %v16151_v0 = vld [vmem:[#allocation20 + $0x20c] ss:$16 sps:$4 sm:$0xff]   ;;  %v16149_v42 = vld [vmem:[#allocation20 + $0x208] ss:$16 sps:$4 sm:$0xff]  }
 0x953   :  { %11444 = vmatpush1.bf16.msra.mxu0 %v16104_v63  ;;  %11485 = vmatpush1.bf16.msra.mxu1 %v16107_v15  ;;  %v16154_v45 = vld [vmem:[#allocation20 + $0x1ec] ss:$16 sps:$4 sm:$0xff]   ;;  %v16152_v23 = vld [vmem:[#allocation20 + $0x1e8] ss:$16 sps:$4 sm:$0xff]  }
 0x954   :  { %11475 = vmatprep.mubr.bf16.mxu0 %v10714_v54  ;;  %11516 = vmatprep.mubr.bf16.mxu1 %v10716_v18  ;;  %v16157_v4 = vld [vmem:[#allocation20 + $0x3ec] ss:$16 sps:$4 sm:$0xff]   ;;  %v16155_v6 = vld [vmem:[#allocation20 + $0x3e8] ss:$16 sps:$4 sm:$0xff]  }
 0x955   :  { %11445 = vmatprep.subr.bf16.mxu0 %v16112_v13  ;;  %11486 = vmatprep.subr.bf16.mxu1 %v16115_v14  ;;  %v16160_v62 = vld [vmem:[#allocation20 + $0x1cc] ss:$16 sps:$4 sm:$0xff]   ;;  %v16158_v43 = vld [vmem:[#allocation20 + $0x1c8] ss:$16 sps:$4 sm:$0xff]  }
 0x956   :  { %v16163_v25 = vld [vmem:[#allocation20 + $0x3cc] ss:$16 sps:$4 sm:$0xff]   ;;  %v16161_v46 = vld [vmem:[#allocation20 + $0x3c8] ss:$16 sps:$4 sm:$0xff]  }
 0x957   :  { %11446 = vmatpush1.bf16.msra.mxu0 %v16110_v21  ;;  %11487 = vmatpush1.bf16.msra.mxu1 %v16113_v51  ;;  %v16166_v50 = vld [vmem:[#allocation20 + $0x1ac] ss:$16 sps:$4 sm:$0xff]   ;;  %v16164_v20 = vld [vmem:[#allocation20 + $0x1a8] ss:$16 sps:$4 sm:$0xff]  }
 0x958   :  { %11447 = vmatprep.subr.bf16.mxu0 %v16118_v56  ;;  %11488 = vmatprep.subr.bf16.mxu1 %v16121_v32  ;;  %v16169_v58 = vld [vmem:[#allocation20 + $0x3ac] ss:$16 sps:$4 sm:$0xff]   ;;  %v16167_v59 = vld [vmem:[#allocation20 + $0x3a8] ss:$16 sps:$4 sm:$0xff]  }
 0x959   :  { %v16172_v39 = vld [vmem:[#allocation20 + $0x18c] ss:$16 sps:$4 sm:$0xff]   ;;  %v16170_v19 = vld [vmem:[#allocation20 + $0x188] ss:$16 sps:$4 sm:$0xff]  }
 0x95a   :  { %v16175_v36 = vld [vmem:[#allocation20 + $0x38c] ss:$16 sps:$4 sm:$0xff]   ;;  %v16173_v52 = vld [vmem:[#allocation20 + $0x388] ss:$16 sps:$4 sm:$0xff]  }
 0x95b   :  { %11448 = vmatpush1.bf16.msra.mxu0 %v16116_v49  ;;  %11489 = vmatpush1.bf16.msra.mxu1 %v16119_v26  ;;  %v16178_v48 = vld [vmem:[#allocation20 + $0x16c] ss:$16 sps:$4 sm:$0xff]   ;;  %v16176_v12 = vld [vmem:[#allocation20 + $0x168] ss:$16 sps:$4 sm:$0xff]  }
 0x95c   :  { %11449 = vmatprep.subr.bf16.mxu0 %v16124_v9  ;;  %11490 = vmatprep.subr.bf16.mxu1 %v16127_v57  ;;  %v16181_v35 = vld [vmem:[#allocation20 + $0x36c] ss:$16 sps:$4 sm:$0xff]   ;;  %v16179_v7 = vld [vmem:[#allocation20 + $0x368] ss:$16 sps:$4 sm:$0xff]  }
 0x95d   :  { %v16184_v22 = vld [vmem:[#allocation20 + $0x14c] ss:$16 sps:$4 sm:$0xff]   ;;  %v16182_v18 = vld [vmem:[#allocation20 + $0x148] ss:$16 sps:$4 sm:$0xff]  }
 0x95e   :  { %v16187_v54 = vld [vmem:[#allocation20 + $0x34c] ss:$16 sps:$4 sm:$0xff]   ;;  %v16185_v63 = vld [vmem:[#allocation20 + $0x348] ss:$16 sps:$4 sm:$0xff]  }
 0x95f   :  { %11450 = vmatpush1.bf16.msra.mxu0 %v16122_v34  ;;  %11491 = vmatpush1.bf16.msra.mxu1 %v16125_v17  ;;  %v16190_v15 = vld [vmem:[#allocation20 + $0x12c] ss:$16 sps:$4 sm:$0xff]   ;;  %v16188_v14 = vld [vmem:[#allocation20 + $0x128] ss:$16 sps:$4 sm:$0xff]  }
 0x960   :  { %11451 = vmatprep.subr.bf16.mxu0 %v16130_v27  ;;  %11492 = vmatprep.subr.bf16.mxu1 %v16133_v29  ;;  %v16193_v13 = vld [vmem:[#allocation20 + $0x32c] ss:$16 sps:$4 sm:$0xff]   ;;  %v16191_v21 = vld [vmem:[#allocation20 + $0x328] ss:$16 sps:$4 sm:$0xff]  }
 0x961   :  { %v16196_v51 = vld [vmem:[#allocation20 + $0x10c] ss:$16 sps:$4 sm:$0xff]   ;;  %v11589_v32 = vld [vmem:[#allocation23 + $0x1c0] sm:$0xff] }
 0x962   :  { %v16199_v56 = vld [vmem:[#allocation20 + $0x30c] ss:$16 sps:$4 sm:$0xff]   ;;  %v11593_v49 = vld [vmem:[#allocation23 + $0x1e0] sm:$0xff] }
 0x963   :  { %11452 = vmatpush1.bf16.msra.mxu0 %v16128_v24  ;;  %11493 = vmatpush1.bf16.msra.mxu1 %v16131_v28  ;;  %v16194_v26 = vld [vmem:[#allocation20 + $0x108] ss:$16 sps:$4 sm:$0xff]   ;;  %v14996_v57 = vcombine.high %v11589_v32, %v11593_v49  ;;  %v14995_v27 = vcombine.low %v11589_v32, %v11593_v49 }
 0x964   :  { %11453 = vmatprep.subr.bf16.mxu0 %v16136_v38  ;;  %11494 = vmatprep.subr.bf16.mxu1 %v16139_v3  ;;  %v16197_v9 = vld [vmem:[#allocation20 + $0x308] ss:$16 sps:$4 sm:$0xff]  }
 0x965   :  { %v11581_v34 = vld [vmem:[#allocation23 + $0x180] sm:$0xff] }
 0x966   :  { %v11585_v17 = vld [vmem:[#allocation23 + $0x1a0] sm:$0xff] }
 0x967   :  { %11454 = vmatpush1.bf16.msra.mxu0 %v16134_v5  ;;  %11495 = vmatpush1.bf16.msra.mxu1 %v16137_v41  ;;  %v14988_v29 = vcombine.high %v11581_v34, %v11585_v17  ;;  %v11573_v24 = vld [vmem:[#allocation23 + $0x140] sm:$0xff]  ;;  %v14987_v38 = vcombine.low %v11581_v34, %v11585_v17 }
 0x968   :  { %11455 = vmatprep.subr.bf16.mxu0 %v16142_v53  ;;  %11496 = vmatprep.subr.bf16.mxu1 %v16145_v55  ;;  %v11577_v28 = vld [vmem:[#allocation23 + $0x160] sm:$0xff] }
 0x969   :  { %v14980_v3 = vcombine.high %v11573_v24, %v11577_v28  ;;  %v11565_v5 = vld [vmem:[#allocation23 + $0x100] sm:$0xff]  ;;  %v14979_v53 = vcombine.low %v11573_v24, %v11577_v28 }
 0x96a   :  { %v11569_v41 = vld [vmem:[#allocation23 + $0x120] sm:$0xff] }
 0x96b   :  { %11456 = vmatpush1.bf16.msra.mxu0 %v16140_v31  ;;  %11497 = vmatpush1.bf16.msra.mxu1 %v16143_v33  ;;  %v14972_v55 = vcombine.high %v11565_v5, %v11569_v41  ;;  %v11557_v31 = vld [vmem:[#allocation23 + $0xc0] sm:$0xff] }
 0x96c   :  { %11457 = vmatprep.subr.bf16.mxu0 %v16148_v40  ;;  %11498 = vmatprep.subr.bf16.mxu1 %v16151_v0  ;;  %v11561_v33 = vld [vmem:[#allocation23 + $0xe0] sm:$0xff] }
 0x96d   :  { %v11717_v40 = vld [vmem:[#allocation23 + $0x5c0] sm:$0xff] }
 0x96e   :  { %v11721_v0 = vld [vmem:[#allocation23 + $0x5e0] sm:$0xff] }
 0x96f   :  { %11458 = vmatpush1.bf16.msra.mxu0 %v16146_v10  ;;  %11499 = vmatpush1.bf16.msra.mxu1 %v16149_v42  ;;  %v14971_v10 = vcombine.low %v11565_v5, %v11569_v41  ;;  %v15123_v42 = vcombine.low %v11717_v40, %v11721_v0  ;;  %v11689_v32 = vld [vmem:[#allocation23 + $0x4e0] sm:$0xff] }
 0x970   :  { %11459 = vmatprep.subr.bf16.mxu0 %v16154_v45  ;;  %11500 = vmatprep.subr.bf16.mxu1 %v16157_v4  ;;  %v17202_v45 = vld [vmem:[#allocation23 + $0x1c8] sm:$0xff]  ;;  %v14964_v4 = vcombine.high %v11557_v31, %v11561_v33  ;;  %v11645_v34 = vld [vmem:[#allocation23 + $0x380] sm:$0xff] }
 0x971   :  { %v11649_v17 = vld [vmem:[#allocation23 + $0x3a0] sm:$0xff] }
 0x972   :  { %v11637_v5 = vld [vmem:[#allocation23 + $0x340] sm:$0xff] }
 0x973   :  { %11460 = vmatpush2.bf16.msra.mxu0 %v16152_v23  ;;  %11501 = vmatpush2.bf16.msra.mxu1 %v16155_v6  ;;  %v11549_v23 = vld [vmem:[#allocation23 + $0x80] sm:$0xff] }
 0x974   :  { %11461 = vmatprep.subr.bf16.mxu0 %v16160_v62  ;;  %11502 = vmatprep.subr.bf16.mxu1 %v16163_v25  ;;  %v11553_v6 = vld [vmem:[#allocation23 + $0xa0] sm:$0xff] }
 0x975   :  { %v11709_v25 = vld [vmem:[#allocation23 + $0x580] sm:$0xff] }
 0x976   :  { %v11641_v41 = vld [vmem:[#allocation23 + $0x360] sm:$0xff] }
 0x977   :  { %11462 = vmatpush2.bf16.msra.mxu0 %v16158_v43  ;;  %11503 = vmatpush2.bf16.msra.mxu1 %v16161_v46  ;;  %v11713_v43 = vld [vmem:[#allocation23 + $0x5a0] sm:$0xff]  ;;  %v14963_v46 = vcombine.low %v11557_v31, %v11561_v33  ;;  %v15051_v31 = vcombine.low %v11645_v34, %v11649_v17 }
 0x978   :  { %11463 = vmatprep.subr.bf16.mxu0 %v16166_v50  ;;  %11504 = vmatprep.subr.bf16.mxu1 %v16169_v58  ;;  %v15115_v50 = vcombine.low %v11709_v25, %v11713_v43  ;;  %v15116_v58 = vcombine.high %v11709_v25, %v11713_v43 }
 0x97b   :  { %11464 = vmatpush2.bf16.msra.mxu0 %v16164_v20  ;;  %11505 = vmatpush2.bf16.msra.mxu1 %v16167_v59  ;;  %v14956_v20 = vcombine.high %v11549_v23, %v11553_v6  ;;  %v11541_v59 = vld [vmem:[#allocation23 + $0x40] sm:$0xff] }
 0x97c   :  { %11465 = vmatprep.subr.bf16.mxu0 %v16172_v39  ;;  %11506 = vmatprep.subr.bf16.mxu1 %v16175_v36  ;;  %v11545_v39 = vld [vmem:[#allocation23 + $0x60] sm:$0xff] }
 0x97d   :  { %v11701_v36 = vld [vmem:[#allocation23 + $0x540] sm:$0xff] }
 0x97f   :  { %11466 = vmatpush2.bf16.msra.mxu0 %v16170_v19  ;;  %11507 = vmatpush2.bf16.msra.mxu1 %v16173_v52  ;;  %v11705_v19 = vld [vmem:[#allocation23 + $0x560] sm:$0xff]  ;;  %v14955_v52 = vcombine.low %v11549_v23, %v11553_v6  ;;  %v15043_v23 = vcombine.low %v11637_v5, %v11641_v41 }
 0x980   :  { %11467 = vmatprep.subr.bf16.mxu0 %v16178_v48  ;;  %11508 = vmatprep.subr.bf16.mxu1 %v16181_v35  ;;  %v15107_v48 = vcombine.low %v11701_v36, %v11705_v19  ;;  %v15108_v35 = vcombine.high %v11701_v36, %v11705_v19 }
 0x983   :  { %11468 = vmatpush2.bf16.msra.mxu0 %v16176_v12  ;;  %11509 = vmatpush2.bf16.msra.mxu1 %v16179_v7  ;;  %v14948_v12 = vcombine.high %v11541_v59, %v11545_v39  ;;  %v11533_v7 = vld [vmem:[#allocation23] sm:$0xff] }
 0x984   :  { %11469 = vmatprep.subr.bf16.mxu0 %v16184_v22  ;;  %11510 = vmatprep.subr.bf16.mxu1 %v16187_v54  ;;  %v11537_v22 = vld [vmem:[#allocation23 + $0x20] sm:$0xff] }
 0x985   :  { %v11693_v54 = vld [vmem:[#allocation23 + $0x500] sm:$0xff]  ;;  %v14939_v49 = vcombine.low %v11533_v7, %v11537_v22 }
 0x987   :  { %11470 = vmatpush2.bf16.msra.mxu0 %v16182_v18  ;;  %11511 = vmatpush2.bf16.msra.mxu1 %v16185_v63  ;;  %v11697_v18 = vld [vmem:[#allocation23 + $0x520] sm:$0xff]  ;;  %v14947_v63 = vcombine.low %v11541_v59, %v11545_v39 }
 0x988   :  { %11471 = vmatprep.subr.bf16.mxu0 %v16190_v15  ;;  %11512 = vmatprep.subr.bf16.mxu1 %v16193_v13  ;;  %v15099_v15 = vcombine.low %v11693_v54, %v11697_v18  ;;  %v15100_v13 = vcombine.high %v11693_v54, %v11697_v18 }
 0x98b   :  { %11472 = vmatpush2.bf16.msra.mxu0 %v16188_v14  ;;  %11513 = vmatpush2.bf16.msra.mxu1 %v16191_v21  ;;  %v14940_v14 = vcombine.high %v11533_v7, %v11537_v22  ;;  %v11653_v21 = vld [vmem:[#allocation23 + $0x3c0] sm:$0xff] }
 0x98c   :  { %11473 = vmatprep.subr.bf16.mxu0 %v16196_v51  ;;  %11514 = vmatprep.subr.bf16.mxu1 %v16199_v56  ;;  %v11657_v51 = vld [vmem:[#allocation23 + $0x3e0] sm:$0xff] }
 0x98d   :  { %v11685_v56 = vld [vmem:[#allocation23 + $0x4c0] sm:$0xff]  ;;  %v15059_v24 = vcombine.low %v11653_v21, %v11657_v51 }
 0x98f   :  { %11474 = vmatpush2.bf16.msra.mxu0 %v16194_v26  ;;  %11515 = vmatpush2.bf16.msra.mxu1 %v16197_v9  ;;  %v15091_v26 = vcombine.low %v11685_v56, %v11689_v32  ;;  %v15092_v9 = vcombine.high %v11685_v56, %v11689_v32 }
 0x990   :  { %13111 = vmatprep.subr.bf16.mxu0 %v14996_v57  ;;  %v15060_v57 = vcombine.high %v11653_v21, %v11657_v51 }
 0x992   :  { %11476 = vmatmul.mubr.bf16.vlgmr.msra.gmra.mxu0 %v17194_v8  ;;  %11517 = vmatmul.mubr.bf16.vlgmr.msra.gmra.mxu1 %v17196_v1  ;;  %v15124_v8 = vcombine.high %v11717_v40, %v11721_v0  ;;  %v17204_v1 = vld [vmem:[#allocation23 + $0x1e8] sm:$0xff]  ;;  %v15044_v0 = vcombine.high %v11637_v5, %v11641_v41 }
 0x993   :  { %13112 = vmatpush1.bf16.msra.mxu0 %v14995_v27  ;;  %v14997_v62 = vcombine.low %v17202_v45, %v17204_v1  ;;  %v11677_v27 = vld [vmem:[#allocation23 + $0x480] sm:$0xff]  ;;  %v14998_v41 = vcombine.high %v17202_v45, %v17204_v1  ;;  %v11554_v45 = vld [vmem:[#allocation23 + $0xa8] sm:$0xff] }
 0x994   :  { %13113 = vmatprep.subr.bf16.mxu0 %v14988_v29  ;;  %13152 = vmatprep.subr.bf16.mxu1 %v15124_v8  ;;  %v11681_v29 = vld [vmem:[#allocation23 + $0x4a0] sm:$0xff] }
 0x995   :  { %13153 = vmatpush1.bf16.msra.mxu1 %v15123_v42  ;;  %v15083_v28 = vcombine.low %v11677_v27, %v11681_v29  ;;  %v11633_v42 = vld [vmem:[#allocation23 + $0x320] sm:$0xff] }
 0x996   :  { %13154 = vmatprep.subr.bf16.mxu1 %v15116_v58  ;;  %v11661_v8 = vld [vmem:[#allocation23 + $0x400] sm:$0xff] }
 0x997   :  { %13114 = vmatpush1.bf16.msra.mxu0 %v14987_v38  ;;  %v15084_v38 = vcombine.high %v11677_v27, %v11681_v29  ;;  %v11781_v58 = vld [vmem:[#allocation23 + $0x7c0] sm:$0xff] }
 0x998   :  { %13115 = vmatprep.subr.bf16.mxu0 %v14980_v3  ;;  %v15052_v3 = vcombine.high %v11645_v34, %v11649_v17 }
 0x999   :  { %13155 = vmatpush1.bf16.msra.mxu1 %v15115_v50  ;;  %v11625_v50 = vld [vmem:[#allocation23 + $0x2e0] sm:$0xff] }
 0x99a   :  { %13156 = vmatprep.subr.bf16.mxu1 %v15108_v35  ;;  %v11773_v35 = vld [vmem:[#allocation23 + $0x780] sm:$0xff] }
 0x99b   :  { %13116 = vmatpush1.bf16.msra.mxu0 %v14979_v53  ;;  %v11669_v53 = vld [vmem:[#allocation23 + $0x440] sm:$0xff] }
 0x99c   :  { %13117 = vmatprep.subr.bf16.mxu0 %v14972_v55  ;;  %v11673_v55 = vld [vmem:[#allocation23 + $0x460] sm:$0xff] }
 0x99d   :  { %13157 = vmatpush1.bf16.msra.mxu1 %v15107_v48  ;;  %v15075_v33 = vcombine.low %v11669_v53, %v11673_v55  ;;  %v15076_v40 = vcombine.high %v11669_v53, %v11673_v55  ;;  %v11617_v48 = vld [vmem:[#allocation23 + $0x2a0] sm:$0xff] }
 0x99e   :  { %13158 = vmatprep.subr.bf16.mxu1 %v15100_v13  ;;  %v11765_v13 = vld [vmem:[#allocation23 + $0x740] sm:$0xff] }
 0x99f   :  { %13118 = vmatpush1.bf16.msra.mxu0 %v14971_v10  ;;  %v11629_v10 = vld [vmem:[#allocation23 + $0x300] sm:$0xff] }
 0x9a0   :  { %13119 = vmatprep.subr.bf16.mxu0 %v14964_v4  ;;  %v11665_v4 = vld [vmem:[#allocation23 + $0x420] sm:$0xff]  ;;  %v15036_v43 = vcombine.high %v11629_v10, %v11633_v42  ;;  %v15035_v59 = vcombine.low %v11629_v10, %v11633_v42 }
 0x9a1   :  { %13159 = vmatpush1.bf16.msra.mxu1 %v15099_v15  ;;  %v15067_v6 = vcombine.low %v11661_v8, %v11665_v4  ;;  %v15068_v25 = vcombine.high %v11661_v8, %v11665_v4  ;;  %v11609_v15 = vld [vmem:[#allocation23 + $0x260] sm:$0xff] }
 0x9a2   :  { %13160 = vmatprep.subr.bf16.mxu1 %v15092_v9  ;;  %v11757_v9 = vld [vmem:[#allocation23 + $0x700] sm:$0xff] }
 0x9a3   :  { %13120 = vmatpush1.bf16.msra.mxu0 %v14963_v46  ;;  %v11621_v46 = vld [vmem:[#allocation23 + $0x2c0] sm:$0xff] }
 0x9a4   :  { %13121 = vmatprep.subr.bf16.mxu0 %v14956_v20  ;;  %v11785_v20 = vld [vmem:[#allocation23 + $0x7e0] sm:$0xff]  ;;  %v15028_v19 = vcombine.high %v11621_v46, %v11625_v50  ;;  %v15027_v7 = vcombine.low %v11621_v46, %v11625_v50 }
 0x9a5   :  { %13161 = vmatpush1.bf16.msra.mxu1 %v15091_v26  ;;  %v15187_v39 = vcombine.low %v11781_v58, %v11785_v20  ;;  %v15188_v36 = vcombine.high %v11781_v58, %v11785_v20  ;;  %v11601_v26 = vld [vmem:[#allocation23 + $0x220] sm:$0xff]  ;;  %v17218_v58 = vld [vmem:[#allocation22] sm:$0xf] }
 0x9a6   :  { %13162 = vmatprep.subr.bf16.mxu1 %v15084_v38  ;;  %v11741_v53 = vld [vmem:[#allocation23 + $0x680] sm:$0xff]  ;;  %v10676_v20 = vrot.slane %v17218_v58, %v16922_v30 }
 0x9a7   :  { %13122 = vmatpush1.bf16.msra.mxu0 %v14955_v52  ;;  %v11613_v52 = vld [vmem:[#allocation23 + $0x280] sm:$0xff] }
 0x9a8   :  { %13123 = vmatprep.subr.bf16.mxu0 %v14948_v12  ;;  %v11777_v12 = vld [vmem:[#allocation23 + $0x7a0] sm:$0xff]  ;;  %v15020_v18 = vcombine.high %v11613_v52, %v11617_v48  ;;  %v15019_v21 = vcombine.low %v11613_v52, %v11617_v48 }
 0x9a9   :  { %13163 = vmatpush1.bf16.msra.mxu1 %v15083_v28  ;;  %v15179_v22 = vcombine.low %v11773_v35, %v11777_v12  ;;  %v15180_v54 = vcombine.high %v11773_v35, %v11777_v12  ;;  %v11753_v28 = vld [vmem:[#allocation23 + $0x6e0] sm:$0xff] }
 0x9aa   :  { %13164 = vmatprep.subr.bf16.mxu1 %v15076_v40  ;;  %v11745_v55 = vld [vmem:[#allocation23 + $0x6a0] sm:$0xff] }
 0x9ab   :  { %13124 = vmatpush1.bf16.msra.mxu0 %v14947_v63  ;;  %v11605_v63 = vld [vmem:[#allocation23 + $0x240] sm:$0xff] }
 0x9ac   :  { %13125 = vmatprep.subr.bf16.mxu0 %v14940_v14  ;;  %v11769_v14 = vld [vmem:[#allocation23 + $0x760] sm:$0xff]  ;;  %v15012_v32 = vcombine.high %v11605_v63, %v11609_v15  ;;  %v15011_v34 = vcombine.low %v11605_v63, %v11609_v15 }
 0x9ad   :  { %13165 = vmatpush1.bf16.msra.mxu1 %v15075_v33  ;;  %v15171_v51 = vcombine.low %v11765_v13, %v11769_v14  ;;  %v15172_v56 = vcombine.high %v11765_v13, %v11769_v14  ;;  %v15148_v33 = vcombine.high %v11741_v53, %v11745_v55  ;;  %v11733_v40 = vld [vmem:[#allocation23 + $0x640] sm:$0xff]  ;;  %v11582_v14 = vld [vmem:[#allocation23 + $0x188] sm:$0xff] }
 0x9ae   :  { %13166 = vmatprep.subr.bf16.mxu1 %v15068_v25  ;;  %v11725_v8 = vld [vmem:[#allocation23 + $0x600] sm:$0xff]  ;;  %v17210_v25 = vld [vmem:[#allocation23 + $0x5c8] sm:$0xff] }
 0x9af   :  { %13126 = vmatpush1.bf16.msra.mxu0 %v14939_v49  ;;  %v11597_v49 = vld [vmem:[#allocation23 + $0x200] sm:$0xff] }
 0x9b0   :  { %13127 = vmatprep.subr.bf16.mxu0 %v15060_v57  ;;  %v11761_v57 = vld [vmem:[#allocation23 + $0x720] sm:$0xff]  ;;  %v15004_v29 = vcombine.high %v11597_v49, %v11601_v26  ;;  %v15003_v38 = vcombine.low %v11597_v49, %v11601_v26  ;;  %v11574_v49 = vld [vmem:[#allocation23 + $0x148] sm:$0xff] }
 0x9b1   :  { %13167 = vmatpush1.bf16.msra.mxu1 %v15067_v6  ;;  %v15163_v17 = vcombine.low %v11757_v9, %v11761_v57  ;;  %v15164_v27 = vcombine.high %v11757_v9, %v11761_v57  ;;  %v11729_v4 = vld [vmem:[#allocation23 + $0x620] sm:$0xff]  ;;  %v11578_v26 = vld [vmem:[#allocation23 + $0x168] sm:$0xff] }
 0x9b2   :  { %13168 = vmatprep.subr.bf16.mxu1 %v15188_v36  ;;  %v15131_v6 = vcombine.low %v11725_v8, %v11729_v4  ;;  %v14982_v57 = vcombine.high %v11574_v49, %v11578_v26 }
 0x9b3   :  { %13128 = vmatpush2.bf16.msra.mxu0 %v15059_v24  ;;  %v11749_v24 = vld [vmem:[#allocation23 + $0x6c0] sm:$0xff] }
 0x9b4   :  { %13129 = vmatprep.subr.bf16.mxu0 %v15052_v3  ;;  %v15155_v3 = vcombine.low %v11749_v24, %v11753_v28  ;;  %v15156_v5 = vcombine.high %v11749_v24, %v11753_v28  ;;  %v11558_v24 = vld [vmem:[#allocation23 + $0xc8] sm:$0xff] }
 0x9b5   :  { %13169 = vmatpush2.bf16.msra.mxu1 %v15187_v39  ;;  %v11562_v28 = vld [vmem:[#allocation23 + $0xe8] sm:$0xff] }
 0x9b6   :  { %13170 = vmatprep.subr.bf16.mxu1 %v15180_v54  ;;  %v14965_v1 = vcombine.low %v11558_v24, %v11562_v28 }
 0x9b7   :  { %13130 = vmatpush2.bf16.msra.mxu0 %v15051_v31  ;;  %v15147_v31 = vcombine.low %v11741_v53, %v11745_v55  ;;  %v11546_v53 = vld [vmem:[#allocation23 + $0x68] sm:$0xff] }
 0x9b8   :  { %13131 = vmatprep.subr.bf16.mxu0 %v15044_v0  ;;  %v11737_v0 = vld [vmem:[#allocation23 + $0x660] sm:$0xff] }
 0x9b9   :  { %13171 = vmatpush2.bf16.msra.mxu1 %v15179_v22  ;;  %v15140_v10 = vcombine.high %v11733_v40, %v11737_v0  ;;  %v15139_v42 = vcombine.low %v11733_v40, %v11737_v0  ;;  %v11538_v40 = vld [vmem:[#allocation23 + $0x28] sm:$0xff] }
 0x9ba   :  { %13172 = vmatprep.subr.bf16.mxu1 %v15172_v56 }
 0x9bb   :  { %13132 = vmatpush2.bf16.msra.mxu0 %v15043_v23  ;;  %v15132_v23 = vcombine.high %v11725_v8, %v11729_v4  ;;  %v11658_v8 = vld [vmem:[#allocation23 + $0x3e8] sm:$0xff] }
 0x9bc   :  { %13133 = vmatprep.subr.bf16.mxu0 %v15036_v43  ;;  %v17212_v43 = vld [vmem:[#allocation23 + $0x5e8] sm:$0xff] }
 0x9bd   :  { %13173 = vmatpush2.bf16.msra.mxu1 %v15171_v51  ;;  %v15126_v46 = vcombine.high %v17210_v25, %v17212_v43  ;;  %v15125_v50 = vcombine.low %v17210_v25, %v17212_v43 }
 0x9be   :  { %13174 = vmatprep.subr.bf16.mxu1 %v15164_v27  ;;  %v14981_v27 = vcombine.low %v11574_v49, %v11578_v26  ;;  %v11610_v49 = vld [vmem:[#allocation23 + $0x268] sm:$0xff]  ;;  %v10684_v26 = vrot.slane %v17218_v58, %v16946_v60 }
 0x9bf   :  { %13134 = vmatpush2.bf16.msra.mxu0 %v15035_v59  ;;  %v10680_v59 = vrot.slane %v17218_v58, %v16919_v37 }
 0x9c0   :  { %13135 = vmatprep.subr.bf16.mxu0 %v15028_v19 }
 0x9c1   :  { %13175 = vmatpush2.bf16.msra.mxu1 %v15163_v17  ;;  %v11570_v17 = vld [vmem:[#allocation23 + $0x128] sm:$0xff] }
 0x9c2   :  { %13176 = vmatprep.subr.bf16.mxu1 %v15156_v5  ;;  %v11550_v5 = vld [vmem:[#allocation23 + $0x88] sm:$0xff] }
 0x9c3   :  { %13136 = vmatpush2.bf16.msra.mxu0 %v15027_v7  ;;  %v14957_v55 = vcombine.low %v11550_v5, %v11554_v45 }
 0x9c4   :  { %13137 = vmatprep.subr.bf16.mxu0 %v15020_v18 }
 0x9c5   :  { %13177 = vmatpush2.bf16.msra.mxu1 %v15155_v3  ;;  %v14966_v3 = vcombine.high %v11558_v24, %v11562_v28 }
 0x9c6   :  { %13178 = vmatprep.subr.bf16.mxu1 %v15148_v33  ;;  %v11534_v33 = vld [vmem:[#allocation23 + $0x8] sm:$0xff] }
 0x9c7   :  { %13138 = vmatpush2.bf16.msra.mxu0 %v15019_v21  ;;  %v11586_v21 = vld [vmem:[#allocation23 + $0x1a8] sm:$0xff]  ;;  %v14941_v4 = vcombine.low %v11534_v33, %v11538_v40 }
 0x9c8   :  { %13139 = vmatprep.subr.bf16.mxu0 %v15012_v32  ;;  %v14990_v32 = vcombine.high %v11582_v14, %v11586_v21  ;;  %v14989_v9 = vcombine.low %v11582_v14, %v11586_v21 }
 0x9c9   :  { %13179 = vmatpush2.bf16.msra.mxu1 %v15147_v31 }
 0x9ca   :  { %13180 = vmatprep.subr.bf16.mxu1 %v15140_v10  ;;  %v14942_v10 = vcombine.high %v11534_v33, %v11538_v40 }
 0x9cb   :  { %13140 = vmatpush2.bf16.msra.mxu0 %v15011_v34  ;;  %v11566_v34 = vld [vmem:[#allocation23 + $0x108] sm:$0xff] }
 0x9cc   :  { %13141 = vmatprep.subr.bf16.mxu0 %v15004_v29  ;;  %v14974_v29 = vcombine.high %v11566_v34, %v11570_v17 }
 0x9cd   :  { %13181 = vmatpush2.bf16.msra.mxu1 %v15139_v42  ;;  %v11654_v42 = vld [vmem:[#allocation23 + $0x3c8] sm:$0xff] }
 0x9ce   :  { %13182 = vmatprep.subr.bf16.mxu1 %v15132_v23  ;;  %v15062_v23 = vcombine.high %v11654_v42, %v11658_v8 }
 0x9cf   :  { %13142 = vmatpush2.bf16.msra.mxu0 %v15003_v38  ;;  %v14973_v38 = vcombine.low %v11566_v34, %v11570_v17  ;;  %v10688_v34 = vrot.slane %v17218_v58, %v16949_v2  ;;  %v11598_v17 = vld [vmem:[#allocation23 + $0x208] sm:$0xff] }
 0x9d0   :  { %13193 = vmatprep.subr.bf16.mxu0 %v14998_v41  ;;  %v11542_v41 = vld [vmem:[#allocation23 + $0x48] sm:$0xff] }
 0x9d1   :  { %13183 = vmatpush2.bf16.msra.mxu1 %v15131_v6  ;;  %v14950_v31 = vcombine.high %v11542_v41, %v11546_v53  ;;  %v14949_v0 = vcombine.low %v11542_v41, %v11546_v53  ;;  %v11646_v6 = vld [vmem:[#allocation23 + $0x388] sm:$0xff]  ;;  %v11591_v41 = vld [vmem:[#allocation23 + $0x1d0] sm:$0xff] }
 0x9d2   :  { %13234 = vmatprep.subr.bf16.mxu1 %v15126_v46  ;;  %v11650_v46 = vld [vmem:[#allocation23 + $0x3a8] sm:$0xff]  ;;  %v11595_v53 = vld [vmem:[#allocation23 + $0x1f0] sm:$0xff] }
 0xa12   :  { %v11395_v39 = vpop.f32.mrf.mxu0  ;;  %v11436_v36 = vpop.f32.mrf.mxu1 }
 0xa13   :  { %v11396_v19 = vadd.f32 %v11395_v39, %v10676_v20  ;;  %v15061_v20 = vcombine.low %v11654_v42, %v11658_v8  ;;  %v11638_v39 = vld [vmem:[#allocation23 + $0x348] sm:$0xff]  ;;  %v15000_v42 = vcombine.high %v11591_v41, %v11595_v53 }
 0xa14   :  { %v11397_v52 = vpop.f32.mrf.mxu0  ;;  %v11438_v48 = vpop.f32.mrf.mxu1 }
 0xa15   :  { %v11437_v35 = vadd.f32 %v11436_v36, %v11396_v19  ;;  %v11398_v12 = vadd.f32 %v11397_v52, %v10680_v59  ;;  %v15054_v59 = vcombine.high %v11646_v6, %v11650_v46  ;;  %v11642_v36 = vld [vmem:[#allocation23 + $0x368] sm:$0xff]  ;;  %v15053_v19 = vcombine.low %v11646_v6, %v11650_v46  ;;  %v11583_v6 = vld [vmem:[#allocation23 + $0x190] sm:$0xff] }
 0xa16   :  { %v11399_v7 = vpop.f32.mrf.mxu0  ;;  %v11440_v22 = vpop.f32.mrf.mxu1  ;;  %v15046_v52 = vcombine.high %v11638_v39, %v11642_v36  ;;  %v11587_v46 = vld [vmem:[#allocation23 + $0x1b0] sm:$0xff] }
 0xa17   :  { %v11439_v54 = vadd.f32 %v11438_v48, %v11398_v12  ;;  %v11525_v18 = vmax.f32 %v11437_v35, 0.0  ;;  %v11630_v48 = vld [vmem:[#allocation23 + $0x308] sm:$0xff]  ;;  %v15045_v12 = vcombine.low %v11638_v39, %v11642_v36  ;;  %v14999_v39 = vcombine.low %v11591_v41, %v11595_v53  ;;  %v11543_v53 = vld [vmem:[#allocation23 + $0x50] sm:$0xff] }
 0xa18   :  { %v11400_v63 = vpop.f32.mrf.mxu0  ;;  %v11441_v15 = vpop.f32.mrf.mxu1  ;;  %v11634_v35 = vld [vmem:[#allocation23 + $0x328] sm:$0xff] }
 0xa19   :  { %v11526_v13 = vmax.f32 %v11439_v54, 0.0  ;;  %v17226_v56 = vpack.c.bf16 %v11525_v18, %v11525_v18  ;;  %v15038_v7 = vcombine.high %v11630_v48, %v11634_v35  ;;  %v11622_v22 = vld [vmem:[#allocation23 + $0x2c8] sm:$0xff]  ;;  %v15037_v18 = vcombine.low %v11630_v48, %v11634_v35  ;;  %v11575_v35 = vld [vmem:[#allocation23 + $0x150] sm:$0xff] }
 0xa1a   :  { %v11626_v54 = vld [vmem:[#allocation23 + $0x2e8] sm:$0xff] }
 0xa1b   :  { %v17224_v51 = vpack.c.bf16 %v11526_v13, %v11526_v13  ;;  %v15030_v63 = vcombine.high %v11622_v22, %v11626_v54  ;;  %v11614_v15 = vld [vmem:[#allocation23 + $0x288] sm:$0xff]  ;;  %v15029_v14 = vcombine.low %v11622_v22, %v11626_v54  ;;  %v14991_v22 = vcombine.low %v11583_v6, %v11587_v46 }
 0xa1c   :  { %v11618_v13 = vld [vmem:[#allocation23 + $0x2a8] sm:$0xff] }
 0xa1d   :  { %13143 = vmatprep.mubr.bf16.mxu0 %v17224_v51  ;;  %v15022_v21 = vcombine.high %v11614_v15, %v11618_v13  ;;  %v11706_v48 = vld [vmem:[#allocation23 + $0x568] sm:$0xff] }
 0xa1e   :  { %13144 = vmatmul.mubr.bf16.vlgmr.msra.gmra.mxu0 %v17226_v56  ;;  %v11674_v41 = vld [vmem:[#allocation23 + $0x468] sm:$0xff] }
 0xa1f   :  { %13194 = vmatpush1.bf16.msra.mxu0 %v14997_v62  ;;  %13225 = vmatprep.mubr.bf16.mxu0 %v17224_v51  ;;  %v14958_v62 = vcombine.high %v11550_v5, %v11554_v45 }
 0xa20   :  { %13195 = vmatprep.subr.bf16.mxu0 %v14990_v32  ;;  %v11606_v32 = vld [vmem:[#allocation23 + $0x248] sm:$0xff] }
 0xa23   :  { %13196 = vmatpush1.bf16.msra.mxu0 %v14989_v9  ;;  %v15021_v9 = vcombine.low %v11614_v15, %v11618_v13  ;;  %v11698_v15 = vld [vmem:[#allocation23 + $0x528] sm:$0xff]  ;;  %v11567_v13 = vld [vmem:[#allocation23 + $0x110] sm:$0xff] }
 0xa24   :  { %13197 = vmatprep.subr.bf16.mxu0 %v14982_v57  ;;  %v15014_v57 = vcombine.high %v11606_v32, %v11610_v49 }
 0xa27   :  { %13198 = vmatpush1.bf16.msra.mxu0 %v14981_v27  ;;  %v11602_v27 = vld [vmem:[#allocation23 + $0x228] sm:$0xff] }
 0xa28   :  { %13199 = vmatprep.subr.bf16.mxu0 %v14974_v29  ;;  %v15006_v45 = vcombine.high %v11598_v17, %v11602_v27  ;;  %v15005_v58 = vcombine.low %v11598_v17, %v11602_v27 }
 0xa2b   :  { %13200 = vmatpush1.bf16.msra.mxu0 %v14973_v38  ;;  %v15013_v38 = vcombine.low %v11606_v32, %v11610_v49  ;;  %v11686_v32 = vld [vmem:[#allocation23 + $0x4c8] sm:$0xff] }
 0xa2c   :  { %13201 = vmatprep.subr.bf16.mxu0 %v14966_v3  ;;  %v11690_v49 = vld [vmem:[#allocation23 + $0x4e8] sm:$0xff] }
 0xa2d   :  { %v15094_v17 = vcombine.high %v11686_v32, %v11690_v49 }
 0xa2f   :  { %13202 = vmatpush1.bf16.msra.mxu0 %v14965_v1 }
 0xa30   :  { %13203 = vmatprep.subr.bf16.mxu0 %v14958_v62 }
 0xa33   :  { %13204 = vmatpush1.bf16.msra.mxu0 %v14957_v55 }
 0xa34   :  { %13205 = vmatprep.subr.bf16.mxu0 %v14950_v31 }
 0xa37   :  { %13206 = vmatpush1.bf16.msra.mxu0 %v14949_v0 }
 0xa38   :  { %13207 = vmatprep.subr.bf16.mxu0 %v14942_v10 }
 0xa3b   :  { %13208 = vmatpush1.bf16.msra.mxu0 %v14941_v4  ;;  %v11710_v4 = vld [vmem:[#allocation23 + $0x588] sm:$0xff] }
 0xa3c   :  { %13209 = vmatprep.subr.bf16.mxu0 %v15062_v23  ;;  %v11714_v23 = vld [vmem:[#allocation23 + $0x5a8] sm:$0xff] }
 0xa3d   :  { %v15118_v36 = vcombine.high %v11710_v4, %v11714_v23 }
 0xa3f   :  { %13210 = vmatpush2.bf16.msra.mxu0 %v15061_v20 }
 0xa40   :  { %13211 = vmatprep.subr.bf16.mxu0 %v15054_v59 }
 0xa43   :  { %13212 = vmatpush2.bf16.msra.mxu0 %v15053_v19  ;;  %v14992_v19 = vcombine.high %v11583_v6, %v11587_v46 }
 0xa44   :  { %13213 = vmatprep.subr.bf16.mxu0 %v15046_v52  ;;  %v11702_v52 = vld [vmem:[#allocation23 + $0x548] sm:$0xff] }
 0xa45   :  { %v15110_v54 = vcombine.high %v11702_v52, %v11706_v48 }
 0xa47   :  { %13214 = vmatpush2.bf16.msra.mxu0 %v15045_v12  ;;  %v11579_v12 = vld [vmem:[#allocation23 + $0x170] sm:$0xff] }
 0xa48   :  { %13215 = vmatprep.subr.bf16.mxu0 %v15038_v7  ;;  %v15117_v7 = vcombine.low %v11710_v4, %v11714_v23  ;;  %v14983_v25 = vcombine.low %v11575_v35, %v11579_v12 }
 0xa4b   :  { %13216 = vmatpush2.bf16.msra.mxu0 %v15037_v18  ;;  %v14984_v18 = vcombine.high %v11575_v35, %v11579_v12 }
 0xa4c   :  { %13217 = vmatprep.subr.bf16.mxu0 %v15030_v63  ;;  %v11694_v63 = vld [vmem:[#allocation23 + $0x508] sm:$0xff] }
 0xa4d   :  { %v15102_v43 = vcombine.high %v11694_v63, %v11698_v15 }
 0xa4f   :  { %13218 = vmatpush2.bf16.msra.mxu0 %v15029_v14  ;;  %v11571_v14 = vld [vmem:[#allocation23 + $0x130] sm:$0xff] }
 0xa50   :  { %13219 = vmatprep.subr.bf16.mxu0 %v15022_v21  ;;  %v15109_v21 = vcombine.low %v11702_v52, %v11706_v48  ;;  %v11659_v52 = vld [vmem:[#allocation23 + $0x3f0] sm:$0xff] }
 0xa52   :  { %v11477_v29 = vpop.f32.mrf.mxu0  ;;  %v11518_v24 = vpop.f32.mrf.mxu1 }
 0xa53   :  { %v11478_v28 = vadd.f32 %v11477_v29, %v10684_v26  ;;  %13220 = vmatpush2.bf16.msra.mxu0 %v15021_v9  ;;  %v11559_v26 = vld [vmem:[#allocation23 + $0xd0] sm:$0xff]  ;;  %v11678_v29 = vld [vmem:[#allocation23 + $0x488] sm:$0xff] }
 0xa54   :  { %v11479_v3 = vpop.f32.mrf.mxu0  ;;  %v11520_v5 = vpop.f32.mrf.mxu1  ;;  %13221 = vmatprep.subr.bf16.mxu0 %v15014_v57  ;;  %v11563_v9 = vld [vmem:[#allocation23 + $0xf0] sm:$0xff]  ;;  %v15101_v57 = vcombine.low %v11694_v63, %v11698_v15 }
 0xa55   :  { %v11519_v1 = vadd.f32 %v11518_v24, %v11478_v28  ;;  %v11480_v62 = vadd.f32 %v11479_v3, %v10688_v34  ;;  %v14975_v34 = vcombine.low %v11567_v13, %v11571_v14  ;;  %v14968_v27 = vcombine.high %v11559_v26, %v11563_v9  ;;  %v11682_v24 = vld [vmem:[#allocation23 + $0x4a8] sm:$0xff]  ;;  %v11551_v28 = vld [vmem:[#allocation23 + $0x90] sm:$0xff] }
 0xa56   :  { %v11481_v55 = vpop.f32.mrf.mxu0  ;;  %v11522_v31 = vpop.f32.mrf.mxu1  ;;  %v15093_v3 = vcombine.low %v11686_v32, %v11690_v49  ;;  %v11651_v63 = vld [vmem:[#allocation23 + $0x3b0] sm:$0xff] }
 0xa57   :  { %v11521_v33 = vadd.f32 %v11520_v5, %v11480_v62  ;;  %13222 = vmatpush2.bf16.msra.mxu0 %v15013_v38  ;;  %v11527_v40 = vmax.f32 %v11519_v1, 0.0  ;;  %v11555_v38 = vld [vmem:[#allocation23 + $0xb0] sm:$0xff]  ;;  %v14967_v5 = vcombine.low %v11559_v26, %v11563_v9  ;;  %v11670_v62 = vld [vmem:[#allocation23 + $0x448] sm:$0xff]  ;;  %v15085_v31 = vcombine.low %v11678_v29, %v11682_v24 }
 0xa58   :  { %v11482_v0 = vpop.f32.mrf.mxu0  ;;  %v11523_v10 = vpop.f32.mrf.mxu1  ;;  %13223 = vmatprep.subr.bf16.mxu0 %v15006_v45  ;;  %v15086_v45 = vcombine.high %v11678_v29, %v11682_v24  ;;  %v14960_v1 = vcombine.high %v11551_v28, %v11555_v38  ;;  %v11547_v55 = vld [vmem:[#allocation23 + $0x70] sm:$0xff]  ;;  %v15077_v4 = vcombine.low %v11670_v62, %v11674_v41 }
 0xa59   :  { %v11528_v8 = vmax.f32 %v11521_v33, 0.0  ;;  %v17240_v59 = vpack.c.bf16 %v11527_v40, %v11527_v40  ;;  %v14959_v33 = vcombine.low %v11551_v28, %v11555_v38  ;;  %v14952_v40 = vcombine.high %v11543_v53, %v11547_v55  ;;  %v11662_v0 = vld [vmem:[#allocation23 + $0x408] sm:$0xff]  ;;  %v11643_v32 = vld [vmem:[#allocation23 + $0x370] sm:$0xff] }
 0xa5a   :  { %v11666_v10 = vld [vmem:[#allocation23 + $0x428] sm:$0xff]  ;;  %v14951_v23 = vcombine.low %v11543_v53, %v11547_v55  ;;  %v11635_v29 = vld [vmem:[#allocation23 + $0x330] sm:$0xff] }
 0xa5b   :  { %v17238_v20 = vpack.c.bf16 %v11528_v8, %v11528_v8  ;;  %13224 = vmatpush2.bf16.msra.mxu0 %v15005_v58  ;;  %v15078_v58 = vcombine.high %v11670_v62, %v11674_v41  ;;  %v11539_v8 = vld [vmem:[#allocation23 + $0x30] sm:$0xff]  ;;  %v15070_v6 = vcombine.high %v11662_v0, %v11666_v10  ;;  %v15069_v48 = vcombine.low %v11662_v0, %v11666_v10 }
 0xa5c   :  { %13275 = vmatprep.subr.bf16.mxu0 %v15000_v42  ;;  %v11535_v42 = vld [vmem:[#allocation23 + $0x10] sm:$0xff] }
 0xa5d   :  { %13184 = vmatprep.mubr.bf16.mxu1 %v17238_v20  ;;  %v14944_v46 = vcombine.high %v11535_v42, %v11539_v8  ;;  %v14943_v35 = vcombine.low %v11535_v42, %v11539_v8  ;;  %v11627_v62 = vld [vmem:[#allocation23 + $0x2f0] sm:$0xff] }
 0xa5e   :  { %13185 = vmatmul.mubr.bf16.vlgmr.msra.gmra.mxu1 %v17240_v59  ;;  %13226 = vmatmul.mubr.bf16.vlgmr.msra.gmra.mxu0 %v17226_v56  ;;  %v11619_v0 = vld [vmem:[#allocation23 + $0x2b0] sm:$0xff] }
 0xa5f   :  { %13235 = vmatpush1.bf16.msra.mxu1 %v15125_v50  ;;  %13266 = vmatprep.mubr.bf16.mxu1 %v17238_v20  ;;  %v14976_v50 = vcombine.high %v11567_v13, %v11571_v14 }
 0xa60   :  { %13276 = vmatpush1.bf16.msra.mxu0 %v14999_v39  ;;  %13307 = vmatprep.mubr.bf16.mxu0 %v17224_v51  ;;  %v11782_v39 = vld [vmem:[#allocation23 + $0x7c8] sm:$0xff] }
 0xa61   :  { %13236 = vmatprep.subr.bf16.mxu1 %v15118_v36  ;;  %13277 = vmatprep.subr.bf16.mxu0 %v14992_v19  ;;  %v11786_v36 = vld [vmem:[#allocation23 + $0x7e8] sm:$0xff]  ;;  %v11655_v19 = vld [vmem:[#allocation23 + $0x3d0] sm:$0xff] }
 0xa62   :  { %v15190_v12 = vcombine.high %v11782_v39, %v11786_v36  ;;  %v15189_v15 = vcombine.low %v11782_v39, %v11786_v36  ;;  %v15063_v13 = vcombine.low %v11655_v19, %v11659_v52  ;;  %v11611_v39 = vld [vmem:[#allocation23 + $0x270] sm:$0xff] }
 0xa63   :  { %13237 = vmatpush1.bf16.msra.mxu1 %v15117_v7  ;;  %v15064_v7 = vcombine.high %v11655_v19, %v11659_v52 }
 0xa64   :  { %13278 = vmatpush1.bf16.msra.mxu0 %v14991_v22  ;;  %13238 = vmatprep.subr.bf16.mxu1 %v15110_v54  ;;  %v11774_v22 = vld [vmem:[#allocation23 + $0x788] sm:$0xff] }
 0xa65   :  { %13279 = vmatprep.subr.bf16.mxu0 %v14984_v18  ;;  %v11778_v54 = vld [vmem:[#allocation23 + $0x7a8] sm:$0xff]  ;;  %v11647_v18 = vld [vmem:[#allocation23 + $0x390] sm:$0xff] }
 0xa66   :  { %v15182_v14 = vcombine.high %v11774_v22, %v11778_v54  ;;  %v15181_v49 = vcombine.low %v11774_v22, %v11778_v54  ;;  %v15055_v26 = vcombine.low %v11647_v18, %v11651_v63  ;;  %v11603_v22 = vld [vmem:[#allocation23 + $0x230] sm:$0xff] }
 0xa67   :  { %13239 = vmatpush1.bf16.msra.mxu1 %v15109_v21  ;;  %v15056_v21 = vcombine.high %v11647_v18, %v11651_v63 }
 0xa68   :  { %13280 = vmatpush1.bf16.msra.mxu0 %v14983_v25  ;;  %13240 = vmatprep.subr.bf16.mxu1 %v15102_v43  ;;  %v11766_v25 = vld [vmem:[#allocation23 + $0x748] sm:$0xff] }
 0xa69   :  { %13281 = vmatprep.subr.bf16.mxu0 %v14976_v50  ;;  %v11770_v43 = vld [vmem:[#allocation23 + $0x768] sm:$0xff]  ;;  %v11639_v50 = vld [vmem:[#allocation23 + $0x350] sm:$0xff] }
 0xa6a   :  { %v15174_v9 = vcombine.high %v11766_v25, %v11770_v43  ;;  %v15173_v24 = vcombine.low %v11766_v25, %v11770_v43  ;;  %v15047_v28 = vcombine.low %v11639_v50, %v11643_v32  ;;  %v11596_v25 = vld [vmem:[#allocation23 + $0x1f8] sm:$0xff] }
 0xa6b   :  { %13241 = vmatpush1.bf16.msra.mxu1 %v15101_v57  ;;  %v15048_v57 = vcombine.high %v11639_v50, %v11643_v32 }
 0xa6c   :  { %13282 = vmatpush1.bf16.msra.mxu0 %v14975_v34  ;;  %13242 = vmatprep.subr.bf16.mxu1 %v15094_v17  ;;  %v11758_v34 = vld [vmem:[#allocation23 + $0x708] sm:$0xff] }
 0xa6d   :  { %13283 = vmatprep.subr.bf16.mxu0 %v14968_v27  ;;  %v11762_v17 = vld [vmem:[#allocation23 + $0x728] sm:$0xff]  ;;  %v11631_v27 = vld [vmem:[#allocation23 + $0x310] sm:$0xff] }
 0xa6e   :  { %v15166_v38 = vcombine.high %v11758_v34, %v11762_v17  ;;  %v15165_v41 = vcombine.low %v11758_v34, %v11762_v17  ;;  %v15039_v53 = vcombine.low %v11631_v27, %v11635_v29  ;;  %v11584_v34 = vld [vmem:[#allocation23 + $0x198] sm:$0xff] }
 0xa6f   :  { %13243 = vmatpush1.bf16.msra.mxu1 %v15093_v3  ;;  %v15040_v3 = vcombine.high %v11631_v27, %v11635_v29  ;;  %v11588_v17 = vld [vmem:[#allocation23 + $0x1b8] sm:$0xff] }
 0xa70   :  { %13284 = vmatpush1.bf16.msra.mxu0 %v14967_v5  ;;  %13244 = vmatprep.subr.bf16.mxu1 %v15086_v45  ;;  %v11750_v5 = vld [vmem:[#allocation23 + $0x6c8] sm:$0xff] }
 0xa71   :  { %13285 = vmatprep.subr.bf16.mxu0 %v14960_v1  ;;  %v11754_v45 = vld [vmem:[#allocation23 + $0x6e8] sm:$0xff]  ;;  %v11623_v1 = vld [vmem:[#allocation23 + $0x2d0] sm:$0xff] }
 0xa72   :  { %v15158_v55 = vcombine.high %v11750_v5, %v11754_v45  ;;  %v15157_v10 = vcombine.low %v11750_v5, %v11754_v45  ;;  %v15031_v42 = vcombine.low %v11623_v1, %v11627_v62  ;;  %v11580_v5 = vld [vmem:[#allocation23 + $0x178] sm:$0xff] }
 0xa73   :  { %13245 = vmatpush1.bf16.msra.mxu1 %v15085_v31  ;;  %v15032_v31 = vcombine.high %v11623_v1, %v11627_v62  ;;  %v14993_v1 = vcombine.low %v11584_v34, %v11588_v17 }
 0xa74   :  { %13286 = vmatpush1.bf16.msra.mxu0 %v14959_v33  ;;  %13246 = vmatprep.subr.bf16.mxu1 %v15078_v58  ;;  %v11742_v33 = vld [vmem:[#allocation23 + $0x688] sm:$0xff] }
 0xa75   :  { %13287 = vmatprep.subr.bf16.mxu0 %v14952_v40  ;;  %v11746_v58 = vld [vmem:[#allocation23 + $0x6a8] sm:$0xff]  ;;  %v11615_v40 = vld [vmem:[#allocation23 + $0x290] sm:$0xff] }
 0xa76   :  { %v15150_v8 = vcombine.high %v11742_v33, %v11746_v58  ;;  %v15149_v36 = vcombine.low %v11742_v33, %v11746_v58  ;;  %v15023_v19 = vcombine.low %v11615_v40, %v11619_v0  ;;  %v11572_v33 = vld [vmem:[#allocation23 + $0x138] sm:$0xff] }
 0xa77   :  { %13247 = vmatpush1.bf16.msra.mxu1 %v15077_v4  ;;  %v15024_v4 = vcombine.high %v11615_v40, %v11619_v0 }
 0xa78   :  { %13288 = vmatpush1.bf16.msra.mxu0 %v14951_v23  ;;  %13248 = vmatprep.subr.bf16.mxu1 %v15070_v6  ;;  %v11734_v23 = vld [vmem:[#allocation23 + $0x648] sm:$0xff] }
 0xa79   :  { %13289 = vmatprep.subr.bf16.mxu0 %v14944_v46  ;;  %v11738_v6 = vld [vmem:[#allocation23 + $0x668] sm:$0xff]  ;;  %v11607_v46 = vld [vmem:[#allocation23 + $0x250] sm:$0xff] }
 0xa7a   :  { %v15142_v52 = vcombine.high %v11734_v23, %v11738_v6  ;;  %v15141_v54 = vcombine.low %v11734_v23, %v11738_v6  ;;  %v15015_v18 = vcombine.low %v11607_v46, %v11611_v39  ;;  %v11564_v23 = vld [vmem:[#allocation23 + $0xf8] sm:$0xff] }
 0xa7b   :  { %13249 = vmatpush1.bf16.msra.mxu1 %v15069_v48  ;;  %v15016_v48 = vcombine.high %v11607_v46, %v11611_v39 }
 0xa7c   :  { %13290 = vmatpush1.bf16.msra.mxu0 %v14943_v35  ;;  %13250 = vmatprep.subr.bf16.mxu1 %v15190_v12  ;;  %v11726_v35 = vld [vmem:[#allocation23 + $0x608] sm:$0xff] }
 0xa7d   :  { %13291 = vmatprep.subr.bf16.mxu0 %v15064_v7  ;;  %v11730_v12 = vld [vmem:[#allocation23 + $0x628] sm:$0xff]  ;;  %v11599_v7 = vld [vmem:[#allocation23 + $0x210] sm:$0xff] }
 0xa7e   :  { %v15134_v63 = vcombine.high %v11726_v35, %v11730_v12  ;;  %v15133_v43 = vcombine.low %v11726_v35, %v11730_v12  ;;  %v15007_v50 = vcombine.low %v11599_v7, %v11603_v22 }
 0xa7f   :  { %13251 = vmatpush2.bf16.msra.mxu1 %v15189_v15  ;;  %v15008_v15 = vcombine.high %v11599_v7, %v11603_v22 }
 0xa80   :  { %13292 = vmatpush2.bf16.msra.mxu0 %v15063_v13  ;;  %13252 = vmatprep.subr.bf16.mxu1 %v15182_v14  ;;  %v11719_v13 = vld [vmem:[#allocation23 + $0x5d0] sm:$0xff] }
 0xa81   :  { %13293 = vmatprep.subr.bf16.mxu0 %v15056_v21  ;;  %v11723_v14 = vld [vmem:[#allocation23 + $0x5f0] sm:$0xff]  ;;  %v11592_v21 = vld [vmem:[#allocation23 + $0x1d8] sm:$0xff] }
 0xa82   :  { %v15128_v32 = vcombine.high %v11719_v13, %v11723_v14  ;;  %v15001_v27 = vcombine.low %v11592_v21, %v11596_v25 }
 0xa83   :  { %13253 = vmatpush2.bf16.msra.mxu1 %v15181_v49  ;;  %v15002_v49 = vcombine.high %v11592_v21, %v11596_v25 }
 0xa84   :  { %13294 = vmatpush2.bf16.msra.mxu0 %v15055_v26  ;;  %13254 = vmatprep.subr.bf16.mxu1 %v15174_v9  ;;  %v11711_v26 = vld [vmem:[#allocation23 + $0x590] sm:$0xff] }
 0xa85   :  { %13295 = vmatprep.subr.bf16.mxu0 %v15048_v57  ;;  %v11715_v9 = vld [vmem:[#allocation23 + $0x5b0] sm:$0xff]  ;;  %v15127_v57 = vcombine.low %v11719_v13, %v11723_v14 }
 0xa86   :  { %v15120_v29 = vcombine.high %v11711_v26, %v11715_v9  ;;  %v15119_v45 = vcombine.low %v11711_v26, %v11715_v9 }
 0xa87   :  { %13255 = vmatpush2.bf16.msra.mxu1 %v15173_v24  ;;  %v11703_v24 = vld [vmem:[#allocation23 + $0x550] sm:$0xff] }
 0xa88   :  { %13296 = vmatpush2.bf16.msra.mxu0 %v15047_v28  ;;  %13256 = vmatprep.subr.bf16.mxu1 %v15166_v38  ;;  %v11707_v28 = vld [vmem:[#allocation23 + $0x570] sm:$0xff]  ;;  %v14994_v38 = vcombine.high %v11584_v34, %v11588_v17 }
 0xa89   :  { %13297 = vmatprep.subr.bf16.mxu0 %v15040_v3  ;;  %v11576_v3 = vld [vmem:[#allocation23 + $0x158] sm:$0xff]  ;;  %v15112_v62 = vcombine.high %v11703_v24, %v11707_v28  ;;  %v15111_v58 = vcombine.low %v11703_v24, %v11707_v28  ;;  %v11783_v17 = vld [vmem:[#allocation23 + $0x7d0] sm:$0xff] }
 0xa8a   :  { %v14985_v40 = vcombine.low %v11576_v3, %v11580_v5  ;;  %v11660_v24 = vld [vmem:[#allocation23 + $0x3f8] sm:$0xff] }
 0xa8b   :  { %13257 = vmatpush2.bf16.msra.mxu1 %v15165_v41  ;;  %v14986_v41 = vcombine.high %v11576_v3, %v11580_v5 }
 0xa8c   :  { %13298 = vmatpush2.bf16.msra.mxu0 %v15039_v53  ;;  %13258 = vmatprep.subr.bf16.mxu1 %v15158_v55  ;;  %v11695_v53 = vld [vmem:[#allocation23 + $0x510] sm:$0xff] }
 0xa8d   :  { %13299 = vmatprep.subr.bf16.mxu0 %v15032_v31  ;;  %v11699_v55 = vld [vmem:[#allocation23 + $0x530] sm:$0xff]  ;;  %v11568_v31 = vld [vmem:[#allocation23 + $0x118] sm:$0xff] }
 0xa8e   :  { %v15104_v0 = vcombine.high %v11695_v53, %v11699_v55  ;;  %v14977_v6 = vcombine.low %v11568_v31, %v11572_v33 }
 0xa8f   :  { %13259 = vmatpush2.bf16.msra.mxu1 %v15157_v10  ;;  %v14978_v10 = vcombine.high %v11568_v31, %v11572_v33 }
 0xa90   :  { %13300 = vmatpush2.bf16.msra.mxu0 %v15031_v42  ;;  %13260 = vmatprep.subr.bf16.mxu1 %v15150_v8  ;;  %v11687_v42 = vld [vmem:[#allocation23 + $0x4d0] sm:$0xff] }
 0xa91   :  { %13301 = vmatprep.subr.bf16.mxu0 %v15024_v4  ;;  %v11691_v8 = vld [vmem:[#allocation23 + $0x4f0] sm:$0xff]  ;;  %v11560_v4 = vld [vmem:[#allocation23 + $0xd8] sm:$0xff] }
 0xa92   :  { %v15096_v46 = vcombine.high %v11687_v42, %v11691_v8  ;;  %v14970_v39 = vcombine.high %v11560_v4, %v11564_v23  ;;  %v15095_v35 = vcombine.low %v11687_v42, %v11691_v8  ;;  %v14969_v12 = vcombine.low %v11560_v4, %v11564_v23 }
 0xa93   :  { %13261 = vmatpush2.bf16.msra.mxu1 %v15149_v36  ;;  %v11679_v36 = vld [vmem:[#allocation23 + $0x490] sm:$0xff] }
 0xa94   :  { %13302 = vmatpush2.bf16.msra.mxu0 %v15023_v19  ;;  %13262 = vmatprep.subr.bf16.mxu1 %v15142_v52  ;;  %v11683_v19 = vld [vmem:[#allocation23 + $0x4b0] sm:$0xff]  ;;  %v11552_v52 = vld [vmem:[#allocation23 + $0x98] sm:$0xff] }
 0xa95   :  { %13303 = vmatprep.subr.bf16.mxu0 %v15016_v48  ;;  %v11556_v48 = vld [vmem:[#allocation23 + $0xb8] sm:$0xff]  ;;  %v15088_v7 = vcombine.high %v11679_v36, %v11683_v19  ;;  %v15087_v13 = vcombine.low %v11679_v36, %v11683_v19 }
 0xa96   :  { %v14962_v22 = vcombine.high %v11552_v52, %v11556_v48  ;;  %v14961_v14 = vcombine.low %v11552_v52, %v11556_v48 }
 0xa97   :  { %13263 = vmatpush2.bf16.msra.mxu1 %v15141_v54  ;;  %v11671_v54 = vld [vmem:[#allocation23 + $0x450] sm:$0xff] }
 0xa98   :  { %13304 = vmatpush2.bf16.msra.mxu0 %v15015_v18  ;;  %13264 = vmatprep.subr.bf16.mxu1 %v15134_v63  ;;  %v11675_v18 = vld [vmem:[#allocation23 + $0x470] sm:$0xff]  ;;  %v11544_v63 = vld [vmem:[#allocation23 + $0x58] sm:$0xff] }
 0xa99   :  { %13305 = vmatprep.subr.bf16.mxu0 %v15008_v15  ;;  %v11548_v15 = vld [vmem:[#allocation23 + $0x78] sm:$0xff]  ;;  %v15080_v21 = vcombine.high %v11671_v54, %v11675_v18  ;;  %v15079_v26 = vcombine.low %v11671_v54, %v11675_v18 }
 0xa9a   :  { %v14954_v25 = vcombine.high %v11544_v63, %v11548_v15  ;;  %v14953_v9 = vcombine.low %v11544_v63, %v11548_v15 }
 0xa9b   :  { %13265 = vmatpush2.bf16.msra.mxu1 %v15133_v43  ;;  %v11663_v43 = vld [vmem:[#allocation23 + $0x410] sm:$0xff] }
 0xa9c   :  { %13306 = vmatpush2.bf16.msra.mxu0 %v15007_v50  ;;  %13316 = vmatprep.subr.bf16.mxu1 %v15128_v32  ;;  %v11667_v50 = vld [vmem:[#allocation23 + $0x430] sm:$0xff]  ;;  %v11536_v32 = vld [vmem:[#allocation23 + $0x18] sm:$0xff] }
 0xa9d   :  { %13357 = vmatprep.subr.bf16.mxu0 %v15002_v49  ;;  %v11540_v49 = vld [vmem:[#allocation23 + $0x38] sm:$0xff]  ;;  %v15071_v28 = vcombine.low %v11663_v43, %v11667_v50 }
 0xa9e   :  { %13267 = vmatmul.mubr.bf16.vlgmr.msra.gmra.mxu1 %v17240_v59  ;;  %v14946_v34 = vcombine.high %v11536_v32, %v11540_v49 }
 0xa9f   :  { %13308 = vmatmul.mubr.bf16.vlgmr.msra.gmra.mxu0 %v17226_v56  ;;  %13317 = vmatpush1.bf16.msra.mxu1 %v15127_v57  ;;  %v15072_v57 = vcombine.high %v11663_v43, %v11667_v50 }
 0xaa0   :  { %13348 = vmatprep.mubr.bf16.mxu1 %v17238_v20  ;;  %13358 = vmatpush1.bf16.msra.mxu0 %v15001_v27  ;;  %v11787_v27 = vld [vmem:[#allocation23 + $0x7f0] sm:$0xff] }
 0xaa1   :  { %13389 = vmatprep.mubr.bf16.mxu0 %v17224_v51  ;;  %13318 = vmatprep.subr.bf16.mxu1 %v15120_v29  ;;  %v15103_v51 = vcombine.low %v11695_v53, %v11699_v55  ;;  %v11656_v29 = vld [vmem:[#allocation23 + $0x3d8] sm:$0xff]  ;;  %v15192_v3 = vcombine.high %v11783_v17, %v11787_v27  ;;  %v15191_v53 = vcombine.low %v11783_v17, %v11787_v27 }
 0xaa2   :  { %13359 = vmatprep.subr.bf16.mxu0 %v14994_v38  ;;  %v14945_v38 = vcombine.low %v11536_v32, %v11540_v49  ;;  %v15066_v5 = vcombine.high %v11656_v29, %v11660_v24  ;;  %v15065_v55 = vcombine.low %v11656_v29, %v11660_v24 }
 0xaa3   :  { %13319 = vmatpush1.bf16.msra.mxu1 %v15119_v45  ;;  %v11775_v45 = vld [vmem:[#allocation23 + $0x790] sm:$0xff] }
 0xaa4   :  { %13360 = vmatpush1.bf16.msra.mxu0 %v14993_v1  ;;  %13320 = vmatprep.subr.bf16.mxu1 %v15112_v62  ;;  %v11779_v1 = vld [vmem:[#allocation23 + $0x7b0] sm:$0xff]  ;;  %v11648_v62 = vld [vmem:[#allocation23 + $0x398] sm:$0xff] }
 0xaa5   :  { %13361 = vmatprep.subr.bf16.mxu0 %v14986_v41  ;;  %v11652_v41 = vld [vmem:[#allocation23 + $0x3b8] sm:$0xff]  ;;  %v15184_v31 = vcombine.high %v11775_v45, %v11779_v1  ;;  %v15183_v42 = vcombine.low %v11775_v45, %v11779_v1 }
 0xaa6   :  { %v15058_v33 = vcombine.high %v11648_v62, %v11652_v41  ;;  %v15057_v8 = vcombine.low %v11648_v62, %v11652_v41 }
 0xaa7   :  { %13321 = vmatpush1.bf16.msra.mxu1 %v15111_v58  ;;  %v11767_v58 = vld [vmem:[#allocation23 + $0x750] sm:$0xff] }
 0xaa8   :  { %13362 = vmatpush1.bf16.msra.mxu0 %v14985_v40  ;;  %13322 = vmatprep.subr.bf16.mxu1 %v15104_v0  ;;  %v11771_v40 = vld [vmem:[#allocation23 + $0x770] sm:$0xff]  ;;  %v11640_v0 = vld [vmem:[#allocation23 + $0x358] sm:$0xff] }
 0xaa9   :  { %13363 = vmatprep.subr.bf16.mxu0 %v14978_v10  ;;  %v11644_v10 = vld [vmem:[#allocation23 + $0x378] sm:$0xff]  ;;  %v15176_v4 = vcombine.high %v11767_v58, %v11771_v40  ;;  %v15175_v36 = vcombine.low %v11767_v58, %v11771_v40 }
 0xaaa   :  { %v15050_v23 = vcombine.high %v11640_v0, %v11644_v10  ;;  %v15049_v19 = vcombine.low %v11640_v0, %v11644_v10  ;;  %v11712_v40 = vld [vmem:[#allocation23 + $0x598] sm:$0xff] }
 0xaab   :  { %13323 = vmatpush1.bf16.msra.mxu1 %v15103_v51  ;;  %v11759_v51 = vld [vmem:[#allocation23 + $0x710] sm:$0xff]  ;;  %v11716_v0 = vld [vmem:[#allocation23 + $0x5b8] sm:$0xff] }
 0xaac   :  { %13364 = vmatpush1.bf16.msra.mxu0 %v14977_v6  ;;  %13324 = vmatprep.subr.bf16.mxu1 %v15096_v46  ;;  %v11763_v6 = vld [vmem:[#allocation23 + $0x730] sm:$0xff]  ;;  %v11632_v46 = vld [vmem:[#allocation23 + $0x318] sm:$0xff] }
 0xaad   :  { %13365 = vmatprep.subr.bf16.mxu0 %v14970_v39  ;;  %v11636_v39 = vld [vmem:[#allocation23 + $0x338] sm:$0xff]  ;;  %v15168_v52 = vcombine.high %v11759_v51, %v11763_v6  ;;  %v15167_v54 = vcombine.low %v11759_v51, %v11763_v6  ;;  %v15121_v51 = vcombine.low %v11712_v40, %v11716_v0 }
 0xaae   :  { %v15042_v48 = vcombine.high %v11632_v46, %v11636_v39  ;;  %v15041_v18 = vcombine.low %v11632_v46, %v11636_v39  ;;  %v11696_v39 = vld [vmem:[#allocation23 + $0x518] sm:$0xff] }
 0xaaf   :  { %13325 = vmatpush1.bf16.msra.mxu1 %v15095_v35  ;;  %v11751_v35 = vld [vmem:[#allocation23 + $0x6d0] sm:$0xff] }
 0xab0   :  { %13366 = vmatpush1.bf16.msra.mxu0 %v14969_v12  ;;  %13326 = vmatprep.subr.bf16.mxu1 %v15088_v7  ;;  %v11755_v12 = vld [vmem:[#allocation23 + $0x6f0] sm:$0xff]  ;;  %v11624_v7 = vld [vmem:[#allocation23 + $0x2d8] sm:$0xff] }
 0xab1   :  { %13367 = vmatprep.subr.bf16.mxu0 %v14962_v22  ;;  %v11628_v22 = vld [vmem:[#allocation23 + $0x2f8] sm:$0xff]  ;;  %v15160_v63 = vcombine.high %v11751_v35, %v11755_v12  ;;  %v15159_v43 = vcombine.low %v11751_v35, %v11755_v12 }
 0xab2   :  { %v15034_v15 = vcombine.high %v11624_v7, %v11628_v22  ;;  %v15033_v50 = vcombine.low %v11624_v7, %v11628_v22  ;;  %v11688_v12 = vld [vmem:[#allocation23 + $0x4d8] sm:$0xff] }
 0xab3   :  { %13327 = vmatpush1.bf16.msra.mxu1 %v15087_v13  ;;  %v11743_v13 = vld [vmem:[#allocation23 + $0x690] sm:$0xff]  ;;  %v11692_v7 = vld [vmem:[#allocation23 + $0x4f8] sm:$0xff] }
 0xab4   :  { %13368 = vmatpush1.bf16.msra.mxu0 %v14961_v14  ;;  %13328 = vmatprep.subr.bf16.mxu1 %v15080_v21  ;;  %v11747_v14 = vld [vmem:[#allocation23 + $0x6b0] sm:$0xff]  ;;  %v11616_v21 = vld [vmem:[#allocation23 + $0x298] sm:$0xff]  ;;  %v15098_v22 = vcombine.high %v11688_v12, %v11692_v7 }
 0xab5   :  { %13369 = vmatprep.subr.bf16.mxu0 %v14954_v25  ;;  %v11620_v25 = vld [vmem:[#allocation23 + $0x2b8] sm:$0xff]  ;;  %v15152_v32 = vcombine.high %v11743_v13, %v11747_v14  ;;  %v15151_v17 = vcombine.low %v11743_v13, %v11747_v14 }
 0xab6   :  { %v15026_v49 = vcombine.high %v11616_v21, %v11620_v25  ;;  %v15025_v27 = vcombine.low %v11616_v21, %v11620_v25  ;;  %v11676_v13 = vld [vmem:[#allocation23 + $0x478] sm:$0xff] }
 0xab7   :  { %13329 = vmatpush1.bf16.msra.mxu1 %v15079_v26  ;;  %v11735_v26 = vld [vmem:[#allocation23 + $0x650] sm:$0xff]  ;;  %v11664_v25 = vld [vmem:[#allocation23 + $0x418] sm:$0xff] }
 0xab8   :  { %13370 = vmatpush1.bf16.msra.mxu0 %v14953_v9  ;;  %13330 = vmatprep.subr.bf16.mxu1 %v15072_v57  ;;  %v11739_v9 = vld [vmem:[#allocation23 + $0x670] sm:$0xff]  ;;  %v11608_v57 = vld [vmem:[#allocation23 + $0x258] sm:$0xff] }
 0xab9   :  { %13371 = vmatprep.subr.bf16.mxu0 %v14946_v34  ;;  %v11612_v34 = vld [vmem:[#allocation23 + $0x278] sm:$0xff]  ;;  %v15144_v29 = vcombine.high %v11735_v26, %v11739_v9  ;;  %v15143_v45 = vcombine.low %v11735_v26, %v11739_v9 }
 0xaba   :  { %v15018_v24 = vcombine.high %v11608_v57, %v11612_v34  ;;  %v15017_v1 = vcombine.low %v11608_v57, %v11612_v34  ;;  %v11788_v26 = vld [vmem:[#allocation23 + $0x7f8] sm:$0xff] }
 0xabb   :  { %13331 = vmatpush1.bf16.msra.mxu1 %v15071_v28  ;;  %v11727_v28 = vld [vmem:[#allocation23 + $0x610] sm:$0xff]  ;;  %v11776_v34 = vld [vmem:[#allocation23 + $0x798] sm:$0xff] }
 0xabc   :  { %13372 = vmatpush1.bf16.msra.mxu0 %v14945_v38  ;;  %13332 = vmatprep.subr.bf16.mxu1 %v15192_v3  ;;  %v11731_v38 = vld [vmem:[#allocation23 + $0x630] sm:$0xff]  ;;  %v11600_v3 = vld [vmem:[#allocation23 + $0x218] sm:$0xff] }
 0xabd   :  { %13373 = vmatprep.subr.bf16.mxu0 %v15066_v5  ;;  %v11604_v5 = vld [vmem:[#allocation23 + $0x238] sm:$0xff]  ;;  %v15136_v62 = vcombine.high %v11727_v28, %v11731_v38 }
 0xabe   :  { %v15010_v41 = vcombine.high %v11600_v3, %v11604_v5 }
 0xabf   :  { %13333 = vmatpush2.bf16.msra.mxu1 %v15191_v53  ;;  %v11720_v53 = vld [vmem:[#allocation23 + $0x5d8] sm:$0xff] }
 0xac0   :  { %13374 = vmatpush2.bf16.msra.mxu0 %v15065_v55  ;;  %13334 = vmatprep.subr.bf16.mxu1 %v15184_v31  ;;  %v11724_v55 = vld [vmem:[#allocation23 + $0x5f8] sm:$0xff]  ;;  %v15135_v31 = vcombine.low %v11727_v28, %v11731_v38 }
 0xac1   :  { %13375 = vmatprep.subr.bf16.mxu0 %v15058_v33  ;;  %v15009_v33 = vcombine.low %v11600_v3, %v11604_v5  ;;  %v15130_v58 = vcombine.high %v11720_v53, %v11724_v55  ;;  %v15129_v10 = vcombine.low %v11720_v53, %v11724_v55  ;;  %v11772_v28 = vld [vmem:[#allocation23 + $0x778] sm:$0xff] }
 0xac2   :  { %v11760_v5 = vld [vmem:[#allocation23 + $0x718] sm:$0xff] }
 0xac3   :  { %13335 = vmatpush2.bf16.msra.mxu1 %v15183_v42  ;;  %v15122_v42 = vcombine.high %v11712_v40, %v11716_v0  ;;  %v11756_v53 = vld [vmem:[#allocation23 + $0x6f8] sm:$0xff] }
 0xac4   :  { %13376 = vmatpush2.bf16.msra.mxu0 %v15057_v8  ;;  %13336 = vmatprep.subr.bf16.mxu1 %v15176_v4  ;;  %v11704_v8 = vld [vmem:[#allocation23 + $0x558] sm:$0xff] }
 0xac5   :  { %13377 = vmatprep.subr.bf16.mxu0 %v15050_v23  ;;  %v11708_v4 = vld [vmem:[#allocation23 + $0x578] sm:$0xff] }
 0xac6   :  { %v15114_v46 = vcombine.high %v11704_v8, %v11708_v4 }
 0xac7   :  { %13337 = vmatpush2.bf16.msra.mxu1 %v15175_v36  ;;  %v11700_v36 = vld [vmem:[#allocation23 + $0x538] sm:$0xff] }
 0xac8   :  { %13378 = vmatpush2.bf16.msra.mxu0 %v15049_v19  ;;  %13338 = vmatprep.subr.bf16.mxu1 %v15168_v52  ;;  %v15113_v52 = vcombine.low %v11704_v8, %v11708_v4  ;;  %v15106_v35 = vcombine.high %v11696_v39, %v11700_v36 }
 0xac9   :  { %13379 = vmatprep.subr.bf16.mxu0 %v15042_v48 }
 0xacb   :  { %13339 = vmatpush2.bf16.msra.mxu1 %v15167_v54  ;;  %v11680_v54 = vld [vmem:[#allocation23 + $0x498] sm:$0xff] }
 0xacc   :  { %13380 = vmatpush2.bf16.msra.mxu0 %v15041_v18  ;;  %13340 = vmatprep.subr.bf16.mxu1 %v15160_v63  ;;  %v15097_v18 = vcombine.low %v11688_v12, %v11692_v7 }
 0xacd   :  { %13381 = vmatprep.subr.bf16.mxu0 %v15034_v15  ;;  %v11672_v15 = vld [vmem:[#allocation23 + $0x458] sm:$0xff] }
 0xace   :  { %v15082_v21 = vcombine.high %v11672_v15, %v11676_v13 }
 0xacf   :  { %13341 = vmatpush2.bf16.msra.mxu1 %v15159_v43  ;;  %v11668_v43 = vld [vmem:[#allocation23 + $0x438] sm:$0xff] }
 0xad0   :  { %13382 = vmatpush2.bf16.msra.mxu0 %v15033_v50  ;;  %13342 = vmatprep.subr.bf16.mxu1 %v15152_v32  ;;  %v15081_v50 = vcombine.low %v11672_v15, %v11676_v13  ;;  %v15074_v32 = vcombine.high %v11664_v25, %v11668_v43  ;;  %v15073_v9 = vcombine.low %v11664_v25, %v11668_v43  ;;  %v16587_v43 = vmov 1983009808  }
 0xad1   :  { %13383 = vmatprep.subr.bf16.mxu0 %v15026_v49  ;;  %v11784_v49 = vld [vmem:[#allocation23 + $0x7d8] sm:$0xff] }
 0xad2   :  { %v15194_v57 = vcombine.high %v11784_v49, %v11788_v26 }
 0xad3   :  { %13343 = vmatpush2.bf16.msra.mxu1 %v15151_v17  ;;  %v11780_v17 = vld [vmem:[#allocation23 + $0x7b8] sm:$0xff] }
 0xad4   :  { %13384 = vmatpush2.bf16.msra.mxu0 %v15025_v27  ;;  %13344 = vmatprep.subr.bf16.mxu1 %v15144_v29  ;;  %v15193_v27 = vcombine.low %v11784_v49, %v11788_v26  ;;  %v15186_v29 = vcombine.high %v11776_v34, %v11780_v17  ;;  %v15185_v38 = vcombine.low %v11776_v34, %v11780_v17 }
 0xad5   :  { %13385 = vmatprep.subr.bf16.mxu0 %v15018_v24  ;;  %v11768_v24 = vld [vmem:[#allocation23 + $0x758] sm:$0xff] }
 0xad6   :  { %v15178_v3 = vcombine.high %v11768_v24, %v11772_v28 }
 0xad7   :  { %13345 = vmatpush2.bf16.msra.mxu1 %v15143_v45  ;;  %v11764_v45 = vld [vmem:[#allocation23 + $0x738] sm:$0xff] }
 0xad8   :  { %13386 = vmatpush2.bf16.msra.mxu0 %v15017_v1  ;;  %13346 = vmatprep.subr.bf16.mxu1 %v15136_v62  ;;  %v15177_v1 = vcombine.low %v11768_v24, %v11772_v28  ;;  %v15170_v62 = vcombine.high %v11760_v5, %v11764_v45  ;;  %v15169_v55 = vcombine.low %v11760_v5, %v11764_v45 }
 0xad9   :  { %13387 = vmatprep.subr.bf16.mxu0 %v15010_v41  ;;  %v11752_v41 = vld [vmem:[#allocation23 + $0x6d8] sm:$0xff] }
 0xada   :  { %v15161_v40 = vcombine.low %v11752_v41, %v11756_v53 }
 0xadb   :  { %13347 = vmatpush2.bf16.msra.mxu1 %v15135_v31  ;;  %v15162_v31 = vcombine.high %v11752_v41, %v11756_v53 }
 0xadc   :  { %13388 = vmatpush2.bf16.msra.mxu0 %v15009_v33  ;;  %13398 = vmatprep.subr.bf16.mxu1 %v15130_v58  ;;  %v11744_v33 = vld [vmem:[#allocation23 + $0x698] sm:$0xff] }
 0xadd   :  { %v11748_v58 = vld [vmem:[#allocation23 + $0x6b8] sm:$0xff] }
 0xade   :  { %13349 = vmatmul.mubr.bf16.vlgmr.msra.gmra.mxu1 %v17240_v59  ;;  %v17255_v23 = vpop.f32.mrf.mxu0  ;;  %v15154_v0 = vcombine.high %v11744_v33, %v11748_v58  ;;  %v15153_v8 = vcombine.low %v11744_v33, %v11748_v58 }
 0xadf   :  { %13390 = vmatmul.mubr.bf16.vlgmr.msra.gmra.mxu0 %v17226_v56  ;;  %13399 = vmatpush1.bf16.msra.mxu1 %v15129_v10  ;;  %v15105_v56 = vcombine.low %v11696_v39, %v11700_v36  ;;  %v11736_v10 = vld [vmem:[#allocation23 + $0x658] sm:$0xff] }
 0xae0   :  { %13430 = vmatprep.mubr.bf16.mxu1 %v17238_v20  ;;  %v17259_v6 = vpop.f32.mrf.mxu0  ;;  %13400 = vmatprep.subr.bf16.mxu1 %v15122_v42  ;;  %v11684_v20 = vld [vmem:[#allocation23 + $0x4b8] sm:$0xff] }
 0xae1   :  { %v15090_v63 = vcombine.high %v11680_v54, %v11684_v20  ;;  %v15089_v14 = vcombine.low %v11680_v54, %v11684_v20  ;;  %v11740_v42 = vld [vmem:[#allocation23 + $0x678] sm:$0xff] }
 0xae2   :  { %v13149_v19 = vpop.f32.mrf.mxu0  ;;  %v15146_v4 = vcombine.high %v11736_v10, %v11740_v42  ;;  %v15145_v39 = vcombine.low %v11736_v10, %v11740_v42 }
 0xae3   :  { %13401 = vmatpush1.bf16.msra.mxu1 %v15121_v51  ;;  %v11728_v51 = vld [vmem:[#allocation23 + $0x618] sm:$0xff]  ;;  %v17261_v19 = vld [vmem:[#allocation25] sm:$0xff] }
 0xae4   :  { %v13150_v48 = vpop.f32.mrf.mxu0  ;;  %13402 = vmatprep.subr.bf16.mxu1 %v15114_v46  ;;  %v11732_v46 = vld [vmem:[#allocation23 + $0x638] sm:$0xff]  ;;  %v11810_v41 = vrot.slane %v17261_v19, %v6020_v16  ;;  %v11814_v53 = vrot.slane %v17261_v19, %v6024_v11  ;;  %v11818_v16 = vrot.slane %v17261_v19, %v6028_v44  ;;  %v11822_v11 = vrot.slane %v17261_v19, %v6032_v47 }
 0xae5   :  { %v15138_v36 = vcombine.high %v11728_v51, %v11732_v46  ;;  %v11794_v48 = vrot.slane %v17261_v19, %v16922_v30 }
 0xae7   :  { %13403 = vmatpush1.bf16.msra.mxu1 %v15113_v52  ;;  %v15137_v52 = vcombine.low %v11728_v51, %v11732_v46  ;;  %v13146_v12 = vadd.f32 %v17255_v23, %v11794_v48  ;;  %v11802_v23 = vrot.slane %v17261_v19, %v16946_v60 }
 0xae8   :  { %13404 = vmatprep.subr.bf16.mxu1 %v15106_v35  ;;  %v11798_v35 = vrot.slane %v17261_v19, %v16919_v37 }
 0xaeb   :  { %13405 = vmatpush1.bf16.msra.mxu1 %v15105_v56 }
 0xaec   :  { %13406 = vmatprep.subr.bf16.mxu1 %v15098_v22  ;;  %v13148_v22 = vadd.f32 %v17259_v6, %v11798_v35 }
 0xaef   :  { %13407 = vmatpush1.bf16.msra.mxu1 %v15097_v18 }
 0xaf0   :  { %13408 = vmatprep.subr.bf16.mxu1 %v15090_v63 }
 0xaf3   :  { %13409 = vmatpush1.bf16.msra.mxu1 %v15089_v14 }
 0xaf4   :  { %13410 = vmatprep.subr.bf16.mxu1 %v15082_v21 }
 0xaf7   :  { %13411 = vmatpush1.bf16.msra.mxu1 %v15081_v50  ;;  %v11806_v50 = vrot.slane %v17261_v19, %v16949_v2 }
 0xaf8   :  { %13412 = vmatprep.subr.bf16.mxu1 %v15074_v32 }
 0xafb   :  { %13413 = vmatpush1.bf16.msra.mxu1 %v15073_v9 }
 0xafc   :  { %13414 = vmatprep.subr.bf16.mxu1 %v15194_v57 }
 0xaff   :  { %13415 = vmatpush2.bf16.msra.mxu1 %v15193_v27 }
 0xb00   :  { %13416 = vmatprep.subr.bf16.mxu1 %v15186_v29 }
 0xb03   :  { %13417 = vmatpush2.bf16.msra.mxu1 %v15185_v38 }
 0xb04   :  { %13418 = vmatprep.subr.bf16.mxu1 %v15178_v3 }
 0xb07   :  { %13419 = vmatpush2.bf16.msra.mxu1 %v15177_v1 }
 0xb08   :  { %13420 = vmatprep.subr.bf16.mxu1 %v15170_v62 }
 0xb0b   :  { %13421 = vmatpush2.bf16.msra.mxu1 %v15169_v55 }
 0xb0c   :  { %13422 = vmatprep.subr.bf16.mxu1 %v15162_v31 }
 0xb0f   :  { %13423 = vmatpush2.bf16.msra.mxu1 %v15161_v40 }
 0xb10   :  { %13424 = vmatprep.subr.bf16.mxu1 %v15154_v0 }
 0xb13   :  { %13425 = vmatpush2.bf16.msra.mxu1 %v15153_v8 }
 0xb14   :  { %13426 = vmatprep.subr.bf16.mxu1 %v15146_v4 }
 0xb17   :  { %13427 = vmatpush2.bf16.msra.mxu1 %v15145_v39 }
 0xb18   :  { %13428 = vmatprep.subr.bf16.mxu1 %v15138_v36 }
 0xb1b   :  { %13429 = vmatpush2.bf16.msra.mxu1 %v15137_v52 }
 0xb1e   :  { %13431 = vmatmul.mubr.bf16.vlgmr.msra.gmra.mxu1 %v17240_v59  ;;  %v13186_v7 = vpop.f32.mrf.mxu1  ;;  %v13227_v56 = vpop.f32.mrf.mxu0  ;;  %v13458_v59 = vunpack.c.l.s4 %v16587_v43 }
 0xb1f   :  { %v13187_v54 = vadd.f32 %v13186_v7, %v13146_v12  ;;  %v13228_v6 = vadd.f32 %v13227_v56, %v11802_v23 }
 0xb20   :  { %v13188_v20 = vpop.f32.mrf.mxu1  ;;  %v13229_v18 = vpop.f32.mrf.mxu0  ;;  %v13459_v49 = vunpack.c.0.s8 %v13458_v59 }
 0xb21   :  { %v13189_v63 = vadd.f32 %v13188_v20, %v13148_v22  ;;  %v13439_v14 = vmax.f32 %v13187_v54, 0.0  ;;  %v13230_v26 = vadd.f32 %v13229_v18, %v11806_v50 }
 0xb22   :  { %v13190_v15 = vpop.f32.mrf.mxu1  ;;  %v13231_v13 = vpop.f32.mrf.mxu0  ;;  %v13462_v24 = vsub.s32 %v13459_v49, %v16907_v61 }
 0xb23   :  { %v13440_v30 = vmax.f32 %v13189_v63, 0.0 }
 0xb24   :  { %v13191_v21 = vpop.f32.mrf.mxu1  ;;  %v13232_v25 = vpop.f32.mrf.mxu0 }
 0xb25   :  { %v13455_v37 = vcombine.low %v13439_v14, %v13440_v30 }
 0xb27   :  { %v13463_v1 = vrot.slane %v13455_v37, %v13462_v24 }
 0xb5e   :  { %v13268_v32 = vpop.f32.mrf.mxu1 }
 0xb5f   :  { %v13269_v9 = vadd.f32 %v13268_v32, %v13228_v6  ;;  %v13309_v57 = vpop.f32.mrf.mxu0 }
 0xb60   :  { %v13270_v34 = vpop.f32.mrf.mxu1  ;;  %v13310_v55 = vadd.f32 %v13309_v57, %v11810_v41 }
 0xb61   :  { %v13271_v17 = vadd.f32 %v13270_v34, %v13230_v26  ;;  %v13311_v27 = vpop.f32.mrf.mxu0  ;;  %v13441_v28 = vmax.f32 %v13269_v9, 0.0 }
 0xb62   :  { %v13272_v29 = vpop.f32.mrf.mxu1  ;;  %v13312_v33 = vadd.f32 %v13311_v27, %v11814_v53 }
 0xb63   :  { %v13442_v38 = vmax.f32 %v13271_v17, 0.0  ;;  %v13313_v60 = vpop.f32.mrf.mxu0 }
 0xb64   :  { %v13273_v3 = vpop.f32.mrf.mxu1 }
 0xb65   :  { %v13456_v5 = vcombine.low %v13441_v28, %v13442_v38  ;;  %v13314_v45 = vpop.f32.mrf.mxu0 }
 0xb67   :  { %v13470_v2 = vrot.slane %v13456_v5, %v13462_v24 }
 0xb69   :  { %v13471_v62 = vcombine.low %v13463_v1, %v13470_v2 }
 0xb6b   :  { %13491 = vst [vmem:[#allocation26] sm:$0xff] %v13471_v62 }
 0xb9e   :  { %v13350_v31 = vpop.f32.mrf.mxu1 }
 0xb9f   :  { %v13351_v58 = vadd.f32 %v13350_v31, %v13310_v55  ;;  %v13391_v40 = vpop.f32.mrf.mxu0 }
 0xba0   :  { %v13352_v0 = vpop.f32.mrf.mxu1  ;;  %v13392_v48 = vadd.f32 %v13391_v40, %v11818_v16 }
 0xba1   :  { %v13353_v10 = vadd.f32 %v13352_v0, %v13312_v33  ;;  %v13393_v42 = vpop.f32.mrf.mxu0  ;;  %v13443_v4 = vmax.f32 %v13351_v58, 0.0 }
 0xba2   :  { %v13354_v8 = vpop.f32.mrf.mxu1  ;;  %v13394_v12 = vadd.f32 %v13393_v42, %v11822_v11 }
 0xba3   :  { %v13444_v51 = vmax.f32 %v13353_v10, 0.0  ;;  %v13395_v46 = vpop.f32.mrf.mxu0 }
 0xba4   :  { %v13355_v39 = vpop.f32.mrf.mxu1 }
 0xba5   :  { %v13472_v36 = vcombine.low %v13443_v4, %v13444_v51  ;;  %v13396_v52 = vpop.f32.mrf.mxu0 }
 0xba7   :  { %v13480_v13 = vrot.slane %v13472_v36, %v13462_v24 }
 0xbde   :  { %v13432_v35 = vpop.f32.mrf.mxu1 }
 0xbdf   :  { %v13433_v7 = vadd.f32 %v13432_v35, %v13392_v48 }
 0xbe0   :  { %v13434_v56 = vpop.f32.mrf.mxu1 }
 0xbe1   :  { %v13435_v22 = vadd.f32 %v13434_v56, %v13394_v12  ;;  %v13445_v20 = vmax.f32 %v13433_v7, 0.0 }
 0xbe2   :  { %v13436_v54 = vpop.f32.mrf.mxu1 }
 0xbe3   :  { %v13446_v18 = vmax.f32 %v13435_v22, 0.0 }
 0xbe4   :  { %v13437_v63 = vpop.f32.mrf.mxu1 }
 0xbe5   :  { %v13473_v15 = vcombine.low %v13445_v20, %v13446_v18 }
 0xbe7   :  { %v13487_v14 = vrot.slane %v13473_v15, %v13462_v24 }
 0xbe9   :  { %v13488_v44 = vcombine.low %v13480_v13, %v13487_v14 }
 0xbeb   :  { %13492 = vst [vmem:[#allocation26 + $0x8] sm:$0xff] %v13488_v44 }
 0xbec   :  { %16535 = shalt.err (!%p16532_p9)
}
 0xbed   :  { %13502 = dma.vmem_to_hbm [thread:$0]  %s13500_s14, 256, %s17305_s15, [#allocation4]  }
 0xbee   :  { %16560 = dma.done.wait [#allocation4], 256  }
 0xbef   :  { %16561 = vsyncadd [#allocation4], 4294967040 }
 0xbf0   :  { %13506 = vsyncpa [#allocation3], 1 }
 0xbf1   :  { %13507 = vsyncpa [#allocation6], 1 }
 0xbf2   :  { %13508 = vsyncpa [#allocation9], 1 }
 0xbf3   :  { %13509 = vsyncpa [#allocation12], 1 }
 0xbf4   :  { %13510 = vsyncpa [#allocation15], 1 }
 0xbf5   :  { %13511 = vsyncpa [#allocation18], 1 }
 0xbf6   :  { %13512 = vsyncpa [#allocation21], 1 }
 0xbf7   :  { %13513 = vsyncpa [#allocation24], 1 }
 0xbf8   :  { %13514 = vsyncpa [#allocation4], 1 }

</bundles_post_ra>
